<compile_context>
chip_gen: v6e
topology: v6e:2x2x1
jax: 0.10.0
libtpu: 0.0.40
codegen_flags: <defaults>
</compile_context>

<pallas_src>
import functools

import jax
import jax.numpy as jnp
from jax.experimental import pallas as pl
from jax.experimental.pallas import tpu as pltpu

_VMEM_LIMIT = 32 * 1024 * 1024   # explicit budget; safe on v5e/v6e/v7x


def _rup(x, m):
    return (x + m - 1) // m * m


# ----------------------------------------------------------------------------
# Tile selection
# ----------------------------------------------------------------------------
def _pick_tiles(M, N, K):
    """Adaptive MXU tiles. bf16 sublane pack = 16, lanes = 128."""
    # --- M ---
    if M <= 512:
        tm = _rup(M, 16)
        Mp = tm
    else:
        tm = 512
        Mp = _rup(M, 512)
    # --- N ---
    if N < 128:
        tn = Np = N                       # full-dim lane block (e.g. conv1 N=64)
    else:
        Np = _rup(N, 128)
        tn = 256 if Np % 256 == 0 else 128
        tn = min(tn, Np)
    # --- K : pad only to rup(K,128); tk is a divisor of Kp (no over-padding) ---
    Kp = _rup(K, 128)
    nk = Kp // 128
    d = max(dd for dd in range(1, min(nk, 8) + 1) if nk % dd == 0)
    tk = 128 * d
    # --- guarantee >=2 tiles on a parallel axis where possible (v7x 2 TCs) ---
    if Mp // tm == 1 and Np // tn == 1:
        if tn >= 256 and (tn // 2) % 128 == 0:
            tn //= 2
        elif tm >= 32 and (tm // 2) % 16 == 0:
            tm //= 2
    return tm, tn, tk, Mp, Np, Kp


# ----------------------------------------------------------------------------
# Pallas kernels
# ----------------------------------------------------------------------------
def _mm_bn_kernel(a_ref, b_ref, o_ref, s_ref, q_ref, acc_ref):
    """K-streamed matmul with fused BN-stat epilogue and bf16 downcast."""
    @pl.when(pl.program_id(2) == 0)
    def _():
        acc_ref[...] = jnp.zeros_like(acc_ref)

    acc_ref[...] += jnp.dot(a_ref[...], b_ref[...],
                            preferred_element_type=jnp.float32)

    @pl.when(pl.program_id(2) == pl.num_programs(2) - 1)
    def _():
        acc = acc_ref[...]
        o_ref[...] = acc.astype(o_ref.dtype)                       # bf16 out
        cs = jnp.sum(acc, axis=0, keepdims=True)                   # (1, tn)
        cq = jnp.sum(acc * acc, axis=0, keepdims=True)
        # stats blocks are 8 sublanes tall (layout constraint); broadcast.
        s_ref[...] = jnp.broadcast_to(cs, s_ref.shape)
        q_ref[...] = jnp.broadcast_to(cq, q_ref.shape)


def _mm_kernel(a_ref, b_ref, o_ref, acc_ref):
    """Plain K-streamed matmul, f32 VMEM accumulator, cast on last K step."""
    @pl.when(pl.program_id(2) == 0)
    def _():
        acc_ref[...] = jnp.zeros_like(acc_ref)

    acc_ref[...] += jnp.dot(a_ref[...], b_ref[...],
                            preferred_element_type=jnp.float32)

    @pl.when(pl.program_id(2) == pl.num_programs(2) - 1)
    def _():
        o_ref[...] = acc_ref[...].astype(o_ref.dtype)


def _affine_leaky_kernel(y_ref, s_ref, b_ref, o_ref, *, slope):
    z = y_ref[...].astype(jnp.float32) * s_ref[...] + b_ref[...]
    o_ref[...] = jnp.where(z >= 0.0, z, z * slope).astype(o_ref.dtype)


# ----------------------------------------------------------------------------
# Pallas wrappers
# ----------------------------------------------------------------------------
def pallas_gemm_bn(a, b):
    """(M,K)@(K,N) -> (padded bf16 y, col_sum(N,), col_sumsq(N,)) with fused
    BN stats in the matmul epilogue."""
    M, K = a.shape
    _, N = b.shape
    tm, tn, tk, Mp, Np, Kp = _pick_tiles(M, N, K)
    a = a.astype(jnp.bfloat16)
    b = b.astype(jnp.bfloat16)
    if (Mp, Kp) != (M, K):
        a = jnp.pad(a, ((0, Mp - M), (0, Kp - K)))
    if (Kp, Np) != (K, N):
        b = jnp.pad(b, ((0, Kp - K), (0, Np - N)))
    Mg, Ng, Kg = Mp // tm, Np // tn, Kp // tk

    y, s8, q8 = pl.pallas_call(
        _mm_bn_kernel,
        out_shape=(jax.ShapeDtypeStruct((Mp, Np), jnp.bfloat16),
                   jax.ShapeDtypeStruct((Mg * 8, Np), jnp.float32),
                   jax.ShapeDtypeStruct((Mg * 8, Np), jnp.float32)),
        grid_spec=pltpu.PrefetchScalarGridSpec(
            num_scalar_prefetch=0,
            grid=(Mg, Ng, Kg),
            in_specs=[pl.BlockSpec((tm, tk), lambda i, j, k: (i, k)),
                      pl.BlockSpec((tk, tn), lambda i, j, k: (k, j))],
            out_specs=(pl.BlockSpec((tm, tn), lambda i, j, k: (i, j)),
                       pl.BlockSpec((8, tn), lambda i, j, k: (i, j)),
                       pl.BlockSpec((8, tn), lambda i, j, k: (i, j))),
            scratch_shapes=[pltpu.VMEM((tm, tn), jnp.float32)]),
        compiler_params=pltpu.CompilerParams(
            dimension_semantics=("parallel", "parallel", "arbitrary"),
            vmem_limit_bytes=_VMEM_LIMIT),
    )(a, b)

    # Tiny XLA reduction of per-M-tile partials (zero pad rows contribute 0).
    col_sum = s8.reshape(Mg, 8, Np)[:, 0, :N].sum(axis=0)
    col_sumsq = q8.reshape(Mg, 8, Np)[:, 0, :N].sum(axis=0)
    return y, col_sum, col_sumsq


def pallas_gemm(a, b, out_dtype):
    M, K = a.shape
    _, N = b.shape
    tm, tn, tk, Mp, Np, Kp = _pick_tiles(M, N, K)
    a = a.astype(jnp.bfloat16)
    b = b.astype(jnp.bfloat16)
    if (Mp, Kp) != (M, K):
        a = jnp.pad(a, ((0, Mp - M), (0, Kp - K)))
    if (Kp, Np) != (K, N):
        b = jnp.pad(b, ((0, Kp - K), (0, Np - N)))

    out = pl.pallas_call(
        _mm_kernel,
        out_shape=jax.ShapeDtypeStruct((Mp, Np), out_dtype),
        grid_spec=pltpu.PrefetchScalarGridSpec(
            num_scalar_prefetch=0,
            grid=(Mp // tm, Np // tn, Kp // tk),
            in_specs=[pl.BlockSpec((tm, tk), lambda i, j, k: (i, k)),
                      pl.BlockSpec((tk, tn), lambda i, j, k: (k, j))],
            out_specs=pl.BlockSpec((tm, tn), lambda i, j, k: (i, j)),
            scratch_shapes=[pltpu.VMEM((tm, tn), jnp.float32)]),
        compiler_params=pltpu.CompilerParams(
            dimension_semantics=("parallel", "parallel", "arbitrary"),
            vmem_limit_bytes=_VMEM_LIMIT),
    )(a, b)
    if (Mp, Np) != (M, N):
        out = out[:M, :N]
    return out


def gemm(a, b, out_dtype=jnp.float32):
    """f32-accumulated matmul; Pallas MXU kernel for large shapes, XLA for the
    tiny ones (N=2 flow heads, K=6 actor convs, collapsed-M deep layers)."""
    M, K = a.shape
    N = b.shape[1]
    if M >= 128 and N >= 128 and K >= 64:
        return pallas_gemm(a, b, out_dtype)
    return jnp.dot(a.astype(jnp.bfloat16), b.astype(jnp.bfloat16),
                   preferred_element_type=jnp.float32).astype(out_dtype)


def pallas_affine_leaky(y, scale, shift, slope=0.1):
    """y*(scale)+shift then LeakyReLU on the (padded) GEMM output.
    Full-channel-width lane-dense blocks, bf16 in / bf16 out."""
    Mp, Np = y.shape
    N = scale.shape[0]
    s = scale.reshape(1, N).astype(jnp.float32)
    b = shift.reshape(1, N).astype(jnp.float32)
    if Np != N:
        s = jnp.pad(s, ((0, 0), (0, Np - N)))
        b = jnp.pad(b, ((0, 0), (0, Np - N)))
    tm = 512 if (Mp > 512 and Mp % 512 == 0) else Mp
    return pl.pallas_call(
        functools.partial(_affine_leaky_kernel, slope=slope),
        out_shape=jax.ShapeDtypeStruct((Mp, Np), jnp.bfloat16),
        grid=(Mp // tm,),
        in_specs=[pl.BlockSpec((tm, Np), lambda i: (i, 0)),
                  pl.BlockSpec((1, Np), lambda i: (0, 0)),
                  pl.BlockSpec((1, Np), lambda i: (0, 0))],
        out_specs=pl.BlockSpec((tm, Np), lambda i: (i, 0)),
        compiler_params=pltpu.CompilerParams(
            dimension_semantics=("parallel",),
            vmem_limit_bytes=_VMEM_LIMIT),
    )(y, s, b)


# ----------------------------------------------------------------------------
# Conv / deconv building blocks
# ----------------------------------------------------------------------------
def _im2col(x, kh, kw, stride, pad):
    if pad:
        x = jnp.pad(x, ((0, 0), (pad, pad), (pad, pad), (0, 0)))
    B, H, W, C = x.shape
    OH = (H - kh) // stride + 1
    OW = (W - kw) // stride + 1
    cols = []
    for i in range(kh):
        for j in range(kw):
            cols.append(x[:, i:i + stride * OH:stride, j:j + stride * OW:stride, :])
    patches = jnp.stack(cols, axis=3)                        # (B,OH,OW,kh*kw,C)
    return patches.reshape(B * OH * OW, kh * kw * C), (B, OH, OW)


def conv_bn_leaky(x, w, stride, pad, eps=1e-5, slope=0.1):
    """Conv2d(bias=False) -> BatchNorm2d(training batch stats, gamma=1, beta=0)
    -> LeakyReLU(0.1). BN stats come out of the fused matmul epilogue (f32)."""
    kh, kw, cin, cout = w.shape
    patches, (B, OH, OW) = _im2col(x.astype(jnp.bfloat16), kh, kw, stride, pad)
    M, K = patches.shape
    N = cout
    if M >= 128 and N >= 64 and K >= 64:
        y, s, q = pallas_gemm_bn(patches, w.reshape(kh * kw * cin, cout))
        mean = s / M
        # NOTE: E[x^2]-E[x]^2 in f32 (accepted vs. a centered second pass).
        var = jnp.maximum(q / M - mean * mean, 0.0)           # biased, torch BN fwd
        scale = jax.lax.rsqrt(var + eps)
        shift = -mean * scale
        y = pallas_affine_leaky(y, scale, shift, slope)       # padded bf16
        y = y[:M, :N]
    else:
        yf = jnp.dot(patches, w.reshape(kh * kw * cin, cout).astype(jnp.bfloat16),
                     preferred_element_type=jnp.float32)
        mean = jnp.mean(yf, axis=0)
        var = jnp.mean(jnp.square(yf - mean), axis=0)
        z = (yf - mean) * jax.lax.rsqrt(var + eps)
        y = jnp.where(z >= 0.0, z, z * slope).astype(jnp.bfloat16)
    return y.reshape(B, OH, OW, N)


def conv_plain(x, w, stride, pad):
    """Conv2d(bias=False), no activation (predict_flow heads), f32 output."""
    kh, kw, cin, cout = w.shape
    patches, (B, OH, OW) = _im2col(x.astype(jnp.bfloat16), kh, kw, stride, pad)
    y = gemm(patches, w.reshape(kh * kw * cin, cout), out_dtype=jnp.float32)
    return y.reshape(B, OH, OW, cout)


def conv_transpose_k4s2p1(x, w_hwio):
    """ConvTranspose2d(k=4, s=2, p=1, bias=False) in NHWC.

    Sub-pixel lowering: one (cin -> 16*cout) GEMM on the raw input (bf16 out),
    then a bf16 shift-add (f32 adds inside the fused elementwise) that places
    the 4x4 taps into the 2x-upsampled output."""
    B, H, W, C = x.shape
    kh, kw, cin, cout = w_hwio.shape
    w_mat = jnp.transpose(w_hwio, (2, 0, 1, 3)).reshape(cin, kh * kw * cout)
    z = gemm(x.reshape(B * H * W, C), w_mat, out_dtype=jnp.bfloat16)
    z = z.reshape(B, H, W, kh, kw, cout)
    zp = jnp.pad(z, ((0, 0), (1, 1), (1, 1), (0, 0), (0, 0), (0, 0)))

    def S(dm, dn, a, b_):
        return zp[:, 1 + dm:1 + dm + H, 1 + dn:1 + dn + W, a, b_, :].astype(jnp.float32)

    def tap4(t0, t1, t2, t3):
        return (t0 + t1 + t2 + t3).astype(z.dtype)

    # y[2m+ph, 2n+pw] = sum of the two row taps x the two col taps.
    y_ee = tap4(S(0, 0, 1, 1), S(-1, 0, 3, 1), S(0, -1, 1, 3), S(-1, -1, 3, 3))
    y_eo = tap4(S(0, 0, 1, 2), S(-1, 0, 3, 2), S(0, 1, 1, 0), S(-1, 1, 3, 0))
    y_oe = tap4(S(0, 0, 2, 1), S(1, 0, 0, 1), S(0, -1, 2, 3), S(1, -1, 0, 3))
    y_oo = tap4(S(0, 0, 2, 2), S(1, 0, 0, 2), S(0, 1, 2, 0), S(1, 1, 0, 0))

    row_e = jnp.stack([y_ee, y_eo], axis=3).reshape(B, H, 2 * W, cout)
    row_o = jnp.stack([y_oe, y_oo], axis=3).reshape(B, H, 2 * W, cout)
    return jnp.stack([row_e, row_o], axis=2).reshape(B, 2 * H, 2 * W, cout)


def deconv_leaky(x, w):
    y = conv_transpose_k4s2p1(x, w)
    return jnp.where(y >= 0, y, y * 0.1).astype(jnp.bfloat16)


def crop_like(a, target):
    return a[:, :target.shape[1], :target.shape[2], :]


def adaptive_avg_pool(x, th, tw):
    B, H, W, C = x.shape
    return x.reshape(B, th, H // th, tw, W // tw, C).mean(axis=(2, 4))


# ----------------------------------------------------------------------------
# Parameters (deterministic kaiming-style init)
# ----------------------------------------------------------------------------
_CONV_SPECS = {
    'conv1': (7, 8, 64), 'conv2': (5, 64, 128), 'conv3': (5, 136, 256),
    'conv3_1': (3, 256, 256), 'conv4': (3, 264, 512), 'conv4_1': (3, 512, 512),
    'conv5': (3, 520, 512), 'conv5_1': (3, 512, 512), 'conv6': (3, 520, 1024),
    'conv6_1': (3, 1024, 1024),
    'deconv5': (4, 1024, 512), 'deconv4': (4, 1026, 256),
    'deconv3': (4, 770, 128), 'deconv2': (4, 386, 64),
    'predict_flow6': (3, 1024, 2), 'predict_flow5': (3, 1026, 2),
    'predict_flow4': (3, 770, 2), 'predict_flow3': (3, 386, 2),
    'predict_flow2': (3, 194, 2),
    'up6to5': (4, 2, 2), 'up5to4': (4, 2, 2), 'up4to3': (4, 2, 2), 'up3to2': (4, 2, 2),
}


def init_params(key):
    names = list(_CONV_SPECS)
    keys = jax.random.split(key, len(names) + 5)
    params = {}
    for k_, name in zip(keys[:len(names)], names):
        kk, cin, cout = _CONV_SPECS[name]
        std = (2.0 / (kk * kk * cin)) ** 0.5
        params[name] = jax.random.normal(k_, (kk, kk, cin, cout), jnp.float32) * std
    # deterministic actor stand-in: 1x1 conv weights (6 -> 2) per pyramid scale
    params['actor'] = [jax.random.normal(k_, (6, 2), jnp.float32) * (2.0 / 6) ** 0.5
                       for k_ in keys[len(names):]]
    return params


# ----------------------------------------------------------------------------
# Forward pass
# ----------------------------------------------------------------------------
def forward(params, x_nchw):
    f32, bf16 = jnp.float32, jnp.bfloat16
    x = jnp.transpose(x_nchw, (0, 2, 3, 1)).astype(f32)       # NCHW -> NHWC
    B, H, W, _ = x.shape

    # ----- actor network stand-in: flows at H/4 .. H/64 (tiny XLA GEMMs) -----
    actor_flows = []
    for i, s in enumerate((4, 8, 16, 32, 64)):
        p = adaptive_avg_pool(x, H // s, W // s)
        y = gemm(p.reshape(-1, p.shape[-1]), params['actor'][i], out_dtype=f32)
        actor_flows.append(y.reshape(B, H // s, W // s, 2))
    actor_flow2, actor_flow3, actor_flow4, actor_flow5, actor_flow6 = actor_flows

    # ----- critic encoder -----
    action_scaled = jax.image.resize(actor_flow2, (B, H, W, 2), method='bilinear')
    critic_input = jnp.concatenate([x.astype(bf16), action_scaled.astype(bf16)], -1)

    out_conv1 = conv_bn_leaky(critic_input, params['conv1'], 2, 3)
    out_conv2 = conv_bn_leaky(out_conv1, params['conv2'], 2, 2)

    def enc_cat(flow, feat):
        red = adaptive_avg_pool(x, feat.shape[1], feat.shape[2])
        return jnp.concatenate([flow.astype(bf16), feat, red.astype(bf16)], -1)

    out_conv3 = conv_bn_leaky(conv_bn_leaky(enc_cat(actor_flow2, out_conv2),
                                            params['conv3'], 2, 2),
                              params['conv3_1'], 1, 1)
    out_conv4 = conv_bn_leaky(conv_bn_leaky(enc_cat(actor_flow3, out_conv3),
                                            params['conv4'], 2, 1),
                              params['conv4_1'], 1, 1)
    out_conv5 = conv_bn_leaky(conv_bn_leaky(enc_cat(actor_flow4, out_conv4),
                                            params['conv5'], 2, 1),
                              params['conv5_1'], 1, 1)
    out_conv6 = conv_bn_leaky(conv_bn_leaky(enc_cat(actor_flow5, out_conv5),
                                            params['conv6'], 2, 1),
                              params['conv6_1'], 1, 1)

    # ----- decoder / flow refinement -----
    flow6 = conv_plain(out_conv6, params['predict_flow6'], 1, 1)
    flow6_up = crop_like(conv_transpose_k4s2p1(flow6, params['up6to5']), out_conv5)
    out_deconv5 = crop_like(deconv_leaky(out_conv6, params['deconv5']), out_conv5)
    concat5 = jnp.concatenate([out_conv5, out_deconv5, flow6_up.astype(bf16)], -1)

    flow5 = conv_plain(concat5, params['predict_flow5'], 1, 1)
    flow5_up = crop_like(conv_transpose_k4s2p1(flow5, params['up5to4']), out_conv4)
    out_deconv4 = crop_like(deconv_leaky(concat5, params['deconv4']), out_conv4)
    concat4 = jnp.concatenate([out_conv4, out_deconv4, flow5_up.astype(bf16)], -1)

    flow4 = conv_plain(concat4, params['predict_flow4'], 1, 1)
    flow4_up = crop_like(conv_transpose_k4s2p1(flow4, params['up4to3']), out_conv3)
    out_deconv3 = crop_like(deconv_leaky(concat4, params['deconv3']), out_conv3)
    concat3 = jnp.concatenate([out_conv3, out_deconv3, flow4_up.astype(bf16)], -1)

    flow3 = conv_plain(concat3, params['predict_flow3'], 1, 1)
    flow3_up = crop_like(conv_transpose_k4s2p1(flow3, params['up3to2']), out_conv2)
    out_deconv2 = crop_like(deconv_leaky(concat3, params['deconv2']), out_conv2)
    concat2 = jnp.concatenate([out_conv2, out_deconv2, flow3_up.astype(bf16)], -1)

    flow2 = conv_plain(concat2, params['predict_flow2'], 1, 1)

    # energy = sum over all non-batch dims of each (tiny, 2-channel) flow; f32.
    energies = [jnp.sum(f, axis=(1, 2, 3), dtype=f32)
                for f in (flow2, flow3, flow4, flow5, flow6)]
    flows_nchw = [jnp.transpose(f, (0, 3, 1, 2)) for f in actor_flows]
    return {'energy': energies, 'flow': flows_nchw}


# ----------------------------------------------------------------------------
if __name__ == "__main__":
    key = jax.random.PRNGKey(0)
    k_x, k_p = jax.random.split(key)
    params = init_params(k_p)
    # x: stacked image pair, 6 channels; 64x64 is the smallest size for which
    # the /64 encoder output (conv6) is still >= 1 pixel.
    x = jax.random.normal(k_x, (2, 6, 64, 64), jnp.float32)

    out = jax.jit(forward)(params, x)
    jax.block_until_ready(out)

    assert all(e.shape == (2,) for e in out['energy'])
    assert all(bool(jnp.isfinite(e).all()) for e in out['energy'])
    assert out['flow'][0].shape == (2, 2, 16, 16)
    print("KERNEL_OK")
</pallas_src>

<mosaic_0001>
module attributes {stable_mosaic.version = 11 : i64} {
  func.func @_mm_bn_kernel(%arg0: i32, %arg1: i32, %arg2: i32, %arg3: memref<512x512xbf16, #tpu.memory_space<vmem>>, %arg4: memref<512x64xbf16, #tpu.memory_space<vmem>>, %arg5: memref<512x64xbf16, #tpu.memory_space<vmem>>, %arg6: memref<8x64xf32, #tpu.memory_space<vmem>>, %arg7: memref<8x64xf32, #tpu.memory_space<vmem>>, %arg8: memref<512x64xf32, #tpu.memory_space<vmem>>) attributes {dimension_semantics = [#tpu.dimension_semantics<parallel>, #tpu.dimension_semantics<parallel>, #tpu.dimension_semantics<arbitrary>], iteration_bounds = array<i64: 4, 1, 1>, scalar_prefetch = 0 : i64, scratch_operands = 1 : i64, tpu.core_type = #tpu.core_type<tc>, window_params = [{transform_indices = @transform_0, window_bounds = array<i64: 512, 512>}, {transform_indices = @transform_1, window_bounds = array<i64: 512, 64>}, {transform_indices = @transform_2, window_bounds = array<i64: 512, 64>}, {transform_indices = @transform_3, window_bounds = array<i64: 8, 64>}, {transform_indices = @transform_4, window_bounds = array<i64: 8, 64>}]} {
    %c0_i32 = arith.constant 0 : i32
    %0 = arith.cmpi eq, %arg2, %c0_i32 : i32
    %1 = arith.extui %0 : i1 to i32
    %c0_i32_0 = arith.constant 0 : i32
    %2 = arith.cmpi ne, %1, %c0_i32_0 : i32
    scf.if %2 {
      %cst_10 = arith.constant 0.000000e+00 : f32
      %12 = vector.broadcast %cst_10 : f32 to vector<512x64xf32>
      %c0_11 = arith.constant 0 : index
      %c0_12 = arith.constant 0 : index
      %13 = vector.load %arg8[%c0_11, %c0_12] : memref<512x64xf32, #tpu.memory_space<vmem>>, vector<512x64xf32>
      tpu.vector_store %arg8[%c0_11, %c0_12], %12 {strides = array<i32>} : memref<512x64xf32, #tpu.memory_space<vmem>>, vector<512x64xf32>,
    } else {
    }
    %c0 = arith.constant 0 : index
    %c0_1 = arith.constant 0 : index
    %3 = vector.load %arg8[%c0, %c0_1] : memref<512x64xf32, #tpu.memory_space<vmem>>, vector<512x64xf32>
    %c0_2 = arith.constant 0 : index
    %c0_3 = arith.constant 0 : index
    %4 = vector.load %arg3[%c0_2, %c0_3] : memref<512x512xbf16, #tpu.memory_space<vmem>>, vector<512x512xbf16>
    %c0_4 = arith.constant 0 : index
    %c0_5 = arith.constant 0 : index
    %5 = vector.load %arg4[%c0_4, %c0_5] : memref<512x64xbf16, #tpu.memory_space<vmem>>, vector<512x64xbf16>
    %cst = arith.constant dense<0.000000e+00> : vector<512x64xf32>
    %6 = tpu.matmul %4, %5, %cst {dimension_numbers = #tpu.dot_dimension_numbers<[1], [0], [0], [1], [0, 0, 1, 1], [], []>} : vector<512x512xbf16>, vector<512x64xbf16>, vector<512x64xf32> -> vector<512x64xf32>
    %7 = arith.addf %3, %6 : vector<512x64xf32>
    %c0_6 = arith.constant 0 : index
    %c0_7 = arith.constant 0 : index
    %8 = vector.load %arg8[%c0_6, %c0_7] : memref<512x64xf32, #tpu.memory_space<vmem>>, vector<512x64xf32>
    tpu.vector_store %arg8[%c0_6, %c0_7], %7 {strides = array<i32>} : memref<512x64xf32, #tpu.memory_space<vmem>>, vector<512x64xf32>,
    %c0_i32_8 = arith.constant 0 : i32
    %9 = arith.cmpi eq, %arg2, %c0_i32_8 : i32
    %10 = arith.extui %9 : i1 to i32
    %c0_i32_9 = arith.constant 0 : i32
    %11 = arith.cmpi ne, %10, %c0_i32_9 : i32
    scf.if %11 {
      %c0_10 = arith.constant 0 : index
      %c0_11 = arith.constant 0 : index
      %12 = vector.load %arg8[%c0_10, %c0_11] : memref<512x64xf32, #tpu.memory_space<vmem>>, vector<512x64xf32>
      %13 = arith.truncf %12 : vector<512x64xf32> to vector<512x64xbf16>
      %c0_12 = arith.constant 0 : index
      %c0_13 = arith.constant 0 : index
      %14 = vector.load %arg5[%c0_12, %c0_13] : memref<512x64xbf16, #tpu.memory_space<vmem>>, vector<512x64xbf16>
      tpu.vector_store %arg5[%c0_12, %c0_13], %13 {strides = array<i32>} : memref<512x64xbf16, #tpu.memory_space<vmem>>, vector<512x64xbf16>,
      %cst_14 = arith.constant dense<0.000000e+00> : vector<64xf32>
      %15 = vector.multi_reduction <add>, %12, %cst_14 [0] : vector<512x64xf32> to vector<64xf32>
      %16 = vector.shape_cast %15 : vector<64xf32> to vector<1x64xf32>
      %17 = arith.mulf %12, %12 : vector<512x64xf32>
      %cst_15 = arith.constant dense<0.000000e+00> : vector<64xf32>
      %18 = vector.multi_reduction <add>, %17, %cst_15 [0] : vector<512x64xf32> to vector<64xf32>
      %19 = vector.shape_cast %18 : vector<64xf32> to vector<1x64xf32>
      %20 = vector.shape_cast %16 : vector<1x64xf32> to vector<1x64xf32>
      %21 = vector.broadcast %20 : vector<1x64xf32> to vector<8x64xf32>
      %c0_16 = arith.constant 0 : index
      %c0_17 = arith.constant 0 : index
      %22 = vector.load %arg6[%c0_16, %c0_17] : memref<8x64xf32, #tpu.memory_space<vmem>>, vector<8x64xf32>
      tpu.vector_store %arg6[%c0_16, %c0_17], %21 {strides = array<i32>} : memref<8x64xf32, #tpu.memory_space<vmem>>, vector<8x64xf32>,
      %23 = vector.shape_cast %19 : vector<1x64xf32> to vector<1x64xf32>
      %24 = vector.broadcast %23 : vector<1x64xf32> to vector<8x64xf32>
      %c0_18 = arith.constant 0 : index
      %c0_19 = arith.constant 0 : index
      %25 = vector.load %arg7[%c0_18, %c0_19] : memref<8x64xf32, #tpu.memory_space<vmem>>, vector<8x64xf32>
      tpu.vector_store %arg7[%c0_18, %c0_19], %24 {strides = array<i32>} : memref<8x64xf32, #tpu.memory_space<vmem>>, vector<8x64xf32>,
    } else {
    }
    return
  }
  func.func @transform_0(%arg0: i32, %arg1: i32, %arg2: i32) -> (i32, i32) {
    %c0_i32 = arith.constant 0 : i32
    return %arg0, %arg2 : i32, i32
  }
  func.func @transform_1(%arg0: i32, %arg1: i32, %arg2: i32) -> (i32, i32) {
    %c0_i32 = arith.constant 0 : i32
    return %arg2, %arg1 : i32, i32
  }
  func.func @transform_2(%arg0: i32, %arg1: i32, %arg2: i32) -> (i32, i32) {
    %c0_i32 = arith.constant 0 : i32
    return %arg0, %arg1 : i32, i32
  }
  func.func @transform_3(%arg0: i32, %arg1: i32, %arg2: i32) -> (i32, i32) {
    %c0_i32 = arith.constant 0 : i32
    return %arg0, %arg1 : i32, i32
  }
  func.func @transform_4(%arg0: i32, %arg1: i32, %arg2: i32) -> (i32, i32) {
    %c0_i32 = arith.constant 0 : i32
    return %arg0, %arg1 : i32, i32
  }
}

module attributes {stable_mosaic.version = 11 : i64} {
  func.func @_affine_leaky_kernel(%arg0: i32, %arg1: memref<512x64xbf16, #tpu.memory_space<vmem>>, %arg2: memref<1x64xf32, #tpu.memory_space<vmem>>, %arg3: memref<1x64xf32, #tpu.memory_space<vmem>>, %arg4: memref<512x64xbf16, #tpu.memory_space<vmem>>) attributes {dimension_semantics = [#tpu.dimension_semantics<parallel>], iteration_bounds = array<i64: 4>, scalar_prefetch = 0 : i64, scratch_operands = 0 : i64, tpu.core_type = #tpu.core_type<tc>, window_params = [{transform_indices = @transform_0, window_bounds = array<i64: 512, 64>}, {pipeline_mode = #tpu.pipeline_mode<synchronous>, transform_indices = @transform_1, window_bounds = array<i64: 1, 64>}, {pipeline_mode = #tpu.pipeline_mode<synchronous>, transform_indices = @transform_2, window_bounds = array<i64: 1, 64>}, {transform_indices = @transform_3, window_bounds = array<i64: 512, 64>}]} {
    %c0 = arith.constant 0 : index
    %c0_0 = arith.constant 0 : index
    %0 = vector.load %arg1[%c0, %c0_0] : memref<512x64xbf16, #tpu.memory_space<vmem>>, vector<512x64xbf16>
    %1 = arith.extf %0 : vector<512x64xbf16> to vector<512x64xf32>
    %c0_1 = arith.constant 0 : index
    %c0_2 = arith.constant 0 : index
    %2 = vector.load %arg2[%c0_1, %c0_2] : memref<1x64xf32, #tpu.memory_space<vmem>>, vector<1x64xf32>
    %3 = vector.broadcast %2 : vector<1x64xf32> to vector<512x64xf32>
    %4 = arith.mulf %1, %3 : vector<512x64xf32>
    %c0_3 = arith.constant 0 : index
    %c0_4 = arith.constant 0 : index
    %5 = vector.load %arg3[%c0_3, %c0_4] : memref<1x64xf32, #tpu.memory_space<vmem>>, vector<1x64xf32>
    %6 = vector.broadcast %5 : vector<1x64xf32> to vector<512x64xf32>
    %7 = arith.addf %4, %6 : vector<512x64xf32>
    %cst = arith.constant 0.000000e+00 : f32
    %8 = vector.broadcast %cst : f32 to vector<512x64xf32>
    %9 = arith.cmpf oge, %7, %8 : vector<512x64xf32>
    %cst_5 = arith.constant 1.000000e-01 : f32
    %10 = vector.broadcast %cst_5 : f32 to vector<512x64xf32>
    %11 = arith.mulf %7, %10 : vector<512x64xf32>
    %12 = arith.select %9, %7, %11 : vector<512x64xi1>, vector<512x64xf32>
    %13 = arith.truncf %12 : vector<512x64xf32> to vector<512x64xbf16>
    %c0_6 = arith.constant 0 : index
    %c0_7 = arith.constant 0 : index
    %14 = vector.load %arg4[%c0_6, %c0_7] : memref<512x64xbf16, #tpu.memory_space<vmem>>, vector<512x64xbf16>
    tpu.vector_store %arg4[%c0_6, %c0_7], %13 {strides = array<i32>} : memref<512x64xbf16, #tpu.memory_space<vmem>>, vector<512x64xbf16>,
    return
  }
  func.func @transform_0(%arg0: i32) -> (i32, i32) {
    %c0_i32 = arith.constant 0 : i32
    %c0_i32_0 = arith.constant 0 : i32
    return %arg0, %c0_i32 : i32, i32
  }
  func.func @transform_1(%arg0: i32) -> (i32, i32) {
    %c0_i32 = arith.constant 0 : i32
    %c0_i32_0 = arith.constant 0 : i32
    %c0_i32_1 = arith.constant 0 : i32
    return %c0_i32, %c0_i32_0 : i32, i32
  }
  func.func @transform_2(%arg0: i32) -> (i32, i32) {
    %c0_i32 = arith.constant 0 : i32
    %c0_i32_0 = arith.constant 0 : i32
    %c0_i32_1 = arith.constant 0 : i32
    return %c0_i32, %c0_i32_0 : i32, i32
  }
  func.func @transform_3(%arg0: i32) -> (i32, i32) {
    %c0_i32 = arith.constant 0 : i32
    %c0_i32_0 = arith.constant 0 : i32
    return %arg0, %c0_i32 : i32, i32
  }
}

module attributes {stable_mosaic.version = 11 : i64} {
  func.func @_mm_bn_kernel(%arg0: i32, %arg1: i32, %arg2: i32, %arg3: memref<256x128xbf16, #tpu.memory_space<vmem>>, %arg4: memref<128x128xbf16, #tpu.memory_space<vmem>>, %arg5: memref<256x128xbf16, #tpu.memory_space<vmem>>, %arg6: memref<8x128xf32, #tpu.memory_space<vmem>>, %arg7: memref<8x128xf32, #tpu.memory_space<vmem>>, %arg8: memref<256x128xf32, #tpu.memory_space<vmem>>) attributes {dimension_semantics = [#tpu.dimension_semantics<parallel>, #tpu.dimension_semantics<parallel>, #tpu.dimension_semantics<arbitrary>], iteration_bounds = array<i64: 2, 1, 13>, scalar_prefetch = 0 : i64, scratch_operands = 1 : i64, tpu.core_type = #tpu.core_type<tc>, window_params = [{transform_indices = @transform_0, window_bounds = array<i64: 256, 128>}, {transform_indices = @transform_1, window_bounds = array<i64: 128, 128>}, {transform_indices = @transform_2, window_bounds = array<i64: 256, 128>}, {transform_indices = @transform_3, window_bounds = array<i64: 8, 128>}, {transform_indices = @transform_4, window_bounds = array<i64: 8, 128>}]} {
    %c0_i32 = arith.constant 0 : i32
    %0 = arith.cmpi eq, %arg2, %c0_i32 : i32
    %1 = arith.extui %0 : i1 to i32
    %c0_i32_0 = arith.constant 0 : i32
    %2 = arith.cmpi ne, %1, %c0_i32_0 : i32
    scf.if %2 {
      %cst_9 = arith.constant 0.000000e+00 : f32
      %12 = vector.broadcast %cst_9 : f32 to vector<256x128xf32>
      %c0_10 = arith.constant 0 : index
      %c0_11 = arith.constant 0 : index
      %13 = vector.load %arg8[%c0_10, %c0_11] : memref<256x128xf32, #tpu.memory_space<vmem>>, vector<256x128xf32>
      tpu.vector_store %arg8[%c0_10, %c0_11], %12 {strides = array<i32>} : memref<256x128xf32, #tpu.memory_space<vmem>>, vector<256x128xf32>,
    } else {
    }
    %c0 = arith.constant 0 : index
    %c0_1 = arith.constant 0 : index
    %3 = vector.load %arg8[%c0, %c0_1] : memref<256x128xf32, #tpu.memory_space<vmem>>, vector<256x128xf32>
    %c0_2 = arith.constant 0 : index
    %c0_3 = arith.constant 0 : index
    %4 = vector.load %arg3[%c0_2, %c0_3] : memref<256x128xbf16, #tpu.memory_space<vmem>>, vector<256x128xbf16>
    %c0_4 = arith.constant 0 : index
    %c0_5 = arith.constant 0 : index
    %5 = vector.load %arg4[%c0_4, %c0_5] : memref<128x128xbf16, #tpu.memory_space<vmem>>, vector<128x128xbf16>
    %cst = arith.constant dense<0.000000e+00> : vector<256x128xf32>
    %6 = tpu.matmul %4, %5, %cst {dimension_numbers = #tpu.dot_dimension_numbers<[1], [0], [0], [1], [0, 0, 1, 1], [], []>} : vector<256x128xbf16>, vector<128x128xbf16>, vector<256x128xf32> -> vector<256x128xf32>
    %7 = arith.addf %3, %6 : vector<256x128xf32>
    %c0_6 = arith.constant 0 : index
    %c0_7 = arith.constant 0 : index
    %8 = vector.load %arg8[%c0_6, %c0_7] : memref<256x128xf32, #tpu.memory_space<vmem>>, vector<256x128xf32>
    tpu.vector_store %arg8[%c0_6, %c0_7], %7 {strides = array<i32>} : memref<256x128xf32, #tpu.memory_space<vmem>>, vector<256x128xf32>,
    %c12_i32 = arith.constant 12 : i32
    %9 = arith.cmpi eq, %arg2, %c12_i32 : i32
    %10 = arith.extui %9 : i1 to i32
    %c0_i32_8 = arith.constant 0 : i32
    %11 = arith.cmpi ne, %10, %c0_i32_8 : i32
    scf.if %11 {
      %c0_9 = arith.constant 0 : index
      %c0_10 = arith.constant 0 : index
      %12 = vector.load %arg8[%c0_9, %c0_10] : memref<256x128xf32, #tpu.memory_space<vmem>>, vector<256x128xf32>
      %13 = arith.truncf %12 : vector<256x128xf32> to vector<256x128xbf16>
      %c0_11 = arith.constant 0 : index
      %c0_12 = arith.constant 0 : index
      %14 = vector.load %arg5[%c0_11, %c0_12] : memref<256x128xbf16, #tpu.memory_space<vmem>>, vector<256x128xbf16>
      tpu.vector_store %arg5[%c0_11, %c0_12], %13 {strides = array<i32>} : memref<256x128xbf16, #tpu.memory_space<vmem>>, vector<256x128xbf16>,
      %cst_13 = arith.constant dense<0.000000e+00> : vector<128xf32>
      %15 = vector.multi_reduction <add>, %12, %cst_13 [0] : vector<256x128xf32> to vector<128xf32>
      %16 = vector.shape_cast %15 : vector<128xf32> to vector<1x128xf32>
      %17 = arith.mulf %12, %12 : vector<256x128xf32>
      %cst_14 = arith.constant dense<0.000000e+00> : vector<128xf32>
      %18 = vector.multi_reduction <add>, %17, %cst_14 [0] : vector<256x128xf32> to vector<128xf32>
      %19 = vector.shape_cast %18 : vector<128xf32> to vector<1x128xf32>
      %20 = vector.shape_cast %16 : vector<1x128xf32> to vector<1x128xf32>
      %21 = vector.broadcast %20 : vector<1x128xf32> to vector<8x128xf32>
      %c0_15 = arith.constant 0 : index
      %c0_16 = arith.constant 0 : index
      %22 = vector.load %arg6[%c0_15, %c0_16] : memref<8x128xf32, #tpu.memory_space<vmem>>, vector<8x128xf32>
      tpu.vector_store %arg6[%c0_15, %c0_16], %21 {strides = array<i32>} : memref<8x128xf32, #tpu.memory_space<vmem>>, vector<8x128xf32>,
      %23 = vector.shape_cast %19 : vector<1x128xf32> to vector<1x128xf32>
      %24 = vector.broadcast %23 : vector<1x128xf32> to vector<8x128xf32>
      %c0_17 = arith.constant 0 : index
      %c0_18 = arith.constant 0 : index
      %25 = vector.load %arg7[%c0_17, %c0_18] : memref<8x128xf32, #tpu.memory_space<vmem>>, vector<8x128xf32>
      tpu.vector_store %arg7[%c0_17, %c0_18], %24 {strides = array<i32>} : memref<8x128xf32, #tpu.memory_space<vmem>>, vector<8x128xf32>,
    } else {
    }
    return
  }
  func.func @transform_0(%arg0: i32, %arg1: i32, %arg2: i32) -> (i32, i32) {
    %c0_i32 = arith.constant 0 : i32
    return %arg0, %arg2 : i32, i32
  }
  func.func @transform_1(%arg0: i32, %arg1: i32, %arg2: i32) -> (i32, i32) {
    %c0_i32 = arith.constant 0 : i32
    return %arg2, %arg1 : i32, i32
  }
  func.func @transform_2(%arg0: i32, %arg1: i32, %arg2: i32) -> (i32, i32) {
    %c0_i32 = arith.constant 0 : i32
    return %arg0, %arg1 : i32, i32
  }
  func.func @transform_3(%arg0: i32, %arg1: i32, %arg2: i32) -> (i32, i32) {
    %c0_i32 = arith.constant 0 : i32
    return %arg0, %arg1 : i32, i32
  }
  func.func @transform_4(%arg0: i32, %arg1: i32, %arg2: i32) -> (i32, i32) {
    %c0_i32 = arith.constant 0 : i32
    return %arg0, %arg1 : i32, i32
  }
}

module attributes {stable_mosaic.version = 11 : i64} {
  func.func @_affine_leaky_kernel(%arg0: i32, %arg1: memref<512x128xbf16, #tpu.memory_space<vmem>>, %arg2: memref<1x128xf32, #tpu.memory_space<vmem>>, %arg3: memref<1x128xf32, #tpu.memory_space<vmem>>, %arg4: memref<512x128xbf16, #tpu.memory_space<vmem>>) attributes {dimension_semantics = [#tpu.dimension_semantics<parallel>], iteration_bounds = array<i64: 1>, scalar_prefetch = 0 : i64, scratch_operands = 0 : i64, tpu.core_type = #tpu.core_type<tc>, window_params = [{transform_indices = @transform_0, window_bounds = array<i64: 512, 128>}, {pipeline_mode = #tpu.pipeline_mode<synchronous>, transform_indices = @transform_1, window_bounds = array<i64: 1, 128>}, {pipeline_mode = #tpu.pipeline_mode<synchronous>, transform_indices = @transform_2, window_bounds = array<i64: 1, 128>}, {transform_indices = @transform_3, window_bounds = array<i64: 512, 128>}]} {
    %c0 = arith.constant 0 : index
    %c0_0 = arith.constant 0 : index
    %0 = vector.load %arg1[%c0, %c0_0] : memref<512x128xbf16, #tpu.memory_space<vmem>>, vector<512x128xbf16>
    %1 = arith.extf %0 : vector<512x128xbf16> to vector<512x128xf32>
    %c0_1 = arith.constant 0 : index
    %c0_2 = arith.constant 0 : index
    %2 = vector.load %arg2[%c0_1, %c0_2] : memref<1x128xf32, #tpu.memory_space<vmem>>, vector<1x128xf32>
    %3 = vector.broadcast %2 : vector<1x128xf32> to vector<512x128xf32>
    %4 = arith.mulf %1, %3 : vector<512x128xf32>
    %c0_3 = arith.constant 0 : index
    %c0_4 = arith.constant 0 : index
    %5 = vector.load %arg3[%c0_3, %c0_4] : memref<1x128xf32, #tpu.memory_space<vmem>>, vector<1x128xf32>
    %6 = vector.broadcast %5 : vector<1x128xf32> to vector<512x128xf32>
    %7 = arith.addf %4, %6 : vector<512x128xf32>
    %cst = arith.constant 0.000000e+00 : f32
    %8 = vector.broadcast %cst : f32 to vector<512x128xf32>
    %9 = arith.cmpf oge, %7, %8 : vector<512x128xf32>
    %cst_5 = arith.constant 1.000000e-01 : f32
    %10 = vector.broadcast %cst_5 : f32 to vector<512x128xf32>
    %11 = arith.mulf %7, %10 : vector<512x128xf32>
    %12 = arith.select %9, %7, %11 : vector<512x128xi1>, vector<512x128xf32>
    %13 = arith.truncf %12 : vector<512x128xf32> to vector<512x128xbf16>
    %c0_6 = arith.constant 0 : index
    %c0_7 = arith.constant 0 : index
    %14 = vector.load %arg4[%c0_6, %c0_7] : memref<512x128xbf16, #tpu.memory_space<vmem>>, vector<512x128xbf16>
    tpu.vector_store %arg4[%c0_6, %c0_7], %13 {strides = array<i32>} : memref<512x128xbf16, #tpu.memory_space<vmem>>, vector<512x128xbf16>,
    return
  }
  func.func @transform_0(%arg0: i32) -> (i32, i32) {
    %c0_i32 = arith.constant 0 : i32
    %c0_i32_0 = arith.constant 0 : i32
    return %arg0, %c0_i32 : i32, i32
  }
  func.func @transform_1(%arg0: i32) -> (i32, i32) {
    %c0_i32 = arith.constant 0 : i32
    %c0_i32_0 = arith.constant 0 : i32
    %c0_i32_1 = arith.constant 0 : i32
    return %c0_i32, %c0_i32_0 : i32, i32
  }
  func.func @transform_2(%arg0: i32) -> (i32, i32) {
    %c0_i32 = arith.constant 0 : i32
    %c0_i32_0 = arith.constant 0 : i32
    %c0_i32_1 = arith.constant 0 : i32
    return %c0_i32, %c0_i32_0 : i32, i32
  }
  func.func @transform_3(%arg0: i32) -> (i32, i32) {
    %c0_i32 = arith.constant 0 : i32
    %c0_i32_0 = arith.constant 0 : i32
    return %arg0, %c0_i32 : i32, i32
  }
}

module attributes {stable_mosaic.version = 11 : i64} {
  func.func @_mm_bn_kernel(%arg0: i32, %arg1: i32, %arg2: i32, %arg3: memref<128x384xbf16, #tpu.memory_space<vmem>>, %arg4: memref<384x128xbf16, #tpu.memory_space<vmem>>, %arg5: memref<128x128xbf16, #tpu.memory_space<vmem>>, %arg6: memref<8x128xf32, #tpu.memory_space<vmem>>, %arg7: memref<8x128xf32, #tpu.memory_space<vmem>>, %arg8: memref<128x128xf32, #tpu.memory_space<vmem>>) attributes {dimension_semantics = [#tpu.dimension_semantics<parallel>, #tpu.dimension_semantics<parallel>, #tpu.dimension_semantics<arbitrary>], iteration_bounds = array<i64: 1, 2, 9>, scalar_prefetch = 0 : i64, scratch_operands = 1 : i64, tpu.core_type = #tpu.core_type<tc>, window_params = [{transform_indices = @transform_0, window_bounds = array<i64: 128, 384>}, {transform_indices = @transform_1, window_bounds = array<i64: 384, 128>}, {transform_indices = @transform_2, window_bounds = array<i64: 128, 128>}, {transform_indices = @transform_3, window_bounds = array<i64: 8, 128>}, {transform_indices = @transform_4, window_bounds = array<i64: 8, 128>}]} {
    %c0_i32 = arith.constant 0 : i32
    %0 = arith.cmpi eq, %arg2, %c0_i32 : i32
    %1 = arith.extui %0 : i1 to i32
    %c0_i32_0 = arith.constant 0 : i32
    %2 = arith.cmpi ne, %1, %c0_i32_0 : i32
    scf.if %2 {
      %cst_9 = arith.constant 0.000000e+00 : f32
      %12 = vector.broadcast %cst_9 : f32 to vector<128x128xf32>
      %c0_10 = arith.constant 0 : index
      %c0_11 = arith.constant 0 : index
      %13 = vector.load %arg8[%c0_10, %c0_11] : memref<128x128xf32, #tpu.memory_space<vmem>>, vector<128x128xf32>
      tpu.vector_store %arg8[%c0_10, %c0_11], %12 {strides = array<i32>} : memref<128x128xf32, #tpu.memory_space<vmem>>, vector<128x128xf32>,
    } else {
    }
    %c0 = arith.constant 0 : index
    %c0_1 = arith.constant 0 : index
    %3 = vector.load %arg8[%c0, %c0_1] : memref<128x128xf32, #tpu.memory_space<vmem>>, vector<128x128xf32>
    %c0_2 = arith.constant 0 : index
    %c0_3 = arith.constant 0 : index
    %4 = vector.load %arg3[%c0_2, %c0_3] : memref<128x384xbf16, #tpu.memory_space<vmem>>, vector<128x384xbf16>
    %c0_4 = arith.constant 0 : index
    %c0_5 = arith.constant 0 : index
    %5 = vector.load %arg4[%c0_4, %c0_5] : memref<384x128xbf16, #tpu.memory_space<vmem>>, vector<384x128xbf16>
    %cst = arith.constant dense<0.000000e+00> : vector<128x128xf32>
    %6 = tpu.matmul %4, %5, %cst {dimension_numbers = #tpu.dot_dimension_numbers<[1], [0], [0], [1], [0, 0, 1, 1], [], []>} : vector<128x384xbf16>, vector<384x128xbf16>, vector<128x128xf32> -> vector<128x128xf32>
    %7 = arith.addf %3, %6 : vector<128x128xf32>
    %c0_6 = arith.constant 0 : index
    %c0_7 = arith.constant 0 : index
    %8 = vector.load %arg8[%c0_6, %c0_7] : memref<128x128xf32, #tpu.memory_space<vmem>>, vector<128x128xf32>
    tpu.vector_store %arg8[%c0_6, %c0_7], %7 {strides = array<i32>} : memref<128x128xf32, #tpu.memory_space<vmem>>, vector<128x128xf32>,
    %c8_i32 = arith.constant 8 : i32
    %9 = arith.cmpi eq, %arg2, %c8_i32 : i32
    %10 = arith.extui %9 : i1 to i32
    %c0_i32_8 = arith.constant 0 : i32
    %11 = arith.cmpi ne, %10, %c0_i32_8 : i32
    scf.if %11 {
      %c0_9 = arith.constant 0 : index
      %c0_10 = arith.constant 0 : index
      %12 = vector.load %arg8[%c0_9, %c0_10] : memref<128x128xf32, #tpu.memory_space<vmem>>, vector<128x128xf32>
      %13 = arith.truncf %12 : vector<128x128xf32> to vector<128x128xbf16>
      %c0_11 = arith.constant 0 : index
      %c0_12 = arith.constant 0 : index
      %14 = vector.load %arg5[%c0_11, %c0_12] : memref<128x128xbf16, #tpu.memory_space<vmem>>, vector<128x128xbf16>
      tpu.vector_store %arg5[%c0_11, %c0_12], %13 {strides = array<i32>} : memref<128x128xbf16, #tpu.memory_space<vmem>>, vector<128x128xbf16>,
      %cst_13 = arith.constant dense<0.000000e+00> : vector<128xf32>
      %15 = vector.multi_reduction <add>, %12, %cst_13 [0] : vector<128x128xf32> to vector<128xf32>
      %16 = vector.shape_cast %15 : vector<128xf32> to vector<1x128xf32>
      %17 = arith.mulf %12, %12 : vector<128x128xf32>
      %cst_14 = arith.constant dense<0.000000e+00> : vector<128xf32>
      %18 = vector.multi_reduction <add>, %17, %cst_14 [0] : vector<128x128xf32> to vector<128xf32>
      %19 = vector.shape_cast %18 : vector<128xf32> to vector<1x128xf32>
      %20 = vector.shape_cast %16 : vector<1x128xf32> to vector<1x128xf32>
      %21 = vector.broadcast %20 : vector<1x128xf32> to vector<8x128xf32>
      %c0_15 = arith.constant 0 : index
      %c0_16 = arith.constant 0 : index
      %22 = vector.load %arg6[%c0_15, %c0_16] : memref<8x128xf32, #tpu.memory_space<vmem>>, vector<8x128xf32>
      tpu.vector_store %arg6[%c0_15, %c0_16], %21 {strides = array<i32>} : memref<8x128xf32, #tpu.memory_space<vmem>>, vector<8x128xf32>,
      %23 = vector.shape_cast %19 : vector<1x128xf32> to vector<1x128xf32>
      %24 = vector.broadcast %23 : vector<1x128xf32> to vector<8x128xf32>
      %c0_17 = arith.constant 0 : index
      %c0_18 = arith.constant 0 : index
      %25 = vector.load %arg7[%c0_17, %c0_18] : memref<8x128xf32, #tpu.memory_space<vmem>>, vector<8x128xf32>
      tpu.vector_store %arg7[%c0_17, %c0_18], %24 {strides = array<i32>} : memref<8x128xf32, #tpu.memory_space<vmem>>, vector<8x128xf32>,
    } else {
    }
    return
  }
  func.func @transform_0(%arg0: i32, %arg1: i32, %arg2: i32) -> (i32, i32) {
    %c0_i32 = arith.constant 0 : i32
    return %arg0, %arg2 : i32, i32
  }
  func.func @transform_1(%arg0: i32, %arg1: i32, %arg2: i32) -> (i32, i32) {
    %c0_i32 = arith.constant 0 : i32
    return %arg2, %arg1 : i32, i32
  }
  func.func @transform_2(%arg0: i32, %arg1: i32, %arg2: i32) -> (i32, i32) {
    %c0_i32 = arith.constant 0 : i32
    return %arg0, %arg1 : i32, i32
  }
  func.func @transform_3(%arg0: i32, %arg1: i32, %arg2: i32) -> (i32, i32) {
    %c0_i32 = arith.constant 0 : i32
    return %arg0, %arg1 : i32, i32
  }
  func.func @transform_4(%arg0: i32, %arg1: i32, %arg2: i32) -> (i32, i32) {
    %c0_i32 = arith.constant 0 : i32
    return %arg0, %arg1 : i32, i32
  }
}

module attributes {stable_mosaic.version = 11 : i64} {
  func.func @_affine_leaky_kernel(%arg0: i32, %arg1: memref<128x256xbf16, #tpu.memory_space<vmem>>, %arg2: memref<1x256xf32, #tpu.memory_space<vmem>>, %arg3: memref<1x256xf32, #tpu.memory_space<vmem>>, %arg4: memref<128x256xbf16, #tpu.memory_space<vmem>>) attributes {dimension_semantics = [#tpu.dimension_semantics<parallel>], iteration_bounds = array<i64: 1>, scalar_prefetch = 0 : i64, scratch_operands = 0 : i64, tpu.core_type = #tpu.core_type<tc>, window_params = [{transform_indices = @transform_0, window_bounds = array<i64: 128, 256>}, {pipeline_mode = #tpu.pipeline_mode<synchronous>, transform_indices = @transform_1, window_bounds = array<i64: 1, 256>}, {pipeline_mode = #tpu.pipeline_mode<synchronous>, transform_indices = @transform_2, window_bounds = array<i64: 1, 256>}, {transform_indices = @transform_3, window_bounds = array<i64: 128, 256>}]} {
    %c0 = arith.constant 0 : index
    %c0_0 = arith.constant 0 : index
    %0 = vector.load %arg1[%c0, %c0_0] : memref<128x256xbf16, #tpu.memory_space<vmem>>, vector<128x256xbf16>
    %1 = arith.extf %0 : vector<128x256xbf16> to vector<128x256xf32>
    %c0_1 = arith.constant 0 : index
    %c0_2 = arith.constant 0 : index
    %2 = vector.load %arg2[%c0_1, %c0_2] : memref<1x256xf32, #tpu.memory_space<vmem>>, vector<1x256xf32>
    %3 = vector.broadcast %2 : vector<1x256xf32> to vector<128x256xf32>
    %4 = arith.mulf %1, %3 : vector<128x256xf32>
    %c0_3 = arith.constant 0 : index
    %c0_4 = arith.constant 0 : index
    %5 = vector.load %arg3[%c0_3, %c0_4] : memref<1x256xf32, #tpu.memory_space<vmem>>, vector<1x256xf32>
    %6 = vector.broadcast %5 : vector<1x256xf32> to vector<128x256xf32>
    %7 = arith.addf %4, %6 : vector<128x256xf32>
    %cst = arith.constant 0.000000e+00 : f32
    %8 = vector.broadcast %cst : f32 to vector<128x256xf32>
    %9 = arith.cmpf oge, %7, %8 : vector<128x256xf32>
    %cst_5 = arith.constant 1.000000e-01 : f32
    %10 = vector.broadcast %cst_5 : f32 to vector<128x256xf32>
    %11 = arith.mulf %7, %10 : vector<128x256xf32>
    %12 = arith.select %9, %7, %11 : vector<128x256xi1>, vector<128x256xf32>
    %13 = arith.truncf %12 : vector<128x256xf32> to vector<128x256xbf16>
    %c0_6 = arith.constant 0 : index
    %c0_7 = arith.constant 0 : index
    %14 = vector.load %arg4[%c0_6, %c0_7] : memref<128x256xbf16, #tpu.memory_space<vmem>>, vector<128x256xbf16>
    tpu.vector_store %arg4[%c0_6, %c0_7], %13 {strides = array<i32>} : memref<128x256xbf16, #tpu.memory_space<vmem>>, vector<128x256xbf16>,
    return
  }
  func.func @transform_0(%arg0: i32) -> (i32, i32) {
    %c0_i32 = arith.constant 0 : i32
    %c0_i32_0 = arith.constant 0 : i32
    return %arg0, %c0_i32 : i32, i32
  }
  func.func @transform_1(%arg0: i32) -> (i32, i32) {
    %c0_i32 = arith.constant 0 : i32
    %c0_i32_0 = arith.constant 0 : i32
    %c0_i32_1 = arith.constant 0 : i32
    return %c0_i32, %c0_i32_0 : i32, i32
  }
  func.func @transform_2(%arg0: i32) -> (i32, i32) {
    %c0_i32 = arith.constant 0 : i32
    %c0_i32_0 = arith.constant 0 : i32
    %c0_i32_1 = arith.constant 0 : i32
    return %c0_i32, %c0_i32_0 : i32, i32
  }
  func.func @transform_3(%arg0: i32) -> (i32, i32) {
    %c0_i32 = arith.constant 0 : i32
    %c0_i32_0 = arith.constant 0 : i32
    return %arg0, %c0_i32 : i32, i32
  }
}

module attributes {stable_mosaic.version = 11 : i64} {
  func.func @_mm_bn_kernel(%arg0: i32, %arg1: i32, %arg2: i32, %arg3: memref<128x768xbf16, #tpu.memory_space<vmem>>, %arg4: memref<768x128xbf16, #tpu.memory_space<vmem>>, %arg5: memref<128x128xbf16, #tpu.memory_space<vmem>>, %arg6: memref<8x128xf32, #tpu.memory_space<vmem>>, %arg7: memref<8x128xf32, #tpu.memory_space<vmem>>, %arg8: memref<128x128xf32, #tpu.memory_space<vmem>>) attributes {dimension_semantics = [#tpu.dimension_semantics<parallel>, #tpu.dimension_semantics<parallel>, #tpu.dimension_semantics<arbitrary>], iteration_bounds = array<i64: 1, 2, 3>, scalar_prefetch = 0 : i64, scratch_operands = 1 : i64, tpu.core_type = #tpu.core_type<tc>, window_params = [{transform_indices = @transform_0, window_bounds = array<i64: 128, 768>}, {transform_indices = @transform_1, window_bounds = array<i64: 768, 128>}, {transform_indices = @transform_2, window_bounds = array<i64: 128, 128>}, {transform_indices = @transform_3, window_bounds = array<i64: 8, 128>}, {transform_indices = @transform_4, window_bounds = array<i64: 8, 128>}]} {
    %c0_i32 = arith.constant 0 : i32
    %0 = arith.cmpi eq, %arg2, %c0_i32 : i32
    %1 = arith.extui %0 : i1 to i32
    %c0_i32_0 = arith.constant 0 : i32
    %2 = arith.cmpi ne, %1, %c0_i32_0 : i32
    scf.if %2 {
      %cst_9 = arith.constant 0.000000e+00 : f32
      %12 = vector.broadcast %cst_9 : f32 to vector<128x128xf32>
      %c0_10 = arith.constant 0 : index
      %c0_11 = arith.constant 0 : index
      %13 = vector.load %arg8[%c0_10, %c0_11] : memref<128x128xf32, #tpu.memory_space<vmem>>, vector<128x128xf32>
      tpu.vector_store %arg8[%c0_10, %c0_11], %12 {strides = array<i32>} : memref<128x128xf32, #tpu.memory_space<vmem>>, vector<128x128xf32>,
    } else {
    }
    %c0 = arith.constant 0 : index
    %c0_1 = arith.constant 0 : index
    %3 = vector.load %arg8[%c0, %c0_1] : memref<128x128xf32, #tpu.memory_space<vmem>>, vector<128x128xf32>
    %c0_2 = arith.constant 0 : index
    %c0_3 = arith.constant 0 : index
    %4 = vector.load %arg3[%c0_2, %c0_3] : memref<128x768xbf16, #tpu.memory_space<vmem>>, vector<128x768xbf16>
    %c0_4 = arith.constant 0 : index
    %c0_5 = arith.constant 0 : index
    %5 = vector.load %arg4[%c0_4, %c0_5] : memref<768x128xbf16, #tpu.memory_space<vmem>>, vector<768x128xbf16>
    %cst = arith.constant dense<0.000000e+00> : vector<128x128xf32>
    %6 = tpu.matmul %4, %5, %cst {dimension_numbers = #tpu.dot_dimension_numbers<[1], [0], [0], [1], [0, 0, 1, 1], [], []>} : vector<128x768xbf16>, vector<768x128xbf16>, vector<128x128xf32> -> vector<128x128xf32>
    %7 = arith.addf %3, %6 : vector<128x128xf32>
    %c0_6 = arith.constant 0 : index
    %c0_7 = arith.constant 0 : index
    %8 = vector.load %arg8[%c0_6, %c0_7] : memref<128x128xf32, #tpu.memory_space<vmem>>, vector<128x128xf32>
    tpu.vector_store %arg8[%c0_6, %c0_7], %7 {strides = array<i32>} : memref<128x128xf32, #tpu.memory_space<vmem>>, vector<128x128xf32>,
    %c2_i32 = arith.constant 2 : i32
    %9 = arith.cmpi eq, %arg2, %c2_i32 : i32
    %10 = arith.extui %9 : i1 to i32
    %c0_i32_8 = arith.constant 0 : i32
    %11 = arith.cmpi ne, %10, %c0_i32_8 : i32
    scf.if %11 {
      %c0_9 = arith.constant 0 : index
      %c0_10 = arith.constant 0 : index
      %12 = vector.load %arg8[%c0_9, %c0_10] : memref<128x128xf32, #tpu.memory_space<vmem>>, vector<128x128xf32>
      %13 = arith.truncf %12 : vector<128x128xf32> to vector<128x128xbf16>
      %c0_11 = arith.constant 0 : index
      %c0_12 = arith.constant 0 : index
      %14 = vector.load %arg5[%c0_11, %c0_12] : memref<128x128xbf16, #tpu.memory_space<vmem>>, vector<128x128xbf16>
      tpu.vector_store %arg5[%c0_11, %c0_12], %13 {strides = array<i32>} : memref<128x128xbf16, #tpu.memory_space<vmem>>, vector<128x128xbf16>,
      %cst_13 = arith.constant dense<0.000000e+00> : vector<128xf32>
      %15 = vector.multi_reduction <add>, %12, %cst_13 [0] : vector<128x128xf32> to vector<128xf32>
      %16 = vector.shape_cast %15 : vector<128xf32> to vector<1x128xf32>
      %17 = arith.mulf %12, %12 : vector<128x128xf32>
      %cst_14 = arith.constant dense<0.000000e+00> : vector<128xf32>
      %18 = vector.multi_reduction <add>, %17, %cst_14 [0] : vector<128x128xf32> to vector<128xf32>
      %19 = vector.shape_cast %18 : vector<128xf32> to vector<1x128xf32>
      %20 = vector.shape_cast %16 : vector<1x128xf32> to vector<1x128xf32>
      %21 = vector.broadcast %20 : vector<1x128xf32> to vector<8x128xf32>
      %c0_15 = arith.constant 0 : index
      %c0_16 = arith.constant 0 : index
      %22 = vector.load %arg6[%c0_15, %c0_16] : memref<8x128xf32, #tpu.memory_space<vmem>>, vector<8x128xf32>
      tpu.vector_store %arg6[%c0_15, %c0_16], %21 {strides = array<i32>} : memref<8x128xf32, #tpu.memory_space<vmem>>, vector<8x128xf32>,
      %23 = vector.shape_cast %19 : vector<1x128xf32> to vector<1x128xf32>
      %24 = vector.broadcast %23 : vector<1x128xf32> to vector<8x128xf32>
      %c0_17 = arith.constant 0 : index
      %c0_18 = arith.constant 0 : index
      %25 = vector.load %arg7[%c0_17, %c0_18] : memref<8x128xf32, #tpu.memory_space<vmem>>, vector<8x128xf32>
      tpu.vector_store %arg7[%c0_17, %c0_18], %24 {strides = array<i32>} : memref<8x128xf32, #tpu.memory_space<vmem>>, vector<8x128xf32>,
    } else {
    }
    return
  }
  func.func @transform_0(%arg0: i32, %arg1: i32, %arg2: i32) -> (i32, i32) {
    %c0_i32 = arith.constant 0 : i32
    return %arg0, %arg2 : i32, i32
  }
  func.func @transform_1(%arg0: i32, %arg1: i32, %arg2: i32) -> (i32, i32) {
    %c0_i32 = arith.constant 0 : i32
    return %arg2, %arg1 : i32, i32
  }
  func.func @transform_2(%arg0: i32, %arg1: i32, %arg2: i32) -> (i32, i32) {
    %c0_i32 = arith.constant 0 : i32
    return %arg0, %arg1 : i32, i32
  }
  func.func @transform_3(%arg0: i32, %arg1: i32, %arg2: i32) -> (i32, i32) {
    %c0_i32 = arith.constant 0 : i32
    return %arg0, %arg1 : i32, i32
  }
  func.func @transform_4(%arg0: i32, %arg1: i32, %arg2: i32) -> (i32, i32) {
    %c0_i32 = arith.constant 0 : i32
    return %arg0, %arg1 : i32, i32
  }
}

module attributes {stable_mosaic.version = 11 : i64} {
  func.func @_mm_kernel(%arg0: i32, %arg1: i32, %arg2: i32, %arg3: memref<128x512xbf16, #tpu.memory_space<vmem>>, %arg4: memref<512x256xbf16, #tpu.memory_space<vmem>>, %arg5: memref<128x256xbf16, #tpu.memory_space<vmem>>, %arg6: memref<128x256xf32, #tpu.memory_space<vmem>>) attributes {dimension_semantics = [#tpu.dimension_semantics<parallel>, #tpu.dimension_semantics<parallel>, #tpu.dimension_semantics<arbitrary>], iteration_bounds = array<i64: 1, 4, 1>, scalar_prefetch = 0 : i64, scratch_operands = 1 : i64, tpu.core_type = #tpu.core_type<tc>, window_params = [{transform_indices = @transform_0, window_bounds = array<i64: 128, 512>}, {transform_indices = @transform_1, window_bounds = array<i64: 512, 256>}, {transform_indices = @transform_2, window_bounds = array<i64: 128, 256>}]} {
    %c0_i32 = arith.constant 0 : i32
    %0 = arith.cmpi eq, %arg2, %c0_i32 : i32
    %1 = arith.extui %0 : i1 to i32
    %c0_i32_0 = arith.constant 0 : i32
    %2 = arith.cmpi ne, %1, %c0_i32_0 : i32
    scf.if %2 {
      %cst_10 = arith.constant 0.000000e+00 : f32
      %12 = vector.broadcast %cst_10 : f32 to vector<128x256xf32>
      %c0_11 = arith.constant 0 : index
      %c0_12 = arith.constant 0 : index
      %13 = vector.load %arg6[%c0_11, %c0_12] : memref<128x256xf32, #tpu.memory_space<vmem>>, vector<128x256xf32>
      tpu.vector_store %arg6[%c0_11, %c0_12], %12 {strides = array<i32>} : memref<128x256xf32, #tpu.memory_space<vmem>>, vector<128x256xf32>,
    } else {
    }
    %c0 = arith.constant 0 : index
    %c0_1 = arith.constant 0 : index
    %3 = vector.load %arg6[%c0, %c0_1] : memref<128x256xf32, #tpu.memory_space<vmem>>, vector<128x256xf32>
    %c0_2 = arith.constant 0 : index
    %c0_3 = arith.constant 0 : index
    %4 = vector.load %arg3[%c0_2, %c0_3] : memref<128x512xbf16, #tpu.memory_space<vmem>>, vector<128x512xbf16>
    %c0_4 = arith.constant 0 : index
    %c0_5 = arith.constant 0 : index
    %5 = vector.load %arg4[%c0_4, %c0_5] : memref<512x256xbf16, #tpu.memory_space<vmem>>, vector<512x256xbf16>
    %cst = arith.constant dense<0.000000e+00> : vector<128x256xf32>
    %6 = tpu.matmul %4, %5, %cst {dimension_numbers = #tpu.dot_dimension_numbers<[1], [0], [0], [1], [0, 0, 1, 1], [], []>} : vector<128x512xbf16>, vector<512x256xbf16>, vector<128x256xf32> -> vector<128x256xf32>
    %7 = arith.addf %3, %6 : vector<128x256xf32>
    %c0_6 = arith.constant 0 : index
    %c0_7 = arith.constant 0 : index
    %8 = vector.load %arg6[%c0_6, %c0_7] : memref<128x256xf32, #tpu.memory_space<vmem>>, vector<128x256xf32>
    tpu.vector_store %arg6[%c0_6, %c0_7], %7 {strides = array<i32>} : memref<128x256xf32, #tpu.memory_space<vmem>>, vector<128x256xf32>,
    %c0_i32_8 = arith.constant 0 : i32
    %9 = arith.cmpi eq, %arg2, %c0_i32_8 : i32
    %10 = arith.extui %9 : i1 to i32
    %c0_i32_9 = arith.constant 0 : i32
    %11 = arith.cmpi ne, %10, %c0_i32_9 : i32
    scf.if %11 {
      %c0_10 = arith.constant 0 : index
      %c0_11 = arith.constant 0 : index
      %12 = vector.load %arg6[%c0_10, %c0_11] : memref<128x256xf32, #tpu.memory_space<vmem>>, vector<128x256xf32>
      %13 = arith.truncf %12 : vector<128x256xf32> to vector<128x256xbf16>
      %c0_12 = arith.constant 0 : index
      %c0_13 = arith.constant 0 : index
      %14 = vector.load %arg5[%c0_12, %c0_13] : memref<128x256xbf16, #tpu.memory_space<vmem>>, vector<128x256xbf16>
      tpu.vector_store %arg5[%c0_12, %c0_13], %13 {strides = array<i32>} : memref<128x256xbf16, #tpu.memory_space<vmem>>, vector<128x256xbf16>,
    } else {
    }
    return
  }
  func.func @transform_0(%arg0: i32, %arg1: i32, %arg2: i32) -> (i32, i32) {
    %c0_i32 = arith.constant 0 : i32
    return %arg0, %arg2 : i32, i32
  }
  func.func @transform_1(%arg0: i32, %arg1: i32, %arg2: i32) -> (i32, i32) {
    %c0_i32 = arith.constant 0 : i32
    return %arg2, %arg1 : i32, i32
  }
  func.func @transform_2(%arg0: i32, %arg1: i32, %arg2: i32) -> (i32, i32) {
    %c0_i32 = arith.constant 0 : i32
    return %arg0, %arg1 : i32, i32
  }
}

</mosaic_0001>

<bundles_post_ra>
// kernel: forward.10
= control target key start
LH: loop header
LB: loop body
LE: loop exit
PB: predicated region body
PF: predicated region fallthrough
CT: control target
= control target key end

     0   :  { %s1351_s12 = smov 0   ;;  %s1681_s0 = inlined_call_operand.vmem [shape: bf16[2048,64], index: 0, kind: input, shape index: {}]   ;;  %s1682_s1 = inlined_call_operand.vmem [shape: f32[1,64], index: 1, kind: input, shape index: {}]   ;;  %s1683_s2 = inlined_call_operand.vmem [shape: f32[1,64], index: 2, kind: input, shape index: {}]   ;;  %s1684_s3 = inlined_call_operand.vmem [shape: bf16[2048,64], index: 3, kind: output, shape index: {}]  }
   0x1 LB: > { %s1013_s13 = sadd.s32 4294967295, %s1329_s12   ;;  %p1017_p0 = scmp.ge.s32.totalorder %s1329_s12, 1  ;;  %s1329_s12 = sphi %s1351_s12, %s13_s12  }
   0x2   : > { %p138_p1 = scmp.lt.s32.totalorder %s1329_s12, 5 }
   0x4   : > { %p139_p2 = pnand %p1017_p0, %p138_p1 }
   0x5   : > { %s1018_s14 = sshll.u32 (!%p139_p2), %s1013_s13, 6 }
   0x6   : > { %142 = sbr.rel (%p139_p2) target bundleno = 133 (0x85), region = 32  ;;  %p163_p3 = scmp.lt.s32.totalorder (!%p139_p2), %s1018_s14, 255 }
   0xb   : > { %s1686_s14 = smov (!%p163_p3, %s1018_s14), 255  ;;  %v1372_v0 = vld [vmem:[%s1682_s1] ss:$0 sm:$0xff]  ;;  %vm892_vm0 = vcmask 519168  }
   0xc   : > { %s1019_s15 = sshll.u32 %s1686_s14, 2  ;;  %v1381_v9 = vld [vmem:[%s1683_s2] ss:$0 sm:$0xff] }
   0xd   : > { %s1367_s18 = scalar_lea.vmem %s1681_s0, %s1019_s15  ;;  %s1404_s25 = scalar_lea.vmem %s1684_s3, %s1019_s15 }
   0xe   : > { %v1155_v1 = vld [vmem:[%s1367_s18] sm:$0xff]   ;;  %v1282_v2 = vld [vmem:[%s1367_s18 + $0x8] sm:$0xff]   ;;  %v1283_v3 = vld [vmem:[%s1367_s18 + $0x10] sm:$0xff]  }
   0xf   : > { %v1156_v4 = vunpack.c.l.bf16 %v1155_v1  ;;  %v1157_v5 = vunpack.c.h.bf16 %v1155_v1  ;;  %v1160_v6 = vunpack.c.l.bf16 %v1282_v2  ;;  %v1161_v7 = vunpack.c.h.bf16 %v1282_v2  ;;  %v1284_v8 = vld [vmem:[%s1367_s18 + $0x18] sm:$0xff]   ;;  %v1285_v41 = vld [vmem:[%s1367_s18 + $0x20] sm:$0xff]   ;;  %v1286_v45 = vld [vmem:[%s1367_s18 + $0x28] sm:$0xff]  }
  0x10   : > { %v1164_v10 = vunpack.c.l.bf16 %v1283_v3  ;;  %v1165_v11 = vunpack.c.h.bf16 %v1283_v3  ;;  %v1168_v12 = vunpack.c.l.bf16 %v1284_v8  ;;  %v1169_v13 = vunpack.c.h.bf16 %v1284_v8  ;;  %v1287_v56 = vld [vmem:[%s1367_s18 + $0x30] sm:$0xff]   ;;  %v1288_v57 = vld [vmem:[%s1367_s18 + $0x38] sm:$0xff]  }
  0x11   : > { %v309_v14 = vmul.f32 %v1156_v4, %v1372_v0  ;;  %v310_v15 = vmul.f32 %v1157_v5, %v1372_v0  ;;  %v311_v16 = vmul.f32 %v1160_v6, %v1372_v0  ;;  %v312_v17 = vmul.f32 %v1161_v7, %v1372_v0 }
  0x12   : > { %v313_v18 = vmul.f32 %v1164_v10, %v1372_v0  ;;  %v314_v19 = vmul.f32 %v1165_v11, %v1372_v0  ;;  %v315_v20 = vmul.f32 %v1168_v12, %v1372_v0  ;;  %v316_v21 = vmul.f32 %v1169_v13, %v1372_v0 }
  0x13   : > { %v380_v22 = vadd.f32 %v1381_v9, %v309_v14  ;;  %v381_v23 = vadd.f32 %v1381_v9, %v310_v15  ;;  %v382_v24 = vadd.f32 %v1381_v9, %v311_v16  ;;  %v383_v25 = vadd.f32 %v1381_v9, %v312_v17 }
  0x14   : > { %v384_v26 = vadd.f32 %v1381_v9, %v313_v18  ;;  %v385_v27 = vadd.f32 %v1381_v9, %v314_v19  ;;  %v386_v28 = vadd.f32 %v1381_v9, %v315_v20  ;;  %v387_v29 = vadd.f32 %v1381_v9, %v316_v21 }
  0x15   : > { %vm444_vm1 = vcmp.ge.f32.partialorder %v380_v22, 0.0  ;;  %v508_v30 = vmul.f32 0.1, %v380_v22  ;;  %vm445_vm2 = vcmp.ge.f32.partialorder %v381_v23, 0.0  ;;  %v509_v31 = vmul.f32 0.1, %v381_v23 }
  0x16   : > { %vm446_vm3 = vcmp.ge.f32.partialorder %v382_v24, 0.0  ;;  %v510_v32 = vmul.f32 0.1, %v382_v24  ;;  %vm447_vm4 = vcmp.ge.f32.partialorder %v383_v25, 0.0  ;;  %v511_v33 = vmul.f32 0.1, %v383_v25 }
  0x17   : > { %v572_v34 = vsel %vm444_vm1, %v380_v22, %v508_v30  ;;  %v573_v35 = vsel %vm445_vm2, %v381_v23, %v509_v31  ;;  %vm448_vm5 = vcmp.ge.f32.partialorder %v384_v26, 0.0  ;;  %v512_v36 = vmul.f32 0.1, %v384_v26 }
  0x18   : > { %v1090_v37 = vpack.c.bf16 %v572_v34, %v572_v34  ;;  %v1091_v38 = vpack.c.bf16 %v573_v35, %v573_v35  ;;  %v574_v39 = vsel %vm446_vm3, %v382_v24, %v510_v32  ;;  %v575_v40 = vsel %vm447_vm4, %v383_v25, %v511_v33  ;;  %v1289_v24 = vld [vmem:[%s1367_s18 + $0x40] sm:$0xff]  }
  0x19   : > { %v1092_v42 = vpack.c.bf16 %v574_v39, %v574_v39  ;;  %v1093_v43 = vpack.c.bf16 %v575_v40, %v575_v40  ;;  %v576_v44 = vsel %vm448_vm5, %v384_v26, %v512_v36  ;;  %vm449_vm6 = vcmp.ge.f32.partialorder %v385_v27, 0.0 }
  0x1a   : > { %893 = vst.msk [vmem:[%s1404_s25] sm:$0xf] %vm892_vm0, %v1090_v37  ;;  %894 = vst.msk [vmem:[%s1404_s25 + $0x4] sm:$0xf] %vm892_vm0, %v1091_v38  ;;  %v1094_v46 = vpack.c.bf16 %v576_v44, %v576_v44  ;;  %v513_v47 = vmul.f32 0.1, %v385_v27  ;;  %v1172_v50 = vunpack.c.l.bf16 %v1285_v41  ;;  %v1173_v51 = vunpack.c.h.bf16 %v1285_v41 }
  0x1b   : > { %vm450_vm7 = vcmp.ge.f32.partialorder %v386_v28, 0.0  ;;  %v514_v48 = vmul.f32 0.1, %v386_v28  ;;  %895 = vst.msk [vmem:[%s1404_s25 + $0x8] sm:$0xf] %vm892_vm0, %v1092_v42  ;;  %vm451_vm8 = vcmp.ge.f32.partialorder %v387_v29, 0.0  ;;  %v1176_v54 = vunpack.c.l.bf16 %v1286_v45 }
  0x1c   : > { %896 = vst.msk [vmem:[%s1404_s25 + $0xc] sm:$0xf] %vm892_vm0, %v1093_v43  ;;  %v515_v49 = vmul.f32 0.1, %v387_v29  ;;  %897 = vst.msk [vmem:[%s1404_s25 + $0x10] sm:$0xf] %vm892_vm0, %v1094_v46  ;;  %v577_v52 = vsel %vm449_vm6, %v385_v27, %v513_v47  ;;  %v1177_v55 = vunpack.c.h.bf16 %v1286_v45  ;;  %v317_v61 = vmul.f32 %v1172_v50, %v1372_v0 }
  0x1d   : > { %v578_v53 = vsel %vm450_vm7, %v386_v28, %v514_v48  ;;  %v1095_v58 = vpack.c.bf16 %v577_v52, %v577_v52  ;;  %v318_v63 = vmul.f32 %v1173_v51, %v1372_v0  ;;  %v319_v1 = vmul.f32 %v1176_v54, %v1372_v0  ;;  %v1290_v28 = vld [vmem:[%s1367_s18 + $0x48] sm:$0xff]   ;;  %v1291_v48 = vld [vmem:[%s1367_s18 + $0x50] sm:$0xff]  }
  0x1e   : > { %v1096_v59 = vpack.c.bf16 %v578_v53, %v578_v53  ;;  %v579_v60 = vsel %vm451_vm8, %v387_v29, %v515_v49  ;;  %v320_v2 = vmul.f32 %v1177_v55, %v1372_v0  ;;  %v388_v3 = vadd.f32 %v1381_v9, %v317_v61 }
  0x1f   : > { %v1097_v62 = vpack.c.bf16 %v579_v60, %v579_v60  ;;  %898 = vst.msk [vmem:[%s1404_s25 + $0x14] sm:$0xf] %vm892_vm0, %v1095_v58  ;;  %v1180_v4 = vunpack.c.l.bf16 %v1287_v56  ;;  %v1181_v5 = vunpack.c.h.bf16 %v1287_v56  ;;  %v1184_v6 = vunpack.c.l.bf16 %v1288_v57 }
  0x20   : > { %899 = vst.msk [vmem:[%s1404_s25 + $0x18] sm:$0xf] %vm892_vm0, %v1096_v59  ;;  %v389_v7 = vadd.f32 %v1381_v9, %v318_v63  ;;  %v390_v8 = vadd.f32 %v1381_v9, %v319_v1  ;;  %v391_v10 = vadd.f32 %v1381_v9, %v320_v2  ;;  %v1185_v11 = vunpack.c.h.bf16 %v1288_v57 }
  0x21   : > { %900 = vst.msk [vmem:[%s1404_s25 + $0x1c] sm:$0xf] %vm892_vm0, %v1097_v62  ;;  %vm452_vm9 = vcmp.ge.f32.partialorder %v388_v3, 0.0  ;;  %v516_v12 = vmul.f32 0.1, %v388_v3  ;;  %v321_v13 = vmul.f32 %v1180_v4, %v1372_v0  ;;  %v322_v14 = vmul.f32 %v1181_v5, %v1372_v0  ;;  %v1292_v4 = vld [vmem:[%s1367_s18 + $0x58] sm:$0xff]  }
  0x22   : > { %vm453_vm10 = vcmp.ge.f32.partialorder %v389_v7, 0.0  ;;  %v517_v15 = vmul.f32 0.1, %v389_v7  ;;  %vm454_vm11 = vcmp.ge.f32.partialorder %v390_v8, 0.0  ;;  %v518_v16 = vmul.f32 0.1, %v390_v8 }
  0x23   : > { %v580_v17 = vsel %vm452_vm9, %v388_v3, %v516_v12  ;;  %vm455_vm12 = vcmp.ge.f32.partialorder %v391_v10, 0.0  ;;  %v519_v18 = vmul.f32 0.1, %v391_v10  ;;  %v392_v19 = vadd.f32 %v1381_v9, %v321_v13 }
  0x24   : > { %v1098_v20 = vpack.c.bf16 %v580_v17, %v580_v17  ;;  %v581_v21 = vsel %vm453_vm10, %v389_v7, %v517_v15  ;;  %v582_v22 = vsel %vm454_vm11, %v390_v8, %v518_v16  ;;  %v393_v23 = vadd.f32 %v1381_v9, %v322_v14 }
  0x25   : > { %v1099_v25 = vpack.c.bf16 %v581_v21, %v581_v21  ;;  %v1100_v26 = vpack.c.bf16 %v582_v22, %v582_v22  ;;  %v583_v27 = vsel %vm455_vm12, %v391_v10, %v519_v18  ;;  %vm456_vm13 = vcmp.ge.f32.partialorder %v392_v19, 0.0  ;;  %v1293_v10 = vld [vmem:[%s1367_s18 + $0x60] sm:$0xff]  }
  0x26   : > { %901 = vst.msk [vmem:[%s1404_s25 + $0x20] sm:$0xf] %vm892_vm0, %v1098_v20  ;;  %v1101_v29 = vpack.c.bf16 %v583_v27, %v583_v27  ;;  %v520_v30 = vmul.f32 0.1, %v392_v19  ;;  %vm457_vm14 = vcmp.ge.f32.partialorder %v393_v23, 0.0  ;;  %v323_v32 = vmul.f32 %v1184_v6, %v1372_v0 }
  0x27   : > { %v521_v31 = vmul.f32 0.1, %v393_v23  ;;  %902 = vst.msk [vmem:[%s1404_s25 + $0x24] sm:$0xf] %vm892_vm0, %v1099_v25  ;;  %903 = vst.msk [vmem:[%s1404_s25 + $0x28] sm:$0xf] %vm892_vm0, %v1100_v26  ;;  %v324_v33 = vmul.f32 %v1185_v11, %v1372_v0  ;;  %v1188_v34 = vunpack.c.l.bf16 %v1289_v24  ;;  %v1189_v35 = vunpack.c.h.bf16 %v1289_v24 }
  0x28   : > { %904 = vst.msk [vmem:[%s1404_s25 + $0x2c] sm:$0xf] %vm892_vm0, %v1101_v29  ;;  %v584_v36 = vsel %vm456_vm13, %v392_v19, %v520_v30  ;;  %v1192_v38 = vunpack.c.l.bf16 %v1290_v28  ;;  %v1193_v39 = vunpack.c.h.bf16 %v1290_v28  ;;  %v394_v42 = vadd.f32 %v1381_v9, %v323_v32  ;;  %v1294_v19 = vld [vmem:[%s1367_s18 + $0x68] sm:$0xff]  }
  0x29   : > { %v585_v37 = vsel %vm457_vm14, %v393_v23, %v521_v31  ;;  %v1102_v40 = vpack.c.bf16 %v584_v36, %v584_v36  ;;  %v395_v43 = vadd.f32 %v1381_v9, %v324_v33  ;;  %v325_v44 = vmul.f32 %v1188_v34, %v1372_v0 }
  0x2a   : > { %v1103_v41 = vpack.c.bf16 %v585_v37, %v585_v37  ;;  %v326_v45 = vmul.f32 %v1189_v35, %v1372_v0  ;;  %v327_v46 = vmul.f32 %v1192_v38, %v1372_v0  ;;  %v328_v47 = vmul.f32 %v1193_v39, %v1372_v0 }
  0x2b   : > { %905 = vst.msk [vmem:[%s1404_s25 + $0x30] sm:$0xf] %vm892_vm0, %v1102_v40  ;;  %vm458_vm15 = vcmp.ge.f32.partialorder %v394_v42, 0.0  ;;  %v522_v49 = vmul.f32 0.1, %v394_v42  ;;  %vm459_vm1 = vcmp.ge.f32.partialorder %v395_v43, 0.0  ;;  %v396_v51 = vadd.f32 %v1381_v9, %v325_v44 }
  0x2c   : > { %906 = vst.msk [vmem:[%s1404_s25 + $0x34] sm:$0xf] %vm892_vm0, %v1103_v41  ;;  %v523_v50 = vmul.f32 0.1, %v395_v43  ;;  %v397_v52 = vadd.f32 %v1381_v9, %v326_v45  ;;  %v398_v53 = vadd.f32 %v1381_v9, %v327_v46  ;;  %v399_v54 = vadd.f32 %v1381_v9, %v328_v47  ;;  %v1295_v46 = vld [vmem:[%s1367_s18 + $0x70] sm:$0xff]   ;;  %v1296_v47 = vld [vmem:[%s1367_s18 + $0x78] sm:$0xff]  }
  0x2d   : > { %v586_v55 = vsel %vm458_vm15, %v394_v42, %v522_v49  ;;  %v1196_v57 = vunpack.c.l.bf16 %v1291_v48  ;;  %v1197_v58 = vunpack.c.h.bf16 %v1291_v48  ;;  %vm460_vm2 = vcmp.ge.f32.partialorder %v396_v51, 0.0 }
  0x2e   : > { %v587_v56 = vsel %vm459_vm1, %v395_v43, %v523_v50  ;;  %v1104_v59 = vpack.c.bf16 %v586_v55, %v586_v55  ;;  %v524_v61 = vmul.f32 0.1, %v396_v51  ;;  %vm461_vm3 = vcmp.ge.f32.partialorder %v397_v52, 0.0 }
  0x2f   : > { %v1105_v60 = vpack.c.bf16 %v587_v56, %v587_v56  ;;  %v525_v62 = vmul.f32 0.1, %v397_v52  ;;  %vm462_vm4 = vcmp.ge.f32.partialorder %v398_v53, 0.0  ;;  %v526_v63 = vmul.f32 0.1, %v398_v53 }
  0x30   : > { %907 = vst.msk [vmem:[%s1404_s25 + $0x38] sm:$0xf] %vm892_vm0, %v1104_v59  ;;  %v588_v1 = vsel %vm460_vm2, %v396_v51, %v524_v61  ;;  %vm463_vm5 = vcmp.ge.f32.partialorder %v399_v54, 0.0  ;;  %v527_v2 = vmul.f32 0.1, %v399_v54  ;;  %v329_v3 = vmul.f32 %v1196_v57, %v1372_v0 }
  0x31   : > { %908 = vst.msk [vmem:[%s1404_s25 + $0x3c] sm:$0xf] %vm892_vm0, %v1105_v60  ;;  %v1106_v5 = vpack.c.bf16 %v588_v1, %v588_v1  ;;  %v589_v6 = vsel %vm461_vm3, %v397_v52, %v525_v62  ;;  %v590_v7 = vsel %vm462_vm4, %v398_v53, %v526_v63  ;;  %v330_v8 = vmul.f32 %v1197_v58, %v1372_v0  ;;  %v1297_v52 = vld [vmem:[%s1367_s18 + $0x80] sm:$0xff]  }
  0x32   : > { %v1107_v11 = vpack.c.bf16 %v589_v6, %v589_v6  ;;  %v1108_v12 = vpack.c.bf16 %v590_v7, %v590_v7  ;;  %v591_v13 = vsel %vm463_vm5, %v399_v54, %v527_v2  ;;  %v400_v14 = vadd.f32 %v1381_v9, %v329_v3 }
  0x33   : > { %909 = vst.msk [vmem:[%s1404_s25 + $0x40] sm:$0xf] %vm892_vm0, %v1106_v5  ;;  %v1109_v15 = vpack.c.bf16 %v591_v13, %v591_v13  ;;  %v401_v16 = vadd.f32 %v1381_v9, %v330_v8  ;;  %v1200_v17 = vunpack.c.l.bf16 %v1292_v4  ;;  %v1201_v18 = vunpack.c.h.bf16 %v1292_v4 }
  0x34   : > { %910 = vst.msk [vmem:[%s1404_s25 + $0x44] sm:$0xf] %vm892_vm0, %v1107_v11  ;;  %911 = vst.msk [vmem:[%s1404_s25 + $0x48] sm:$0xf] %vm892_vm0, %v1108_v12  ;;  %vm464_vm6 = vcmp.ge.f32.partialorder %v400_v14, 0.0  ;;  %v1204_v21 = vunpack.c.l.bf16 %v1293_v10  ;;  %v1205_v22 = vunpack.c.h.bf16 %v1293_v10  ;;  %v1208_v29 = vunpack.c.l.bf16 %v1294_v19 }
  0x35   : > { %v528_v20 = vmul.f32 0.1, %v400_v14  ;;  %912 = vst.msk [vmem:[%s1404_s25 + $0x4c] sm:$0xf] %vm892_vm0, %v1109_v15  ;;  %vm465_vm7 = vcmp.ge.f32.partialorder %v401_v16, 0.0  ;;  %v331_v24 = vmul.f32 %v1200_v17, %v1372_v0  ;;  %v332_v25 = vmul.f32 %v1201_v18, %v1372_v0 }
  0x36   : > { %v529_v23 = vmul.f32 0.1, %v401_v16  ;;  %v333_v27 = vmul.f32 %v1204_v21, %v1372_v0  ;;  %v334_v28 = vmul.f32 %v1205_v22, %v1372_v0  ;;  %v335_v37 = vmul.f32 %v1208_v29, %v1372_v0  ;;  %v1299_v29 = vld [vmem:[%s1367_s18 + $0x90] sm:$0xff]  }
  0x37   : > { %v592_v26 = vsel %vm464_vm6, %v400_v14, %v528_v20  ;;  %v402_v32 = vadd.f32 %v1381_v9, %v331_v24  ;;  %v403_v33 = vadd.f32 %v1381_v9, %v332_v25  ;;  %v1209_v45 = vunpack.c.h.bf16 %v1294_v19  ;;  %v1298_v24 = vld [vmem:[%s1367_s18 + $0x88] sm:$0xff]  }
  0x38   : > { %v1110_v30 = vpack.c.bf16 %v592_v26, %v592_v26  ;;  %v593_v31 = vsel %vm465_vm7, %v401_v16, %v529_v23  ;;  %v404_v35 = vadd.f32 %v1381_v9, %v333_v27  ;;  %v405_v36 = vadd.f32 %v1381_v9, %v334_v28 }
  0x39   : > { %v1111_v34 = vpack.c.bf16 %v593_v31, %v593_v31  ;;  %vm466_vm8 = vcmp.ge.f32.partialorder %v402_v32, 0.0  ;;  %v530_v38 = vmul.f32 0.1, %v402_v32  ;;  %vm467_vm9 = vcmp.ge.f32.partialorder %v403_v33, 0.0 }
  0x3a   : > { %913 = vst.msk [vmem:[%s1404_s25 + $0x50] sm:$0xf] %vm892_vm0, %v1110_v30  ;;  %v531_v39 = vmul.f32 0.1, %v403_v33  ;;  %vm468_vm10 = vcmp.ge.f32.partialorder %v404_v35, 0.0  ;;  %vm469_vm11 = vcmp.ge.f32.partialorder %v405_v36, 0.0  ;;  %v406_v44 = vadd.f32 %v1381_v9, %v335_v37 }
  0x3b   : > { %914 = vst.msk [vmem:[%s1404_s25 + $0x54] sm:$0xf] %vm892_vm0, %v1111_v34  ;;  %v532_v40 = vmul.f32 0.1, %v404_v35  ;;  %v533_v41 = vmul.f32 0.1, %v405_v36  ;;  %v594_v42 = vsel %vm466_vm8, %v402_v32, %v530_v38  ;;  %v336_v56 = vmul.f32 %v1209_v45, %v1372_v0 }
  0x3c   : > { %v595_v43 = vsel %vm467_vm9, %v403_v33, %v531_v39  ;;  %v1112_v48 = vpack.c.bf16 %v594_v42, %v594_v42  ;;  %vm470_vm12 = vcmp.ge.f32.partialorder %v406_v44, 0.0  ;;  %v534_v55 = vmul.f32 0.1, %v406_v44  ;;  %v1300_v33 = vld [vmem:[%s1367_s18 + $0x98] sm:$0xff]   ;;  %v1301_v42 = vld [vmem:[%s1367_s18 + $0xa0] sm:$0xff]  }
  0x3d   : > { %v1113_v49 = vpack.c.bf16 %v595_v43, %v595_v43  ;;  %v596_v50 = vsel %vm468_vm10, %v404_v35, %v532_v40  ;;  %v597_v51 = vsel %vm469_vm11, %v405_v36, %v533_v41  ;;  %v1212_v57 = vunpack.c.l.bf16 %v1295_v46 }
  0x3e   : > { %v1114_v53 = vpack.c.bf16 %v596_v50, %v596_v50  ;;  %v1115_v54 = vpack.c.bf16 %v597_v51, %v597_v51  ;;  %915 = vst.msk [vmem:[%s1404_s25 + $0x58] sm:$0xf] %vm892_vm0, %v1112_v48  ;;  %v1213_v58 = vunpack.c.h.bf16 %v1295_v46  ;;  %v1216_v59 = vunpack.c.l.bf16 %v1296_v47 }
  0x3f   : > { %916 = vst.msk [vmem:[%s1404_s25 + $0x5c] sm:$0xf] %vm892_vm0, %v1113_v49  ;;  %v598_v60 = vsel %vm470_vm12, %v406_v44, %v534_v55  ;;  %v1217_v61 = vunpack.c.h.bf16 %v1296_v47  ;;  %v1220_v62 = vunpack.c.l.bf16 %v1297_v52  ;;  %v1221_v63 = vunpack.c.h.bf16 %v1297_v52 }
  0x40   : > { %917 = vst.msk [vmem:[%s1404_s25 + $0x60] sm:$0xf] %vm892_vm0, %v1114_v53  ;;  %918 = vst.msk [vmem:[%s1404_s25 + $0x64] sm:$0xf] %vm892_vm0, %v1115_v54  ;;  %v1116_v1 = vpack.c.bf16 %v598_v60, %v598_v60  ;;  %v407_v2 = vadd.f32 %v1381_v9, %v336_v56  ;;  %v337_v3 = vmul.f32 %v1212_v57, %v1372_v0  ;;  %v1224_v37 = vunpack.c.l.bf16 %v1298_v24 }
  0x41   : > { %v338_v4 = vmul.f32 %v1213_v58, %v1372_v0  ;;  %v339_v5 = vmul.f32 %v1216_v59, %v1372_v0  ;;  %v340_v6 = vmul.f32 %v1217_v61, %v1372_v0  ;;  %v341_v7 = vmul.f32 %v1220_v62, %v1372_v0 }
  0x42   : > { %v342_v8 = vmul.f32 %v1221_v63, %v1372_v0  ;;  %919 = vst.msk [vmem:[%s1404_s25 + $0x68] sm:$0xf] %vm892_vm0, %v1116_v1  ;;  %vm471_vm13 = vcmp.ge.f32.partialorder %v407_v2, 0.0  ;;  %v535_v10 = vmul.f32 0.1, %v407_v2  ;;  %v408_v11 = vadd.f32 %v1381_v9, %v337_v3 }
  0x43   : > { %v409_v12 = vadd.f32 %v1381_v9, %v338_v4  ;;  %v410_v13 = vadd.f32 %v1381_v9, %v339_v5  ;;  %v411_v14 = vadd.f32 %v1381_v9, %v340_v6  ;;  %v412_v15 = vadd.f32 %v1381_v9, %v341_v7  ;;  %v1302_v7 = vld [vmem:[%s1367_s18 + $0xa8] sm:$0xff]  }
  0x44   : > { %v413_v16 = vadd.f32 %v1381_v9, %v342_v8  ;;  %v599_v17 = vsel %vm471_vm13, %v407_v2, %v535_v10  ;;  %vm472_vm14 = vcmp.ge.f32.partialorder %v408_v11, 0.0  ;;  %v536_v18 = vmul.f32 0.1, %v408_v11 }
  0x45   : > { %vm473_vm15 = vcmp.ge.f32.partialorder %v409_v12, 0.0  ;;  %v1117_v19 = vpack.c.bf16 %v599_v17, %v599_v17  ;;  %v537_v20 = vmul.f32 0.1, %v409_v12  ;;  %vm474_vm1 = vcmp.ge.f32.partialorder %v410_v13, 0.0 }
  0x46   : > { %v538_v21 = vmul.f32 0.1, %v410_v13  ;;  %v600_v22 = vsel %vm472_vm14, %v408_v11, %v536_v18  ;;  %vm475_vm2 = vcmp.ge.f32.partialorder %v411_v14, 0.0  ;;  %v539_v23 = vmul.f32 0.1, %v411_v14 }
  0x47   : > { %vm476_vm3 = vcmp.ge.f32.partialorder %v412_v15, 0.0  ;;  %920 = vst.msk [vmem:[%s1404_s25 + $0x6c] sm:$0xf] %vm892_vm0, %v1117_v19  ;;  %v1118_v25 = vpack.c.bf16 %v600_v22, %v600_v22  ;;  %v601_v26 = vsel %vm473_vm15, %v409_v12, %v537_v20  ;;  %v540_v28 = vmul.f32 0.1, %v412_v15  ;;  %v1303_v12 = vld [vmem:[%s1367_s18 + $0xb0] sm:$0xff]  }
  0x48   : > { %v602_v27 = vsel %vm474_vm1, %v410_v13, %v538_v21  ;;  %v1119_v30 = vpack.c.bf16 %v601_v26, %v601_v26  ;;  %v603_v32 = vsel %vm475_vm2, %v411_v14, %v539_v23  ;;  %vm477_vm4 = vcmp.ge.f32.partialorder %v413_v16, 0.0 }
  0x49   : > { %v1120_v31 = vpack.c.bf16 %v602_v27, %v602_v27  ;;  %921 = vst.msk [vmem:[%s1404_s25 + $0x70] sm:$0xf] %vm892_vm0, %v1118_v25  ;;  %v1121_v34 = vpack.c.bf16 %v603_v32, %v603_v32  ;;  %v604_v35 = vsel %vm476_vm3, %v412_v15, %v540_v28  ;;  %v541_v36 = vmul.f32 0.1, %v413_v16 }
  0x4a   : > { %922 = vst.msk [vmem:[%s1404_s25 + $0x74] sm:$0xf] %vm892_vm0, %v1119_v30  ;;  %v1122_v38 = vpack.c.bf16 %v604_v35, %v604_v35  ;;  %v1225_v39 = vunpack.c.h.bf16 %v1298_v24  ;;  %v1228_v40 = vunpack.c.l.bf16 %v1299_v29  ;;  %v1229_v41 = vunpack.c.h.bf16 %v1299_v29  ;;  %v1304_v29 = vld [vmem:[%s1367_s18 + $0xb8] sm:$0xff]  }
  0x4b   : > { %923 = vst.msk [vmem:[%s1404_s25 + $0x78] sm:$0xf] %vm892_vm0, %v1120_v31  ;;  %924 = vst.msk [vmem:[%s1404_s25 + $0x7c] sm:$0xf] %vm892_vm0, %v1121_v34  ;;  %v605_v43 = vsel %vm477_vm4, %v413_v16, %v541_v36  ;;  %v343_v44 = vmul.f32 %v1224_v37, %v1372_v0  ;;  %v1232_v45 = vunpack.c.l.bf16 %v1300_v33  ;;  %v1233_v46 = vunpack.c.h.bf16 %v1300_v33 }
  0x4c   : > { %925 = vst.msk [vmem:[%s1404_s25 + $0x80] sm:$0xf] %vm892_vm0, %v1122_v38  ;;  %v1123_v47 = vpack.c.bf16 %v605_v43, %v605_v43  ;;  %v344_v48 = vmul.f32 %v1225_v39, %v1372_v0  ;;  %v345_v49 = vmul.f32 %v1228_v40, %v1372_v0  ;;  %v346_v50 = vmul.f32 %v1229_v41, %v1372_v0 }
  0x4d   : > { %v414_v51 = vadd.f32 %v1381_v9, %v343_v44  ;;  %v347_v52 = vmul.f32 %v1232_v45, %v1372_v0  ;;  %v348_v53 = vmul.f32 %v1233_v46, %v1372_v0  ;;  %v1236_v54 = vunpack.c.l.bf16 %v1301_v42  ;;  %v1305_v45 = vld [vmem:[%s1367_s18 + $0xc0] sm:$0xff]  }
  0x4e   : > { %926 = vst.msk [vmem:[%s1404_s25 + $0x84] sm:$0xf] %vm892_vm0, %v1123_v47  ;;  %v415_v55 = vadd.f32 %v1381_v9, %v344_v48  ;;  %v416_v56 = vadd.f32 %v1381_v9, %v345_v49  ;;  %v417_v57 = vadd.f32 %v1381_v9, %v346_v50  ;;  %v1237_v58 = vunpack.c.h.bf16 %v1301_v42 }
  0x4f   : > { %vm478_vm5 = vcmp.ge.f32.partialorder %v414_v51, 0.0  ;;  %v542_v59 = vmul.f32 0.1, %v414_v51  ;;  %v418_v60 = vadd.f32 %v1381_v9, %v347_v52  ;;  %v419_v61 = vadd.f32 %v1381_v9, %v348_v53  ;;  %v1306_v53 = vld [vmem:[%s1367_s18 + $0xc8] sm:$0xff]  }
  0x50   : > { %vm479_vm6 = vcmp.ge.f32.partialorder %v415_v55, 0.0  ;;  %v543_v62 = vmul.f32 0.1, %v415_v55  ;;  %vm480_vm7 = vcmp.ge.f32.partialorder %v416_v56, 0.0  ;;  %v544_v63 = vmul.f32 0.1, %v416_v56 }
  0x51   : > { %v606_v1 = vsel %vm478_vm5, %v414_v51, %v542_v59  ;;  %vm481_vm8 = vcmp.ge.f32.partialorder %v417_v57, 0.0  ;;  %v545_v2 = vmul.f32 0.1, %v417_v57  ;;  %vm482_vm9 = vcmp.ge.f32.partialorder %v418_v60, 0.0 }
  0x52   : > { %v1124_v3 = vpack.c.bf16 %v606_v1, %v606_v1  ;;  %v607_v4 = vsel %vm479_vm6, %v415_v55, %v543_v62  ;;  %v608_v5 = vsel %vm480_vm7, %v416_v56, %v544_v63  ;;  %v546_v6 = vmul.f32 0.1, %v418_v60 }
  0x53   : > { %v1125_v8 = vpack.c.bf16 %v607_v4, %v607_v4  ;;  %v1126_v10 = vpack.c.bf16 %v608_v5, %v608_v5  ;;  %v609_v11 = vsel %vm481_vm8, %v417_v57, %v545_v2  ;;  %vm483_vm10 = vcmp.ge.f32.partialorder %v419_v61, 0.0 }
  0x54   : > { %927 = vst.msk [vmem:[%s1404_s25 + $0x88] sm:$0xf] %vm892_vm0, %v1124_v3  ;;  %v1127_v13 = vpack.c.bf16 %v609_v11, %v609_v11  ;;  %v610_v14 = vsel %vm482_vm9, %v418_v60, %v546_v6  ;;  %v547_v15 = vmul.f32 0.1, %v419_v61  ;;  %v349_v16 = vmul.f32 %v1236_v54, %v1372_v0 }
  0x55   : > { %928 = vst.msk [vmem:[%s1404_s25 + $0x8c] sm:$0xf] %vm892_vm0, %v1125_v8  ;;  %929 = vst.msk [vmem:[%s1404_s25 + $0x90] sm:$0xf] %vm892_vm0, %v1126_v10  ;;  %v1128_v17 = vpack.c.bf16 %v610_v14, %v610_v14  ;;  %v350_v18 = vmul.f32 %v1237_v58, %v1372_v0  ;;  %v1240_v19 = vunpack.c.l.bf16 %v1302_v7  ;;  %v1241_v20 = vunpack.c.h.bf16 %v1302_v7  ;;  %v1590_v58 = vld [vmem:[%s1367_s18 + $0xd0] sm:$0xff]  }
  0x56   : > { %930 = vst.msk [vmem:[%s1404_s25 + $0x94] sm:$0xf] %vm892_vm0, %v1127_v13  ;;  %v611_v21 = vsel %vm483_vm10, %v419_v61, %v547_v15  ;;  %v420_v22 = vadd.f32 %v1381_v9, %v349_v16  ;;  %v1244_v23 = vunpack.c.l.bf16 %v1303_v12  ;;  %v1245_v24 = vunpack.c.h.bf16 %v1303_v12 }
  0x57   : > { %931 = vst.msk [vmem:[%s1404_s25 + $0x98] sm:$0xf] %vm892_vm0, %v1128_v17  ;;  %v1129_v25 = vpack.c.bf16 %v611_v21, %v611_v21  ;;  %v421_v26 = vadd.f32 %v1381_v9, %v350_v18  ;;  %v351_v27 = vmul.f32 %v1240_v19, %v1372_v0  ;;  %v352_v28 = vmul.f32 %v1241_v20, %v1372_v0 }
  0x58   : > { %vm484_vm11 = vcmp.ge.f32.partialorder %v420_v22, 0.0  ;;  %v548_v30 = vmul.f32 0.1, %v420_v22  ;;  %v353_v31 = vmul.f32 %v1244_v23, %v1372_v0  ;;  %v354_v32 = vmul.f32 %v1245_v24, %v1372_v0 }
  0x59   : > { %932 = vst.msk [vmem:[%s1404_s25 + $0x9c] sm:$0xf] %vm892_vm0, %v1129_v25  ;;  %vm485_vm12 = vcmp.ge.f32.partialorder %v421_v26, 0.0  ;;  %v549_v33 = vmul.f32 0.1, %v421_v26  ;;  %v422_v34 = vadd.f32 %v1381_v9, %v351_v27  ;;  %v423_v35 = vadd.f32 %v1381_v9, %v352_v28  ;;  %v1308_v25 = vld [vmem:[%s1367_s18 + $0xd8] sm:$0xff]  }
  0x5a   : > { %v612_v36 = vsel %vm484_vm11, %v420_v22, %v548_v30  ;;  %v424_v37 = vadd.f32 %v1381_v9, %v353_v31  ;;  %v425_v38 = vadd.f32 %v1381_v9, %v354_v32  ;;  %v1248_v39 = vunpack.c.l.bf16 %v1304_v29 }
  0x5b   : > { %v1130_v40 = vpack.c.bf16 %v612_v36, %v612_v36  ;;  %v613_v41 = vsel %vm485_vm12, %v421_v26, %v549_v33  ;;  %vm486_vm13 = vcmp.ge.f32.partialorder %v422_v34, 0.0  ;;  %v550_v42 = vmul.f32 0.1, %v422_v34  ;;  %v1310_v36 = vld [vmem:[%s1367_s18 + $0xe8] sm:$0xff]  }
  0x5c   : > { %v1131_v43 = vpack.c.bf16 %v613_v41, %v613_v41  ;;  %vm487_vm14 = vcmp.ge.f32.partialorder %v423_v35, 0.0  ;;  %v551_v44 = vmul.f32 0.1, %v423_v35  ;;  %vm488_vm15 = vcmp.ge.f32.partialorder %v424_v37, 0.0  ;;  %v1311_v41 = vld [vmem:[%s1367_s18 + $0xf0] sm:$0xff]  }
  0x5d   : > { %933 = vst.msk [vmem:[%s1404_s25 + $0xa0] sm:$0xf] %vm892_vm0, %v1130_v40  ;;  %v614_v46 = vsel %vm486_vm13, %v422_v34, %v550_v42  ;;  %v552_v47 = vmul.f32 0.1, %v424_v37  ;;  %vm489_vm1 = vcmp.ge.f32.partialorder %v425_v38, 0.0  ;;  %v355_v51 = vmul.f32 %v1248_v39, %v1372_v0 }
  0x5e   : > { %v553_v48 = vmul.f32 0.1, %v425_v38  ;;  %934 = vst.msk [vmem:[%s1404_s25 + $0xa4] sm:$0xf] %vm892_vm0, %v1131_v43  ;;  %v1132_v49 = vpack.c.bf16 %v614_v46, %v614_v46  ;;  %v615_v50 = vsel %vm487_vm14, %v423_v35, %v551_v44  ;;  %v1249_v52 = vunpack.c.h.bf16 %v1304_v29  ;;  %v1309_v35 = vld [vmem:[%s1367_s18 + $0xe0] sm:$0xff]  }
  0x5f   : > { %v1133_v54 = vpack.c.bf16 %v615_v50, %v615_v50  ;;  %v616_v55 = vsel %vm488_vm15, %v424_v37, %v552_v47  ;;  %v1252_v57 = vunpack.c.l.bf16 %v1305_v45  ;;  %v426_v61 = vadd.f32 %v1381_v9, %v355_v51 }
  0x60   : > { %v617_v56 = vsel %vm489_vm1, %v425_v38, %v553_v48  ;;  %935 = vst.msk [vmem:[%s1404_s25 + $0xa8] sm:$0xf] %vm892_vm0, %v1132_v49  ;;  %v1134_v59 = vpack.c.bf16 %v616_v55, %v616_v55  ;;  %v356_v62 = vmul.f32 %v1249_v52, %v1372_v0  ;;  %v1253_v1 = vunpack.c.h.bf16 %v1305_v45 }
  0x61   : > { %v1135_v60 = vpack.c.bf16 %v617_v56, %v617_v56  ;;  %936 = vst.msk [vmem:[%s1404_s25 + $0xac] sm:$0xf] %vm892_vm0, %v1133_v54  ;;  %v357_v63 = vmul.f32 %v1252_v57, %v1372_v0  ;;  %v1256_v2 = vunpack.c.l.bf16 %v1306_v53  ;;  %v1257_v3 = vunpack.c.h.bf16 %v1306_v53 }
  0x62   : > { %937 = vst.msk [vmem:[%s1404_s25 + $0xb0] sm:$0xf] %vm892_vm0, %v1134_v59  ;;  %vm490_vm2 = vcmp.ge.f32.partialorder %v426_v61, 0.0  ;;  %v554_v4 = vmul.f32 0.1, %v426_v61  ;;  %v427_v5 = vadd.f32 %v1381_v9, %v356_v62  ;;  %v1260_v6 = vunpack.c.l.bf16 %v1590_v58 }
  0x63   : > { %938 = vst.msk [vmem:[%s1404_s25 + $0xb4] sm:$0xf] %vm892_vm0, %v1135_v60  ;;  %v428_v7 = vadd.f32 %v1381_v9, %v357_v63  ;;  %v358_v8 = vmul.f32 %v1253_v1, %v1372_v0  ;;  %v359_v10 = vmul.f32 %v1256_v2, %v1372_v0  ;;  %v360_v11 = vmul.f32 %v1257_v3, %v1372_v0 }
  0x64   : > { %v618_v12 = vsel %vm490_vm2, %v426_v61, %v554_v4  ;;  %vm491_vm3 = vcmp.ge.f32.partialorder %v427_v5, 0.0  ;;  %v555_v13 = vmul.f32 0.1, %v427_v5  ;;  %v361_v14 = vmul.f32 %v1260_v6, %v1372_v0 }
  0x65   : > { %v1136_v15 = vpack.c.bf16 %v618_v12, %v618_v12  ;;  %vm492_vm4 = vcmp.ge.f32.partialorder %v428_v7, 0.0  ;;  %v556_v16 = vmul.f32 0.1, %v428_v7  ;;  %v429_v17 = vadd.f32 %v1381_v9, %v358_v8 }
  0x66   : > { %v619_v18 = vsel %vm491_vm3, %v427_v5, %v555_v13  ;;  %v430_v19 = vadd.f32 %v1381_v9, %v359_v10  ;;  %v431_v20 = vadd.f32 %v1381_v9, %v360_v11  ;;  %v432_v21 = vadd.f32 %v1381_v9, %v361_v14 }
  0x67   : > { %939 = vst.msk [vmem:[%s1404_s25 + $0xb8] sm:$0xf] %vm892_vm0, %v1136_v15  ;;  %v1137_v22 = vpack.c.bf16 %v619_v18, %v619_v18  ;;  %v620_v23 = vsel %vm492_vm4, %v428_v7, %v556_v16  ;;  %vm493_vm5 = vcmp.ge.f32.partialorder %v429_v17, 0.0  ;;  %v557_v24 = vmul.f32 0.1, %v429_v17  ;;  %v1312_v7 = vld [vmem:[%s1367_s18 + $0xf8] sm:$0xff]  }
  0x68   : > { %v1138_v26 = vpack.c.bf16 %v620_v23, %v620_v23  ;;  %vm494_vm6 = vcmp.ge.f32.partialorder %v430_v19, 0.0  ;;  %v558_v27 = vmul.f32 0.1, %v430_v19  ;;  %vm495_vm7 = vcmp.ge.f32.partialorder %v431_v20, 0.0 }
  0x69   : > { %940 = vst.msk [vmem:[%s1404_s25 + $0xbc] sm:$0xf] %vm892_vm0, %v1137_v22  ;;  %v621_v28 = vsel %vm493_vm5, %v429_v17, %v557_v24  ;;  %v559_v29 = vmul.f32 0.1, %v431_v20  ;;  %vm496_vm8 = vcmp.ge.f32.partialorder %v432_v21, 0.0  ;;  %v1261_v33 = vunpack.c.h.bf16 %v1590_v58 }
  0x6a   : > { %v560_v30 = vmul.f32 0.1, %v432_v21  ;;  %941 = vst.msk [vmem:[%s1404_s25 + $0xc0] sm:$0xf] %vm892_vm0, %v1138_v26  ;;  %v1139_v31 = vpack.c.bf16 %v621_v28, %v621_v28  ;;  %v622_v32 = vsel %vm494_vm6, %v430_v19, %v558_v27  ;;  %v1264_v34 = vunpack.c.l.bf16 %v1308_v25 }
  0x6b   : > { %v1140_v37 = vpack.c.bf16 %v622_v32, %v622_v32  ;;  %v623_v38 = vsel %vm495_vm7, %v431_v20, %v559_v29  ;;  %v1265_v40 = vunpack.c.h.bf16 %v1308_v25  ;;  %v362_v44 = vmul.f32 %v1261_v33, %v1372_v0 }
  0x6c   : > { %v624_v39 = vsel %vm496_vm8, %v432_v21, %v560_v30  ;;  %942 = vst.msk [vmem:[%s1404_s25 + $0xc4] sm:$0xf] %vm892_vm0, %v1139_v31  ;;  %v1141_v42 = vpack.c.bf16 %v623_v38, %v623_v38  ;;  %v363_v45 = vmul.f32 %v1264_v34, %v1372_v0  ;;  %v1268_v47 = vunpack.c.l.bf16 %v1309_v35 }
  0x6d   : > { %v1142_v43 = vpack.c.bf16 %v624_v39, %v624_v39  ;;  %943 = vst.msk [vmem:[%s1404_s25 + $0xc8] sm:$0xf] %vm892_vm0, %v1140_v37  ;;  %v364_v46 = vmul.f32 %v1265_v40, %v1372_v0  ;;  %v1269_v48 = vunpack.c.h.bf16 %v1309_v35  ;;  %v1272_v49 = vunpack.c.l.bf16 %v1310_v36 }
  0x6e   : > { %944 = vst.msk [vmem:[%s1404_s25 + $0xcc] sm:$0xf] %vm892_vm0, %v1141_v42  ;;  %v433_v50 = vadd.f32 %v1381_v9, %v362_v44  ;;  %v434_v51 = vadd.f32 %v1381_v9, %v363_v45  ;;  %v1273_v52 = vunpack.c.h.bf16 %v1310_v36  ;;  %v1276_v53 = vunpack.c.l.bf16 %v1311_v41 }
  0x6f   : > { %945 = vst.msk [vmem:[%s1404_s25 + $0xd0] sm:$0xf] %vm892_vm0, %v1142_v43  ;;  %v435_v54 = vadd.f32 %v1381_v9, %v364_v46  ;;  %v365_v55 = vmul.f32 %v1268_v47, %v1372_v0  ;;  %v366_v56 = vmul.f32 %v1269_v48, %v1372_v0  ;;  %v367_v57 = vmul.f32 %v1272_v49, %v1372_v0 }
  0x70   : > { %vm497_vm9 = vcmp.ge.f32.partialorder %v433_v50, 0.0  ;;  %v561_v58 = vmul.f32 0.1, %v433_v50  ;;  %vm498_vm10 = vcmp.ge.f32.partialorder %v434_v51, 0.0  ;;  %v562_v59 = vmul.f32 0.1, %v434_v51 }
  0x71   : > { %vm499_vm11 = vcmp.ge.f32.partialorder %v435_v54, 0.0  ;;  %v563_v60 = vmul.f32 0.1, %v435_v54  ;;  %v436_v61 = vadd.f32 %v1381_v9, %v365_v55  ;;  %v437_v62 = vadd.f32 %v1381_v9, %v366_v56 }
  0x72   : > { %v625_v63 = vsel %vm497_vm9, %v433_v50, %v561_v58  ;;  %v626_v1 = vsel %vm498_vm10, %v434_v51, %v562_v59  ;;  %v438_v2 = vadd.f32 %v1381_v9, %v367_v57  ;;  %v368_v3 = vmul.f32 %v1273_v52, %v1372_v0 }
  0x73   : > { %v1143_v4 = vpack.c.bf16 %v625_v63, %v625_v63  ;;  %v1144_v5 = vpack.c.bf16 %v626_v1, %v626_v1  ;;  %v627_v6 = vsel %vm499_vm11, %v435_v54, %v563_v60  ;;  %vm500_vm12 = vcmp.ge.f32.partialorder %v436_v61, 0.0 }
  0x74   : > { %v1145_v8 = vpack.c.bf16 %v627_v6, %v627_v6  ;;  %v564_v10 = vmul.f32 0.1, %v436_v61  ;;  %vm501_vm13 = vcmp.ge.f32.partialorder %v437_v62, 0.0  ;;  %v565_v11 = vmul.f32 0.1, %v437_v62 }
  0x75   : > { %946 = vst.msk [vmem:[%s1404_s25 + $0xd4] sm:$0xf] %vm892_vm0, %v1143_v4  ;;  %947 = vst.msk [vmem:[%s1404_s25 + $0xd8] sm:$0xf] %vm892_vm0, %v1144_v5  ;;  %vm502_vm14 = vcmp.ge.f32.partialorder %v438_v2, 0.0  ;;  %v439_v13 = vadd.f32 %v1381_v9, %v368_v3  ;;  %v369_v14 = vmul.f32 %v1276_v53, %v1372_v0  ;;  %v1277_v17 = vunpack.c.h.bf16 %v1311_v41 }
  0x76   : > { %v566_v12 = vmul.f32 0.1, %v438_v2  ;;  %948 = vst.msk [vmem:[%s1404_s25 + $0xdc] sm:$0xf] %vm892_vm0, %v1145_v8  ;;  %v628_v15 = vsel %vm500_vm12, %v436_v61, %v564_v10  ;;  %v629_v16 = vsel %vm501_vm13, %v437_v62, %v565_v11  ;;  %v1280_v18 = vunpack.c.l.bf16 %v1312_v7  ;;  %v1321_v0 = vld [vmem:[%s1682_s1] ss:$0 sm:$0xff] }
  0x77   : > { %v1146_v19 = vpack.c.bf16 %v628_v15, %v628_v15  ;;  %v1147_v20 = vpack.c.bf16 %v629_v16, %v629_v16  ;;  %vm503_vm15 = vcmp.ge.f32.partialorder %v439_v13, 0.0  ;;  %v567_v23 = vmul.f32 0.1, %v439_v13 }
  0x78   : > { %v630_v21 = vsel %vm502_vm14, %v438_v2, %v566_v12  ;;  %v440_v24 = vadd.f32 %v1381_v9, %v369_v14  ;;  %v370_v25 = vmul.f32 %v1321_v0, %v1277_v17  ;;  %v371_v26 = vmul.f32 %v1321_v0, %v1280_v18  ;;  %v1322_v9 = vld [vmem:[%s1683_s2] ss:$0 sm:$0xff] }
  0x79   : > { %v1148_v22 = vpack.c.bf16 %v630_v21, %v630_v21  ;;  %949 = vst.msk [vmem:[%s1404_s25 + $0xe0] sm:$0xf] %vm892_vm0, %v1146_v19  ;;  %950 = vst.msk [vmem:[%s1404_s25 + $0xe4] sm:$0xf] %vm892_vm0, %v1147_v20  ;;  %v1281_v27 = vunpack.c.h.bf16 %v1312_v7  ;;  %v631_v28 = vsel %vm503_vm15, %v439_v13, %v567_v23 }
  0x7a   : > { %vm504_vm1 = vcmp.ge.f32.partialorder %v440_v24, 0.0  ;;  %v568_v29 = vmul.f32 0.1, %v440_v24  ;;  %v441_v30 = vadd.f32 %v1322_v9, %v370_v25  ;;  %v1149_v31 = vpack.c.bf16 %v631_v28, %v631_v28 }
  0x7b   : > { %951 = vst.msk [vmem:[%s1404_s25 + $0xe8] sm:$0xf] %vm892_vm0, %v1148_v22  ;;  %v442_v32 = vadd.f32 %v1322_v9, %v371_v26  ;;  %v372_v33 = vmul.f32 %v1321_v0, %v1281_v27 }
  0x7c   : > { %v632_v34 = vsel %vm504_vm1, %v440_v24, %v568_v29  ;;  %vm505_vm2 = vcmp.ge.f32.partialorder %v441_v30, 0.0  ;;  %v569_v35 = vmul.f32 0.1, %v441_v30  ;;  %952 = vst.msk [vmem:[%s1404_s25 + $0xec] sm:$0xf] %vm892_vm0, %v1149_v31 }
  0x7d   : > { %v1150_v36 = vpack.c.bf16 %v632_v34, %v632_v34  ;;  %vm506_vm3 = vcmp.ge.f32.partialorder %v442_v32, 0.0  ;;  %v570_v37 = vmul.f32 0.1, %v442_v32  ;;  %v443_v38 = vadd.f32 %v1322_v9, %v372_v33 }
  0x7e   : > { %v633_v39 = vsel %vm505_vm2, %v441_v30, %v569_v35 }
  0x7f   : > { %953 = vst.msk [vmem:[%s1404_s25 + $0xf0] sm:$0xf] %vm892_vm0, %v1150_v36  ;;  %v1151_v40 = vpack.c.bf16 %v633_v39, %v633_v39  ;;  %v634_v41 = vsel %vm506_vm3, %v442_v32, %v570_v37  ;;  %vm507_vm4 = vcmp.ge.f32.partialorder %v443_v38, 0.0  ;;  %v571_v42 = vmul.f32 0.1, %v443_v38 }
  0x80   : > { %v1152_v43 = vpack.c.bf16 %v634_v41, %v634_v41 }
  0x81   : > { %954 = vst.msk [vmem:[%s1404_s25 + $0xf4] sm:$0xf] %vm892_vm0, %v1151_v40  ;;  %v635_v44 = vsel %vm507_vm4, %v443_v38, %v571_v42 }
  0x82   : > { %955 = vst.msk [vmem:[%s1404_s25 + $0xf8] sm:$0xf] %vm892_vm0, %v1152_v43  ;;  %v1153_v45 = vpack.c.bf16 %v635_v44, %v635_v44 }
  0x84   : > { %956 = vst.msk [vmem:[%s1404_s25 + $0xfc] sm:$0xf] %vm892_vm0, %v1153_v45 }
  0x85 PF: > { %s13_s12 = sadd.s32 1, %s1329_s12  }
  0x86   : > { %p10_p4 = scmp.ge.s32.totalorder %s13_s12, 6  }
  0x88   :  { %12 = sbr.rel (!%p10_p4) target bundleno = 1 (0x1), region = 62 }

// kernel: forward.9
= control target key start
LH: loop header
LB: loop body
LE: loop exit
PB: predicated region body
PF: predicated region fallthrough
CT: control target
= control target key end

     0   :  { %s3687_s15 = smov 0   ;;  %s3689_s16 = smov 0   ;;  %s4633_s0 = inlined_call_operand.vmem [shape: bf16[2048,512], index: 0, kind: input, shape index: {}]   ;;  %s4634_s1 = inlined_call_operand.vmem [shape: bf16[512,64], index: 1, kind: input, shape index: {}]   ;;  %s4635_s2 = inlined_call_operand.vmem [shape: bf16[2048,64], index: 2, kind: output, shape index: {0}]   ;;  %s4636_s3 = inlined_call_operand.vmem [shape: f32[32,64], index: 3, kind: output, shape index: {1}]   ;;  %s4637_s4 = inlined_call_operand.vmem [shape: f32[32,64], index: 4, kind: output, shape index: {2}]  }
   0x1   :  { %s3691_s17 = smov 0  }
   0x2 LB: > { %s34_s18 = sadd.s32 1, %s3654_s16  ;;  %p3091_p0 = scmp.ge.s32.totalorder %s3658_s17, 1  ;;  %s3658_s17 = sphi %s3691_s17, %s15_s17   ;;  %s3654_s16 = sphi %s3689_s16, %s4639_s16   ;;  %s3650_s15 = sphi %s3687_s15, %s4638_s15  }
   0x3   : > { %p36_p1 = scmp.ge.s32.totalorder %s34_s18, 4  ;;  %p217_p2 = scmp.lt.s32.totalorder %s3658_s17, 5 }
   0x5   : > { %s4641_s18 = smov (%p36_p1, %s34_s18), 0  ;;  %p218_p3 = pnand %p3091_p0, %p217_p2 }
   0x6   : > { %s3092_s13 = sshll.u32 (!%p218_p3), %s3650_s15, 6  ;;  %p303_p5 = scmp.lt.s32.totalorder (!%p218_p3), %s3650_s15, 3 }
   0x7   : > { %221 = sbr.rel (%p218_p3) target bundleno = 552 (0x228), region = 28  ;;  %p275_p4 = scmp.lt.s32.totalorder (!%p218_p3), %s3092_s13, 255 }
   0xc   : > { %v3416_v0 = vld [vmem:[%s4634_s1 + $0x38] sm:$0xff]   ;;  %v3660_v1 = vmov 0   ;;  %v3418_v3 = vld [vmem:[%s4634_s1 + $0x30] sm:$0xff]   ;;  %v3420_v5 = vld [vmem:[%s4634_s1 + $0x28] sm:$0xff]   ;;  %s4643_s13 = smov (!%p275_p4, %s3092_s13), 255  ;;  %vm322_vm0 = vcmask 523264  }
   0xd   : > { %1475 = vmatprep.subr.bf16.mxu0 %v3660_v1  ;;  %1764 = vmatprep.subr.bf16.mxu1 %v3660_v1  ;;  %v3417_v2 = vld [vmem:[%s4634_s1 + $0xb8] sm:$0xff]   ;;  %v3419_v4 = vld [vmem:[%s4634_s1 + $0xb0] sm:$0xff]   ;;  %v3421_v6 = vld [vmem:[%s4634_s1 + $0xa8] sm:$0xff]   ;;  %s3325_s30 = sshll.u32 %s4643_s13, 4  ;;  %s3096_s25 = sshll.u32 %s4643_s13, 2  ;;  %vm2505_vm1 = vcmask 519168  }
   0xe   : > { %1476 = vmatpush1.bf16.msra.mxu0 %v3416_v0  ;;  %1765 = vmatpush1.bf16.msra.mxu1 %v3417_v2  ;;  %v3422_v7 = vld [vmem:[%s4634_s1 + $0x20] sm:$0xff]   ;;  %v3424_v9 = vld [vmem:[%s4634_s1 + $0x18] sm:$0xff]   ;;  %v3426_v11 = vld [vmem:[%s4634_s1 + $0x10] sm:$0xff]   ;;  %s3781_s9 = scalar_lea.vmem %s4633_s0, %s3325_s30  ;;  %s4092_s28 = scalar_lea.vmem %s4635_s2, %s3096_s25 }
   0xf   : > { %1477 = vmatprep.subr.bf16.mxu0 %v3660_v1  ;;  %1766 = vmatprep.subr.bf16.mxu1 %v3660_v1  ;;  %v3423_v8 = vld [vmem:[%s4634_s1 + $0xa0] sm:$0xff]   ;;  %v3425_v10 = vld [vmem:[%s4634_s1 + $0x98] sm:$0xff]   ;;  %v3427_v12 = vld [vmem:[%s4634_s1 + $0x90] sm:$0xff]   ;;  %s4645_s15 = smov (!%p303_p5, %s3650_s15), 3 }
  0x10   : > { %v3428_v13 = vld [vmem:[%s4634_s1 + $0x8] sm:$0xff]   ;;  %v3430_v15 = vld [vmem:[%s4634_s1] sm:$0xff]   ;;  %v3432_v17 = vld [vmem:[%s4634_s1 + $0x78] sm:$0xff]   ;;  %s3097_s13 = sshll.u32 %s4645_s15, 3 }
  0x11   : > { %v3429_v14 = vld [vmem:[%s4634_s1 + $0x88] sm:$0xff]   ;;  %v3431_v16 = vld [vmem:[%s4634_s1 + $0x80] sm:$0xff]   ;;  %v3433_v18 = vld [vmem:[%s4634_s1 + $0xf8] sm:$0xff]   ;;  %s309_s30 = scalar_lea.vmem %s4636_s3, %s3097_s13  ;;  %s316_s7 = scalar_lea.vmem %s4637_s4, %s3097_s13 }
  0x12   : > { %1478 = vmatpush1.bf16.msra.mxu0 %v3418_v3  ;;  %1767 = vmatpush1.bf16.msra.mxu1 %v3419_v4  ;;  %v3450_v19 = vld [vmem:[%s3781_s9 + $0x4] ss:$16 sps:$4 sm:$0xff]   ;;  %v3453_v21 = vld [vmem:[%s3781_s9 + $0xc] ss:$16 sps:$4 sm:$0xff]   ;;  %v3448_v35 = vld [vmem:[%s3781_s9] ss:$16 sps:$4 sm:$0xff]  }
  0x13   : > { %1479 = vmatprep.subr.bf16.mxu0 %v3660_v1  ;;  %1768 = vmatprep.subr.bf16.mxu1 %v3660_v1  ;;  %v3434_v20 = vld [vmem:[%s4634_s1 + $0x70] sm:$0xff]   ;;  %v3436_v23 = vld [vmem:[%s4634_s1 + $0x68] sm:$0xff]   ;;  %v3438_v25 = vld [vmem:[%s4634_s1 + $0x60] sm:$0xff]   ;;  %v3661_v4 = vmov 0.0  }
  0x14   : > { %v3435_v22 = vld [vmem:[%s4634_s1 + $0xf0] sm:$0xff]   ;;  %1507 = vmatprep.mubr.bf16.mxu0 %v3450_v19  ;;  %1796 = vmatprep.mubr.bf16.mxu1 %v3453_v21  ;;  %v3437_v24 = vld [vmem:[%s4634_s1 + $0xe8] sm:$0xff]   ;;  %v3439_v26 = vld [vmem:[%s4634_s1 + $0xe0] sm:$0xff]   ;;  %323 = vst.msk [vmem:[#allocation2] sm:$0xff] %vm322_vm0, %v3661_v4 }
  0x15   : > { %v3440_v27 = vld [vmem:[%s4634_s1 + $0x58] sm:$0xff]   ;;  %v3442_v29 = vld [vmem:[%s4634_s1 + $0x50] sm:$0xff]   ;;  %v3444_v31 = vld [vmem:[%s4634_s1 + $0x48] sm:$0xff]   ;;  %324 = vst.msk [vmem:[#allocation2 + $0x8] sm:$0xff] %vm322_vm0, %v3661_v4 }
  0x16   : > { %1480 = vmatpush1.bf16.msra.mxu0 %v3420_v5  ;;  %1769 = vmatpush1.bf16.msra.mxu1 %v3421_v6  ;;  %v3441_v28 = vld [vmem:[%s4634_s1 + $0xd8] sm:$0xff]   ;;  %v3443_v30 = vld [vmem:[%s4634_s1 + $0xd0] sm:$0xff]   ;;  %v3445_v32 = vld [vmem:[%s4634_s1 + $0xc8] sm:$0xff]   ;;  %325 = vst.msk [vmem:[#allocation2 + $0x10] sm:$0xff] %vm322_vm0, %v3661_v4 }
  0x17   : > { %1481 = vmatprep.subr.bf16.mxu0 %v3660_v1  ;;  %1770 = vmatprep.subr.bf16.mxu1 %v3660_v1  ;;  %v3446_v33 = vld [vmem:[%s4634_s1 + $0x40] sm:$0xff]   ;;  %v3451_v36 = vld [vmem:[%s3781_s9 + $0x8] ss:$16 sps:$4 sm:$0xff]   ;;  %v3456_v38 = vld [vmem:[%s3781_s9 + $0x2c] ss:$16 sps:$4 sm:$0xff]   ;;  %326 = vst.msk [vmem:[#allocation2 + $0x18] sm:$0xff] %vm322_vm0, %v3661_v4 }
  0x18   : > { %v3447_v34 = vld [vmem:[%s4634_s1 + $0xc0] sm:$0xff]   ;;  %v3459_v40 = vld [vmem:[%s3781_s9 + $0x28] ss:$16 sps:$4 sm:$0xff]   ;;  %v3462_v42 = vld [vmem:[%s3781_s9 + $0x4c] ss:$16 sps:$4 sm:$0xff]   ;;  %327 = vst.msk [vmem:[#allocation2 + $0x20] sm:$0xff] %vm322_vm0, %v3661_v4 }
  0x19   : > { %v3454_v37 = vld [vmem:[%s3781_s9 + $0x24] ss:$16 sps:$4 sm:$0xff]   ;;  %v3458_v39 = vld [vmem:[%s3781_s9 + $0x20] ss:$16 sps:$4 sm:$0xff]   ;;  %v3465_v44 = vld [vmem:[%s3781_s9 + $0x48] ss:$16 sps:$4 sm:$0xff]  }
  0x1a   : > { %1482 = vmatpush1.bf16.msra.mxu0 %v3422_v7  ;;  %1771 = vmatpush1.bf16.msra.mxu1 %v3423_v8  ;;  %v3460_v41 = vld [vmem:[%s3781_s9 + $0x44] ss:$16 sps:$4 sm:$0xff]   ;;  %v3464_v43 = vld [vmem:[%s3781_s9 + $0x40] ss:$16 sps:$4 sm:$0xff]   ;;  %v3468_v46 = vld [vmem:[%s3781_s9 + $0x6c] ss:$16 sps:$4 sm:$0xff]  }
  0x1b   : > { %1483 = vmatprep.subr.bf16.mxu0 %v3660_v1  ;;  %1772 = vmatprep.subr.bf16.mxu1 %v3660_v1  ;;  %v3466_v45 = vld [vmem:[%s3781_s9 + $0x64] ss:$16 sps:$4 sm:$0xff]   ;;  %v3470_v47 = vld [vmem:[%s3781_s9 + $0x60] ss:$16 sps:$4 sm:$0xff]   ;;  %v3471_v48 = vld [vmem:[%s3781_s9 + $0x68] ss:$16 sps:$4 sm:$0xff]  }
  0x1c   : > { %v3472_v49 = vld [vmem:[%s3781_s9 + $0x84] ss:$16 sps:$4 sm:$0xff]   ;;  %v3474_v50 = vld [vmem:[%s3781_s9 + $0x8c] ss:$16 sps:$4 sm:$0xff]   ;;  %v3476_v51 = vld [vmem:[%s3781_s9 + $0x80] ss:$16 sps:$4 sm:$0xff]  }
  0x1d   : > { %v3477_v52 = vld [vmem:[%s3781_s9 + $0x88] ss:$16 sps:$4 sm:$0xff]   ;;  %v3478_v53 = vld [vmem:[%s3781_s9 + $0xa4] ss:$16 sps:$4 sm:$0xff]   ;;  %v3480_v54 = vld [vmem:[%s3781_s9 + $0xac] ss:$16 sps:$4 sm:$0xff]  }
  0x1e   : > { %1484 = vmatpush1.bf16.msra.mxu0 %v3424_v9  ;;  %1773 = vmatpush1.bf16.msra.mxu1 %v3425_v10  ;;  %v3482_v55 = vld [vmem:[%s3781_s9 + $0xa0] ss:$16 sps:$4 sm:$0xff]   ;;  %v3483_v56 = vld [vmem:[%s3781_s9 + $0xa8] ss:$16 sps:$4 sm:$0xff]   ;;  %v3484_v57 = vld [vmem:[%s3781_s9 + $0xc4] ss:$16 sps:$4 sm:$0xff]  }
  0x1f   : > { %1485 = vmatprep.subr.bf16.mxu0 %v3660_v1  ;;  %1774 = vmatprep.subr.bf16.mxu1 %v3660_v1  ;;  %v3486_v58 = vld [vmem:[%s3781_s9 + $0xcc] ss:$16 sps:$4 sm:$0xff]   ;;  %v3488_v59 = vld [vmem:[%s3781_s9 + $0xc0] ss:$16 sps:$4 sm:$0xff]   ;;  %v3489_v60 = vld [vmem:[%s3781_s9 + $0xc8] ss:$16 sps:$4 sm:$0xff]  }
  0x20   : > { %v3490_v61 = vld [vmem:[%s3781_s9 + $0xe4] ss:$16 sps:$4 sm:$0xff]   ;;  %v3492_v62 = vld [vmem:[%s3781_s9 + $0xec] ss:$16 sps:$4 sm:$0xff]   ;;  %v3494_v63 = vld [vmem:[%s3781_s9 + $0xe0] ss:$16 sps:$4 sm:$0xff]  }
  0x21   : > { %v3495_v0 = vld [vmem:[%s3781_s9 + $0xe8] ss:$16 sps:$4 sm:$0xff]   ;;  %v3498_v2 = vld [vmem:[%s3781_s9 + $0x10c] ss:$16 sps:$4 sm:$0xff]   ;;  %v3879_v3 = vld [vmem:[%s3781_s9 + $0x100] ss:$16 sps:$4 sm:$0xff]  }
  0x22   : > { %1486 = vmatpush1.bf16.msra.mxu0 %v3426_v11  ;;  %1775 = vmatpush1.bf16.msra.mxu1 %v3427_v12  ;;  %328 = vst.msk [vmem:[#allocation2 + $0x28] sm:$0xff] %vm322_vm0, %v3661_v4  ;;  %329 = vst.msk [vmem:[#allocation2 + $0x30] sm:$0xff] %vm322_vm0, %v3661_v4  ;;  %v3501_v5 = vld [vmem:[%s3781_s9 + $0x108] ss:$16 sps:$4 sm:$0xff]   ;;  %v3502_v6 = vld [vmem:[%s3781_s9 + $0x124] ss:$16 sps:$4 sm:$0xff]  }
  0x23   : > { %1487 = vmatprep.subr.bf16.mxu0 %v3660_v1  ;;  %1776 = vmatprep.subr.bf16.mxu1 %v3660_v1  ;;  %330 = vst.msk [vmem:[#allocation2 + $0x38] sm:$0xff] %vm322_vm0, %v3661_v4  ;;  %331 = vst.msk [vmem:[#allocation2 + $0x40] sm:$0xff] %vm322_vm0, %v3661_v4  ;;  %v3504_v7 = vld [vmem:[%s3781_s9 + $0x12c] ss:$16 sps:$4 sm:$0xff]   ;;  %v3506_v8 = vld [vmem:[%s3781_s9 + $0x120] ss:$16 sps:$4 sm:$0xff]  }
  0x24   : > { %332 = vst.msk [vmem:[#allocation2 + $0x48] sm:$0xff] %vm322_vm0, %v3661_v4  ;;  %333 = vst.msk [vmem:[#allocation2 + $0x50] sm:$0xff] %vm322_vm0, %v3661_v4  ;;  %v3507_v9 = vld [vmem:[%s3781_s9 + $0x128] ss:$16 sps:$4 sm:$0xff]   ;;  %v3508_v10 = vld [vmem:[%s3781_s9 + $0x144] ss:$16 sps:$4 sm:$0xff]  }
  0x25   : > { %334 = vst.msk [vmem:[#allocation2 + $0x58] sm:$0xff] %vm322_vm0, %v3661_v4  ;;  %335 = vst.msk [vmem:[#allocation2 + $0x60] sm:$0xff] %vm322_vm0, %v3661_v4  ;;  %v3510_v11 = vld [vmem:[%s3781_s9 + $0x14c] ss:$16 sps:$4 sm:$0xff]   ;;  %v3512_v12 = vld [vmem:[%s3781_s9 + $0x140] ss:$16 sps:$4 sm:$0xff]  }
  0x26   : > { %1488 = vmatpush1.bf16.msra.mxu0 %v3428_v13  ;;  %1777 = vmatpush1.bf16.msra.mxu1 %v3429_v14  ;;  %336 = vst.msk [vmem:[#allocation2 + $0x68] sm:$0xff] %vm322_vm0, %v3661_v4  ;;  %337 = vst.msk [vmem:[#allocation2 + $0x70] sm:$0xff] %vm322_vm0, %v3661_v4  ;;  %v3513_v13 = vld [vmem:[%s3781_s9 + $0x148] ss:$16 sps:$4 sm:$0xff]   ;;  %v3514_v14 = vld [vmem:[%s3781_s9 + $0x164] ss:$16 sps:$4 sm:$0xff]  }
  0x27   : > { %1489 = vmatprep.subr.bf16.mxu0 %v3660_v1  ;;  %1778 = vmatprep.subr.bf16.mxu1 %v3660_v1  ;;  %338 = vst.msk [vmem:[#allocation2 + $0x78] sm:$0xff] %vm322_vm0, %v3661_v4  ;;  %339 = vst.msk [vmem:[#allocation2 + $0x80] sm:$0xff] %vm322_vm0, %v3661_v4  ;;  %v3522_v19 = vld [vmem:[%s3781_s9 + $0x18c] ss:$16 sps:$4 sm:$0xff]   ;;  %v3525_v21 = vld [vmem:[%s3781_s9 + $0x188] ss:$16 sps:$4 sm:$0xff]  }
  0x28   : > { %340 = vst.msk [vmem:[#allocation2 + $0x88] sm:$0xff] %vm322_vm0, %v3661_v4  ;;  %341 = vst.msk [vmem:[#allocation2 + $0x90] sm:$0xff] %vm322_vm0, %v3661_v4 }
  0x29   : > { %342 = vst.msk [vmem:[#allocation2 + $0x98] sm:$0xff] %vm322_vm0, %v3661_v4  ;;  %343 = vst.msk [vmem:[#allocation2 + $0xa0] sm:$0xff] %vm322_vm0, %v3661_v4 }
  0x2a   : > { %1490 = vmatpush1.bf16.msra.mxu0 %v3430_v15  ;;  %1779 = vmatpush1.bf16.msra.mxu1 %v3431_v16  ;;  %344 = vst.msk [vmem:[#allocation2 + $0xa8] sm:$0xff] %vm322_vm0, %v3661_v4  ;;  %345 = vst.msk [vmem:[#allocation2 + $0xb0] sm:$0xff] %vm322_vm0, %v3661_v4  ;;  %v3516_v15 = vld [vmem:[%s3781_s9 + $0x16c] ss:$16 sps:$4 sm:$0xff]   ;;  %v3518_v16 = vld [vmem:[%s3781_s9 + $0x160] ss:$16 sps:$4 sm:$0xff]  }
  0x2b   : > { %1491 = vmatprep.subr.bf16.mxu0 %v3660_v1  ;;  %1780 = vmatprep.subr.bf16.mxu1 %v3660_v1  ;;  %346 = vst.msk [vmem:[#allocation2 + $0xb8] sm:$0xff] %vm322_vm0, %v3661_v4  ;;  %347 = vst.msk [vmem:[#allocation2 + $0xc0] sm:$0xff] %vm322_vm0, %v3661_v4 }
  0x2c   : > { %348 = vst.msk [vmem:[#allocation2 + $0xc8] sm:$0xff] %vm322_vm0, %v3661_v4  ;;  %349 = vst.msk [vmem:[#allocation2 + $0xd0] sm:$0xff] %vm322_vm0, %v3661_v4 }
  0x2d   : > { %350 = vst.msk [vmem:[#allocation2 + $0xd8] sm:$0xff] %vm322_vm0, %v3661_v4  ;;  %351 = vst.msk [vmem:[#allocation2 + $0xe0] sm:$0xff] %vm322_vm0, %v3661_v4 }
  0x2e   : > { %1492 = vmatpush2.bf16.msra.mxu0 %v3432_v17  ;;  %1781 = vmatpush2.bf16.msra.mxu1 %v3433_v18  ;;  %352 = vst.msk [vmem:[#allocation2 + $0xe8] sm:$0xff] %vm322_vm0, %v3661_v4  ;;  %353 = vst.msk [vmem:[#allocation2 + $0xf0] sm:$0xff] %vm322_vm0, %v3661_v4  ;;  %v3519_v17 = vld [vmem:[%s3781_s9 + $0x168] ss:$16 sps:$4 sm:$0xff]   ;;  %v3520_v18 = vld [vmem:[%s3781_s9 + $0x184] ss:$16 sps:$4 sm:$0xff]  }
  0x2f   : > { %1493 = vmatprep.subr.bf16.mxu0 %v3660_v1  ;;  %1782 = vmatprep.subr.bf16.mxu1 %v3660_v1  ;;  %354 = vst.msk [vmem:[#allocation2 + $0xf8] sm:$0xff] %vm322_vm0, %v3661_v4  ;;  %355 = vst.msk [vmem:[#allocation2 + $0x100] sm:$0xff] %vm322_vm0, %v3661_v4 }
  0x30   : > { %356 = vst.msk [vmem:[#allocation2 + $0x108] sm:$0xff] %vm322_vm0, %v3661_v4  ;;  %357 = vst.msk [vmem:[#allocation2 + $0x110] sm:$0xff] %vm322_vm0, %v3661_v4 }
  0x31   : > { %358 = vst.msk [vmem:[#allocation2 + $0x118] sm:$0xff] %vm322_vm0, %v3661_v4  ;;  %359 = vst.msk [vmem:[#allocation2 + $0x120] sm:$0xff] %vm322_vm0, %v3661_v4 }
  0x32   : > { %1494 = vmatpush2.bf16.msra.mxu0 %v3434_v20  ;;  %1783 = vmatpush2.bf16.msra.mxu1 %v3435_v22  ;;  %360 = vst.msk [vmem:[#allocation2 + $0x128] sm:$0xff] %vm322_vm0, %v3661_v4  ;;  %361 = vst.msk [vmem:[#allocation2 + $0x130] sm:$0xff] %vm322_vm0, %v3661_v4  ;;  %v3524_v20 = vld [vmem:[%s3781_s9 + $0x180] ss:$16 sps:$4 sm:$0xff]   ;;  %v3526_v22 = vld [vmem:[%s3781_s9 + $0x1a4] ss:$16 sps:$4 sm:$0xff]  }
  0x33   : > { %1495 = vmatprep.subr.bf16.mxu0 %v3660_v1  ;;  %1784 = vmatprep.subr.bf16.mxu1 %v3660_v1  ;;  %362 = vst.msk [vmem:[#allocation2 + $0x138] sm:$0xff] %vm322_vm0, %v3661_v4  ;;  %363 = vst.msk [vmem:[#allocation2 + $0x140] sm:$0xff] %vm322_vm0, %v3661_v4 }
  0x34   : > { %364 = vst.msk [vmem:[#allocation2 + $0x148] sm:$0xff] %vm322_vm0, %v3661_v4  ;;  %365 = vst.msk [vmem:[#allocation2 + $0x150] sm:$0xff] %vm322_vm0, %v3661_v4 }
  0x35   : > { %366 = vst.msk [vmem:[#allocation2 + $0x158] sm:$0xff] %vm322_vm0, %v3661_v4  ;;  %367 = vst.msk [vmem:[#allocation2 + $0x160] sm:$0xff] %vm322_vm0, %v3661_v4 }
  0x36   : > { %1496 = vmatpush2.bf16.msra.mxu0 %v3436_v23  ;;  %1785 = vmatpush2.bf16.msra.mxu1 %v3437_v24  ;;  %368 = vst.msk [vmem:[#allocation2 + $0x168] sm:$0xff] %vm322_vm0, %v3661_v4  ;;  %369 = vst.msk [vmem:[#allocation2 + $0x170] sm:$0xff] %vm322_vm0, %v3661_v4  ;;  %v3528_v23 = vld [vmem:[%s3781_s9 + $0x1ac] ss:$16 sps:$4 sm:$0xff]   ;;  %v3530_v24 = vld [vmem:[%s3781_s9 + $0x1a0] ss:$16 sps:$4 sm:$0xff]  }
  0x37   : > { %1497 = vmatprep.subr.bf16.mxu0 %v3660_v1  ;;  %1786 = vmatprep.subr.bf16.mxu1 %v3660_v1  ;;  %370 = vst.msk [vmem:[#allocation2 + $0x178] sm:$0xff] %vm322_vm0, %v3661_v4  ;;  %371 = vst.msk [vmem:[#allocation2 + $0x180] sm:$0xff] %vm322_vm0, %v3661_v4 }
  0x38   : > { %372 = vst.msk [vmem:[#allocation2 + $0x188] sm:$0xff] %vm322_vm0, %v3661_v4  ;;  %373 = vst.msk [vmem:[#allocation2 + $0x190] sm:$0xff] %vm322_vm0, %v3661_v4 }
  0x39   : > { %374 = vst.msk [vmem:[#allocation2 + $0x198] sm:$0xff] %vm322_vm0, %v3661_v4  ;;  %375 = vst.msk [vmem:[#allocation2 + $0x1a0] sm:$0xff] %vm322_vm0, %v3661_v4 }
  0x3a   : > { %1498 = vmatpush2.bf16.msra.mxu0 %v3438_v25  ;;  %1787 = vmatpush2.bf16.msra.mxu1 %v3439_v26  ;;  %376 = vst.msk [vmem:[#allocation2 + $0x1a8] sm:$0xff] %vm322_vm0, %v3661_v4  ;;  %377 = vst.msk [vmem:[#allocation2 + $0x1b0] sm:$0xff] %vm322_vm0, %v3661_v4  ;;  %v3531_v25 = vld [vmem:[%s3781_s9 + $0x1a8] ss:$16 sps:$4 sm:$0xff]   ;;  %v3532_v26 = vld [vmem:[%s3781_s9 + $0x1c4] ss:$16 sps:$4 sm:$0xff]  }
  0x3b   : > { %1499 = vmatprep.subr.bf16.mxu0 %v3660_v1  ;;  %1788 = vmatprep.subr.bf16.mxu1 %v3660_v1  ;;  %378 = vst.msk [vmem:[#allocation2 + $0x1b8] sm:$0xff] %vm322_vm0, %v3661_v4  ;;  %379 = vst.msk [vmem:[#allocation2 + $0x1c0] sm:$0xff] %vm322_vm0, %v3661_v4 }
  0x3c   : > { %380 = vst.msk [vmem:[#allocation2 + $0x1c8] sm:$0xff] %vm322_vm0, %v3661_v4  ;;  %381 = vst.msk [vmem:[#allocation2 + $0x1d0] sm:$0xff] %vm322_vm0, %v3661_v4 }
  0x3d   : > { %382 = vst.msk [vmem:[#allocation2 + $0x1d8] sm:$0xff] %vm322_vm0, %v3661_v4  ;;  %383 = vst.msk [vmem:[#allocation2 + $0x1e0] sm:$0xff] %vm322_vm0, %v3661_v4 }
  0x3e   : > { %1500 = vmatpush2.bf16.msra.mxu0 %v3440_v27  ;;  %1789 = vmatpush2.bf16.msra.mxu1 %v3441_v28  ;;  %384 = vst.msk [vmem:[#allocation2 + $0x1e8] sm:$0xff] %vm322_vm0, %v3661_v4  ;;  %385 = vst.msk [vmem:[#allocation2 + $0x1f0] sm:$0xff] %vm322_vm0, %v3661_v4  ;;  %v3534_v27 = vld [vmem:[%s3781_s9 + $0x1cc] ss:$16 sps:$4 sm:$0xff]   ;;  %v3536_v28 = vld [vmem:[%s3781_s9 + $0x1c0] ss:$16 sps:$4 sm:$0xff]  }
  0x3f   : > { %1501 = vmatprep.subr.bf16.mxu0 %v3660_v1  ;;  %1790 = vmatprep.subr.bf16.mxu1 %v3660_v1  ;;  %386 = vst.msk [vmem:[#allocation2 + $0x1f8] sm:$0xff] %vm322_vm0, %v3661_v4  ;;  %v548_v4 = vld [vmem:[%s3781_s9 + $0x308] sm:$0xff] }
  0x42   : > { %1502 = vmatpush2.bf16.msra.mxu0 %v3442_v29  ;;  %1791 = vmatpush2.bf16.msra.mxu1 %v3443_v30  ;;  %v3537_v29 = vld [vmem:[%s3781_s9 + $0x1c8] ss:$16 sps:$4 sm:$0xff]   ;;  %v3538_v30 = vld [vmem:[%s3781_s9 + $0x1e4] ss:$16 sps:$4 sm:$0xff]  }
  0x43   : > { %1503 = vmatprep.subr.bf16.mxu0 %v3660_v1  ;;  %1792 = vmatprep.subr.bf16.mxu1 %v3660_v1 }
  0x46   : > { %1504 = vmatpush2.bf16.msra.mxu0 %v3444_v31  ;;  %1793 = vmatpush2.bf16.msra.mxu1 %v3445_v32  ;;  %v3540_v31 = vld [vmem:[%s3781_s9 + $0x1ec] ss:$16 sps:$4 sm:$0xff]   ;;  %v3542_v32 = vld [vmem:[%s3781_s9 + $0x1e0] ss:$16 sps:$4 sm:$0xff]  }
  0x47   : > { %1505 = vmatprep.subr.bf16.mxu0 %v3660_v1  ;;  %1794 = vmatprep.subr.bf16.mxu1 %v3660_v1  ;;  %v3496_v1 = vld [vmem:[%s3781_s9 + $0x104] ss:$16 sps:$4 sm:$0xff]  }
  0x4a   : > { %1506 = vmatpush2.bf16.msra.mxu0 %v3446_v33  ;;  %1795 = vmatpush2.bf16.msra.mxu1 %v3447_v34  ;;  %v3543_v33 = vld [vmem:[%s3781_s9 + $0x1e8] ss:$16 sps:$4 sm:$0xff]   ;;  %v3544_v34 = vld [vmem:[%s3781_s9 + $0x204] ss:$16 sps:$4 sm:$0xff]  }
  0x4d   : > { %1508 = vmatmul.mubr.bf16.vlgmr.msra.gmra.mxu0 %v3448_v35  ;;  %1797 = vmatmul.mubr.bf16.vlgmr.msra.gmra.mxu1 %v3451_v36  ;;  %v3546_v35 = vld [vmem:[%s3781_s9 + $0x20c] ss:$16 sps:$4 sm:$0xff]   ;;  %v3548_v36 = vld [vmem:[%s3781_s9 + $0x200] ss:$16 sps:$4 sm:$0xff]  }
  0x4e   : > { %1515 = vmatprep.mubr.bf16.mxu0 %v3454_v37  ;;  %1804 = vmatprep.mubr.bf16.mxu1 %v3456_v38  ;;  %v3549_v37 = vld [vmem:[%s3781_s9 + $0x208] ss:$16 sps:$4 sm:$0xff]   ;;  %v3550_v38 = vld [vmem:[%s3781_s9 + $0x224] ss:$16 sps:$4 sm:$0xff]  }
  0x55   : > { %1516 = vmatmul.mubr.bf16.gmra.mxu0 %v3458_v39  ;;  %1805 = vmatmul.mubr.bf16.gmra.mxu1 %v3459_v40  ;;  %v3552_v39 = vld [vmem:[%s3781_s9 + $0x22c] ss:$16 sps:$4 sm:$0xff]   ;;  %v3554_v40 = vld [vmem:[%s3781_s9 + $0x220] ss:$16 sps:$4 sm:$0xff]  }
  0x56   : > { %1523 = vmatprep.mubr.bf16.mxu0 %v3460_v41  ;;  %1812 = vmatprep.mubr.bf16.mxu1 %v3462_v42  ;;  %v3555_v41 = vld [vmem:[%s3781_s9 + $0x228] ss:$16 sps:$4 sm:$0xff]   ;;  %v3556_v42 = vld [vmem:[%s3781_s9 + $0x244] ss:$16 sps:$4 sm:$0xff]  }
  0x5d   : > { %1524 = vmatmul.mubr.bf16.gmra.mxu0 %v3464_v43  ;;  %1813 = vmatmul.mubr.bf16.gmra.mxu1 %v3465_v44  ;;  %v3558_v43 = vld [vmem:[%s3781_s9 + $0x24c] ss:$16 sps:$4 sm:$0xff]   ;;  %v3560_v44 = vld [vmem:[%s3781_s9 + $0x240] ss:$16 sps:$4 sm:$0xff]  }
  0x5e   : > { %1531 = vmatprep.mubr.bf16.mxu0 %v3466_v45  ;;  %1820 = vmatprep.mubr.bf16.mxu1 %v3468_v46  ;;  %v3561_v45 = vld [vmem:[%s3781_s9 + $0x248] ss:$16 sps:$4 sm:$0xff]   ;;  %v3562_v46 = vld [vmem:[%s3781_s9 + $0x264] ss:$16 sps:$4 sm:$0xff]  }
  0x65   : > { %1532 = vmatmul.mubr.bf16.gmra.mxu0 %v3470_v47  ;;  %1821 = vmatmul.mubr.bf16.gmra.mxu1 %v3471_v48  ;;  %v3564_v47 = vld [vmem:[%s3781_s9 + $0x26c] ss:$16 sps:$4 sm:$0xff]   ;;  %v3566_v48 = vld [vmem:[%s3781_s9 + $0x260] ss:$16 sps:$4 sm:$0xff]  }
  0x66   : > { %1539 = vmatprep.mubr.bf16.mxu0 %v3472_v49  ;;  %1828 = vmatprep.mubr.bf16.mxu1 %v3474_v50  ;;  %v3567_v49 = vld [vmem:[%s3781_s9 + $0x268] ss:$16 sps:$4 sm:$0xff]   ;;  %v3568_v50 = vld [vmem:[%s3781_s9 + $0x284] ss:$16 sps:$4 sm:$0xff]  }
  0x6d   : > { %1540 = vmatmul.mubr.bf16.gmra.mxu0 %v3476_v51  ;;  %1829 = vmatmul.mubr.bf16.gmra.mxu1 %v3477_v52  ;;  %v3570_v51 = vld [vmem:[%s3781_s9 + $0x28c] ss:$16 sps:$4 sm:$0xff]   ;;  %v3572_v52 = vld [vmem:[%s3781_s9 + $0x280] ss:$16 sps:$4 sm:$0xff]  }
  0x6e   : > { %1547 = vmatprep.mubr.bf16.mxu0 %v3478_v53  ;;  %1836 = vmatprep.mubr.bf16.mxu1 %v3480_v54  ;;  %v3573_v53 = vld [vmem:[%s3781_s9 + $0x288] ss:$16 sps:$4 sm:$0xff]   ;;  %v3574_v54 = vld [vmem:[%s3781_s9 + $0x2a4] ss:$16 sps:$4 sm:$0xff]  }
  0x75   : > { %1548 = vmatmul.mubr.bf16.gmra.mxu0 %v3482_v55  ;;  %1837 = vmatmul.mubr.bf16.gmra.mxu1 %v3483_v56  ;;  %v3576_v55 = vld [vmem:[%s3781_s9 + $0x2ac] ss:$16 sps:$4 sm:$0xff]   ;;  %v3578_v56 = vld [vmem:[%s3781_s9 + $0x2a0] ss:$16 sps:$4 sm:$0xff]  }
  0x76   : > { %1555 = vmatprep.mubr.bf16.mxu0 %v3484_v57  ;;  %1844 = vmatprep.mubr.bf16.mxu1 %v3486_v58  ;;  %v3579_v57 = vld [vmem:[%s3781_s9 + $0x2a8] ss:$16 sps:$4 sm:$0xff]   ;;  %v3580_v58 = vld [vmem:[%s3781_s9 + $0x2c4] ss:$16 sps:$4 sm:$0xff]  }
  0x7d   : > { %1556 = vmatmul.mubr.bf16.gmra.mxu0 %v3488_v59  ;;  %1845 = vmatmul.mubr.bf16.gmra.mxu1 %v3489_v60  ;;  %v3582_v59 = vld [vmem:[%s3781_s9 + $0x2cc] ss:$16 sps:$4 sm:$0xff]   ;;  %v3584_v60 = vld [vmem:[%s3781_s9 + $0x2c0] ss:$16 sps:$4 sm:$0xff]  }
  0x7e   : > { %1563 = vmatprep.mubr.bf16.mxu0 %v3490_v61  ;;  %1852 = vmatprep.mubr.bf16.mxu1 %v3492_v62  ;;  %v3585_v61 = vld [vmem:[%s3781_s9 + $0x2c8] ss:$16 sps:$4 sm:$0xff]   ;;  %v3586_v62 = vld [vmem:[%s3781_s9 + $0x2e4] ss:$16 sps:$4 sm:$0xff]  }
  0x85   : > { %1564 = vmatmul.mubr.bf16.gmra.mxu0 %v3494_v63  ;;  %1853 = vmatmul.mubr.bf16.gmra.mxu1 %v3495_v0  ;;  %v3588_v63 = vld [vmem:[%s3781_s9 + $0x2ec] ss:$16 sps:$4 sm:$0xff]   ;;  %v3590_v0 = vld [vmem:[%s3781_s9 + $0x2e0] ss:$16 sps:$4 sm:$0xff]  }
  0x86   : > { %1571 = vmatprep.mubr.bf16.mxu0 %v3496_v1  ;;  %1860 = vmatprep.mubr.bf16.mxu1 %v3498_v2  ;;  %v3591_v1 = vld [vmem:[%s3781_s9 + $0x2e8] ss:$16 sps:$4 sm:$0xff]   ;;  %v3592_v2 = vld [vmem:[%s3781_s9 + $0x304] ss:$16 sps:$4 sm:$0xff]  }
  0x8d   : > { %1572 = vmatmul.mubr.bf16.gmra.mxu0 %v3879_v3  ;;  %1861 = vmatmul.mubr.bf16.gmra.mxu1 %v3501_v5  ;;  %v3594_v3 = vld [vmem:[%s3781_s9 + $0x30c] ss:$16 sps:$4 sm:$0xff]  }
  0x8e   : > { %1579 = vmatprep.mubr.bf16.mxu0 %v3502_v6  ;;  %1868 = vmatprep.mubr.bf16.mxu1 %v3504_v7  ;;  %v550_v5 = vld [vmem:[%s3781_s9 + $0x318] sm:$0xff]  ;;  %v3596_v6 = vld [vmem:[%s3781_s9 + $0x300] ss:$16 sps:$4 sm:$0xff]  }
  0x8f   : > { %v3197_v7 = vcombine.low %v548_v4, %v550_v5 }
  0x95   : > { %1580 = vmatmul.mubr.bf16.gmra.mxu0 %v3506_v8  ;;  %1869 = vmatmul.mubr.bf16.gmra.mxu1 %v3507_v9  ;;  %v3597_v8 = vld [vmem:[%s3781_s9 + $0x324] ss:$16 sps:$4 sm:$0xff]   ;;  %v3599_v9 = vld [vmem:[%s3781_s9 + $0x32c] ss:$16 sps:$4 sm:$0xff]  }
  0x96   : > { %1587 = vmatprep.mubr.bf16.mxu0 %v3508_v10  ;;  %1876 = vmatprep.mubr.bf16.mxu1 %v3510_v11  ;;  %v387_v11 = vld [vmem:[#allocation2] sm:$0xff] }
  0x9d   : > { %1588 = vmatmul.mubr.bf16.gmra.mxu0 %v3512_v12  ;;  %1877 = vmatmul.mubr.bf16.gmra.mxu1 %v3513_v13 }
  0x9e   : > { %1595 = vmatprep.mubr.bf16.mxu0 %v3514_v14  ;;  %1884 = vmatprep.mubr.bf16.mxu1 %v3516_v15  ;;  %v552_v15 = vld [vmem:[%s3781_s9 + $0x328] sm:$0xff] }
  0xa5   : > { %1596 = vmatmul.mubr.bf16.gmra.mxu0 %v3518_v16  ;;  %1885 = vmatmul.mubr.bf16.gmra.mxu1 %v3519_v17  ;;  %v554_v16 = vld [vmem:[%s3781_s9 + $0x338] sm:$0xff] }
  0xa6   : > { %1603 = vmatprep.mubr.bf16.mxu0 %v3520_v18  ;;  %1892 = vmatprep.mubr.bf16.mxu1 %v3522_v19 }
  0xad   : > { %1604 = vmatmul.mubr.bf16.gmra.mxu0 %v3524_v20  ;;  %1893 = vmatmul.mubr.bf16.gmra.mxu1 %v3525_v21  ;;  %v3601_v20 = vld [vmem:[%s3781_s9 + $0x320] ss:$16 sps:$4 sm:$0xff]   ;;  %v388_v21 = vld [vmem:[#allocation2 + $0x8] sm:$0xff] }
  0xae   : > { %1611 = vmatprep.mubr.bf16.mxu0 %v3526_v22  ;;  %1900 = vmatprep.mubr.bf16.mxu1 %v3528_v23  ;;  %v3201_v23 = vcombine.low %v552_v15, %v554_v16 }
  0xb5   : > { %1612 = vmatmul.mubr.bf16.gmra.mxu0 %v3530_v24  ;;  %1901 = vmatmul.mubr.bf16.gmra.mxu1 %v3531_v25  ;;  %v3602_v24 = vld [vmem:[%s3781_s9 + $0x344] ss:$16 sps:$4 sm:$0xff]  }
  0xb6   : > { %1619 = vmatprep.mubr.bf16.mxu0 %v3532_v26  ;;  %1908 = vmatprep.mubr.bf16.mxu1 %v3534_v27  ;;  %v3604_v27 = vld [vmem:[%s3781_s9 + $0x34c] ss:$16 sps:$4 sm:$0xff]  }
  0xbd   : > { %1620 = vmatmul.mubr.bf16.gmra.mxu0 %v3536_v28  ;;  %1909 = vmatmul.mubr.bf16.gmra.mxu1 %v3537_v29 }
  0xbe   : > { %1627 = vmatprep.mubr.bf16.mxu0 %v3538_v30  ;;  %1916 = vmatprep.mubr.bf16.mxu1 %v3540_v31  ;;  %v389_v31 = vld [vmem:[#allocation2 + $0x10] sm:$0xff] }
  0xc5   : > { %1628 = vmatmul.mubr.bf16.gmra.mxu0 %v3542_v32  ;;  %1917 = vmatmul.mubr.bf16.gmra.mxu1 %v3543_v33 }
  0xc6   : > { %1635 = vmatprep.mubr.bf16.mxu0 %v3544_v34  ;;  %1924 = vmatprep.mubr.bf16.mxu1 %v3546_v35  ;;  %v556_v35 = vld [vmem:[%s3781_s9 + $0x348] sm:$0xff] }
  0xcd   : > { %1636 = vmatmul.mubr.bf16.gmra.mxu0 %v3548_v36  ;;  %1925 = vmatmul.mubr.bf16.gmra.mxu1 %v3549_v37  ;;  %v558_v36 = vld [vmem:[%s3781_s9 + $0x358] sm:$0xff] }
  0xce   : > { %1643 = vmatprep.mubr.bf16.mxu0 %v3550_v38  ;;  %1932 = vmatprep.mubr.bf16.mxu1 %v3552_v39 }
  0xd5   : > { %1644 = vmatmul.mubr.bf16.gmra.mxu0 %v3554_v40  ;;  %1933 = vmatmul.mubr.bf16.gmra.mxu1 %v3555_v41  ;;  %v3606_v40 = vld [vmem:[%s3781_s9 + $0x340] ss:$16 sps:$4 sm:$0xff]  }
  0xd6   : > { %1651 = vmatprep.mubr.bf16.mxu0 %v3556_v42  ;;  %1940 = vmatprep.mubr.bf16.mxu1 %v3558_v43  ;;  %v390_v42 = vld [vmem:[#allocation2 + $0x18] sm:$0xff] }
  0xdd   : > { %1652 = vmatmul.mubr.bf16.gmra.mxu0 %v3560_v44  ;;  %1941 = vmatmul.mubr.bf16.gmra.mxu1 %v3561_v45  ;;  %v3205_v44 = vcombine.low %v556_v35, %v558_v36  ;;  %v3607_v45 = vld [vmem:[%s3781_s9 + $0x364] ss:$16 sps:$4 sm:$0xff]  }
  0xde   : > { %1659 = vmatprep.mubr.bf16.mxu0 %v3562_v46  ;;  %1948 = vmatprep.mubr.bf16.mxu1 %v3564_v47 }
  0xe5   : > { %1660 = vmatmul.mubr.bf16.gmra.mxu0 %v3566_v48  ;;  %1949 = vmatmul.mubr.bf16.gmra.mxu1 %v3567_v49  ;;  %v3609_v49 = vld [vmem:[%s3781_s9 + $0x36c] ss:$16 sps:$4 sm:$0xff]  }
  0xe6   : > { %1667 = vmatprep.mubr.bf16.mxu0 %v3568_v50  ;;  %1956 = vmatprep.mubr.bf16.mxu1 %v3570_v51 }
  0xed   : > { %1668 = vmatmul.mubr.bf16.gmra.mxu0 %v3572_v52  ;;  %1957 = vmatmul.mubr.bf16.gmra.mxu1 %v3573_v53 }
  0xee   : > { %1675 = vmatprep.mubr.bf16.mxu0 %v3574_v54  ;;  %1964 = vmatprep.mubr.bf16.mxu1 %v3576_v55 }
  0xf5   : > { %1676 = vmatmul.mubr.bf16.gmra.mxu0 %v3578_v56  ;;  %1965 = vmatmul.mubr.bf16.gmra.mxu1 %v3579_v57  ;;  %v391_v56 = vld [vmem:[#allocation2 + $0x20] sm:$0xff] }
  0xf6   : > { %1683 = vmatprep.mubr.bf16.mxu0 %v3580_v58  ;;  %1972 = vmatprep.mubr.bf16.mxu1 %v3582_v59 }
  0xfd   : > { %1684 = vmatmul.mubr.bf16.gmra.mxu0 %v3584_v60  ;;  %1973 = vmatmul.mubr.bf16.gmra.mxu1 %v3585_v61 }
  0xfe   : > { %1691 = vmatprep.mubr.bf16.mxu0 %v3586_v62  ;;  %1980 = vmatprep.mubr.bf16.mxu1 %v3588_v63  ;;  %v560_v63 = vld [vmem:[%s3781_s9 + $0x368] sm:$0xff] }
 0x105   : > { %1692 = vmatmul.mubr.bf16.gmra.mxu0 %v3590_v0  ;;  %1981 = vmatmul.mubr.bf16.gmra.mxu1 %v3591_v1  ;;  %v562_v0 = vld [vmem:[%s3781_s9 + $0x378] sm:$0xff] }
 0x106   : > { %1699 = vmatprep.mubr.bf16.mxu0 %v3592_v2  ;;  %1988 = vmatprep.mubr.bf16.mxu1 %v3594_v3 }
 0x10d   : > { %v1509_v10 = vpop.f32.mrf.mxu0  ;;  %1700 = vmatmul.mubr.bf16.gmra.mxu0 %v3596_v6  ;;  %v1798_v12 = vpop.f32.mrf.mxu1  ;;  %1989 = vmatmul.mubr.bf16.gmra.mxu1 %v3197_v7  ;;  %v3611_v7 = vld [vmem:[%s3781_s9 + $0x360] ss:$16 sps:$4 sm:$0xff]  }
 0x10e   : > { %1707 = vmatprep.mubr.bf16.mxu0 %v3597_v8  ;;  %v1799_v13 = vadd.f32 %v1798_v12, %v1509_v10  ;;  %1996 = vmatprep.mubr.bf16.mxu1 %v3599_v9  ;;  %v392_v10 = vld [vmem:[#allocation2 + $0x28] sm:$0xff]  ;;  %v3209_v12 = vcombine.low %v560_v63, %v562_v0 }
 0x10f   : > { %v1511_v14 = vpop.f32.mrf.mxu0  ;;  %v1800_v17 = vpop.f32.mrf.mxu1 }
 0x110   : > { %v2053_v18 = vadd.f32 %v1799_v13, %v387_v11  ;;  %v3614_v13 = vld [vmem:[%s3781_s9 + $0x384] ss:$16 sps:$4 sm:$0xff]  }
 0x111   : > { %v1512_v19 = vpop.f32.mrf.mxu0  ;;  %v1801_v22 = vpop.f32.mrf.mxu1 }
 0x112   : > { %2118 = vst.msk [vmem:[#allocation2] sm:$0xff] %vm322_vm0, %v2053_v18  ;;  %v1802_v25 = vadd.f32 %v1801_v22, %v1512_v19  ;;  %v3617_v19 = vld [vmem:[%s3781_s9 + $0x38c] ss:$16 sps:$4 sm:$0xff]  }
 0x113   : > { %v1514_v26 = vpop.f32.mrf.mxu0  ;;  %v1803_v28 = vpop.f32.mrf.mxu1 }
 0x114   : > { %v2054_v29 = vadd.f32 %v1802_v25, %v388_v21 }
 0x115   : > { %v1517_v30 = vpop.f32.mrf.mxu0  ;;  %1708 = vmatmul.mubr.bf16.gmra.mxu0 %v3601_v20  ;;  %v1806_v32 = vpop.f32.mrf.mxu1  ;;  %1997 = vmatmul.mubr.bf16.gmra.mxu1 %v3201_v23 }
 0x116   : > { %1715 = vmatprep.mubr.bf16.mxu0 %v3602_v24  ;;  %2119 = vst.msk [vmem:[#allocation2 + $0x8] sm:$0xff] %vm322_vm0, %v2054_v29  ;;  %v1807_v33 = vadd.f32 %v1806_v32, %v1517_v30  ;;  %2004 = vmatprep.mubr.bf16.mxu1 %v3604_v27  ;;  %v393_v27 = vld [vmem:[#allocation2 + $0x30] sm:$0xff] }
 0x117   : > { %v1519_v34 = vpop.f32.mrf.mxu0  ;;  %v1808_v37 = vpop.f32.mrf.mxu1 }
 0x118   : > { %v2055_v38 = vadd.f32 %v1807_v33, %v389_v31 }
 0x119   : > { %v1520_v39 = vpop.f32.mrf.mxu0  ;;  %v2185_v41 = vld [vmem:[#allocation2] sm:$0xff]  ;;  %v1809_v43 = vpop.f32.mrf.mxu1 }
 0x11a   : > { %v3326_v46 = vpack.c.bf16 %v2185_v41, %v2185_v41  ;;  %2120 = vst.msk [vmem:[#allocation2 + $0x10] sm:$0xff] %vm322_vm0, %v2055_v38  ;;  %v1810_v47 = vadd.f32 %v1809_v43, %v1520_v39  ;;  %v2703_v51 = vmul.f32 %v2185_v41, %v2185_v41  ;;  %v2570_v54 = vsel %vm322_vm0, %v2185_v41, 0.0  ;;  %v394_v39 = vld [vmem:[#allocation2 + $0x38] sm:$0xff] }
 0x11b   : > { %v1522_v48 = vpop.f32.mrf.mxu0  ;;  %v1811_v50 = vpop.f32.mrf.mxu1 }
 0x11c   : > { %2506 = vst.msk [vmem:[%s4092_s28] sm:$0xf] %vm2505_vm1, %v3326_v46  ;;  %v2056_v52 = vadd.f32 %v1810_v47, %v390_v42  ;;  %v2767_v3 = vsel %vm322_vm0, %v2703_v51, 0.0  ;;  %v3623_v51 = vld [vmem:[%s3781_s9 + $0x3ac] ss:$16 sps:$4 sm:$0xff]  }
 0x11d   : > { %v1525_v53 = vpop.f32.mrf.mxu0  ;;  %1716 = vmatmul.mubr.bf16.gmra.mxu0 %v3606_v40  ;;  %v2186_v55 = vld [vmem:[#allocation2 + $0x8] sm:$0xff]  ;;  %v1814_v57 = vpop.f32.mrf.mxu1  ;;  %2005 = vmatmul.mubr.bf16.gmra.mxu1 %v3205_v44  ;;  %v3612_v40 = vld [vmem:[%s3781_s9 + $0x380] ss:$16 sps:$4 sm:$0xff]  }
 0x11e   : > { %1723 = vmatprep.mubr.bf16.mxu0 %v3607_v45  ;;  %v3327_v58 = vpack.c.bf16 %v2186_v55, %v2186_v55  ;;  %v2571_v59 = vsel %vm322_vm0, %v2186_v55, 0.0  ;;  %v2704_v60 = vmul.f32 %v2186_v55, %v2186_v55  ;;  %2121 = vst.msk [vmem:[#allocation2 + $0x18] sm:$0xff] %vm322_vm0, %v2056_v52  ;;  %v1815_v61 = vadd.f32 %v1814_v57, %v1525_v53  ;;  %v3615_v44 = vld [vmem:[%s3781_s9 + $0x388] ss:$16 sps:$4 sm:$0xff]   ;;  %v3620_v45 = vld [vmem:[%s3781_s9 + $0x3a4] ss:$16 sps:$4 sm:$0xff]  }
 0x11f   : > { %v1527_v62 = vpop.f32.mrf.mxu0  ;;  %2012 = vmatprep.mubr.bf16.mxu1 %v3609_v49  ;;  %v2572_v1 = vadd.f32 %v2571_v59, %v2570_v54  ;;  %v1816_v2 = vpop.f32.mrf.mxu1  ;;  %v395_v59 = vld [vmem:[#allocation2 + $0x40] sm:$0xff] }
 0x120   : > { %2507 = vst.msk [vmem:[%s4092_s28 + $0x4] sm:$0xf] %vm2505_vm1, %v3327_v58  ;;  %v2768_v4 = vsel %vm322_vm0, %v2704_v60, 0.0  ;;  %v2057_v5 = vadd.f32 %v1815_v61, %v391_v56 }
 0x121   : > { %v1528_v6 = vpop.f32.mrf.mxu0  ;;  %v2769_v8 = vadd.f32 %v2768_v4, %v2767_v3  ;;  %v2187_v9 = vld [vmem:[#allocation2 + $0x10] sm:$0xff]  ;;  %v1817_v11 = vpop.f32.mrf.mxu1 }
 0x122   : > { %v3328_v14 = vpack.c.bf16 %v2187_v9, %v2187_v9  ;;  %v2573_v15 = vsel %vm322_vm0, %v2187_v9, 0.0  ;;  %v2705_v16 = vmul.f32 %v2187_v9, %v2187_v9  ;;  %2122 = vst.msk [vmem:[#allocation2 + $0x20] sm:$0xff] %vm322_vm0, %v2057_v5  ;;  %v1818_v17 = vadd.f32 %v1817_v11, %v1528_v6 }
 0x123   : > { %v1530_v18 = vpop.f32.mrf.mxu0  ;;  %v2574_v20 = vadd.f32 %v2573_v15, %v2572_v1  ;;  %v1819_v21 = vpop.f32.mrf.mxu1 }
 0x124   : > { %2508 = vst.msk [vmem:[%s4092_s28 + $0x8] sm:$0xf] %vm2505_vm1, %v3328_v14  ;;  %v2770_v22 = vsel %vm322_vm0, %v2705_v16, 0.0  ;;  %v2058_v23 = vadd.f32 %v1818_v17, %v392_v10 }
 0x125   : > { %v1533_v24 = vpop.f32.mrf.mxu0  ;;  %1724 = vmatmul.mubr.bf16.gmra.mxu0 %v3611_v7  ;;  %v2771_v25 = vadd.f32 %v2770_v22, %v2769_v8  ;;  %v2188_v26 = vld [vmem:[#allocation2 + $0x18] sm:$0xff]  ;;  %v1822_v28 = vpop.f32.mrf.mxu1  ;;  %2013 = vmatmul.mubr.bf16.gmra.mxu1 %v3209_v12  ;;  %v396_v7 = vld [vmem:[#allocation2 + $0x48] sm:$0xff]  ;;  %v3618_v8 = vld [vmem:[%s3781_s9 + $0x3a0] ss:$16 sps:$4 sm:$0xff]  }
 0x126   : > { %1731 = vmatprep.mubr.bf16.mxu0 %v3614_v13  ;;  %v3329_v29 = vpack.c.bf16 %v2188_v26, %v2188_v26  ;;  %v2575_v30 = vsel %vm322_vm0, %v2188_v26, 0.0  ;;  %v2706_v31 = vmul.f32 %v2188_v26, %v2188_v26  ;;  %2123 = vst.msk [vmem:[#allocation2 + $0x28] sm:$0xff] %vm322_vm0, %v2058_v23  ;;  %v1823_v32 = vadd.f32 %v1822_v28, %v1533_v24  ;;  %v3621_v12 = vld [vmem:[%s3781_s9 + $0x3a8] ss:$16 sps:$4 sm:$0xff]   ;;  %v3626_v13 = vld [vmem:[%s3781_s9 + $0x3c4] ss:$16 sps:$4 sm:$0xff]  }
 0x127   : > { %v1535_v33 = vpop.f32.mrf.mxu0  ;;  %2020 = vmatprep.mubr.bf16.mxu1 %v3617_v19  ;;  %v2576_v34 = vadd.f32 %v2575_v30, %v2574_v20  ;;  %v1824_v35 = vpop.f32.mrf.mxu1  ;;  %v3629_v19 = vld [vmem:[%s3781_s9 + $0x3cc] ss:$16 sps:$4 sm:$0xff]  }
 0x128   : > { %2509 = vst.msk [vmem:[%s4092_s28 + $0xc] sm:$0xf] %vm2505_vm1, %v3329_v29  ;;  %v2772_v36 = vsel %vm322_vm0, %v2706_v31, 0.0  ;;  %v2059_v37 = vadd.f32 %v1823_v32, %v393_v27  ;;  %v397_v27 = vld [vmem:[#allocation2 + $0x50] sm:$0xff] }
 0x129   : > { %v1536_v38 = vpop.f32.mrf.mxu0  ;;  %v2773_v41 = vadd.f32 %v2772_v36, %v2771_v25  ;;  %v2189_v42 = vld [vmem:[#allocation2 + $0x20] sm:$0xff]  ;;  %v1825_v43 = vpop.f32.mrf.mxu1 }
 0x12a   : > { %v3330_v46 = vpack.c.bf16 %v2189_v42, %v2189_v42  ;;  %v2577_v47 = vsel %vm322_vm0, %v2189_v42, 0.0  ;;  %v2707_v48 = vmul.f32 %v2189_v42, %v2189_v42  ;;  %2124 = vst.msk [vmem:[#allocation2 + $0x30] sm:$0xff] %vm322_vm0, %v2059_v37  ;;  %v1826_v49 = vadd.f32 %v1825_v43, %v1536_v38 }
 0x12b   : > { %v1538_v50 = vpop.f32.mrf.mxu0  ;;  %v2578_v52 = vadd.f32 %v2577_v47, %v2576_v34  ;;  %v1827_v53 = vpop.f32.mrf.mxu1 }
 0x12c   : > { %2510 = vst.msk [vmem:[%s4092_s28 + $0x10] sm:$0xf] %vm2505_vm1, %v3330_v46  ;;  %v2774_v54 = vsel %vm322_vm0, %v2707_v48, 0.0  ;;  %v2060_v55 = vadd.f32 %v1826_v49, %v394_v39  ;;  %v398_v39 = vld [vmem:[#allocation2 + $0x58] sm:$0xff] }
 0x12d   : > { %v1541_v56 = vpop.f32.mrf.mxu0  ;;  %1732 = vmatmul.mubr.bf16.gmra.mxu0 %v3612_v40  ;;  %v2775_v57 = vadd.f32 %v2774_v54, %v2773_v41  ;;  %v2190_v58 = vld [vmem:[#allocation2 + $0x28] sm:$0xff]  ;;  %v1830_v60 = vpop.f32.mrf.mxu1  ;;  %2021 = vmatmul.mubr.bf16.gmra.mxu1 %v3615_v44  ;;  %v3624_v40 = vld [vmem:[%s3781_s9 + $0x3c0] ss:$16 sps:$4 sm:$0xff]  }
 0x12e   : > { %1739 = vmatprep.mubr.bf16.mxu0 %v3620_v45  ;;  %v3331_v61 = vpack.c.bf16 %v2190_v58, %v2190_v58  ;;  %v2579_v62 = vsel %vm322_vm0, %v2190_v58, 0.0  ;;  %v2708_v63 = vmul.f32 %v2190_v58, %v2190_v58  ;;  %2125 = vst.msk [vmem:[#allocation2 + $0x38] sm:$0xff] %vm322_vm0, %v2060_v55  ;;  %v1831_v0 = vadd.f32 %v1830_v60, %v1541_v56  ;;  %v3627_v44 = vld [vmem:[%s3781_s9 + $0x3c8] ss:$16 sps:$4 sm:$0xff]   ;;  %v3632_v45 = vld [vmem:[%s3781_s9 + $0x3e4] ss:$16 sps:$4 sm:$0xff]  }
 0x12f   : > { %v1543_v1 = vpop.f32.mrf.mxu0  ;;  %2028 = vmatprep.mubr.bf16.mxu1 %v3623_v51  ;;  %v2580_v2 = vadd.f32 %v2579_v62, %v2578_v52  ;;  %v1832_v3 = vpop.f32.mrf.mxu1  ;;  %v3635_v51 = vld [vmem:[%s3781_s9 + $0x3ec] ss:$16 sps:$4 sm:$0xff]  }
 0x130   : > { %2511 = vst.msk [vmem:[%s4092_s28 + $0x14] sm:$0xf] %vm2505_vm1, %v3331_v61  ;;  %v2776_v4 = vsel %vm322_vm0, %v2708_v63, 0.0  ;;  %v2061_v5 = vadd.f32 %v1831_v0, %v395_v59  ;;  %v399_v59 = vld [vmem:[#allocation2 + $0x60] sm:$0xff] }
 0x131   : > { %v1544_v6 = vpop.f32.mrf.mxu0  ;;  %v2777_v9 = vadd.f32 %v2776_v4, %v2775_v57  ;;  %v2191_v10 = vld [vmem:[#allocation2 + $0x30] sm:$0xff]  ;;  %v1833_v11 = vpop.f32.mrf.mxu1 }
 0x132   : > { %v3332_v14 = vpack.c.bf16 %v2191_v10, %v2191_v10  ;;  %v2581_v15 = vsel %vm322_vm0, %v2191_v10, 0.0  ;;  %v2709_v16 = vmul.f32 %v2191_v10, %v2191_v10  ;;  %2126 = vst.msk [vmem:[#allocation2 + $0x40] sm:$0xff] %vm322_vm0, %v2061_v5  ;;  %v1834_v17 = vadd.f32 %v1833_v11, %v1544_v6  ;;  %v400_v10 = vld [vmem:[#allocation2 + $0x68] sm:$0xff] }
 0x133   : > { %v1546_v18 = vpop.f32.mrf.mxu0  ;;  %v2582_v20 = vadd.f32 %v2581_v15, %v2580_v2  ;;  %v1835_v21 = vpop.f32.mrf.mxu1 }
 0x134   : > { %2512 = vst.msk [vmem:[%s4092_s28 + $0x18] sm:$0xf] %vm2505_vm1, %v3332_v14  ;;  %v2778_v22 = vsel %vm322_vm0, %v2709_v16, 0.0  ;;  %v2062_v23 = vadd.f32 %v1834_v17, %v396_v7  ;;  %v3630_v7 = vld [vmem:[%s3781_s9 + $0x3e0] ss:$16 sps:$4 sm:$0xff]  }
 0x135   : > { %v1549_v24 = vpop.f32.mrf.mxu0  ;;  %1740 = vmatmul.mubr.bf16.gmra.mxu0 %v3618_v8  ;;  %v2779_v25 = vadd.f32 %v2778_v22, %v2777_v9  ;;  %v2192_v26 = vld [vmem:[#allocation2 + $0x38] sm:$0xff]  ;;  %v1838_v28 = vpop.f32.mrf.mxu1  ;;  %2029 = vmatmul.mubr.bf16.gmra.mxu1 %v3621_v12 }
 0x136   : > { %1747 = vmatprep.mubr.bf16.mxu0 %v3626_v13  ;;  %v3333_v29 = vpack.c.bf16 %v2192_v26, %v2192_v26  ;;  %v2583_v30 = vsel %vm322_vm0, %v2192_v26, 0.0  ;;  %v2710_v31 = vmul.f32 %v2192_v26, %v2192_v26  ;;  %2127 = vst.msk [vmem:[#allocation2 + $0x48] sm:$0xff] %vm322_vm0, %v2062_v23  ;;  %v1839_v32 = vadd.f32 %v1838_v28, %v1549_v24  ;;  %v3633_v12 = vld [vmem:[%s3781_s9 + $0x3e8] ss:$16 sps:$4 sm:$0xff]  }
 0x137   : > { %v1551_v33 = vpop.f32.mrf.mxu0  ;;  %2036 = vmatprep.mubr.bf16.mxu1 %v3629_v19  ;;  %v2584_v34 = vadd.f32 %v2583_v30, %v2582_v20  ;;  %v1840_v35 = vpop.f32.mrf.mxu1 }
 0x138   : > { %2513 = vst.msk [vmem:[%s4092_s28 + $0x1c] sm:$0xf] %vm2505_vm1, %v3333_v29  ;;  %v2780_v36 = vsel %vm322_vm0, %v2710_v31, 0.0  ;;  %v2063_v37 = vadd.f32 %v1839_v32, %v397_v27 }
 0x139   : > { %v1552_v38 = vpop.f32.mrf.mxu0  ;;  %v2781_v41 = vadd.f32 %v2780_v36, %v2779_v25  ;;  %v2193_v42 = vld [vmem:[#allocation2 + $0x40] sm:$0xff]  ;;  %v1841_v43 = vpop.f32.mrf.mxu1  ;;  %v401_v25 = vld [vmem:[#allocation2 + $0x70] sm:$0xff] }
 0x13a   : > { %v3334_v46 = vpack.c.bf16 %v2193_v42, %v2193_v42  ;;  %v2585_v47 = vsel %vm322_vm0, %v2193_v42, 0.0  ;;  %v2711_v48 = vmul.f32 %v2193_v42, %v2193_v42  ;;  %2128 = vst.msk [vmem:[#allocation2 + $0x50] sm:$0xff] %vm322_vm0, %v2063_v37  ;;  %v1842_v49 = vadd.f32 %v1841_v43, %v1552_v38 }
 0x13b   : > { %v1554_v50 = vpop.f32.mrf.mxu0  ;;  %v2586_v52 = vadd.f32 %v2585_v47, %v2584_v34  ;;  %v1843_v53 = vpop.f32.mrf.mxu1 }
 0x13c   : > { %2514 = vst.msk [vmem:[%s4092_s28 + $0x20] sm:$0xf] %vm2505_vm1, %v3334_v46  ;;  %v2782_v54 = vsel %vm322_vm0, %v2711_v48, 0.0  ;;  %v2064_v55 = vadd.f32 %v1842_v49, %v398_v39  ;;  %v402_v39 = vld [vmem:[#allocation2 + $0x78] sm:$0xff]  ;;  %v403_v53 = vld [vmem:[#allocation2 + $0x80] sm:$0xff] }
 0x13d   : > { %v1557_v56 = vpop.f32.mrf.mxu0  ;;  %1748 = vmatmul.mubr.bf16.gmra.mxu0 %v3624_v40  ;;  %v2783_v57 = vadd.f32 %v2782_v54, %v2781_v41  ;;  %v2194_v58 = vld [vmem:[#allocation2 + $0x48] sm:$0xff]  ;;  %v1846_v60 = vpop.f32.mrf.mxu1  ;;  %2037 = vmatmul.mubr.bf16.gmra.mxu1 %v3627_v44 }
 0x13e   : > { %1755 = vmatprep.mubr.bf16.mxu0 %v3632_v45  ;;  %v3335_v61 = vpack.c.bf16 %v2194_v58, %v2194_v58  ;;  %v2587_v62 = vsel %vm322_vm0, %v2194_v58, 0.0  ;;  %v2712_v63 = vmul.f32 %v2194_v58, %v2194_v58  ;;  %2129 = vst.msk [vmem:[#allocation2 + $0x58] sm:$0xff] %vm322_vm0, %v2064_v55  ;;  %v1847_v0 = vadd.f32 %v1846_v60, %v1557_v56 }
 0x13f   : > { %v1559_v1 = vpop.f32.mrf.mxu0  ;;  %2044 = vmatprep.mubr.bf16.mxu1 %v3635_v51  ;;  %v2588_v2 = vadd.f32 %v2587_v62, %v2586_v52  ;;  %v1848_v3 = vpop.f32.mrf.mxu1 }
 0x140   : > { %2515 = vst.msk [vmem:[%s4092_s28 + $0x24] sm:$0xf] %vm2505_vm1, %v3335_v61  ;;  %v2784_v4 = vsel %vm322_vm0, %v2712_v63, 0.0  ;;  %v2065_v5 = vadd.f32 %v1847_v0, %v399_v59  ;;  %v404_v3 = vld [vmem:[#allocation2 + $0x88] sm:$0xff] }
 0x141   : > { %v1560_v6 = vpop.f32.mrf.mxu0  ;;  %v2785_v8 = vadd.f32 %v2784_v4, %v2783_v57  ;;  %v2195_v9 = vld [vmem:[#allocation2 + $0x50] sm:$0xff]  ;;  %v1849_v11 = vpop.f32.mrf.mxu1 }
 0x142   : > { %v3336_v13 = vpack.c.bf16 %v2195_v9, %v2195_v9  ;;  %v2589_v14 = vsel %vm322_vm0, %v2195_v9, 0.0  ;;  %v2713_v15 = vmul.f32 %v2195_v9, %v2195_v9  ;;  %2130 = vst.msk [vmem:[#allocation2 + $0x60] sm:$0xff] %vm322_vm0, %v2065_v5  ;;  %v1850_v16 = vadd.f32 %v1849_v11, %v1560_v6 }
 0x143   : > { %v1562_v17 = vpop.f32.mrf.mxu0  ;;  %v2590_v18 = vadd.f32 %v2589_v14, %v2588_v2  ;;  %v1851_v19 = vpop.f32.mrf.mxu1 }
 0x144   : > { %2516 = vst.msk [vmem:[%s4092_s28 + $0x28] sm:$0xf] %vm2505_vm1, %v3336_v13  ;;  %v2786_v20 = vsel %vm322_vm0, %v2713_v15, 0.0  ;;  %v2066_v21 = vadd.f32 %v1850_v16, %v400_v10  ;;  %v405_v17 = vld [vmem:[#allocation2 + $0x90] sm:$0xff] }
 0x145   : > { %v1565_v22 = vpop.f32.mrf.mxu0  ;;  %1756 = vmatmul.mubr.bf16.gmra.mxu0 %v3630_v7  ;;  %v2787_v23 = vadd.f32 %v2786_v20, %v2785_v8  ;;  %v2196_v24 = vld [vmem:[#allocation2 + $0x58] sm:$0xff]  ;;  %v1854_v26 = vpop.f32.mrf.mxu1  ;;  %2045 = vmatmul.mubr.bf16.gmra.mxu1 %v3633_v12 }
 0x146   : > { %v3337_v27 = vpack.c.bf16 %v2196_v24, %v2196_v24  ;;  %v2591_v28 = vsel %vm322_vm0, %v2196_v24, 0.0  ;;  %v2714_v29 = vmul.f32 %v2196_v24, %v2196_v24  ;;  %2131 = vst.msk [vmem:[#allocation2 + $0x68] sm:$0xff] %vm322_vm0, %v2066_v21  ;;  %v1855_v30 = vadd.f32 %v1854_v26, %v1565_v22 }
 0x147   : > { %v1567_v31 = vpop.f32.mrf.mxu0  ;;  %v2592_v32 = vadd.f32 %v2591_v28, %v2590_v18  ;;  %v1856_v33 = vpop.f32.mrf.mxu1 }
 0x148   : > { %2517 = vst.msk [vmem:[%s4092_s28 + $0x2c] sm:$0xf] %vm2505_vm1, %v3337_v27  ;;  %v2788_v34 = vsel %vm322_vm0, %v2714_v29, 0.0  ;;  %v2067_v35 = vadd.f32 %v1855_v30, %v401_v25  ;;  %v406_v31 = vld [vmem:[#allocation2 + $0x98] sm:$0xff] }
 0x149   : > { %v1568_v36 = vpop.f32.mrf.mxu0  ;;  %v2789_v37 = vadd.f32 %v2788_v34, %v2787_v23  ;;  %v2197_v38 = vld [vmem:[#allocation2 + $0x60] sm:$0xff]  ;;  %v1857_v40 = vpop.f32.mrf.mxu1 }
 0x14a   : > { %v3338_v41 = vpack.c.bf16 %v2197_v38, %v2197_v38  ;;  %v2593_v42 = vsel %vm322_vm0, %v2197_v38, 0.0  ;;  %v2715_v43 = vmul.f32 %v2197_v38, %v2197_v38  ;;  %2132 = vst.msk [vmem:[#allocation2 + $0x70] sm:$0xff] %vm322_vm0, %v2067_v35  ;;  %v1858_v44 = vadd.f32 %v1857_v40, %v1568_v36 }
 0x14b   : > { %v1570_v45 = vpop.f32.mrf.mxu0  ;;  %v2594_v46 = vadd.f32 %v2593_v42, %v2592_v32  ;;  %v1859_v47 = vpop.f32.mrf.mxu1 }
 0x14c   : > { %2518 = vst.msk [vmem:[%s4092_s28 + $0x30] sm:$0xf] %vm2505_vm1, %v3338_v41  ;;  %v2790_v48 = vsel %vm322_vm0, %v2715_v43, 0.0  ;;  %v2068_v49 = vadd.f32 %v1858_v44, %v402_v39  ;;  %v407_v45 = vld [vmem:[#allocation2 + $0xa0] sm:$0xff] }
 0x14d   : > { %v1573_v50 = vpop.f32.mrf.mxu0  ;;  %v2791_v51 = vadd.f32 %v2790_v48, %v2789_v37  ;;  %v2198_v52 = vld [vmem:[#allocation2 + $0x68] sm:$0xff]  ;;  %v1862_v54 = vpop.f32.mrf.mxu1 }
 0x14e   : > { %v3339_v55 = vpack.c.bf16 %v2198_v52, %v2198_v52  ;;  %v2595_v56 = vsel %vm322_vm0, %v2198_v52, 0.0  ;;  %v2716_v57 = vmul.f32 %v2198_v52, %v2198_v52  ;;  %2133 = vst.msk [vmem:[#allocation2 + $0x78] sm:$0xff] %vm322_vm0, %v2068_v49  ;;  %v1863_v58 = vadd.f32 %v1862_v54, %v1573_v50 }
 0x14f   : > { %v1575_v59 = vpop.f32.mrf.mxu0  ;;  %v2596_v60 = vadd.f32 %v2595_v56, %v2594_v46  ;;  %v1864_v61 = vpop.f32.mrf.mxu1 }
 0x150   : > { %2519 = vst.msk [vmem:[%s4092_s28 + $0x34] sm:$0xf] %vm2505_vm1, %v3339_v55  ;;  %v2792_v62 = vsel %vm322_vm0, %v2716_v57, 0.0  ;;  %v2069_v63 = vadd.f32 %v1863_v58, %v403_v53  ;;  %v408_v59 = vld [vmem:[#allocation2 + $0xa8] sm:$0xff] }
 0x151   : > { %v1576_v0 = vpop.f32.mrf.mxu0  ;;  %v2793_v1 = vadd.f32 %v2792_v62, %v2791_v51  ;;  %v2199_v2 = vld [vmem:[#allocation2 + $0x70] sm:$0xff]  ;;  %v1865_v4 = vpop.f32.mrf.mxu1 }
 0x152   : > { %v3340_v5 = vpack.c.bf16 %v2199_v2, %v2199_v2  ;;  %v2597_v6 = vsel %vm322_vm0, %v2199_v2, 0.0  ;;  %v2717_v7 = vmul.f32 %v2199_v2, %v2199_v2  ;;  %2134 = vst.msk [vmem:[#allocation2 + $0x80] sm:$0xff] %vm322_vm0, %v2069_v63  ;;  %v1866_v8 = vadd.f32 %v1865_v4, %v1576_v0 }
 0x153   : > { %v1578_v9 = vpop.f32.mrf.mxu0  ;;  %v2598_v10 = vadd.f32 %v2597_v6, %v2596_v60  ;;  %v1867_v11 = vpop.f32.mrf.mxu1 }
 0x154   : > { %2520 = vst.msk [vmem:[%s4092_s28 + $0x38] sm:$0xf] %vm2505_vm1, %v3340_v5  ;;  %v2794_v12 = vsel %vm322_vm0, %v2717_v7, 0.0  ;;  %v2070_v13 = vadd.f32 %v1866_v8, %v404_v3  ;;  %v409_v9 = vld [vmem:[#allocation2 + $0xb0] sm:$0xff] }
 0x155   : > { %v1581_v14 = vpop.f32.mrf.mxu0  ;;  %v2795_v15 = vadd.f32 %v2794_v12, %v2793_v1  ;;  %v2200_v16 = vld [vmem:[#allocation2 + $0x78] sm:$0xff]  ;;  %v1870_v18 = vpop.f32.mrf.mxu1 }
 0x156   : > { %v3341_v19 = vpack.c.bf16 %v2200_v16, %v2200_v16  ;;  %v2599_v20 = vsel %vm322_vm0, %v2200_v16, 0.0  ;;  %v2718_v21 = vmul.f32 %v2200_v16, %v2200_v16  ;;  %2135 = vst.msk [vmem:[#allocation2 + $0x88] sm:$0xff] %vm322_vm0, %v2070_v13  ;;  %v1871_v22 = vadd.f32 %v1870_v18, %v1581_v14 }
 0x157   : > { %v1583_v23 = vpop.f32.mrf.mxu0  ;;  %v2600_v24 = vadd.f32 %v2599_v20, %v2598_v10  ;;  %v1872_v25 = vpop.f32.mrf.mxu1 }
 0x158   : > { %2521 = vst.msk [vmem:[%s4092_s28 + $0x3c] sm:$0xf] %vm2505_vm1, %v3341_v19  ;;  %v2796_v26 = vsel %vm322_vm0, %v2718_v21, 0.0  ;;  %v2071_v27 = vadd.f32 %v1871_v22, %v405_v17  ;;  %v410_v23 = vld [vmem:[#allocation2 + $0xb8] sm:$0xff] }
 0x159   : > { %v1584_v28 = vpop.f32.mrf.mxu0  ;;  %v2797_v29 = vadd.f32 %v2796_v26, %v2795_v15  ;;  %v2201_v30 = vld [vmem:[#allocation2 + $0x80] sm:$0xff]  ;;  %v1873_v32 = vpop.f32.mrf.mxu1 }
 0x15a   : > { %v3342_v33 = vpack.c.bf16 %v2201_v30, %v2201_v30  ;;  %v2601_v34 = vsel %vm322_vm0, %v2201_v30, 0.0  ;;  %v2719_v35 = vmul.f32 %v2201_v30, %v2201_v30  ;;  %2136 = vst.msk [vmem:[#allocation2 + $0x90] sm:$0xff] %vm322_vm0, %v2071_v27  ;;  %v1874_v36 = vadd.f32 %v1873_v32, %v1584_v28 }
 0x15b   : > { %v1586_v37 = vpop.f32.mrf.mxu0  ;;  %v2602_v38 = vadd.f32 %v2601_v34, %v2600_v24  ;;  %v1875_v39 = vpop.f32.mrf.mxu1 }
 0x15c   : > { %2522 = vst.msk [vmem:[%s4092_s28 + $0x40] sm:$0xf] %vm2505_vm1, %v3342_v33  ;;  %v2798_v40 = vsel %vm322_vm0, %v2719_v35, 0.0  ;;  %v2072_v41 = vadd.f32 %v1874_v36, %v406_v31  ;;  %v411_v37 = vld [vmem:[#allocation2 + $0xc0] sm:$0xff] }
 0x15d   : > { %v1589_v42 = vpop.f32.mrf.mxu0  ;;  %v2799_v43 = vadd.f32 %v2798_v40, %v2797_v29  ;;  %v2202_v44 = vld [vmem:[#allocation2 + $0x88] sm:$0xff]  ;;  %v1878_v46 = vpop.f32.mrf.mxu1 }
 0x15e   : > { %v3343_v47 = vpack.c.bf16 %v2202_v44, %v2202_v44  ;;  %v2603_v48 = vsel %vm322_vm0, %v2202_v44, 0.0  ;;  %v2720_v49 = vmul.f32 %v2202_v44, %v2202_v44  ;;  %2137 = vst.msk [vmem:[#allocation2 + $0x98] sm:$0xff] %vm322_vm0, %v2072_v41  ;;  %v1879_v50 = vadd.f32 %v1878_v46, %v1589_v42 }
 0x15f   : > { %v1591_v51 = vpop.f32.mrf.mxu0  ;;  %v2604_v52 = vadd.f32 %v2603_v48, %v2602_v38  ;;  %v1880_v53 = vpop.f32.mrf.mxu1 }
 0x160   : > { %2523 = vst.msk [vmem:[%s4092_s28 + $0x44] sm:$0xf] %vm2505_vm1, %v3343_v47  ;;  %v2800_v54 = vsel %vm322_vm0, %v2720_v49, 0.0  ;;  %v2073_v55 = vadd.f32 %v1879_v50, %v407_v45  ;;  %v412_v51 = vld [vmem:[#allocation2 + $0xc8] sm:$0xff] }
 0x161   : > { %v1592_v56 = vpop.f32.mrf.mxu0  ;;  %v2801_v57 = vadd.f32 %v2800_v54, %v2799_v43  ;;  %v2203_v58 = vld [vmem:[#allocation2 + $0x90] sm:$0xff]  ;;  %v1881_v60 = vpop.f32.mrf.mxu1 }
 0x162   : > { %v3344_v61 = vpack.c.bf16 %v2203_v58, %v2203_v58  ;;  %v2605_v62 = vsel %vm322_vm0, %v2203_v58, 0.0  ;;  %v2721_v63 = vmul.f32 %v2203_v58, %v2203_v58  ;;  %2138 = vst.msk [vmem:[#allocation2 + $0xa0] sm:$0xff] %vm322_vm0, %v2073_v55  ;;  %v1882_v0 = vadd.f32 %v1881_v60, %v1592_v56 }
 0x163   : > { %v1594_v1 = vpop.f32.mrf.mxu0  ;;  %v2606_v2 = vadd.f32 %v2605_v62, %v2604_v52  ;;  %v1883_v3 = vpop.f32.mrf.mxu1 }
 0x164   : > { %2524 = vst.msk [vmem:[%s4092_s28 + $0x48] sm:$0xf] %vm2505_vm1, %v3344_v61  ;;  %v2802_v4 = vsel %vm322_vm0, %v2721_v63, 0.0  ;;  %v2074_v5 = vadd.f32 %v1882_v0, %v408_v59  ;;  %v413_v1 = vld [vmem:[#allocation2 + $0xd0] sm:$0xff] }
 0x165   : > { %v1597_v6 = vpop.f32.mrf.mxu0  ;;  %v2803_v7 = vadd.f32 %v2802_v4, %v2801_v57  ;;  %v2204_v8 = vld [vmem:[#allocation2 + $0x98] sm:$0xff]  ;;  %v1886_v10 = vpop.f32.mrf.mxu1 }
 0x166   : > { %v3345_v11 = vpack.c.bf16 %v2204_v8, %v2204_v8  ;;  %v2607_v12 = vsel %vm322_vm0, %v2204_v8, 0.0  ;;  %v2722_v13 = vmul.f32 %v2204_v8, %v2204_v8  ;;  %2139 = vst.msk [vmem:[#allocation2 + $0xa8] sm:$0xff] %vm322_vm0, %v2074_v5  ;;  %v1887_v14 = vadd.f32 %v1886_v10, %v1597_v6 }
 0x167   : > { %v1599_v15 = vpop.f32.mrf.mxu0  ;;  %v2608_v16 = vadd.f32 %v2607_v12, %v2606_v2  ;;  %v1888_v17 = vpop.f32.mrf.mxu1 }
 0x168   : > { %2525 = vst.msk [vmem:[%s4092_s28 + $0x4c] sm:$0xf] %vm2505_vm1, %v3345_v11  ;;  %v2804_v18 = vsel %vm322_vm0, %v2722_v13, 0.0  ;;  %v2075_v19 = vadd.f32 %v1887_v14, %v409_v9  ;;  %v414_v15 = vld [vmem:[#allocation2 + $0xd8] sm:$0xff] }
 0x169   : > { %v1600_v20 = vpop.f32.mrf.mxu0  ;;  %v2805_v21 = vadd.f32 %v2804_v18, %v2803_v7  ;;  %v2205_v22 = vld [vmem:[#allocation2 + $0xa0] sm:$0xff]  ;;  %v1889_v24 = vpop.f32.mrf.mxu1 }
 0x16a   : > { %v3346_v25 = vpack.c.bf16 %v2205_v22, %v2205_v22  ;;  %v2609_v26 = vsel %vm322_vm0, %v2205_v22, 0.0  ;;  %v2723_v27 = vmul.f32 %v2205_v22, %v2205_v22  ;;  %2140 = vst.msk [vmem:[#allocation2 + $0xb0] sm:$0xff] %vm322_vm0, %v2075_v19  ;;  %v1890_v28 = vadd.f32 %v1889_v24, %v1600_v20 }
 0x16b   : > { %v1602_v29 = vpop.f32.mrf.mxu0  ;;  %v2610_v30 = vadd.f32 %v2609_v26, %v2608_v16  ;;  %v1891_v31 = vpop.f32.mrf.mxu1 }
 0x16c   : > { %2526 = vst.msk [vmem:[%s4092_s28 + $0x50] sm:$0xf] %vm2505_vm1, %v3346_v25  ;;  %v2806_v32 = vsel %vm322_vm0, %v2723_v27, 0.0  ;;  %v2076_v33 = vadd.f32 %v1890_v28, %v410_v23  ;;  %v415_v29 = vld [vmem:[#allocation2 + $0xe0] sm:$0xff] }
 0x16d   : > { %v1605_v34 = vpop.f32.mrf.mxu0  ;;  %v2807_v35 = vadd.f32 %v2806_v32, %v2805_v21  ;;  %v2206_v36 = vld [vmem:[#allocation2 + $0xa8] sm:$0xff]  ;;  %v1894_v38 = vpop.f32.mrf.mxu1 }
 0x16e   : > { %v3347_v39 = vpack.c.bf16 %v2206_v36, %v2206_v36  ;;  %v2611_v40 = vsel %vm322_vm0, %v2206_v36, 0.0  ;;  %v2724_v41 = vmul.f32 %v2206_v36, %v2206_v36  ;;  %2141 = vst.msk [vmem:[#allocation2 + $0xb8] sm:$0xff] %vm322_vm0, %v2076_v33  ;;  %v1895_v42 = vadd.f32 %v1894_v38, %v1605_v34 }
 0x16f   : > { %v1607_v43 = vpop.f32.mrf.mxu0  ;;  %v2612_v44 = vadd.f32 %v2611_v40, %v2610_v30  ;;  %v1896_v45 = vpop.f32.mrf.mxu1 }
 0x170   : > { %2527 = vst.msk [vmem:[%s4092_s28 + $0x54] sm:$0xf] %vm2505_vm1, %v3347_v39  ;;  %v2808_v46 = vsel %vm322_vm0, %v2724_v41, 0.0  ;;  %v2077_v47 = vadd.f32 %v1895_v42, %v411_v37  ;;  %v416_v43 = vld [vmem:[#allocation2 + $0xe8] sm:$0xff] }
 0x171   : > { %v1608_v48 = vpop.f32.mrf.mxu0  ;;  %v2809_v49 = vadd.f32 %v2808_v46, %v2807_v35  ;;  %v2207_v50 = vld [vmem:[#allocation2 + $0xb0] sm:$0xff]  ;;  %v1897_v52 = vpop.f32.mrf.mxu1 }
 0x172   : > { %v3348_v53 = vpack.c.bf16 %v2207_v50, %v2207_v50  ;;  %v2613_v54 = vsel %vm322_vm0, %v2207_v50, 0.0  ;;  %v2725_v55 = vmul.f32 %v2207_v50, %v2207_v50  ;;  %2142 = vst.msk [vmem:[#allocation2 + $0xc0] sm:$0xff] %vm322_vm0, %v2077_v47  ;;  %v1898_v56 = vadd.f32 %v1897_v52, %v1608_v48 }
 0x173   : > { %v1610_v57 = vpop.f32.mrf.mxu0  ;;  %v2614_v58 = vadd.f32 %v2613_v54, %v2612_v44  ;;  %v1899_v59 = vpop.f32.mrf.mxu1 }
 0x174   : > { %2528 = vst.msk [vmem:[%s4092_s28 + $0x58] sm:$0xf] %vm2505_vm1, %v3348_v53  ;;  %v2810_v60 = vsel %vm322_vm0, %v2725_v55, 0.0  ;;  %v2078_v61 = vadd.f32 %v1898_v56, %v412_v51  ;;  %v417_v57 = vld [vmem:[#allocation2 + $0xf0] sm:$0xff] }
 0x175   : > { %v1613_v62 = vpop.f32.mrf.mxu0  ;;  %v2811_v63 = vadd.f32 %v2810_v60, %v2809_v49  ;;  %v2208_v0 = vld [vmem:[#allocation2 + $0xb8] sm:$0xff]  ;;  %v1902_v2 = vpop.f32.mrf.mxu1 }
 0x176   : > { %v3349_v3 = vpack.c.bf16 %v2208_v0, %v2208_v0  ;;  %v2615_v4 = vsel %vm322_vm0, %v2208_v0, 0.0  ;;  %v2726_v5 = vmul.f32 %v2208_v0, %v2208_v0  ;;  %2143 = vst.msk [vmem:[#allocation2 + $0xc8] sm:$0xff] %vm322_vm0, %v2078_v61  ;;  %v1903_v6 = vadd.f32 %v1902_v2, %v1613_v62 }
 0x177   : > { %v1615_v7 = vpop.f32.mrf.mxu0  ;;  %v2616_v8 = vadd.f32 %v2615_v4, %v2614_v58  ;;  %v1904_v9 = vpop.f32.mrf.mxu1 }
 0x178   : > { %2529 = vst.msk [vmem:[%s4092_s28 + $0x5c] sm:$0xf] %vm2505_vm1, %v3349_v3  ;;  %v2812_v10 = vsel %vm322_vm0, %v2726_v5, 0.0  ;;  %v2079_v11 = vadd.f32 %v1903_v6, %v413_v1  ;;  %v418_v7 = vld [vmem:[#allocation2 + $0xf8] sm:$0xff] }
 0x179   : > { %v1616_v12 = vpop.f32.mrf.mxu0  ;;  %v2813_v13 = vadd.f32 %v2812_v10, %v2811_v63  ;;  %v2209_v14 = vld [vmem:[#allocation2 + $0xc0] sm:$0xff]  ;;  %v1905_v16 = vpop.f32.mrf.mxu1 }
 0x17a   : > { %v3350_v17 = vpack.c.bf16 %v2209_v14, %v2209_v14  ;;  %v2617_v18 = vsel %vm322_vm0, %v2209_v14, 0.0  ;;  %v2727_v19 = vmul.f32 %v2209_v14, %v2209_v14  ;;  %2144 = vst.msk [vmem:[#allocation2 + $0xd0] sm:$0xff] %vm322_vm0, %v2079_v11  ;;  %v1906_v20 = vadd.f32 %v1905_v16, %v1616_v12 }
 0x17b   : > { %v1618_v21 = vpop.f32.mrf.mxu0  ;;  %v2618_v22 = vadd.f32 %v2617_v18, %v2616_v8  ;;  %v1907_v23 = vpop.f32.mrf.mxu1 }
 0x17c   : > { %2530 = vst.msk [vmem:[%s4092_s28 + $0x60] sm:$0xf] %vm2505_vm1, %v3350_v17  ;;  %v2814_v24 = vsel %vm322_vm0, %v2727_v19, 0.0  ;;  %v2080_v25 = vadd.f32 %v1906_v20, %v414_v15  ;;  %v419_v21 = vld [vmem:[#allocation2 + $0x100] sm:$0xff] }
 0x17d   : > { %v1621_v26 = vpop.f32.mrf.mxu0  ;;  %v2815_v27 = vadd.f32 %v2814_v24, %v2813_v13  ;;  %v2210_v28 = vld [vmem:[#allocation2 + $0xc8] sm:$0xff]  ;;  %v1910_v30 = vpop.f32.mrf.mxu1 }
 0x17e   : > { %v3351_v31 = vpack.c.bf16 %v2210_v28, %v2210_v28  ;;  %v2619_v32 = vsel %vm322_vm0, %v2210_v28, 0.0  ;;  %v2728_v33 = vmul.f32 %v2210_v28, %v2210_v28  ;;  %2145 = vst.msk [vmem:[#allocation2 + $0xd8] sm:$0xff] %vm322_vm0, %v2080_v25  ;;  %v1911_v34 = vadd.f32 %v1910_v30, %v1621_v26 }
 0x17f   : > { %v1623_v35 = vpop.f32.mrf.mxu0  ;;  %v2620_v36 = vadd.f32 %v2619_v32, %v2618_v22  ;;  %v1912_v37 = vpop.f32.mrf.mxu1 }
 0x180   : > { %2531 = vst.msk [vmem:[%s4092_s28 + $0x64] sm:$0xf] %vm2505_vm1, %v3351_v31  ;;  %v2816_v38 = vsel %vm322_vm0, %v2728_v33, 0.0  ;;  %v2081_v39 = vadd.f32 %v1911_v34, %v415_v29  ;;  %v420_v35 = vld [vmem:[#allocation2 + $0x108] sm:$0xff] }
 0x181   : > { %v1624_v40 = vpop.f32.mrf.mxu0  ;;  %v2817_v41 = vadd.f32 %v2816_v38, %v2815_v27  ;;  %v2211_v42 = vld [vmem:[#allocation2 + $0xd0] sm:$0xff]  ;;  %v1913_v44 = vpop.f32.mrf.mxu1 }
 0x182   : > { %v3352_v45 = vpack.c.bf16 %v2211_v42, %v2211_v42  ;;  %v2621_v46 = vsel %vm322_vm0, %v2211_v42, 0.0  ;;  %v2729_v47 = vmul.f32 %v2211_v42, %v2211_v42  ;;  %2146 = vst.msk [vmem:[#allocation2 + $0xe0] sm:$0xff] %vm322_vm0, %v2081_v39  ;;  %v1914_v48 = vadd.f32 %v1913_v44, %v1624_v40 }
 0x183   : > { %v1626_v49 = vpop.f32.mrf.mxu0  ;;  %v2622_v50 = vadd.f32 %v2621_v46, %v2620_v36  ;;  %v1915_v51 = vpop.f32.mrf.mxu1 }
 0x184   : > { %2532 = vst.msk [vmem:[%s4092_s28 + $0x68] sm:$0xf] %vm2505_vm1, %v3352_v45  ;;  %v2818_v52 = vsel %vm322_vm0, %v2729_v47, 0.0  ;;  %v2082_v53 = vadd.f32 %v1914_v48, %v416_v43  ;;  %v421_v49 = vld [vmem:[#allocation2 + $0x110] sm:$0xff] }
 0x185   : > { %v1629_v54 = vpop.f32.mrf.mxu0  ;;  %v2819_v55 = vadd.f32 %v2818_v52, %v2817_v41  ;;  %v2212_v56 = vld [vmem:[#allocation2 + $0xd8] sm:$0xff]  ;;  %v1918_v58 = vpop.f32.mrf.mxu1 }
 0x186   : > { %v3353_v59 = vpack.c.bf16 %v2212_v56, %v2212_v56  ;;  %v2623_v60 = vsel %vm322_vm0, %v2212_v56, 0.0  ;;  %v2730_v61 = vmul.f32 %v2212_v56, %v2212_v56  ;;  %2147 = vst.msk [vmem:[#allocation2 + $0xe8] sm:$0xff] %vm322_vm0, %v2082_v53  ;;  %v1919_v62 = vadd.f32 %v1918_v58, %v1629_v54 }
 0x187   : > { %v1631_v63 = vpop.f32.mrf.mxu0  ;;  %v2624_v0 = vadd.f32 %v2623_v60, %v2622_v50  ;;  %v1920_v1 = vpop.f32.mrf.mxu1 }
 0x188   : > { %2533 = vst.msk [vmem:[%s4092_s28 + $0x6c] sm:$0xf] %vm2505_vm1, %v3353_v59  ;;  %v2820_v2 = vsel %vm322_vm0, %v2730_v61, 0.0  ;;  %v2083_v3 = vadd.f32 %v1919_v62, %v417_v57  ;;  %v422_v63 = vld [vmem:[#allocation2 + $0x118] sm:$0xff] }
 0x189   : > { %v1632_v4 = vpop.f32.mrf.mxu0  ;;  %v2821_v5 = vadd.f32 %v2820_v2, %v2819_v55  ;;  %v2213_v6 = vld [vmem:[#allocation2 + $0xe0] sm:$0xff]  ;;  %v1921_v8 = vpop.f32.mrf.mxu1 }
 0x18a   : > { %v3354_v9 = vpack.c.bf16 %v2213_v6, %v2213_v6  ;;  %v2625_v10 = vsel %vm322_vm0, %v2213_v6, 0.0  ;;  %v2731_v11 = vmul.f32 %v2213_v6, %v2213_v6  ;;  %2148 = vst.msk [vmem:[#allocation2 + $0xf0] sm:$0xff] %vm322_vm0, %v2083_v3  ;;  %v1922_v12 = vadd.f32 %v1921_v8, %v1632_v4  ;;  %v423_v8 = vld [vmem:[#allocation2 + $0x120] sm:$0xff] }
 0x18b   : > { %v1634_v13 = vpop.f32.mrf.mxu0  ;;  %v2626_v14 = vadd.f32 %v2625_v10, %v2624_v0  ;;  %v1923_v15 = vpop.f32.mrf.mxu1 }
 0x18c   : > { %2534 = vst.msk [vmem:[%s4092_s28 + $0x70] sm:$0xf] %vm2505_vm1, %v3354_v9  ;;  %v2822_v16 = vsel %vm322_vm0, %v2731_v11, 0.0  ;;  %v2084_v17 = vadd.f32 %v1922_v12, %v418_v7 }
 0x18d   : > { %v1637_v18 = vpop.f32.mrf.mxu0  ;;  %v2823_v19 = vadd.f32 %v2822_v16, %v2821_v5  ;;  %v2214_v20 = vld [vmem:[#allocation2 + $0xe8] sm:$0xff]  ;;  %v1926_v22 = vpop.f32.mrf.mxu1 }
 0x18e   : > { %v3355_v23 = vpack.c.bf16 %v2214_v20, %v2214_v20  ;;  %v2627_v24 = vsel %vm322_vm0, %v2214_v20, 0.0  ;;  %v2732_v25 = vmul.f32 %v2214_v20, %v2214_v20  ;;  %2149 = vst.msk [vmem:[#allocation2 + $0xf8] sm:$0xff] %vm322_vm0, %v2084_v17  ;;  %v1927_v26 = vadd.f32 %v1926_v22, %v1637_v18  ;;  %v424_v17 = vld [vmem:[#allocation2 + $0x128] sm:$0xff] }
 0x18f   : > { %v1639_v27 = vpop.f32.mrf.mxu0  ;;  %v2628_v28 = vadd.f32 %v2627_v24, %v2626_v14  ;;  %v1928_v29 = vpop.f32.mrf.mxu1 }
 0x190   : > { %2535 = vst.msk [vmem:[%s4092_s28 + $0x74] sm:$0xf] %vm2505_vm1, %v3355_v23  ;;  %v2824_v30 = vsel %vm322_vm0, %v2732_v25, 0.0  ;;  %v2085_v31 = vadd.f32 %v1927_v26, %v419_v21  ;;  %v425_v26 = vld [vmem:[#allocation2 + $0x130] sm:$0xff] }
 0x191   : > { %v1640_v32 = vpop.f32.mrf.mxu0  ;;  %v2825_v33 = vadd.f32 %v2824_v30, %v2823_v19  ;;  %v2215_v34 = vld [vmem:[#allocation2 + $0xf0] sm:$0xff]  ;;  %v1929_v36 = vpop.f32.mrf.mxu1 }
 0x192   : > { %v3356_v37 = vpack.c.bf16 %v2215_v34, %v2215_v34  ;;  %v2629_v38 = vsel %vm322_vm0, %v2215_v34, 0.0  ;;  %v2733_v39 = vmul.f32 %v2215_v34, %v2215_v34  ;;  %2150 = vst.msk [vmem:[#allocation2 + $0x100] sm:$0xff] %vm322_vm0, %v2085_v31  ;;  %v1930_v40 = vadd.f32 %v1929_v36, %v1640_v32 }
 0x193   : > { %v1642_v41 = vpop.f32.mrf.mxu0  ;;  %v2630_v42 = vadd.f32 %v2629_v38, %v2628_v28  ;;  %v1931_v43 = vpop.f32.mrf.mxu1 }
 0x194   : > { %2536 = vst.msk [vmem:[%s4092_s28 + $0x78] sm:$0xf] %vm2505_vm1, %v3356_v37  ;;  %v2826_v44 = vsel %vm322_vm0, %v2733_v39, 0.0  ;;  %v2086_v45 = vadd.f32 %v1930_v40, %v420_v35  ;;  %v426_v35 = vld [vmem:[#allocation2 + $0x138] sm:$0xff] }
 0x195   : > { %v1645_v46 = vpop.f32.mrf.mxu0  ;;  %v2827_v47 = vadd.f32 %v2826_v44, %v2825_v33  ;;  %v2216_v48 = vld [vmem:[#allocation2 + $0xf8] sm:$0xff]  ;;  %v1934_v50 = vpop.f32.mrf.mxu1  ;;  %v427_v44 = vld [vmem:[#allocation2 + $0x140] sm:$0xff] }
 0x196   : > { %v3357_v51 = vpack.c.bf16 %v2216_v48, %v2216_v48  ;;  %v2631_v52 = vsel %vm322_vm0, %v2216_v48, 0.0  ;;  %v2734_v53 = vmul.f32 %v2216_v48, %v2216_v48  ;;  %2151 = vst.msk [vmem:[#allocation2 + $0x108] sm:$0xff] %vm322_vm0, %v2086_v45  ;;  %v1935_v54 = vadd.f32 %v1934_v50, %v1645_v46 }
 0x197   : > { %v1647_v55 = vpop.f32.mrf.mxu0  ;;  %v4272_v56 = vadd.f32 %v2631_v52, %v2630_v42  ;;  %v1936_v57 = vpop.f32.mrf.mxu1 }
 0x198   : > { %2537 = vst.msk [vmem:[%s4092_s28 + $0x7c] sm:$0xf] %vm2505_vm1, %v3357_v51  ;;  %v2828_v58 = vsel %vm322_vm0, %v2734_v53, 0.0  ;;  %v2087_v59 = vadd.f32 %v1935_v54, %v421_v49  ;;  %v428_v53 = vld [vmem:[#allocation2 + $0x148] sm:$0xff] }
 0x199   : > { %v1648_v60 = vpop.f32.mrf.mxu0  ;;  %v4277_v61 = vadd.f32 %v2828_v58, %v2827_v47  ;;  %v4279_v62 = vld [vmem:[#allocation2 + $0x100] sm:$0xff]  ;;  %v1937_v0 = vpop.f32.mrf.mxu1 }
 0x19a   : > { %v3358_v1 = vpack.c.bf16 %v4279_v62, %v4279_v62  ;;  %2152 = vst.msk [vmem:[#allocation2 + $0x110] sm:$0xff] %vm322_vm0, %v2087_v59  ;;  %v1938_v2 = vadd.f32 %v1937_v0, %v1648_v60 }
 0x19b   : > { %v1650_v3 = vpop.f32.mrf.mxu0  ;;  %v1939_v4 = vpop.f32.mrf.mxu1 }
 0x19c   : > { %2538 = vst.msk [vmem:[%s4092_s28 + $0x80] sm:$0xf] %vm2505_vm1, %v3358_v1  ;;  %v2088_v5 = vadd.f32 %v1938_v2, %v422_v63  ;;  %v429_v1 = vld [vmem:[#allocation2 + $0x150] sm:$0xff] }
 0x19d   : > { %v1653_v6 = vpop.f32.mrf.mxu0  ;;  %v4286_v7 = vld [vmem:[#allocation2 + $0x108] sm:$0xff]  ;;  %v1942_v9 = vpop.f32.mrf.mxu1 }
 0x19e   : > { %v3359_v10 = vpack.c.bf16 %v4286_v7, %v4286_v7  ;;  %2153 = vst.msk [vmem:[#allocation2 + $0x118] sm:$0xff] %vm322_vm0, %v2088_v5  ;;  %v1943_v11 = vadd.f32 %v1942_v9, %v1653_v6 }
 0x19f   : > { %v1655_v12 = vpop.f32.mrf.mxu0  ;;  %v1944_v13 = vpop.f32.mrf.mxu1 }
 0x1a0   : > { %2539 = vst.msk [vmem:[%s4092_s28 + $0x84] sm:$0xf] %vm2505_vm1, %v3359_v10  ;;  %v2089_v14 = vadd.f32 %v1943_v11, %v423_v8  ;;  %v430_v11 = vld [vmem:[#allocation2 + $0x158] sm:$0xff] }
 0x1a1   : > { %v1656_v15 = vpop.f32.mrf.mxu0  ;;  %v4293_v16 = vld [vmem:[#allocation2 + $0x110] sm:$0xff]  ;;  %v1945_v18 = vpop.f32.mrf.mxu1 }
 0x1a2   : > { %v3360_v19 = vpack.c.bf16 %v4293_v16, %v4293_v16  ;;  %2154 = vst.msk [vmem:[#allocation2 + $0x120] sm:$0xff] %vm322_vm0, %v2089_v14  ;;  %v1946_v20 = vadd.f32 %v1945_v18, %v1656_v15 }
 0x1a3   : > { %v1658_v21 = vpop.f32.mrf.mxu0  ;;  %v1947_v22 = vpop.f32.mrf.mxu1 }
 0x1a4   : > { %2540 = vst.msk [vmem:[%s4092_s28 + $0x88] sm:$0xf] %vm2505_vm1, %v3360_v19  ;;  %v2090_v23 = vadd.f32 %v1946_v20, %v424_v17  ;;  %v431_v21 = vld [vmem:[#allocation2 + $0x160] sm:$0xff] }
 0x1a5   : > { %v1661_v24 = vpop.f32.mrf.mxu0  ;;  %v4300_v25 = vld [vmem:[#allocation2 + $0x118] sm:$0xff]  ;;  %v1950_v27 = vpop.f32.mrf.mxu1 }
 0x1a6   : > { %v3361_v28 = vpack.c.bf16 %v4300_v25, %v4300_v25  ;;  %2155 = vst.msk [vmem:[#allocation2 + $0x128] sm:$0xff] %vm322_vm0, %v2090_v23  ;;  %v1951_v29 = vadd.f32 %v1950_v27, %v1661_v24 }
 0x1a7   : > { %v1663_v30 = vpop.f32.mrf.mxu0  ;;  %v1952_v31 = vpop.f32.mrf.mxu1 }
 0x1a8   : > { %2541 = vst.msk [vmem:[%s4092_s28 + $0x8c] sm:$0xf] %vm2505_vm1, %v3361_v28  ;;  %v2091_v32 = vadd.f32 %v1951_v29, %v425_v26  ;;  %v432_v31 = vld [vmem:[#allocation2 + $0x168] sm:$0xff] }
 0x1a9   : > { %v1664_v33 = vpop.f32.mrf.mxu0  ;;  %v4307_v34 = vld [vmem:[#allocation2 + $0x120] sm:$0xff]  ;;  %v1953_v36 = vpop.f32.mrf.mxu1 }
 0x1aa   : > { %v3362_v37 = vpack.c.bf16 %v4307_v34, %v4307_v34  ;;  %2156 = vst.msk [vmem:[#allocation2 + $0x130] sm:$0xff] %vm322_vm0, %v2091_v32  ;;  %v1954_v38 = vadd.f32 %v1953_v36, %v1664_v33 }
 0x1ab   : > { %v1666_v39 = vpop.f32.mrf.mxu0  ;;  %v1955_v40 = vpop.f32.mrf.mxu1 }
 0x1ac   : > { %2542 = vst.msk [vmem:[%s4092_s28 + $0x90] sm:$0xf] %vm2505_vm1, %v3362_v37  ;;  %v2092_v41 = vadd.f32 %v1954_v38, %v426_v35 }
 0x1ad   : > { %v1669_v42 = vpop.f32.mrf.mxu0  ;;  %v4314_v43 = vld [vmem:[#allocation2 + $0x128] sm:$0xff]  ;;  %v1958_v45 = vpop.f32.mrf.mxu1 }
 0x1ae   : > { %v3363_v46 = vpack.c.bf16 %v4314_v43, %v4314_v43  ;;  %2157 = vst.msk [vmem:[#allocation2 + $0x138] sm:$0xff] %vm322_vm0, %v2092_v41  ;;  %v1959_v47 = vadd.f32 %v1958_v45, %v1669_v42  ;;  %v433_v41 = vld [vmem:[#allocation2 + $0x170] sm:$0xff] }
 0x1af   : > { %v1671_v48 = vpop.f32.mrf.mxu0  ;;  %v1960_v49 = vpop.f32.mrf.mxu1 }
 0x1b0   : > { %2543 = vst.msk [vmem:[%s4092_s28 + $0x94] sm:$0xf] %vm2505_vm1, %v3363_v46  ;;  %v2093_v50 = vadd.f32 %v1959_v47, %v427_v44 }
 0x1b1   : > { %v1672_v51 = vpop.f32.mrf.mxu0  ;;  %v4321_v52 = vld [vmem:[#allocation2 + $0x130] sm:$0xff]  ;;  %v1961_v54 = vpop.f32.mrf.mxu1 }
 0x1b2   : > { %v3364_v55 = vpack.c.bf16 %v4321_v52, %v4321_v52  ;;  %2158 = vst.msk [vmem:[#allocation2 + $0x140] sm:$0xff] %vm322_vm0, %v2093_v50  ;;  %v1962_v57 = vadd.f32 %v1961_v54, %v1672_v51  ;;  %v434_v51 = vld [vmem:[#allocation2 + $0x178] sm:$0xff] }
 0x1b3   : > { %v1674_v58 = vpop.f32.mrf.mxu0  ;;  %v1963_v59 = vpop.f32.mrf.mxu1 }
 0x1b4   : > { %2544 = vst.msk [vmem:[%s4092_s28 + $0x98] sm:$0xf] %vm2505_vm1, %v3364_v55  ;;  %v2094_v60 = vadd.f32 %v1962_v57, %v428_v53 }
 0x1b5   : > { %v1677_v63 = vpop.f32.mrf.mxu0  ;;  %v4328_v0 = vld [vmem:[#allocation2 + $0x138] sm:$0xff]  ;;  %v1966_v2 = vpop.f32.mrf.mxu1 }
 0x1b6   : > { %v3365_v3 = vpack.c.bf16 %v4328_v0, %v4328_v0  ;;  %2159 = vst.msk [vmem:[#allocation2 + $0x148] sm:$0xff] %vm322_vm0, %v2094_v60  ;;  %v1967_v4 = vadd.f32 %v1966_v2, %v1677_v63 }
 0x1b7   : > { %v1679_v5 = vpop.f32.mrf.mxu0  ;;  %v1968_v6 = vpop.f32.mrf.mxu1 }
 0x1b8   : > { %2545 = vst.msk [vmem:[%s4092_s28 + $0x9c] sm:$0xf] %vm2505_vm1, %v3365_v3  ;;  %v2095_v8 = vadd.f32 %v1967_v4, %v429_v1  ;;  %v435_v1 = vld [vmem:[#allocation2 + $0x180] sm:$0xff] }
 0x1b9   : > { %v1680_v9 = vpop.f32.mrf.mxu0  ;;  %v4335_v10 = vld [vmem:[#allocation2 + $0x140] sm:$0xff]  ;;  %v1969_v12 = vpop.f32.mrf.mxu1 }
 0x1ba   : > { %v3366_v13 = vpack.c.bf16 %v4335_v10, %v4335_v10  ;;  %2160 = vst.msk [vmem:[#allocation2 + $0x150] sm:$0xff] %vm322_vm0, %v2095_v8  ;;  %v1970_v14 = vadd.f32 %v1969_v12, %v1680_v9  ;;  %v436_v12 = vld [vmem:[#allocation2 + $0x188] sm:$0xff] }
 0x1bb   : > { %v1682_v15 = vpop.f32.mrf.mxu0  ;;  %v1971_v17 = vpop.f32.mrf.mxu1 }
 0x1bc   : > { %2546 = vst.msk [vmem:[%s4092_s28 + $0xa0] sm:$0xf] %vm2505_vm1, %v3366_v13  ;;  %v2096_v18 = vadd.f32 %v1970_v14, %v430_v11 }
 0x1bd   : > { %v1685_v19 = vpop.f32.mrf.mxu0  ;;  %v4342_v20 = vld [vmem:[#allocation2 + $0x148] sm:$0xff]  ;;  %v1974_v22 = vpop.f32.mrf.mxu1 }
 0x1be   : > { %v3367_v23 = vpack.c.bf16 %v4342_v20, %v4342_v20  ;;  %2161 = vst.msk [vmem:[#allocation2 + $0x158] sm:$0xff] %vm322_vm0, %v2096_v18  ;;  %v1975_v24 = vadd.f32 %v1974_v22, %v1685_v19  ;;  %v2735_v19 = vmul.f32 %v4279_v62, %v4279_v62 }
 0x1bf   : > { %v1687_v26 = vpop.f32.mrf.mxu0  ;;  %v1976_v27 = vpop.f32.mrf.mxu1 }
 0x1c0   : > { %2547 = vst.msk [vmem:[%s4092_s28 + $0xa4] sm:$0xf] %vm2505_vm1, %v3367_v23  ;;  %v2097_v28 = vadd.f32 %v1975_v24, %v431_v21  ;;  %v2736_v23 = vmul.f32 %v4286_v7, %v4286_v7  ;;  %v437_v26 = vld [vmem:[#allocation2 + $0x190] sm:$0xff] }
 0x1c1   : > { %v1688_v29 = vpop.f32.mrf.mxu0  ;;  %v4349_v30 = vld [vmem:[#allocation2 + $0x150] sm:$0xff]  ;;  %v1977_v32 = vpop.f32.mrf.mxu1 }
 0x1c2   : > { %v3368_v33 = vpack.c.bf16 %v4349_v30, %v4349_v30  ;;  %2162 = vst.msk [vmem:[#allocation2 + $0x160] sm:$0xff] %vm322_vm0, %v2097_v28  ;;  %v1978_v35 = vadd.f32 %v1977_v32, %v1688_v29  ;;  %v2633_v28 = vsel %vm322_vm0, %v4279_v62, 0.0 }
 0x1c3   : > { %v1690_v36 = vpop.f32.mrf.mxu0  ;;  %v1979_v37 = vpop.f32.mrf.mxu1 }
 0x1c4   : > { %2548 = vst.msk [vmem:[%s4092_s28 + $0xa8] sm:$0xf] %vm2505_vm1, %v3368_v33  ;;  %v2098_v38 = vadd.f32 %v1978_v35, %v432_v31  ;;  %v2830_v35 = vsel %vm322_vm0, %v2735_v19, 0.0  ;;  %v2635_v36 = vsel %vm322_vm0, %v4286_v7, 0.0  ;;  %v2737_v37 = vmul.f32 %v4293_v16, %v4293_v16 }
 0x1c5   : > { %v1693_v39 = vpop.f32.mrf.mxu0  ;;  %v4356_v40 = vld [vmem:[#allocation2 + $0x158] sm:$0xff]  ;;  %v1982_v42 = vpop.f32.mrf.mxu1  ;;  %v2738_v7 = vmul.f32 %v4300_v25, %v4300_v25 }
 0x1c6   : > { %v3369_v44 = vpack.c.bf16 %v4356_v40, %v4356_v40  ;;  %2163 = vst.msk [vmem:[#allocation2 + $0x168] sm:$0xff] %vm322_vm0, %v2098_v38  ;;  %v1983_v45 = vadd.f32 %v1982_v42, %v1693_v39  ;;  %v2634_v39 = vadd.f32 %v2633_v28, %v4272_v56  ;;  %v2645_v28 = vsel %vm322_vm0, %v4321_v52, 0.0 }
 0x1c7   : > { %v1695_v46 = vpop.f32.mrf.mxu0  ;;  %v1984_v47 = vpop.f32.mrf.mxu1 }
 0x1c8   : > { %2549 = vst.msk [vmem:[%s4092_s28 + $0xac] sm:$0xf] %vm2505_vm1, %v3369_v44  ;;  %v2099_v48 = vadd.f32 %v1983_v45, %v433_v41  ;;  %v2832_v41 = vsel %vm322_vm0, %v2736_v23, 0.0  ;;  %v438_v44 = vld [vmem:[#allocation2 + $0x198] sm:$0xff]  ;;  %v2637_v46 = vsel %vm322_vm0, %v4293_v16, 0.0  ;;  %v2739_v16 = vmul.f32 %v4307_v34, %v4307_v34 }
 0x1c9   : > { %v1696_v49 = vpop.f32.mrf.mxu0  ;;  %v4363_v50 = vld [vmem:[#allocation2 + $0x160] sm:$0xff]  ;;  %v1985_v53 = vpop.f32.mrf.mxu1 }
 0x1ca   : > { %v3370_v54 = vpack.c.bf16 %v4363_v50, %v4363_v50  ;;  %2164 = vst.msk [vmem:[#allocation2 + $0x170] sm:$0xff] %vm322_vm0, %v2099_v48  ;;  %v1986_v55 = vadd.f32 %v1985_v53, %v1696_v49  ;;  %v2831_v49 = vadd.f32 %v2830_v35, %v4277_v61 }
 0x1cb   : > { %v1698_v57 = vpop.f32.mrf.mxu0  ;;  %v1987_v58 = vpop.f32.mrf.mxu1 }
 0x1cc   : > { %2550 = vst.msk [vmem:[%s4092_s28 + $0xb0] sm:$0xf] %vm2505_vm1, %v3370_v54  ;;  %v2100_v59 = vadd.f32 %v1986_v55, %v434_v51  ;;  %v2636_v51 = vadd.f32 %v2635_v36, %v2634_v39  ;;  %v2834_v54 = vsel %vm322_vm0, %v2737_v37, 0.0  ;;  %v2639_v55 = vsel %vm322_vm0, %v4300_v25, 0.0 }
 0x1cd   : > { %v1701_v60 = vpop.f32.mrf.mxu0  ;;  %v4370_v63 = vld [vmem:[#allocation2 + $0x168] sm:$0xff]  ;;  %v1990_v2 = vpop.f32.mrf.mxu1  ;;  %v2641_v25 = vsel %vm322_vm0, %v4307_v34, 0.0 }
 0x1ce   : > { %v3371_v3 = vpack.c.bf16 %v4370_v63, %v4370_v63  ;;  %2165 = vst.msk [vmem:[#allocation2 + $0x178] sm:$0xff] %vm322_vm0, %v2100_v59  ;;  %v1991_v4 = vadd.f32 %v1990_v2, %v1701_v60  ;;  %v2833_v59 = vadd.f32 %v2832_v41, %v2831_v49  ;;  %v2638_v60 = vadd.f32 %v2637_v46, %v2636_v51  ;;  %v439_v2 = vld [vmem:[#allocation2 + $0x1a0] sm:$0xff] }
 0x1cf   : > { %v1703_v5 = vpop.f32.mrf.mxu0  ;;  %v1992_v6 = vpop.f32.mrf.mxu1 }
 0x1d0   : > { %2551 = vst.msk [vmem:[%s4092_s28 + $0xb4] sm:$0xf] %vm2505_vm1, %v3371_v3  ;;  %v2101_v8 = vadd.f32 %v1991_v4, %v435_v1  ;;  %v2740_v1 = vmul.f32 %v4314_v43, %v4314_v43  ;;  %v2836_v4 = vsel %vm322_vm0, %v2738_v7, 0.0  ;;  %v441_v7 = vld [vmem:[#allocation2 + $0x1b0] sm:$0xff] }
 0x1d1   : > { %v1704_v9 = vpop.f32.mrf.mxu0  ;;  %v4377_v11 = vld [vmem:[#allocation2 + $0x170] sm:$0xff]  ;;  %v1993_v13 = vpop.f32.mrf.mxu1 }
 0x1d2   : > { %v3372_v14 = vpack.c.bf16 %v4377_v11, %v4377_v11  ;;  %2166 = vst.msk [vmem:[#allocation2 + $0x180] sm:$0xff] %vm322_vm0, %v2101_v8  ;;  %v1994_v15 = vadd.f32 %v1993_v13, %v1704_v9  ;;  %v2835_v9 = vadd.f32 %v2834_v54, %v2833_v59 }
 0x1d3   : > { %v1706_v17 = vpop.f32.mrf.mxu0  ;;  %v1995_v18 = vpop.f32.mrf.mxu1 }
 0x1d4   : > { %2552 = vst.msk [vmem:[%s4092_s28 + $0xb8] sm:$0xf] %vm2505_vm1, %v3372_v14  ;;  %v2102_v21 = vadd.f32 %v1994_v15, %v436_v12  ;;  %v2640_v12 = vadd.f32 %v2639_v55, %v2638_v60  ;;  %v2838_v14 = vsel %vm322_vm0, %v2739_v16, 0.0  ;;  %v2643_v15 = vsel %vm322_vm0, %v4314_v43, 0.0 }
 0x1d5   : > { %v1709_v22 = vpop.f32.mrf.mxu0  ;;  %v4388_v24 = vld [vmem:[#allocation2 + $0x178] sm:$0xff]  ;;  %v1998_v27 = vpop.f32.mrf.mxu1  ;;  %v2741_v17 = vmul.f32 %v4321_v52, %v4321_v52  ;;  %v2837_v19 = vadd.f32 %v2836_v4, %v2835_v9  ;;  %v2742_v43 = vmul.f32 %v4328_v0, %v4328_v0  ;;  %v2743_v52 = vmul.f32 %v4335_v10, %v4335_v10 }
 0x1d6   : > { %v3373_v29 = vpack.c.bf16 %v4388_v24, %v4388_v24  ;;  %2167 = vst.msk [vmem:[#allocation2 + $0x188] sm:$0xff] %vm322_vm0, %v2102_v21  ;;  %v1999_v31 = vadd.f32 %v1998_v27, %v1709_v22  ;;  %v2642_v21 = vadd.f32 %v2641_v25, %v2640_v12  ;;  %v2840_v22 = vsel %vm322_vm0, %v2740_v1, 0.0  ;;  %v442_v4 = vld [vmem:[#allocation2 + $0x1b8] sm:$0xff] }
 0x1d7   : > { %v1711_v32 = vpop.f32.mrf.mxu0  ;;  %v2000_v33 = vpop.f32.mrf.mxu1  ;;  %v2842_v37 = vsel %vm322_vm0, %v2741_v17, 0.0  ;;  %v2846_v16 = vsel %vm322_vm0, %v2743_v52, 0.0  ;;  %v2655_v17 = vsel %vm322_vm0, %v4356_v40, 0.0  ;;  %v2749_v52 = vmul.f32 %v4377_v11, %v4377_v11 }
 0x1d8   : > { %2553 = vst.msk [vmem:[%s4092_s28 + $0xbc] sm:$0xf] %vm2505_vm1, %v3373_v29  ;;  %v2103_v38 = vadd.f32 %v1999_v31, %v437_v26  ;;  %v440_v26 = vld [vmem:[#allocation2 + $0x1a8] sm:$0xff]  ;;  %v2839_v33 = vadd.f32 %v2838_v14, %v2837_v19  ;;  %v2644_v35 = vadd.f32 %v2643_v15, %v2642_v21 }
 0x1d9   : > { %v1712_v62 = vpop.f32.mrf.mxu0  ;;  %v4404_v42 = vld [vmem:[#allocation2 + $0x180] sm:$0xff]  ;;  %v2001_v45 = vpop.f32.mrf.mxu1 }
 0x1da   : > { %v3374_v47 = vpack.c.bf16 %v4404_v42, %v4404_v42  ;;  %2168 = vst.msk [vmem:[#allocation2 + $0x190] sm:$0xff] %vm322_vm0, %v2103_v38  ;;  %v2002_v48 = vadd.f32 %v2001_v45, %v1712_v62  ;;  %v2647_v38 = vsel %vm322_vm0, %v4328_v0, 0.0  ;;  %v2841_v41 = vadd.f32 %v2840_v22, %v2839_v33 }
 0x1db   : > { %v1714_v56 = vpop.f32.mrf.mxu0  ;;  %v2003_v53 = vpop.f32.mrf.mxu1  ;;  %v2744_v45 = vmul.f32 %v4342_v20, %v4342_v20  ;;  %v2649_v0 = vsel %vm322_vm0, %v4335_v10, 0.0  ;;  %v2748_v22 = vmul.f32 %v4370_v63, %v4370_v63 }
 0x1dc   : > { %2554 = vst.msk [vmem:[%s4092_s28 + $0xc0] sm:$0xf] %vm2505_vm1, %v3374_v47  ;;  %v2104_v57 = vadd.f32 %v2002_v48, %v438_v44  ;;  %v2646_v44 = vadd.f32 %v2645_v28, %v2644_v35  ;;  %v2844_v48 = vsel %vm322_vm0, %v2742_v43, 0.0  ;;  %v2843_v53 = vadd.f32 %v2842_v37, %v2841_v41 }
 0x1dd   : > { %v1717_v58 = vpop.f32.mrf.mxu0  ;;  %v4423_v61 = vld [vmem:[#allocation2 + $0x188] sm:$0xff]  ;;  %v2006_v3 = vpop.f32.mrf.mxu1 }
 0x1de   : > { %v3375_v5 = vpack.c.bf16 %v4423_v61, %v4423_v61  ;;  %2169 = vst.msk [vmem:[#allocation2 + $0x198] sm:$0xff] %vm322_vm0, %v2104_v57  ;;  %v2007_v6 = vadd.f32 %v2006_v3, %v1717_v58  ;;  %v2648_v54 = vadd.f32 %v2647_v38, %v2646_v44  ;;  %v2651_v57 = vsel %vm322_vm0, %v4342_v20, 0.0 }
 0x1df   : > { %v1719_v8 = vpop.f32.mrf.mxu0  ;;  %v2008_v13 = vpop.f32.mrf.mxu1  ;;  %v2745_v58 = vmul.f32 %v4349_v30, %v4349_v30  ;;  %v2845_v60 = vadd.f32 %v2844_v48, %v2843_v53  ;;  %v2746_v20 = vmul.f32 %v4356_v40, %v4356_v40  ;;  %v2657_v40 = vsel %vm322_vm0, %v4363_v50, 0.0 }
 0x1e0   : > { %2555 = vst.msk [vmem:[%s4092_s28 + $0xc4] sm:$0xf] %vm2505_vm1, %v3375_v5  ;;  %v2105_v34 = vadd.f32 %v2007_v6, %v439_v2  ;;  %v2650_v1 = vadd.f32 %v2649_v0, %v2648_v54  ;;  %v2848_v2 = vsel %vm322_vm0, %v2744_v45, 0.0  ;;  %v2653_v5 = vsel %vm322_vm0, %v4349_v30, 0.0 }
 0x1e1   : > { %v1720_v18 = vpop.f32.mrf.mxu0  ;;  %v4439_v23 = vld [vmem:[#allocation2 + $0x190] sm:$0xff]  ;;  %v2009_v27 = vpop.f32.mrf.mxu1  ;;  %v2847_v12 = vadd.f32 %v2846_v16, %v2845_v60  ;;  %v2850_v15 = vsel %vm322_vm0, %v2745_v58, 0.0  ;;  %v2747_v30 = vmul.f32 %v4363_v50, %v4363_v50  ;;  %v2852_v43 = vsel %vm322_vm0, %v2746_v20, 0.0 }
 0x1e2   : > { %v3376_v29 = vpack.c.bf16 %v4439_v23, %v4439_v23  ;;  %2170 = vst.msk [vmem:[#allocation2 + $0x1a0] sm:$0xff] %vm322_vm0, %v2105_v34  ;;  %v2010_v31 = vadd.f32 %v2009_v27, %v1720_v18  ;;  %v2652_v13 = vadd.f32 %v2651_v57, %v2650_v1  ;;  %v443_v27 = vld [vmem:[#allocation2 + $0x1c0] sm:$0xff]  ;;  %v2659_v38 = vsel %vm322_vm0, %v4370_v63, 0.0 }
 0x1e3   : > { %v1722_v32 = vpop.f32.mrf.mxu0  ;;  %v2011_v36 = vpop.f32.mrf.mxu1  ;;  %v2849_v19 = vadd.f32 %v2848_v2, %v2847_v12  ;;  %v2854_v37 = vsel %vm322_vm0, %v2747_v30, 0.0  ;;  %v2856_v44 = vsel %vm322_vm0, %v2748_v22, 0.0  ;;  %v2661_v48 = vsel %vm322_vm0, %v4377_v11, 0.0  ;;  %v445_v2 = vld [vmem:[#allocation2 + $0x1d0] sm:$0xff] }
 0x1e4   : > { %2556 = vst.msk [vmem:[%s4092_s28 + $0xc8] sm:$0xf] %vm2505_vm1, %v3376_v29  ;;  %v2106_v62 = vadd.f32 %v2010_v31, %v440_v26  ;;  %v2654_v21 = vadd.f32 %v2653_v5, %v2652_v13  ;;  %v2750_v63 = vmul.f32 %v4388_v24, %v4388_v24  ;;  %v2663_v16 = vsel %vm322_vm0, %v4388_v24, 0.0 }
 0x1e5   : > { %v1725_v39 = vpop.f32.mrf.mxu0  ;;  %v4457_v46 = vld [vmem:[#allocation2 + $0x198] sm:$0xff]  ;;  %v2014_v47 = vpop.f32.mrf.mxu1  ;;  %v2851_v33 = vadd.f32 %v2850_v15, %v2849_v19  ;;  %v2751_v11 = vmul.f32 %v4404_v42, %v4404_v42  ;;  %v2752_v60 = vmul.f32 %v4423_v61, %v4423_v61  ;;  %v2665_v24 = vsel %vm322_vm0, %v4404_v42, 0.0 }
 0x1e6   : > { %v3377_v56 = vpack.c.bf16 %v4457_v46, %v4457_v46  ;;  %2171 = vst.msk [vmem:[#allocation2 + $0x1a8] sm:$0xff] %vm322_vm0, %v2106_v62  ;;  %v2015_v49 = vadd.f32 %v2014_v47, %v1725_v39  ;;  %v2656_v35 = vadd.f32 %v2655_v17, %v2654_v21  ;;  %v2753_v15 = vmul.f32 %v4439_v23, %v4439_v23  ;;  %v446_v21 = vld [vmem:[#allocation2 + $0x1d8] sm:$0xff] }
 0x1e7   : > { %v1727_v51 = vpop.f32.mrf.mxu0  ;;  %v2016_v55 = vpop.f32.mrf.mxu1  ;;  %v2853_v39 = vadd.f32 %v2852_v43, %v2851_v33  ;;  %v2862_v13 = vsel %vm322_vm0, %v2751_v11, 0.0 }
 0x1e8   : > { %2557 = vst.msk [vmem:[%s4092_s28 + $0xcc] sm:$0xf] %vm2505_vm1, %v3377_v56  ;;  %v2107_v10 = vadd.f32 %v2015_v49, %v441_v7  ;;  %v2658_v41 = vadd.f32 %v2657_v40, %v2656_v35  ;;  %v444_v7 = vld [vmem:[#allocation2 + $0x1c8] sm:$0xff]  ;;  %v2858_v55 = vsel %vm322_vm0, %v2749_v52, 0.0  ;;  %v2866_v33 = vsel %vm322_vm0, %v2753_v15, 0.0 }
 0x1e9   : > { %v1728_v59 = vpop.f32.mrf.mxu0  ;;  %v4473_v3 = vld [vmem:[#allocation2 + $0x1a0] sm:$0xff]  ;;  %v2017_v25 = vpop.f32.mrf.mxu1  ;;  %v2855_v51 = vadd.f32 %v2854_v37, %v2853_v39  ;;  %v2671_v35 = vsel %vm322_vm0, %v4457_v46, 0.0 }
 0x1ea   : > { %v3378_v6 = vpack.c.bf16 %v4473_v3, %v4473_v3  ;;  %2172 = vst.msk [vmem:[#allocation2 + $0x1b0] sm:$0xff] %vm322_vm0, %v2107_v10  ;;  %v2018_v8 = vadd.f32 %v2017_v25, %v1728_v59  ;;  %v2660_v53 = vadd.f32 %v2659_v38, %v2658_v41  ;;  %v2860_v25 = vsel %vm322_vm0, %v2750_v63, 0.0  ;;  %v447_v39 = vld [vmem:[#allocation2 + $0x1e0] sm:$0xff] }
 0x1eb   : > { %v1730_v9 = vpop.f32.mrf.mxu0  ;;  %v2019_v14 = vpop.f32.mrf.mxu1  ;;  %v2857_v10 = vadd.f32 %v2856_v44, %v2855_v51 }
 0x1ec   : > { %2558 = vst.msk [vmem:[%s4092_s28 + $0xd0] sm:$0xf] %vm2505_vm1, %v3378_v6  ;;  %v2108_v34 = vadd.f32 %v2018_v8, %v442_v4  ;;  %v2662_v59 = vadd.f32 %v2661_v48, %v2660_v53  ;;  %v2667_v14 = vsel %vm322_vm0, %v4423_v61, 0.0  ;;  %v2754_v61 = vmul.f32 %v4457_v46, %v4457_v46 }
 0x1ed   : > { %v1733_v18 = vpop.f32.mrf.mxu0  ;;  %v4491_v26 = vld [vmem:[#allocation2 + $0x1a8] sm:$0xff]  ;;  %v2022_v28 = vpop.f32.mrf.mxu1  ;;  %v2859_v8 = vadd.f32 %v2858_v55, %v2857_v10  ;;  %v2673_v46 = vsel %vm322_vm0, %v4473_v3, 0.0 }
 0x1ee   : > { %v3379_v29 = vpack.c.bf16 %v4491_v26, %v4491_v26  ;;  %2173 = vst.msk [vmem:[#allocation2 + $0x1b8] sm:$0xff] %vm322_vm0, %v2108_v34  ;;  %v2023_v31 = vadd.f32 %v2022_v28, %v1733_v18  ;;  %v2664_v9 = vadd.f32 %v2663_v16, %v2662_v59  ;;  %v2864_v18 = vsel %vm322_vm0, %v2752_v60, 0.0 }
 0x1ef   : > { %v1735_v32 = vpop.f32.mrf.mxu0  ;;  %v2024_v36 = vpop.f32.mrf.mxu1  ;;  %v2861_v30 = vadd.f32 %v2860_v25, %v2859_v8  ;;  %v2868_v44 = vsel %vm322_vm0, %v2754_v61, 0.0  ;;  %v2675_v51 = vsel %vm322_vm0, %v4491_v26, 0.0 }
 0x1f0   : > { %2559 = vst.msk [vmem:[%s4092_s28 + $0xd4] sm:$0xf] %vm2505_vm1, %v3379_v29  ;;  %v2109_v50 = vadd.f32 %v2023_v31, %v443_v27  ;;  %v2666_v34 = vadd.f32 %v2665_v24, %v2664_v9  ;;  %v2669_v27 = vsel %vm322_vm0, %v4439_v23, 0.0  ;;  %v2755_v23 = vmul.f32 %v4473_v3, %v4473_v3 }
 0x1f1   : > { %v1736_v62 = vpop.f32.mrf.mxu0  ;;  %v4507_v45 = vld [vmem:[#allocation2 + $0x1b0] sm:$0xff]  ;;  %v2025_v47 = vpop.f32.mrf.mxu1  ;;  %v2863_v29 = vadd.f32 %v2862_v13, %v2861_v30 }
 0x1f2   : > { %v3380_v0 = vpack.c.bf16 %v4507_v45, %v4507_v45  ;;  %2174 = vst.msk [vmem:[#allocation2 + $0x1c0] sm:$0xff] %vm322_vm0, %v2109_v50  ;;  %v2026_v56 = vadd.f32 %v2025_v47, %v1736_v62  ;;  %v2668_v31 = vadd.f32 %v2667_v14, %v2666_v34  ;;  %v2756_v50 = vmul.f32 %v4491_v26, %v4491_v26 }
 0x1f3   : > { %v1738_v49 = vpop.f32.mrf.mxu0  ;;  %v2027_v54 = vpop.f32.mrf.mxu1  ;;  %v2865_v38 = vadd.f32 %v2864_v18, %v2863_v29  ;;  %v2757_v53 = vmul.f32 %v4507_v45, %v4507_v45  ;;  %v2677_v59 = vsel %vm322_vm0, %v4507_v45, 0.0 }
 0x1f4   : > { %2560 = vst.msk [vmem:[%s4092_s28 + $0xd8] sm:$0xf] %vm2505_vm1, %v3380_v0  ;;  %v2110_v57 = vadd.f32 %v2026_v56, %v444_v7  ;;  %v2670_v52 = vadd.f32 %v2669_v27, %v2668_v31  ;;  %v2870_v49 = vsel %vm322_vm0, %v2755_v23, 0.0  ;;  %v2872_v11 = vsel %vm322_vm0, %v2756_v50, 0.0  ;;  %v450_v23 = vld [vmem:[#allocation2 + $0x1f8] sm:$0xff] }
 0x1f5   : > { %v1741_v58 = vpop.f32.mrf.mxu0  ;;  %v4525_v1 = vld [vmem:[#allocation2 + $0x1b8] sm:$0xff]  ;;  %v2030_v4 = vpop.f32.mrf.mxu1  ;;  %v2867_v63 = vadd.f32 %v2866_v33, %v2865_v38 }
 0x1f6   : > { %v3381_v5 = vpack.c.bf16 %v4525_v1, %v4525_v1  ;;  %2175 = vst.msk [vmem:[#allocation2 + $0x1c8] sm:$0xff] %vm322_vm0, %v2110_v57  ;;  %v2031_v20 = vadd.f32 %v2030_v4, %v1741_v58  ;;  %v2672_v0 = vadd.f32 %v2671_v35, %v2670_v52  ;;  %v448_v58 = vld [vmem:[#allocation2 + $0x1e8] sm:$0xff]  ;;  %v2758_v26 = vmul.f32 %v4525_v1, %v4525_v1 }
 0x1f7   : > { %v1743_v6 = vpop.f32.mrf.mxu0  ;;  %v2032_v12 = vpop.f32.mrf.mxu1  ;;  %v2869_v55 = vadd.f32 %v2868_v44, %v2867_v63 }
 0x1f8   : > { %2561 = vst.msk [vmem:[%s4092_s28 + $0xdc] sm:$0xf] %vm2505_vm1, %v3381_v5  ;;  %v2111_v42 = vadd.f32 %v2031_v20, %v445_v2  ;;  %v2674_v16 = vadd.f32 %v2673_v46, %v2672_v0  ;;  %v2874_v20 = vsel %vm322_vm0, %v2757_v53, 0.0  ;;  %v2679_v6 = vsel %vm322_vm0, %v4525_v1, 0.0 }
 0x1f9   : > { %v1744_v17 = vpop.f32.mrf.mxu0  ;;  %v4541_v19 = vld [vmem:[#allocation2 + $0x1c0] sm:$0xff]  ;;  %v2033_v22 = vpop.f32.mrf.mxu1  ;;  %v2871_v25 = vadd.f32 %v2870_v49, %v2869_v55  ;;  %v2876_v30 = vsel %vm322_vm0, %v2758_v26, 0.0 }
 0x1fa   : > { %v3382_v28 = vpack.c.bf16 %v4541_v19, %v4541_v19  ;;  %2176 = vst.msk [vmem:[#allocation2 + $0x1d0] sm:$0xff] %vm322_vm0, %v2111_v42  ;;  %v2034_v43 = vadd.f32 %v2033_v22, %v1744_v17  ;;  %v2676_v24 = vadd.f32 %v2675_v51, %v2674_v16  ;;  %v2759_v8 = vmul.f32 %v4541_v19, %v4541_v19  ;;  %v449_v42 = vld [vmem:[#allocation2 + $0x1f0] sm:$0xff] }
 0x1fb   : > { %v1746_v40 = vpop.f32.mrf.mxu0  ;;  %v2035_v32 = vpop.f32.mrf.mxu1  ;;  %v2873_v12 = vadd.f32 %v2872_v11, %v2871_v25  ;;  %v2681_v34 = vsel %vm322_vm0, %v4541_v19, 0.0 }
 0x1fc   : > { %2562 = vst.msk [vmem:[%s4092_s28 + $0xe0] sm:$0xf] %vm2505_vm1, %v3382_v28  ;;  %v2112_v36 = vadd.f32 %v2034_v43, %v446_v21  ;;  %v2678_v13 = vadd.f32 %v2677_v59, %v2676_v24  ;;  %v2878_v28 = vsel %vm322_vm0, %v2759_v8, 0.0 }
 0x1fd   : > { %v1749_v37 = vpop.f32.mrf.mxu0  ;;  %v2242_v62 = vld [vmem:[#allocation2 + $0x1c8] sm:$0xff]  ;;  %v2038_v41 = vpop.f32.mrf.mxu1  ;;  %v2875_v22 = vadd.f32 %v2874_v20, %v2873_v12 }
 0x1fe   : > { %v3383_v7 = vpack.c.bf16 %v2242_v62, %v2242_v62  ;;  %2177 = vst.msk [vmem:[#allocation2 + $0x1d8] sm:$0xff] %vm322_vm0, %v2112_v36  ;;  %v2039_v47 = vadd.f32 %v2038_v41, %v1749_v37  ;;  %v2760_v14 = vmul.f32 %v2242_v62, %v2242_v62  ;;  %v2680_v27 = vadd.f32 %v2679_v6, %v2678_v13 }
 0x1ff   : > { %v1751_v48 = vpop.f32.mrf.mxu0  ;;  %v2040_v56 = vpop.f32.mrf.mxu1  ;;  %v2683_v43 = vsel %vm322_vm0, %v2242_v62, 0.0  ;;  %v2877_v32 = vadd.f32 %v2876_v30, %v2875_v22 }
 0x200   : > { %2563 = vst.msk [vmem:[%s4092_s28 + $0xe4] sm:$0xf] %vm2505_vm1, %v3383_v7  ;;  %v2113_v54 = vadd.f32 %v2039_v47, %v447_v39  ;;  %v2682_v33 = vadd.f32 %v2681_v34, %v2680_v27  ;;  %v2880_v19 = vsel %vm322_vm0, %v2760_v14, 0.0 }
 0x201   : > { %v1752_v3 = vpop.f32.mrf.mxu0  ;;  %v2243_v57 = vld [vmem:[#allocation2 + $0x1d0] sm:$0xff]  ;;  %v2041_v10 = vpop.f32.mrf.mxu1  ;;  %v2879_v39 = vadd.f32 %v2878_v28, %v2877_v32 }
 0x202   : > { %v3384_v60 = vpack.c.bf16 %v2243_v57, %v2243_v57  ;;  %2178 = vst.msk [vmem:[#allocation2 + $0x1e0] sm:$0xff] %vm322_vm0, %v2113_v54  ;;  %v2042_v2 = vadd.f32 %v2041_v10, %v1752_v3  ;;  %v2761_v40 = vmul.f32 %v2243_v57, %v2243_v57  ;;  %v2685_v37 = vsel %vm322_vm0, %v2243_v57, 0.0 }
 0x203   : > { %v1754_v4 = vpop.f32.mrf.mxu0  ;;  %v2043_v5 = vpop.f32.mrf.mxu1  ;;  %v2684_v41 = vadd.f32 %v2683_v43, %v2682_v33  ;;  %v2881_v63 = vadd.f32 %v2880_v19, %v2879_v39 }
 0x204   : > { %2564 = vst.msk [vmem:[%s4092_s28 + $0xe8] sm:$0xf] %vm2505_vm1, %v3384_v60  ;;  %v2114_v45 = vadd.f32 %v2042_v2, %v448_v58  ;;  %v2882_v46 = vsel %vm322_vm0, %v2761_v40, 0.0 }
 0x205   : > { %v1757_v9 = vpop.f32.mrf.mxu0  ;;  %v2244_v15 = vld [vmem:[#allocation2 + $0x1d8] sm:$0xff]  ;;  %v2046_v17 = vpop.f32.mrf.mxu1  ;;  %v2686_v0 = vadd.f32 %v2685_v37, %v2684_v41  ;;  %v2883_v3 = vadd.f32 %v2882_v46, %v2881_v63 }
 0x206   : > { %v3385_v1 = vpack.c.bf16 %v2244_v15, %v2244_v15  ;;  %2179 = vst.msk [vmem:[#allocation2 + $0x1e8] sm:$0xff] %vm322_vm0, %v2114_v45  ;;  %v2047_v18 = vadd.f32 %v2046_v17, %v1757_v9  ;;  %v2762_v38 = vmul.f32 %v2244_v15, %v2244_v15  ;;  %v2687_v7 = vsel %vm322_vm0, %v2244_v15, 0.0 }
 0x207   : > { %v1759_v21 = vpop.f32.mrf.mxu0  ;;  %v2048_v61 = vpop.f32.mrf.mxu1  ;;  %v2688_v55 = vadd.f32 %v2687_v7, %v2686_v0 }
 0x208   : > { %2565 = vst.msk [vmem:[%s4092_s28 + $0xec] sm:$0xf] %vm2505_vm1, %v3385_v1  ;;  %v2115_v29 = vadd.f32 %v2047_v18, %v449_v42  ;;  %v2884_v49 = vsel %vm322_vm0, %v2762_v38, 0.0 }
 0x209   : > { %v1760_v31 = vpop.f32.mrf.mxu0  ;;  %v2245_v35 = vld [vmem:[#allocation2 + $0x1e0] sm:$0xff]  ;;  %v2049_v36 = vpop.f32.mrf.mxu1  ;;  %v2885_v57 = vadd.f32 %v2884_v49, %v2883_v3 }
 0x20a   : > { %v3386_v52 = vpack.c.bf16 %v2245_v35, %v2245_v35  ;;  %2180 = vst.msk [vmem:[#allocation2 + $0x1f0] sm:$0xff] %vm322_vm0, %v2115_v29  ;;  %v2050_v50 = vadd.f32 %v2049_v36, %v1760_v31  ;;  %v2763_v47 = vmul.f32 %v2245_v35, %v2245_v35  ;;  %v2689_v51 = vsel %vm322_vm0, %v2245_v35, 0.0 }
 0x20b   : > { %v1762_v62 = vpop.f32.mrf.mxu0  ;;  %v2051_v44 = vpop.f32.mrf.mxu1  ;;  %v2690_v58 = vadd.f32 %v2689_v51, %v2688_v55 }
 0x20c   : > { %2566 = vst.msk [vmem:[%s4092_s28 + $0xf0] sm:$0xf] %vm2505_vm1, %v3386_v52  ;;  %v2116_v48 = vadd.f32 %v2050_v50, %v450_v23  ;;  %v2886_v16 = vsel %vm322_vm0, %v2763_v47, 0.0 }
 0x20d   : > { %v2246_v56 = vld [vmem:[#allocation2 + $0x1e8] sm:$0xff]  ;;  %v2887_v4 = vadd.f32 %v2886_v16, %v2885_v57 }
 0x20e   : > { %v3387_v53 = vpack.c.bf16 %v2246_v56, %v2246_v56  ;;  %v2764_v54 = vmul.f32 %v2246_v56, %v2246_v56  ;;  %2181 = vst.msk [vmem:[#allocation2 + $0x1f8] sm:$0xff] %vm322_vm0, %v2116_v48  ;;  %v2691_v11 = vsel %vm322_vm0, %v2246_v56, 0.0 }
 0x20f   : > { %v2692_v25 = vadd.f32 %v2691_v11, %v2690_v58 }
 0x210   : > { %2567 = vst.msk [vmem:[%s4092_s28 + $0xf4] sm:$0xf] %vm2505_vm1, %v3387_v53  ;;  %v2888_v59 = vsel %vm322_vm0, %v2764_v54, 0.0 }
 0x211   : > { %v2247_v10 = vld [vmem:[#allocation2 + $0x1f0] sm:$0xff]  ;;  %v2889_v5 = vadd.f32 %v2888_v59, %v2887_v4 }
 0x212   : > { %v3388_v26 = vpack.c.bf16 %v2247_v10, %v2247_v10  ;;  %v2693_v60 = vsel %vm322_vm0, %v2247_v10, 0.0  ;;  %v2765_v2 = vmul.f32 %v2247_v10, %v2247_v10 }
 0x213   : > { %v2694_v20 = vadd.f32 %v2693_v60, %v2692_v25 }
 0x214   : > { %2568 = vst.msk [vmem:[%s4092_s28 + $0xf8] sm:$0xf] %vm2505_vm1, %v3388_v26  ;;  %v2890_v24 = vsel %vm322_vm0, %v2765_v2, 0.0 }
 0x215   : > { %v2248_v6 = vld [vmem:[#allocation2 + $0x1f8] sm:$0xff]  ;;  %v2891_v12 = vadd.f32 %v2890_v24, %v2889_v5 }
 0x216   : > { %v3389_v8 = vpack.c.bf16 %v2248_v6, %v2248_v6  ;;  %v2695_v45 = vsel %vm322_vm0, %v2248_v6, 0.0  ;;  %v2766_v9 = vmul.f32 %v2248_v6, %v2248_v6 }
 0x217   : > { %v2696_v13 = vadd.f32 %v2695_v45, %v2694_v20 }
 0x218   : > { %2569 = vst.msk [vmem:[%s4092_s28 + $0xfc] sm:$0xf] %vm2505_vm1, %v3389_v8  ;;  %v2892_v14 = vsel %vm322_vm0, %v2766_v9, 0.0 }
 0x219   : > { %v2697_v15 = vrot.slane %v2696_v13, 4  ;;  %v2893_v42 = vadd.f32 %v2892_v14, %v2891_v12 }
 0x21b   : > { %v2698_v17 = vadd.f32 %v2697_v15, %v2696_v13  ;;  %v2894_v30 = vrot.slane %v2893_v42, 4 }
 0x21d   : > { %v2699_v34 = vrot.slane %v2698_v17, 2  ;;  %v2895_v1 = vadd.f32 %v2894_v30, %v2893_v42 }
 0x21f   : > { %v2700_v18 = vadd.f32 %v2699_v34, %v2698_v17  ;;  %v2896_v21 = vrot.slane %v2895_v1, 2 }
 0x221   : > { %v2701_v22 = vrot.slane %v2700_v18, 1  ;;  %v2897_v27 = vadd.f32 %v2896_v21, %v2895_v1 }
 0x223   : > { %v2702_v61 = vadd.f32 %v2701_v22, %v2700_v18  ;;  %v2898_v28 = vrot.slane %v2897_v27, 1 }
 0x225   : > { %v2899_v43 = vadd.f32 %v2898_v28, %v2897_v27  ;;  %2900 = vst.msk [vmem:[%s309_s30] sm:$0xff] %vm322_vm0, %v2702_v61 }
 0x227   : > { %2901 = vst.msk [vmem:[%s316_s7] sm:$0xff] %vm322_vm0, %v2899_v43 }
 0x228 PF: > { %s15_s17 = sadd.s32 1, %s3658_s17   ;;  %s4638_s15 = smov %s3654_s16 }
 0x229   : > { %p12_p6 = scmp.ge.s32.totalorder %s15_s17, 6   ;;  %s4639_s16 = smov %s4641_s18 }
 0x22b   :  { %14 = sbr.rel (!%p12_p6) target bundleno = 2 (0x2), region = 93 }

// kernel: forward.11
= control target key start
LH: loop header
LB: loop body
LE: loop exit
PB: predicated region body
PF: predicated region fallthrough
CT: control target
= control target key end

     0   :  { %s1900_s15 = smov 0   ;;  %s1902_s16 = smov 0   ;;  %s2260_s0 = inlined_call_operand.vmem [shape: bf16[512,1664], index: 0, kind: input, shape index: {}]   ;;  %s2261_s1 = inlined_call_operand.vmem [shape: bf16[1664,128], index: 1, kind: input, shape index: {}]   ;;  %s2262_s2 = inlined_call_operand.vmem [shape: bf16[512,128], index: 2, kind: output, shape index: {0}]   ;;  %s2263_s3 = inlined_call_operand.vmem [shape: f32[16,128], index: 3, kind: output, shape index: {1}]   ;;  %s2264_s4 = inlined_call_operand.vmem [shape: f32[16,128], index: 4, kind: output, shape index: {2}]  }
   0x1   :  { %s1904_s17 = smov 0   ;;  %s1906_s18 = smov 0  }
   0x2   :  { %s1908_s19 = smov 0   ;;  %s1910_s20 = smov 0  }
   0x3   :  { %s1912_s21 = smov 0  }
   0x4 LB: > { %s27_s22 = sadd.s32 1, %s1864_s19  ;;  %s34_s23 = sadd.s32 1, %s1868_s20  ;;  %s1872_s21 = sphi %s1912_s21, %s15_s21   ;;  %s1868_s20 = sphi %s1910_s20, %s2270_s20   ;;  %s1864_s19 = sphi %s1908_s19, %s2269_s19   ;;  %s1860_s18 = sphi %s1906_s18, %s2268_s18   ;;  %s1856_s17 = sphi %s1904_s17, %s2267_s17   ;;  %s1852_s16 = sphi %s1902_s16, %s2266_s16   ;;  %s1848_s15 = sphi %s1900_s15, %s2265_s15  }
   0x5   : > { %p28_p0 = scmp.ge.s32.totalorder %s27_s22, 13  ;;  %p50_p1 = scmp.ne.s32.totalorder %s1852_s16, %s1848_s15 }
   0x6   : > { %p51_p2 = scmp.eq.s32.totalorder %s1872_s21, 0  ;;  %s43_s27 = sadd.s32 1, %s1852_s16 }
   0x7   : > { %s2272_s22 = smov (%p28_p0, %s27_s22), 0  ;;  %s2274_s23 = smov (!%p28_p0, %s34_s23), %s1868_s20 }
   0x8   : > { %p52_p3 = por %p51_p2, %p50_p1  ;;  %p36_p4 = scmp.ge.s32.totalorder %s2274_s23, 2 }
   0x9   : > { %s39_s24 = ssub.s32 %s1864_s19, %s2272_s22  ;;  %p1448_p6 = scmp.ge.s32.totalorder %s1872_s21, 26 }
   0xa   : > { %s2276_s23 = smov (%p36_p4, %s2274_s23), 0 }
   0xb   : > { %s38_s25 = ssub.s32 %s1868_s20, %s2276_s23  ;;  %188 = sbr.rel (%p1448_p6) target bundleno = 44 (0x2c), region = 16 }
   0xc   : > { %s40_s26 = sor.u32 %s39_s24, %s38_s25 }
   0xd   : > { %p41_p5 = scmp.eq.s32.totalorder %s40_s26, 0 }
   0xf   : > { %s1951_s28 = scalar_select %p41_p5, %s1852_s16, %s43_s27  }
  0x10   : > { %191 = sbr.rel (!%p52_p3) target bundleno = 44 (0x2c), region = 20  ;;  %s193_s29 = sand.u32 (%p52_p3), 1, %s1852_s16  }
  0x11   : > { %s1736_s30 = smul.u32 (%p52_p3), 416, %s1868_s20  ;;  %s1449_s5 = sshll.u32 (%p52_p3), %s193_s29, 7 }
  0x12   : > { %s1965_s11 = scalar_lea.vmem (%p52_p3), [#allocation3], %s1449_s5 }
  0x13   : > { %s198_s6 = sadd.s32 (%p52_p3), %s1864_s19, %s1736_s30 }
  0x14   : > { %s1452_s7 = sshll.u32 (%p52_p3), %s198_s6, 2 }
  0x15   : > { %s1960_s10 = scalar_lea.vmem %s2260_s0, %s1452_s7 }
  0x16   : > { %v217_v0 = vld [vmem:[%s1960_s10] sm:$0xf]  ;;  %v219_v1 = vld [vmem:[%s1960_s10 + $0x34] sm:$0xf]  ;;  %v221_v2 = vld [vmem:[%s1960_s10 + $0x68] sm:$0xf] }
  0x17   : > { %218 = vst [vmem:[%s1965_s11] sm:$0xf] %v217_v0  ;;  %220 = vst [vmem:[%s1965_s11 + $0x4] sm:$0xf] %v219_v1  ;;  %v223_v3 = vld [vmem:[%s1960_s10 + $0x9c] sm:$0xf] }
  0x18   : > { %222 = vst [vmem:[%s1965_s11 + $0x8] sm:$0xf] %v221_v2  ;;  %v225_v4 = vld [vmem:[%s1960_s10 + $0xd0] sm:$0xf]  ;;  %v227_v5 = vld [vmem:[%s1960_s10 + $0x104] sm:$0xf] }
  0x19   : > { %224 = vst [vmem:[%s1965_s11 + $0xc] sm:$0xf] %v223_v3  ;;  %226 = vst [vmem:[%s1965_s11 + $0x10] sm:$0xf] %v225_v4  ;;  %v229_v6 = vld [vmem:[%s1960_s10 + $0x138] sm:$0xf] }
  0x1a   : > { %228 = vst [vmem:[%s1965_s11 + $0x14] sm:$0xf] %v227_v5  ;;  %v231_v7 = vld [vmem:[%s1960_s10 + $0x16c] sm:$0xf]  ;;  %v233_v8 = vld [vmem:[%s1960_s10 + $0x1a0] sm:$0xf] }
  0x1b   : > { %230 = vst [vmem:[%s1965_s11 + $0x18] sm:$0xf] %v229_v6  ;;  %232 = vst [vmem:[%s1965_s11 + $0x1c] sm:$0xf] %v231_v7  ;;  %v235_v9 = vld [vmem:[%s1960_s10 + $0x1d4] sm:$0xf] }
  0x1c   : > { %234 = vst [vmem:[%s1965_s11 + $0x20] sm:$0xf] %v233_v8  ;;  %v237_v10 = vld [vmem:[%s1960_s10 + $0x208] sm:$0xf]  ;;  %v239_v11 = vld [vmem:[%s1960_s10 + $0x23c] sm:$0xf] }
  0x1d   : > { %236 = vst [vmem:[%s1965_s11 + $0x24] sm:$0xf] %v235_v9  ;;  %238 = vst [vmem:[%s1965_s11 + $0x28] sm:$0xf] %v237_v10  ;;  %v241_v12 = vld [vmem:[%s1960_s10 + $0x270] sm:$0xf] }
  0x1e   : > { %240 = vst [vmem:[%s1965_s11 + $0x2c] sm:$0xf] %v239_v11  ;;  %v243_v13 = vld [vmem:[%s1960_s10 + $0x2a4] sm:$0xf]  ;;  %v245_v14 = vld [vmem:[%s1960_s10 + $0x2d8] sm:$0xf] }
  0x1f   : > { %242 = vst [vmem:[%s1965_s11 + $0x30] sm:$0xf] %v241_v12  ;;  %244 = vst [vmem:[%s1965_s11 + $0x34] sm:$0xf] %v243_v13  ;;  %v247_v15 = vld [vmem:[%s1960_s10 + $0x30c] sm:$0xf] }
  0x20   : > { %246 = vst [vmem:[%s1965_s11 + $0x38] sm:$0xf] %v245_v14  ;;  %v249_v16 = vld [vmem:[%s1960_s10 + $0x340] sm:$0xf]  ;;  %v251_v17 = vld [vmem:[%s1960_s10 + $0x374] sm:$0xf] }
  0x21   : > { %248 = vst [vmem:[%s1965_s11 + $0x3c] sm:$0xf] %v247_v15  ;;  %250 = vst [vmem:[%s1965_s11 + $0x40] sm:$0xf] %v249_v16  ;;  %v253_v18 = vld [vmem:[%s1960_s10 + $0x3a8] sm:$0xf] }
  0x22   : > { %252 = vst [vmem:[%s1965_s11 + $0x44] sm:$0xf] %v251_v17  ;;  %v255_v19 = vld [vmem:[%s1960_s10 + $0x3dc] sm:$0xf]  ;;  %v257_v20 = vld [vmem:[%s1960_s10 + $0x410] sm:$0xf] }
  0x23   : > { %254 = vst [vmem:[%s1965_s11 + $0x48] sm:$0xf] %v253_v18  ;;  %256 = vst [vmem:[%s1965_s11 + $0x4c] sm:$0xf] %v255_v19  ;;  %v259_v21 = vld [vmem:[%s1960_s10 + $0x444] sm:$0xf] }
  0x24   : > { %258 = vst [vmem:[%s1965_s11 + $0x50] sm:$0xf] %v257_v20  ;;  %v261_v22 = vld [vmem:[%s1960_s10 + $0x478] sm:$0xf]  ;;  %v263_v23 = vld [vmem:[%s1960_s10 + $0x4ac] sm:$0xf] }
  0x25   : > { %260 = vst [vmem:[%s1965_s11 + $0x54] sm:$0xf] %v259_v21  ;;  %262 = vst [vmem:[%s1965_s11 + $0x58] sm:$0xf] %v261_v22  ;;  %v265_v24 = vld [vmem:[%s1960_s10 + $0x4e0] sm:$0xf] }
  0x26   : > { %264 = vst [vmem:[%s1965_s11 + $0x5c] sm:$0xf] %v263_v23  ;;  %v267_v25 = vld [vmem:[%s1960_s10 + $0x514] sm:$0xf]  ;;  %v269_v26 = vld [vmem:[%s1960_s10 + $0x548] sm:$0xf] }
  0x27   : > { %266 = vst [vmem:[%s1965_s11 + $0x60] sm:$0xf] %v265_v24  ;;  %268 = vst [vmem:[%s1965_s11 + $0x64] sm:$0xf] %v267_v25  ;;  %v271_v27 = vld [vmem:[%s1960_s10 + $0x57c] sm:$0xf] }
  0x28   : > { %270 = vst [vmem:[%s1965_s11 + $0x68] sm:$0xf] %v269_v26  ;;  %v273_v28 = vld [vmem:[%s1960_s10 + $0x5b0] sm:$0xf]  ;;  %v275_v29 = vld [vmem:[%s1960_s10 + $0x5e4] sm:$0xf] }
  0x29   : > { %272 = vst [vmem:[%s1965_s11 + $0x6c] sm:$0xf] %v271_v27  ;;  %274 = vst [vmem:[%s1965_s11 + $0x70] sm:$0xf] %v273_v28  ;;  %v277_v30 = vld [vmem:[%s1960_s10 + $0x618] sm:$0xf] }
  0x2a   : > { %276 = vst [vmem:[%s1965_s11 + $0x74] sm:$0xf] %v275_v29  ;;  %v279_v31 = vld [vmem:[%s1960_s10 + $0x64c] sm:$0xf]  ;;  %278 = vst [vmem:[%s1965_s11 + $0x78] sm:$0xf] %v277_v30 }
  0x2b   : > { %280 = vst [vmem:[%s1965_s11 + $0x7c] sm:$0xf] %v279_v31 }
  0x2c PF: > { %p1453_p7 = scmp.ge.s32.totalorder %s1872_s21, 1  ;;  %p379_p8 = scmp.lt.s32.totalorder %s1872_s21, 27 }
  0x2e   : > { %p380_p9 = pnand %p1453_p7, %p379_p8 }
  0x2f   : > { %s386_s12 = sand.u32 (!%p380_p9), 1, %s1848_s15   ;;  %s1455_s13 = sshll.u32 (!%p380_p9), %s1856_s17, 4 }
  0x30   : > { %383 = sbr.rel (%p380_p9) target bundleno = 417 (0x1a1), region = 65  ;;  %s1454_s14 = sshll.u32 (!%p380_p9), %s386_s12, 7 }
  0x31   : > { %p438_p10 = scmp.lt.s32.totalorder (!%p380_p9), %s1455_s13, 207  ;;  %s1457_s24 = sshll.u32 (!%p380_p9), %s1860_s18, 5 }
  0x32   : > { %p447_p11 = scmp.lt.s32.totalorder (!%p380_p9), %s1457_s24, 63  ;;  %p455_p12 = scmp.lt.s32.totalorder (!%p380_p9), %s1860_s18, 1 }
  0x33   : > { %p1461_p13 = scmp.ne.s32.totalorder (!%p380_p9), %s1856_s17, 0 }
  0x35   : > { %s2278_s13 = smov (!%p438_p10, %s1455_s13), 207  ;;  %s2280_s24 = smov (!%p447_p11, %s1457_s24), 63 }
  0x36   : > { %s1456_s25 = sshll.u32 %s2278_s13, 2  ;;  %s2282_s18 = smov (!%p455_p12, %s1860_s18), 1 }
  0x37   : > { %s2037_s29 = scalar_lea.vmem %s2261_s1, %s1456_s25  ;;  %s1458_s30 = sshll.u32 %s2280_s24, 2 }
  0x38   : > { %s2043_s15 = scalar_lea.vmem %s2262_s2, %s1458_s30  ;;  %s1459_s7 = sshll.u32 %s2282_s18, 3 }
  0x39   : > { %s2048_s10 = scalar_lea.vmem %s2263_s3, %s1459_s7  ;;  %s2053_s13 = scalar_lea.vmem %s2264_s4, %s1459_s7 }
  0x3a   : > { %s2055_s25 = scalar_lea.vmem [#allocation3], %s1454_s14  ;;  %473 = sbr.rel (%p1461_p13) target bundleno = 80 (0x50), region = 73 }
  0x3f   : > { %v1874_v32 = vmov 0.0  }
  0x40   : > { %474 = vst [vmem:[#allocation2 + $0xb0] sm:$0xff] %v1874_v32  ;;  %475 = vst [vmem:[#allocation2] sm:$0xff] %v1874_v32 }
  0x41   : > { %476 = vst [vmem:[#allocation2 + $0xd8] sm:$0xff] %v1874_v32  ;;  %477 = vst [vmem:[#allocation2 + $0x18] sm:$0xff] %v1874_v32 }
  0x42   : > { %478 = vst [vmem:[#allocation2 + $0x50] sm:$0xff] %v1874_v32  ;;  %479 = vst [vmem:[#allocation2 + $0x68] sm:$0xff] %v1874_v32 }
  0x43   : > { %480 = vst [vmem:[#allocation2 + $0x30] sm:$0xff] %v1874_v32  ;;  %481 = vst [vmem:[#allocation2 + $0x48] sm:$0xff] %v1874_v32 }
  0x44   : > { %482 = vst [vmem:[#allocation2 + $0x80] sm:$0xff] %v1874_v32  ;;  %483 = vst [vmem:[#allocation2 + $0x88] sm:$0xff] %v1874_v32 }
  0x45   : > { %484 = vst [vmem:[#allocation2 + $0xe8] sm:$0xff] %v1874_v32  ;;  %485 = vst [vmem:[#allocation2 + $0xb8] sm:$0xff] %v1874_v32 }
  0x46   : > { %486 = vst [vmem:[#allocation2 + $0x60] sm:$0xff] %v1874_v32  ;;  %487 = vst [vmem:[#allocation2 + $0xf0] sm:$0xff] %v1874_v32 }
  0x47   : > { %488 = vst [vmem:[#allocation2 + $0x8] sm:$0xff] %v1874_v32  ;;  %489 = vst [vmem:[#allocation2 + $0x78] sm:$0xff] %v1874_v32 }
  0x48   : > { %490 = vst [vmem:[#allocation2 + $0x38] sm:$0xff] %v1874_v32  ;;  %491 = vst [vmem:[#allocation2 + $0x58] sm:$0xff] %v1874_v32 }
  0x49   : > { %492 = vst [vmem:[#allocation2 + $0x40] sm:$0xff] %v1874_v32  ;;  %493 = vst [vmem:[#allocation2 + $0xc8] sm:$0xff] %v1874_v32 }
  0x4a   : > { %494 = vst [vmem:[#allocation2 + $0xe0] sm:$0xff] %v1874_v32  ;;  %495 = vst [vmem:[#allocation2 + $0x90] sm:$0xff] %v1874_v32 }
  0x4b   : > { %496 = vst [vmem:[#allocation2 + $0x70] sm:$0xff] %v1874_v32  ;;  %497 = vst [vmem:[#allocation2 + $0xc0] sm:$0xff] %v1874_v32 }
  0x4c   : > { %498 = vst [vmem:[#allocation2 + $0xa8] sm:$0xff] %v1874_v32  ;;  %499 = vst [vmem:[#allocation2 + $0xd0] sm:$0xff] %v1874_v32 }
  0x4d   : > { %500 = vst [vmem:[#allocation2 + $0x10] sm:$0xff] %v1874_v32  ;;  %501 = vst [vmem:[#allocation2 + $0x28] sm:$0xff] %v1874_v32 }
  0x4e   : > { %502 = vst [vmem:[#allocation2 + $0xa0] sm:$0xff] %v1874_v32  ;;  %503 = vst [vmem:[#allocation2 + $0xf8] sm:$0xff] %v1874_v32 }
  0x4f   : > { %504 = vst [vmem:[#allocation2 + $0x20] sm:$0xff] %v1874_v32  ;;  %505 = vst [vmem:[#allocation2 + $0x98] sm:$0xff] %v1874_v32 }
  0x50 PF: > { %v1794_v33 = vld [vmem:[%s2037_s29 + $0x38] sm:$0xff]   ;;  %v1795_v34 = vld [vmem:[%s2037_s29 + $0x30] sm:$0xff]   ;;  %v1796_v35 = vld [vmem:[%s2037_s29 + $0x28] sm:$0xff]   ;;  %p1486_p0 = scmp.ne.s32.totalorder %s1856_s17, 12 }
  0x51   : > { %1672 = vmatprep.subr.bf16.mxu0 %v1794_v33  ;;  %1720 = vmatprep.subr.bf16.mxu1 %v1794_v33  ;;  %v1797_v36 = vld [vmem:[%s2037_s29 + $0x20] sm:$0xff]   ;;  %v1798_v39 = vld [vmem:[%s2037_s29 + $0x18] sm:$0xff]   ;;  %v1799_v40 = vld [vmem:[%s2037_s29 + $0x10] sm:$0xff]  }
  0x52   : > { %1673 = vmatpush3.bf16.msra.mxu0 %v1794_v33  ;;  %1728 = vmatpush3.bf16.msra.mxu1 %v1794_v33  ;;  %v1802_v37 = vld [vmem:[%s2055_s25] sm:$0xff]   ;;  %v1800_v41 = vld [vmem:[%s2037_s29 + $0x8] sm:$0xff]   ;;  %v1806_v45 = vld [vmem:[%s2055_s25 + $0x10] sm:$0xff]  }
  0x53   : > { %1674 = vmatprep.subr.bf16.mxu0 %v1795_v34  ;;  %1721 = vmatprep.subr.bf16.mxu1 %v1795_v34  ;;  %v1803_v38 = vld [vmem:[%s2055_s25 + $0x40] sm:$0xff]   ;;  %v1804_v43 = vld [vmem:[%s2055_s25 + $0x8] sm:$0xff]   ;;  %v1807_v46 = vld [vmem:[%s2055_s25 + $0x50] sm:$0xff]  }
  0x54   : > { %1688 = vmatprep.mubr.bf16.mxu0 %v1802_v37  ;;  %1704 = vmatprep.mubr.bf16.mxu1 %v1803_v38  ;;  %v1801_v42 = vld [vmem:[%s2037_s29] sm:$0xff]   ;;  %v1805_v44 = vld [vmem:[%s2055_s25 + $0x48] sm:$0xff]   ;;  %v1808_v47 = vld [vmem:[%s2055_s25 + $0x18] sm:$0xff]  }
  0x55   : > { %v1809_v48 = vld [vmem:[%s2055_s25 + $0x58] sm:$0xff]   ;;  %v1810_v49 = vld [vmem:[%s2055_s25 + $0x20] sm:$0xff]   ;;  %v1812_v51 = vld [vmem:[%s2055_s25 + $0x28] sm:$0xff]  }
  0x56   : > { %1675 = vmatpush3.bf16.msra.mxu0 %v1795_v34  ;;  %1729 = vmatpush3.bf16.msra.mxu1 %v1795_v34  ;;  %v1811_v50 = vld [vmem:[%s2055_s25 + $0x60] sm:$0xff]   ;;  %v1813_v52 = vld [vmem:[%s2055_s25 + $0x68] sm:$0xff]   ;;  %v1814_v53 = vld [vmem:[%s2055_s25 + $0x30] sm:$0xff]  }
  0x57   : > { %1676 = vmatprep.subr.bf16.mxu0 %v1796_v35  ;;  %1722 = vmatprep.subr.bf16.mxu1 %v1796_v35  ;;  %v1815_v54 = vld [vmem:[%s2055_s25 + $0x70] sm:$0xff]   ;;  %v1816_v55 = vld [vmem:[%s2055_s25 + $0x38] sm:$0xff]   ;;  %v524_v58 = vld [vmem:[#allocation2 + $0x40] sm:$0xff] }
  0x58   : > { %v1817_v56 = vld [vmem:[%s2055_s25 + $0x78] sm:$0xff]   ;;  %v506_v61 = vld [vmem:[#allocation2 + $0xb0] sm:$0xff]  ;;  %v525_v4 = vld [vmem:[#allocation2 + $0xc8] sm:$0xff] }
  0x59   : > { %v508_v57 = vld [vmem:[#allocation2 + $0xd8] sm:$0xff]  ;;  %v507_v9 = vld [vmem:[#allocation2] sm:$0xff]  ;;  %v512_v15 = vld [vmem:[#allocation2 + $0x30] sm:$0xff] }
  0x5a   : > { %1677 = vmatpush3.bf16.msra.mxu0 %v1796_v35  ;;  %1730 = vmatpush3.bf16.msra.mxu1 %v1796_v35  ;;  %v522_v62 = vld [vmem:[#allocation2 + $0x38] sm:$0xff]  ;;  %v528_v16 = vld [vmem:[#allocation2 + $0x70] sm:$0xff]  ;;  %v526_v22 = vld [vmem:[#allocation2 + $0xe0] sm:$0xff] }
  0x5b   : > { %1678 = vmatprep.subr.bf16.mxu0 %v1797_v36  ;;  %1723 = vmatprep.subr.bf16.mxu1 %v1797_v36  ;;  %v509_v3 = vld [vmem:[#allocation2 + $0x18] sm:$0xff]  ;;  %v510_v21 = vld [vmem:[#allocation2 + $0x50] sm:$0xff]  ;;  %v513_v27 = vld [vmem:[#allocation2 + $0x48] sm:$0xff] }
  0x5c   : > { %v523_v10 = vld [vmem:[#allocation2 + $0x58] sm:$0xff]  ;;  %v529_v28 = vld [vmem:[#allocation2 + $0xc0] sm:$0xff]  ;;  %v511_v33 = vld [vmem:[#allocation2 + $0x68] sm:$0xff] }
  0x5d   : > { %v527_v34 = vld [vmem:[#allocation2 + $0x90] sm:$0xff] }
  0x5e   : > { %1679 = vmatpush3.bf16.msra.mxu0 %v1797_v36  ;;  %1731 = vmatpush3.bf16.msra.mxu1 %v1797_v36 }
  0x5f   : > { %1680 = vmatprep.subr.bf16.mxu0 %v1798_v39  ;;  %1724 = vmatprep.subr.bf16.mxu1 %v1798_v39 }
  0x62   : > { %1681 = vmatpush3.bf16.msra.mxu0 %v1798_v39  ;;  %1732 = vmatpush3.bf16.msra.mxu1 %v1798_v39  ;;  %v516_v39 = vld [vmem:[#allocation2 + $0xe8] sm:$0xff] }
  0x63   : > { %1682 = vmatprep.subr.bf16.mxu0 %v1799_v40  ;;  %1725 = vmatprep.subr.bf16.mxu1 %v1799_v40 }
  0x66   : > { %1683 = vmatpush3.bf16.msra.mxu0 %v1799_v40  ;;  %1733 = vmatpush3.bf16.msra.mxu1 %v1799_v40  ;;  %v532_v40 = vld [vmem:[#allocation2 + $0x10] sm:$0xff] }
  0x67   : > { %1684 = vmatprep.subr.bf16.mxu0 %v1800_v41  ;;  %1726 = vmatprep.subr.bf16.mxu1 %v1800_v41 }
  0x6a   : > { %1685 = vmatpush3.bf16.msra.mxu0 %v1800_v41  ;;  %1734 = vmatpush3.bf16.msra.mxu1 %v1800_v41 }
  0x6b   : > { %1686 = vmatprep.subr.bf16.mxu0 %v1801_v42  ;;  %1727 = vmatprep.subr.bf16.mxu1 %v1801_v42 }
  0x6e   : > { %1687 = vmatpush3.bf16.msra.mxu0 %v1801_v42  ;;  %1735 = vmatpush3.bf16.msra.mxu1 %v1801_v42 }
  0x71   : > { %1689 = vmatmul.mubr.bf16.vlgmr.msra.gmra.mxu0 %v1804_v43  ;;  %1705 = vmatmul.mubr.bf16.vlgmr.msra.gmra.mxu1 %v1805_v44 }
  0x72   : > { %1692 = vmatprep.mubr.bf16.mxu0 %v1806_v45  ;;  %1708 = vmatprep.mubr.bf16.mxu1 %v1807_v46  ;;  %v514_v45 = vld [vmem:[#allocation2 + $0x80] sm:$0xff]  ;;  %v530_v46 = vld [vmem:[#allocation2 + $0xa8] sm:$0xff] }
  0x79   : > { %1693 = vmatmul.mubr.bf16.gmra.mxu0 %v1808_v47  ;;  %1709 = vmatmul.mubr.bf16.gmra.mxu1 %v1809_v48 }
  0x7a   : > { %1696 = vmatprep.mubr.bf16.mxu0 %v1810_v49  ;;  %1712 = vmatprep.mubr.bf16.mxu1 %v1811_v50 }
  0x81   : > { %1697 = vmatmul.mubr.bf16.gmra.mxu0 %v1812_v51  ;;  %1713 = vmatmul.mubr.bf16.gmra.mxu1 %v1813_v52  ;;  %v517_v51 = vld [vmem:[#allocation2 + $0xb8] sm:$0xff]  ;;  %v533_v52 = vld [vmem:[#allocation2 + $0x28] sm:$0xff] }
  0x82   : > { %1700 = vmatprep.mubr.bf16.mxu0 %v1814_v53  ;;  %1716 = vmatprep.mubr.bf16.mxu1 %v1815_v54 }
  0x89   : > { %1701 = vmatmul.mubr.bf16.gmra.mxu0 %v1816_v55  ;;  %1717 = vmatmul.mubr.bf16.gmra.mxu1 %v1817_v56 }
 0x131   : > { %v1690_v59 = vpop.f32.mrf.mxu0  ;;  %v1706_v60 = vpop.f32.mrf.mxu1 }
 0x132   : > { %v893_v63 = vadd.f32 %v1690_v59, %v508_v57  ;;  %v909_v0 = vadd.f32 %v1706_v60, %v524_v58  ;;  %v515_v57 = vld [vmem:[#allocation2 + $0x88] sm:$0xff]  ;;  %v531_v58 = vld [vmem:[#allocation2 + $0xd0] sm:$0xff] }
 0x133   : > { %v764_v1 = vpop.f32.mrf.mxu0  ;;  %v828_v2 = vpop.f32.mrf.mxu1 }
 0x134   : > { %925 = vst [vmem:[#allocation2 + $0xd8] sm:$0xff] %v893_v63  ;;  %941 = vst [vmem:[#allocation2 + $0x40] sm:$0xff] %v909_v0  ;;  %v891_v5 = vadd.f32 %v764_v1, %v506_v61  ;;  %v907_v6 = vadd.f32 %v828_v2, %v522_v62  ;;  %v520_v63 = vld [vmem:[#allocation2 + $0x8] sm:$0xff]  ;;  %v536_v0 = vld [vmem:[#allocation2 + $0x20] sm:$0xff] }
 0x135   : > { %v1691_v7 = vpop.f32.mrf.mxu0  ;;  %v1707_v8 = vpop.f32.mrf.mxu1 }
 0x136   : > { %923 = vst [vmem:[#allocation2 + $0xb0] sm:$0xff] %v891_v5  ;;  %939 = vst [vmem:[#allocation2 + $0x38] sm:$0xff] %v907_v6  ;;  %v894_v11 = vadd.f32 %v1691_v7, %v509_v3  ;;  %v910_v12 = vadd.f32 %v1707_v8, %v525_v4  ;;  %v518_v5 = vld [vmem:[#allocation2 + $0x60] sm:$0xff] }
 0x137   : > { %v767_v13 = vpop.f32.mrf.mxu0  ;;  %v831_v14 = vpop.f32.mrf.mxu1  ;;  %v534_v6 = vld [vmem:[#allocation2 + $0xa0] sm:$0xff] }
 0x138   : > { %926 = vst [vmem:[#allocation2 + $0x18] sm:$0xff] %v894_v11  ;;  %942 = vst [vmem:[#allocation2 + $0xc8] sm:$0xff] %v910_v12  ;;  %v892_v17 = vadd.f32 %v767_v13, %v507_v9  ;;  %v908_v18 = vadd.f32 %v831_v14, %v523_v10  ;;  %v521_v11 = vld [vmem:[#allocation2 + $0x78] sm:$0xff] }
 0x139   : > { %v1694_v19 = vpop.f32.mrf.mxu0  ;;  %v1710_v20 = vpop.f32.mrf.mxu1  ;;  %v537_v12 = vld [vmem:[#allocation2 + $0x98] sm:$0xff] }
 0x13a   : > { %924 = vst [vmem:[#allocation2] sm:$0xff] %v892_v17  ;;  %940 = vst [vmem:[#allocation2 + $0x58] sm:$0xff] %v908_v18  ;;  %v897_v23 = vadd.f32 %v1694_v19, %v512_v15  ;;  %v913_v24 = vadd.f32 %v1710_v20, %v528_v16  ;;  %v519_v17 = vld [vmem:[#allocation2 + $0xf0] sm:$0xff]  ;;  %v535_v18 = vld [vmem:[#allocation2 + $0xf8] sm:$0xff] }
 0x13b   : > { %v780_v25 = vpop.f32.mrf.mxu0  ;;  %v844_v26 = vpop.f32.mrf.mxu1 }
 0x13c   : > { %929 = vst [vmem:[#allocation2 + $0x30] sm:$0xff] %v897_v23  ;;  %945 = vst [vmem:[#allocation2 + $0x70] sm:$0xff] %v913_v24  ;;  %v895_v29 = vadd.f32 %v780_v25, %v510_v21  ;;  %v911_v30 = vadd.f32 %v844_v26, %v526_v22 }
 0x13d   : > { %v1695_v31 = vpop.f32.mrf.mxu0  ;;  %v1711_v32 = vpop.f32.mrf.mxu1 }
 0x13e   : > { %927 = vst [vmem:[#allocation2 + $0x50] sm:$0xff] %v895_v29  ;;  %943 = vst [vmem:[#allocation2 + $0xe0] sm:$0xff] %v911_v30  ;;  %v898_v35 = vadd.f32 %v1695_v31, %v513_v27  ;;  %v914_v36 = vadd.f32 %v1711_v32, %v529_v28 }
 0x13f   : > { %v783_v37 = vpop.f32.mrf.mxu0  ;;  %v847_v38 = vpop.f32.mrf.mxu1 }
 0x140   : > { %930 = vst [vmem:[#allocation2 + $0x48] sm:$0xff] %v898_v35  ;;  %946 = vst [vmem:[#allocation2 + $0xc0] sm:$0xff] %v914_v36  ;;  %v896_v41 = vadd.f32 %v783_v37, %v511_v33  ;;  %v912_v42 = vadd.f32 %v847_v38, %v527_v34 }
 0x141   : > { %v1698_v43 = vpop.f32.mrf.mxu0  ;;  %v1714_v44 = vpop.f32.mrf.mxu1 }
 0x142   : > { %928 = vst [vmem:[#allocation2 + $0x68] sm:$0xff] %v896_v41  ;;  %944 = vst [vmem:[#allocation2 + $0x90] sm:$0xff] %v912_v42  ;;  %v901_v47 = vadd.f32 %v1698_v43, %v516_v39  ;;  %v917_v48 = vadd.f32 %v1714_v44, %v532_v40 }
 0x143   : > { %v796_v49 = vpop.f32.mrf.mxu0  ;;  %v860_v50 = vpop.f32.mrf.mxu1 }
 0x144   : > { %933 = vst [vmem:[#allocation2 + $0xe8] sm:$0xff] %v901_v47  ;;  %949 = vst [vmem:[#allocation2 + $0x10] sm:$0xff] %v917_v48  ;;  %v899_v53 = vadd.f32 %v796_v49, %v514_v45  ;;  %v915_v54 = vadd.f32 %v860_v50, %v530_v46 }
 0x145   : > { %v1699_v55 = vpop.f32.mrf.mxu0  ;;  %v1715_v56 = vpop.f32.mrf.mxu1 }
 0x146   : > { %931 = vst [vmem:[#allocation2 + $0x80] sm:$0xff] %v899_v53  ;;  %947 = vst [vmem:[#allocation2 + $0xa8] sm:$0xff] %v915_v54  ;;  %v902_v59 = vadd.f32 %v1699_v55, %v517_v51  ;;  %v918_v60 = vadd.f32 %v1715_v56, %v533_v52 }
 0x147   : > { %v799_v61 = vpop.f32.mrf.mxu0  ;;  %v863_v62 = vpop.f32.mrf.mxu1 }
 0x148   : > { %934 = vst [vmem:[#allocation2 + $0xb8] sm:$0xff] %v902_v59  ;;  %950 = vst [vmem:[#allocation2 + $0x28] sm:$0xff] %v918_v60  ;;  %v900_v1 = vadd.f32 %v799_v61, %v515_v57  ;;  %v916_v2 = vadd.f32 %v863_v62, %v531_v58 }
 0x149   : > { %v1702_v3 = vpop.f32.mrf.mxu0  ;;  %v1718_v4 = vpop.f32.mrf.mxu1 }
 0x14a   : > { %932 = vst [vmem:[#allocation2 + $0x88] sm:$0xff] %v900_v1  ;;  %948 = vst [vmem:[#allocation2 + $0xd0] sm:$0xff] %v916_v2  ;;  %v905_v7 = vadd.f32 %v1702_v3, %v520_v63  ;;  %v921_v8 = vadd.f32 %v1718_v4, %v536_v0 }
 0x14b   : > { %v812_v9 = vpop.f32.mrf.mxu0  ;;  %v876_v10 = vpop.f32.mrf.mxu1 }
 0x14c   : > { %937 = vst [vmem:[#allocation2 + $0x8] sm:$0xff] %v905_v7  ;;  %953 = vst [vmem:[#allocation2 + $0x20] sm:$0xff] %v921_v8  ;;  %v903_v13 = vadd.f32 %v812_v9, %v518_v5  ;;  %v919_v14 = vadd.f32 %v876_v10, %v534_v6 }
 0x14d   : > { %v1703_v15 = vpop.f32.mrf.mxu0  ;;  %v1719_v16 = vpop.f32.mrf.mxu1 }
 0x14e   : > { %935 = vst [vmem:[#allocation2 + $0x60] sm:$0xff] %v903_v13  ;;  %951 = vst [vmem:[#allocation2 + $0xa0] sm:$0xff] %v919_v14  ;;  %v906_v19 = vadd.f32 %v1703_v15, %v521_v11  ;;  %v922_v20 = vadd.f32 %v1719_v16, %v537_v12  ;;  %958 = sbr.rel (%p1486_p0) target bundleno = 417 (0x1a1), region = 77 }
 0x14f   : > { %v815_v21 = vpop.f32.mrf.mxu0  ;;  %v879_v22 = vpop.f32.mrf.mxu1 }
 0x150   : > { %938 = vst [vmem:[#allocation2 + $0x78] sm:$0xff] %v906_v19  ;;  %954 = vst [vmem:[#allocation2 + $0x98] sm:$0xff] %v922_v20  ;;  %v904_v23 = vadd.f32 %v815_v21, %v519_v17  ;;  %v920_v24 = vadd.f32 %v879_v22, %v535_v18 }
 0x152   : > { %936 = vst [vmem:[#allocation2 + $0xf0] sm:$0xff] %v904_v23  ;;  %952 = vst [vmem:[#allocation2 + $0xf8] sm:$0xff] %v920_v24 }
 0x153   : > { %v959_v25 = vld [vmem:[#allocation2 + $0xb0] sm:$0xff]  ;;  %v960_v26 = vld [vmem:[#allocation2] sm:$0xff]  ;;  %v961_v27 = vld [vmem:[#allocation2 + $0xd8] sm:$0xff] }
 0x154   : > { %v1556_v28 = vpack.c.bf16 %v960_v26, %v959_v25  ;;  %v1151_v29 = vadd.f32 %v960_v26, %v959_v25  ;;  %v1188_v30 = vmul.f32 %v959_v25, %v959_v25  ;;  %v1189_v31 = vmul.f32 %v960_v26, %v960_v26  ;;  %v962_v32 = vld [vmem:[#allocation2 + $0x18] sm:$0xff]  ;;  %v963_v33 = vld [vmem:[#allocation2 + $0x50] sm:$0xff]  ;;  %v964_v34 = vld [vmem:[#allocation2 + $0x68] sm:$0xff] }
 0x155   : > { %v1561_v35 = vpack.c.bf16 %v962_v32, %v961_v27  ;;  %v1190_v36 = vmul.f32 %v961_v27, %v961_v27  ;;  %v1566_v37 = vpack.c.bf16 %v964_v34, %v963_v33  ;;  %v965_v38 = vld [vmem:[#allocation2 + $0x30] sm:$0xff]  ;;  %v1191_v41 = vmul.f32 %v962_v32, %v962_v32  ;;  %v966_v42 = vld [vmem:[#allocation2 + $0x48] sm:$0xff]  ;;  %v967_v43 = vld [vmem:[#allocation2 + $0x80] sm:$0xff] }
 0x156   : > { %1557 = vst [vmem:[%s2043_s15] sm:$0xff] %v1556_v28   ;;  %v1220_v39 = vadd.f32 %v1189_v31, %v1188_v30  ;;  %v1152_v40 = vadd.f32 %v1151_v29, %v961_v27  ;;  %v2084_v44 = vld [vmem:[#allocation2 + $0x88] sm:$0xff]  ;;  %v1571_v45 = vpack.c.bf16 %v966_v42, %v965_v38  ;;  %v1192_v50 = vmul.f32 %v963_v33, %v963_v33  ;;  %v2091_v51 = vld [vmem:[#allocation2 + $0xb8] sm:$0xff]  ;;  %v2093_v52 = vld [vmem:[#allocation2 + $0x60] sm:$0xff] }
 0x157   : > { %1633 = vst [vmem:[%s2043_s15 + $0x8] sm:$0xff] %v1561_v35   ;;  %1634 = vst [vmem:[%s2043_s15 + $0x10] sm:$0xff] %v1566_v37   ;;  %v1576_v46 = vpack.c.bf16 %v2084_v44, %v967_v43  ;;  %v2089_v47 = vld [vmem:[#allocation2 + $0xe8] sm:$0xff]  ;;  %v1193_v59 = vmul.f32 %v964_v34, %v964_v34  ;;  %v2105_v60 = vld [vmem:[#allocation2 + $0x78] sm:$0xff]  ;;  %v1194_v4 = vmul.f32 %v965_v38, %v965_v38 }
 0x158   : > { %v1153_v48 = vadd.f32 %v1152_v40, %v962_v32  ;;  %v1221_v49 = vadd.f32 %v1220_v39, %v1190_v36  ;;  %1635 = vst [vmem:[%s2043_s15 + $0x18] sm:$0xff] %v1571_v45   ;;  %v1581_v54 = vpack.c.bf16 %v2091_v51, %v2089_v47  ;;  %v2103_v56 = vld [vmem:[#allocation2 + $0x8] sm:$0xff]  ;;  %v2107_v61 = vld [vmem:[#allocation2 + $0x38] sm:$0xff]  ;;  %v2117_v1 = vld [vmem:[#allocation2 + $0x40] sm:$0xff]  ;;  %v1195_v13 = vmul.f32 %v966_v42, %v966_v42 }
 0x159   : > { %v2095_v53 = vld [vmem:[#allocation2 + $0xf0] sm:$0xff]  ;;  %1636 = vst [vmem:[%s2043_s15 + $0x20] sm:$0xff] %v1576_v46   ;;  %v2109_v62 = vld [vmem:[#allocation2 + $0x58] sm:$0xff]  ;;  %v1591_v63 = vpack.c.bf16 %v2105_v60, %v2103_v56  ;;  %v2119_v5 = vld [vmem:[#allocation2 + $0xc8] sm:$0xff]  ;;  %v1196_v22 = vmul.f32 %v967_v43, %v967_v43  ;;  %v1197_v30 = vmul.f32 %v2084_v44, %v2084_v44  ;;  %v1198_v36 = vmul.f32 %v2089_v47, %v2089_v47 }
 0x15a   : > { %v1586_v55 = vpack.c.bf16 %v2095_v53, %v2093_v52  ;;  %v1222_v57 = vadd.f32 %v1221_v49, %v1191_v41  ;;  %v1154_v58 = vadd.f32 %v1153_v48, %v963_v33  ;;  %1637 = vst [vmem:[%s2043_s15 + $0x28] sm:$0xff] %v1581_v54   ;;  %v1596_v0 = vpack.c.bf16 %v2109_v62, %v2107_v61  ;;  %v2121_v6 = vld [vmem:[#allocation2 + $0xe0] sm:$0xff]  ;;  %v2123_v7 = vld [vmem:[#allocation2 + $0x90] sm:$0xff]  ;;  %v2135_v15 = vld [vmem:[#allocation2 + $0xa8] sm:$0xff] }
 0x15b   : > { %1639 = vst [vmem:[%s2043_s15 + $0x38] sm:$0xff] %v1591_v63   ;;  %v1601_v8 = vpack.c.bf16 %v2119_v5, %v2117_v1  ;;  %v1606_v9 = vpack.c.bf16 %v2123_v7, %v2121_v6  ;;  %v2131_v10 = vld [vmem:[#allocation2 + $0x70] sm:$0xff]  ;;  %v2133_v14 = vld [vmem:[#allocation2 + $0xc0] sm:$0xff]  ;;  %v2147_v23 = vld [vmem:[#allocation2 + $0x28] sm:$0xff]  ;;  %v1199_v39 = vmul.f32 %v2091_v51, %v2091_v51  ;;  %v1201_v45 = vmul.f32 %v2095_v53, %v2095_v53 }
 0x15c   : > { %1638 = vst [vmem:[%s2043_s15 + $0x30] sm:$0xff] %v1586_v55   ;;  %v1155_v2 = vadd.f32 %v1154_v58, %v964_v34  ;;  %v1223_v3 = vadd.f32 %v1222_v57, %v1192_v50  ;;  %1640 = vst [vmem:[%s2043_s15 + $0x40] sm:$0xff] %v1596_v0   ;;  %v2137_v16 = vld [vmem:[#allocation2 + $0xd0] sm:$0xff]  ;;  %v1611_v17 = vpack.c.bf16 %v2133_v14, %v2131_v10  ;;  %v2149_v24 = vld [vmem:[#allocation2 + $0xa0] sm:$0xff] }
 0x15d   : > { %1641 = vst [vmem:[%s2043_s15 + $0x48] sm:$0xff] %v1601_v8   ;;  %1642 = vst [vmem:[%s2043_s15 + $0x50] sm:$0xff] %v1606_v9   ;;  %v1616_v18 = vpack.c.bf16 %v2137_v16, %v2135_v15  ;;  %v2145_v19 = vld [vmem:[#allocation2 + $0x10] sm:$0xff]  ;;  %v2151_v25 = vld [vmem:[#allocation2 + $0xf8] sm:$0xff] }
 0x15e   : > { %v1224_v11 = vadd.f32 %v1223_v3, %v1193_v59  ;;  %v1156_v12 = vadd.f32 %v1155_v2, %v965_v38  ;;  %1643 = vst [vmem:[%s2043_s15 + $0x58] sm:$0xff] %v1611_v17   ;;  %v1621_v26 = vpack.c.bf16 %v2147_v23, %v2145_v19  ;;  %v1626_v27 = vpack.c.bf16 %v2151_v25, %v2149_v24  ;;  %v2161_v31 = vld [vmem:[#allocation2 + $0x20] sm:$0xff]  ;;  %v2163_v32 = vld [vmem:[#allocation2 + $0x98] sm:$0xff] }
 0x15f   : > { %1644 = vst [vmem:[%s2043_s15 + $0x60] sm:$0xff] %v1616_v18   ;;  %v1631_v33 = vpack.c.bf16 %v2163_v32, %v2161_v31 }
 0x160   : > { %v1157_v20 = vadd.f32 %v1156_v12, %v966_v42  ;;  %v1225_v21 = vadd.f32 %v1224_v11, %v1194_v4  ;;  %1645 = vst [vmem:[%s2043_s15 + $0x68] sm:$0xff] %v1621_v26   ;;  %1646 = vst [vmem:[%s2043_s15 + $0x70] sm:$0xff] %v1626_v27   ;;  %v1200_v42 = vmul.f32 %v2093_v52, %v2093_v52 }
 0x161   : > { %1647 = vst [vmem:[%s2043_s15 + $0x78] sm:$0xff] %v1631_v33  }
 0x162   : > { %v1226_v28 = vadd.f32 %v1225_v21, %v1195_v13  ;;  %v1158_v29 = vadd.f32 %v1157_v20, %v967_v43 }
 0x164   : > { %v1159_v34 = vadd.f32 %v1158_v29, %v2084_v44  ;;  %v1227_v35 = vadd.f32 %v1226_v28, %v1196_v22 }
 0x166   : > { %v1228_v37 = vadd.f32 %v1227_v35, %v1197_v30  ;;  %v1160_v38 = vadd.f32 %v1159_v34, %v2089_v47  ;;  %v1202_v47 = vmul.f32 %v2103_v56, %v2103_v56 }
 0x168   : > { %v1161_v40 = vadd.f32 %v1160_v38, %v2091_v51  ;;  %v1229_v41 = vadd.f32 %v1228_v37, %v1198_v36  ;;  %v1203_v51 = vmul.f32 %v2105_v60, %v2105_v60 }
 0x16a   : > { %v1230_v43 = vadd.f32 %v1229_v41, %v1199_v39  ;;  %v1162_v44 = vadd.f32 %v1161_v40, %v2093_v52  ;;  %v1204_v52 = vmul.f32 %v2107_v61, %v2107_v61 }
 0x16c   : > { %v1163_v46 = vadd.f32 %v1162_v44, %v2095_v53  ;;  %v1231_v48 = vadd.f32 %v1230_v43, %v1200_v42  ;;  %v1205_v53 = vmul.f32 %v2109_v62, %v2109_v62 }
 0x16e   : > { %v1232_v49 = vadd.f32 %v1231_v48, %v1201_v45  ;;  %v1164_v50 = vadd.f32 %v1163_v46, %v2103_v56  ;;  %v1206_v56 = vmul.f32 %v2117_v1, %v2117_v1 }
 0x170   : > { %v1165_v54 = vadd.f32 %v1164_v50, %v2105_v60  ;;  %v1233_v55 = vadd.f32 %v1232_v49, %v1202_v47  ;;  %v1207_v60 = vmul.f32 %v2119_v5, %v2119_v5 }
 0x172   : > { %v1234_v57 = vadd.f32 %v1233_v55, %v1203_v51  ;;  %v1166_v58 = vadd.f32 %v1165_v54, %v2107_v61  ;;  %v1208_v61 = vmul.f32 %v2121_v6, %v2121_v6 }
 0x174   : > { %v1167_v59 = vadd.f32 %v1166_v58, %v2109_v62  ;;  %v1235_v63 = vadd.f32 %v1234_v57, %v1204_v52  ;;  %v1209_v62 = vmul.f32 %v2123_v7, %v2123_v7 }
 0x176   : > { %v1236_v0 = vadd.f32 %v1235_v63, %v1205_v53  ;;  %v1168_v2 = vadd.f32 %v1167_v59, %v2117_v1  ;;  %v1210_v1 = vmul.f32 %v2131_v10, %v2131_v10 }
 0x178   : > { %v1169_v3 = vadd.f32 %v1168_v2, %v2119_v5  ;;  %v1237_v4 = vadd.f32 %v1236_v0, %v1206_v56  ;;  %v1211_v5 = vmul.f32 %v2133_v14, %v2133_v14 }
 0x17a   : > { %v1238_v8 = vadd.f32 %v1237_v4, %v1207_v60  ;;  %v1170_v9 = vadd.f32 %v1169_v3, %v2121_v6  ;;  %v1212_v6 = vmul.f32 %v2135_v15, %v2135_v15 }
 0x17c   : > { %v1171_v11 = vadd.f32 %v1170_v9, %v2123_v7  ;;  %v1239_v12 = vadd.f32 %v1238_v8, %v1208_v61  ;;  %v1213_v7 = vmul.f32 %v2137_v16, %v2137_v16 }
 0x17e   : > { %v1240_v13 = vadd.f32 %v1239_v12, %v1209_v62  ;;  %v1172_v17 = vadd.f32 %v1171_v11, %v2131_v10  ;;  %v1214_v10 = vmul.f32 %v2145_v19, %v2145_v19 }
 0x180   : > { %v1173_v18 = vadd.f32 %v1172_v17, %v2133_v14  ;;  %v1241_v20 = vadd.f32 %v1240_v13, %v1210_v1  ;;  %v1215_v14 = vmul.f32 %v2147_v23, %v2147_v23 }
 0x182   : > { %v1242_v21 = vadd.f32 %v1241_v20, %v1211_v5  ;;  %v1174_v22 = vadd.f32 %v1173_v18, %v2135_v15  ;;  %v1216_v15 = vmul.f32 %v2149_v24, %v2149_v24 }
 0x184   : > { %v1175_v26 = vadd.f32 %v1174_v22, %v2137_v16  ;;  %v1243_v27 = vadd.f32 %v1242_v21, %v1212_v6  ;;  %v1217_v16 = vmul.f32 %v2151_v25, %v2151_v25 }
 0x186   : > { %v1244_v28 = vadd.f32 %v1243_v27, %v1213_v7  ;;  %v1176_v29 = vadd.f32 %v1175_v26, %v2145_v19  ;;  %v1218_v19 = vmul.f32 %v2161_v31, %v2161_v31 }
 0x188   : > { %v1177_v30 = vadd.f32 %v1176_v29, %v2147_v23  ;;  %v1245_v33 = vadd.f32 %v1244_v28, %v1214_v10  ;;  %v1219_v23 = vmul.f32 %v2163_v32, %v2163_v32 }
 0x18a   : > { %v1246_v34 = vadd.f32 %v1245_v33, %v1215_v14  ;;  %v1178_v35 = vadd.f32 %v1177_v30, %v2149_v24 }
 0x18c   : > { %v1179_v36 = vadd.f32 %v1178_v35, %v2151_v25  ;;  %v1247_v37 = vadd.f32 %v1246_v34, %v1216_v15 }
 0x18e   : > { %v1248_v38 = vadd.f32 %v1247_v37, %v1217_v16  ;;  %v1180_v39 = vadd.f32 %v1179_v36, %v2161_v31 }
 0x190   : > { %v1181_v40 = vadd.f32 %v1180_v39, %v2163_v32  ;;  %v1249_v24 = vadd.f32 %v1248_v38, %v1218_v19 }
 0x192   : > { %v1182_v41 = vrot.slane %v1181_v40, 4  ;;  %v1250_v42 = vadd.f32 %v1249_v24, %v1219_v23 }
 0x194   : > { %v1183_v43 = vadd.f32 %v1182_v41, %v1181_v40  ;;  %v1251_v44 = vrot.slane %v1250_v42, 4 }
 0x196   : > { %v1184_v25 = vrot.slane %v1183_v43, 2  ;;  %v1252_v45 = vadd.f32 %v1251_v44, %v1250_v42 }
 0x198   : > { %v1185_v46 = vadd.f32 %v1184_v25, %v1183_v43  ;;  %v1253_v48 = vrot.slane %v1252_v45, 2 }
 0x19a   : > { %v1186_v47 = vrot.slane %v1185_v46, 1  ;;  %v1254_v49 = vadd.f32 %v1253_v48, %v1252_v45 }
 0x19c   : > { %v1187_v50 = vadd.f32 %v1186_v47, %v1185_v46  ;;  %v1255_v31 = vrot.slane %v1254_v49, 1 }
 0x19e   : > { %1257 = vst [vmem:[%s2048_s10] sm:$0xff] %v1187_v50  ;;  %v1256_v51 = vadd.f32 %v1255_v31, %v1254_v49 }
 0x1a0   : > { %1258 = vst [vmem:[%s2053_s13] sm:$0xff] %v1256_v51 }
 0x1a1 PF: > { %s15_s21 = sadd.s32 1, %s1872_s21   ;;  %s2265_s15 = smov %s1852_s16 }
 0x1a2   : > { %p12_p1 = scmp.ge.s32.totalorder %s15_s21, 28   ;;  %s2266_s16 = smov %s1951_s28 }
 0x1a3   : > { %s2267_s17 = smov %s1864_s19  ;;  %s2268_s18 = smov %s1868_s20 }
 0x1a4   : > { %s2269_s19 = smov %s2272_s22  ;;  %s2270_s20 = smov %s2276_s23 }
 0x1a5   :  { %14 = sbr.rel (!%p12_p1) target bundleno = 4 (0x4), region = 139 }

// kernel: forward.12
= control target key start
LH: loop header
LB: loop body
LE: loop exit
PB: predicated region body
PF: predicated region fallthrough
CT: control target
= control target key end

     0   :  { %s1631_s0 = inlined_call_operand.vmem [shape: bf16[512,128], index: 0, kind: input, shape index: {}]   ;;  %s1632_s1 = inlined_call_operand.vmem [shape: f32[1,128], index: 1, kind: input, shape index: {}]   ;;  %s1633_s2 = inlined_call_operand.vmem [shape: f32[1,128], index: 2, kind: input, shape index: {}]   ;;  %s1634_s3 = inlined_call_operand.vmem [shape: bf16[512,128], index: 3, kind: output, shape index: {}]  }
   0x1   :  { %v931_v0 = vld [vmem:[%s1631_s0] sm:$0xff]   ;;  %v1218_v4 = vld [vmem:[%s1631_s0 + $0x8] sm:$0xff]   ;;  %v1219_v5 = vld [vmem:[%s1631_s0 + $0x10] sm:$0xff]  }
   0x2   :  { %v1306_v1 = vld [vmem:[%s1632_s1] ss:$0 sm:$0xff]  ;;  %v932_v2 = vunpack.c.l.bf16 %v931_v0  ;;  %v933_v3 = vunpack.c.h.bf16 %v931_v0  ;;  %v1220_v6 = vld [vmem:[%s1631_s0 + $0x18] sm:$0xff]   ;;  %v936_v8 = vunpack.c.l.bf16 %v1218_v4  ;;  %v937_v9 = vunpack.c.h.bf16 %v1218_v4  ;;  %v1222_v35 = vld [vmem:[%s1631_s0 + $0x28] sm:$0xff]  }
   0x3   :  { %v1320_v7 = vld [vmem:[%s1633_s2] ss:$0 sm:$0xff]  ;;  %v940_v10 = vunpack.c.l.bf16 %v1219_v5  ;;  %v941_v11 = vunpack.c.h.bf16 %v1219_v5  ;;  %v944_v14 = vunpack.c.l.bf16 %v1220_v6  ;;  %v945_v15 = vunpack.c.h.bf16 %v1220_v6  ;;  %v1223_v48 = vld [vmem:[%s1631_s0 + $0x30] sm:$0xff]   ;;  %v1224_v4 = vld [vmem:[%s1631_s0 + $0x38] sm:$0xff]  }
   0x4   :  { %v149_v12 = vmul.f32 %v932_v2, %v1306_v1  ;;  %v150_v13 = vmul.f32 %v933_v3, %v1306_v1  ;;  %v151_v16 = vmul.f32 %v936_v8, %v1306_v1  ;;  %v152_v17 = vmul.f32 %v937_v9, %v1306_v1  ;;  %v1221_v34 = vld [vmem:[%s1631_s0 + $0x20] sm:$0xff]  }
   0x5   :  { %v153_v18 = vmul.f32 %v940_v10, %v1306_v1  ;;  %v154_v19 = vmul.f32 %v941_v11, %v1306_v1  ;;  %v155_v22 = vmul.f32 %v944_v14, %v1306_v1  ;;  %v156_v23 = vmul.f32 %v945_v15, %v1306_v1  ;;  %v1225_v15 = vld [vmem:[%s1631_s0 + $0x40] sm:$0xff]  }
   0x6   :  { %v220_v20 = vadd.f32 %v1320_v7, %v149_v12  ;;  %v221_v21 = vadd.f32 %v1320_v7, %v150_v13  ;;  %v222_v24 = vadd.f32 %v1320_v7, %v151_v16  ;;  %v223_v25 = vadd.f32 %v1320_v7, %v152_v17 }
   0x7   :  { %v224_v26 = vadd.f32 %v1320_v7, %v153_v18  ;;  %v225_v27 = vadd.f32 %v1320_v7, %v154_v19  ;;  %v226_v42 = vadd.f32 %v1320_v7, %v155_v22  ;;  %v227_v43 = vadd.f32 %v1320_v7, %v156_v23 }
   0x8   :  { %vm284_vm0 = vcmp.ge.f32.partialorder %v220_v20, 0.0  ;;  %vm285_vm1 = vcmp.ge.f32.partialorder %v221_v21, 0.0  ;;  %v348_v28 = vmul.f32 0.1, %v220_v20  ;;  %v349_v29 = vmul.f32 0.1, %v221_v21 }
   0x9   :  { %vm286_vm2 = vcmp.ge.f32.partialorder %v222_v24, 0.0  ;;  %vm287_vm3 = vcmp.ge.f32.partialorder %v223_v25, 0.0  ;;  %v350_v30 = vmul.f32 0.1, %v222_v24  ;;  %v351_v31 = vmul.f32 0.1, %v223_v25 }
   0xa   :  { %v412_v32 = vsel %vm284_vm0, %v220_v20, %v348_v28  ;;  %v413_v33 = vsel %vm285_vm1, %v221_v21, %v349_v29  ;;  %vm288_vm4 = vcmp.ge.f32.partialorder %v224_v26, 0.0  ;;  %vm289_vm5 = vcmp.ge.f32.partialorder %v225_v27, 0.0 }
   0xb   :  { %v1061_v36 = vpack.c.bf16 %v413_v33, %v412_v32  ;;  %v414_v37 = vsel %vm286_vm2, %v222_v24, %v350_v30  ;;  %v415_v38 = vsel %vm287_vm3, %v223_v25, %v351_v31  ;;  %v352_v39 = vmul.f32 0.1, %v224_v26 }
   0xc   :  { %v1066_v40 = vpack.c.bf16 %v415_v38, %v414_v37  ;;  %v353_v41 = vmul.f32 0.1, %v225_v27  ;;  %v948_v45 = vunpack.c.l.bf16 %v1221_v34  ;;  %v949_v46 = vunpack.c.h.bf16 %v1221_v34 }
   0xd   :  { %1062 = vst [vmem:[%s1634_s3] sm:$0xff] %v1061_v36   ;;  %v416_v44 = vsel %vm288_vm4, %v224_v26, %v352_v39  ;;  %v952_v47 = vunpack.c.l.bf16 %v1222_v35  ;;  %vm290_vm6 = vcmp.ge.f32.partialorder %v226_v42, 0.0  ;;  %vm291_vm7 = vcmp.ge.f32.partialorder %v227_v43, 0.0  ;;  %v1226_v26 = vld [vmem:[%s1631_s0 + $0x48] sm:$0xff]  }
   0xe   :  { %1249 = vst [vmem:[%s1634_s3 + $0x8] sm:$0xff] %v1066_v40   ;;  %v417_v49 = vsel %vm289_vm5, %v225_v27, %v353_v41  ;;  %v354_v50 = vmul.f32 0.1, %v226_v42  ;;  %v355_v52 = vmul.f32 0.1, %v227_v43  ;;  %v157_v53 = vmul.f32 %v948_v45, %v1306_v1  ;;  %v1227_v27 = vld [vmem:[%s1631_s0 + $0x50] sm:$0xff]  }
   0xf   :  { %v1071_v51 = vpack.c.bf16 %v417_v49, %v416_v44  ;;  %v158_v54 = vmul.f32 %v949_v46, %v1306_v1  ;;  %v953_v56 = vunpack.c.h.bf16 %v1222_v35  ;;  %v159_v57 = vmul.f32 %v952_v47, %v1306_v1 }
  0x10   :  { %v418_v55 = vsel %vm290_vm6, %v226_v42, %v354_v50  ;;  %v956_v58 = vunpack.c.l.bf16 %v1223_v48  ;;  %v419_v59 = vsel %vm291_vm7, %v227_v43, %v355_v52  ;;  %v228_v60 = vadd.f32 %v1320_v7, %v157_v53 }
  0x11   :  { %1250 = vst [vmem:[%s1634_s3 + $0x10] sm:$0xff] %v1071_v51   ;;  %v229_v61 = vadd.f32 %v1320_v7, %v158_v54  ;;  %v957_v62 = vunpack.c.h.bf16 %v1223_v48  ;;  %v1076_v63 = vpack.c.bf16 %v419_v59, %v418_v55  ;;  %v160_v0 = vmul.f32 %v953_v56, %v1306_v1  ;;  %v1228_v55 = vld [vmem:[%s1631_s0 + $0x58] sm:$0xff]  }
  0x12   :  { %v230_v2 = vadd.f32 %v1320_v7, %v159_v57  ;;  %v161_v3 = vmul.f32 %v956_v58, %v1306_v1  ;;  %vm292_vm8 = vcmp.ge.f32.partialorder %v228_v60, 0.0  ;;  %v356_v5 = vmul.f32 0.1, %v228_v60 }
  0x13   :  { %vm293_vm9 = vcmp.ge.f32.partialorder %v229_v61, 0.0  ;;  %v357_v6 = vmul.f32 0.1, %v229_v61  ;;  %1251 = vst [vmem:[%s1634_s3 + $0x18] sm:$0xff] %v1076_v63   ;;  %v231_v8 = vadd.f32 %v1320_v7, %v160_v0  ;;  %v162_v10 = vmul.f32 %v957_v62, %v1306_v1 }
  0x14   :  { %vm294_vm10 = vcmp.ge.f32.partialorder %v230_v2, 0.0  ;;  %v358_v9 = vmul.f32 0.1, %v230_v2  ;;  %v420_v11 = vsel %vm292_vm8, %v228_v60, %v356_v5  ;;  %v232_v13 = vadd.f32 %v1320_v7, %v161_v3  ;;  %v1229_v60 = vld [vmem:[%s1631_s0 + $0x60] sm:$0xff]  }
  0x15   :  { %v421_v12 = vsel %vm293_vm9, %v229_v61, %v357_v6  ;;  %v960_v14 = vunpack.c.l.bf16 %v1224_v4  ;;  %vm295_vm11 = vcmp.ge.f32.partialorder %v231_v8, 0.0  ;;  %v359_v17 = vmul.f32 0.1, %v231_v8 }
  0x16   :  { %v1081_v16 = vpack.c.bf16 %v421_v12, %v420_v11  ;;  %v422_v18 = vsel %vm294_vm10, %v230_v2, %v358_v9  ;;  %v233_v19 = vadd.f32 %v1320_v7, %v162_v10  ;;  %vm296_vm12 = vcmp.ge.f32.partialorder %v232_v13, 0.0  ;;  %v1230_v9 = vld [vmem:[%s1631_s0 + $0x68] sm:$0xff]  }
  0x17   :  { %v360_v20 = vmul.f32 0.1, %v232_v13  ;;  %v961_v21 = vunpack.c.h.bf16 %v1224_v4  ;;  %v423_v22 = vsel %vm295_vm11, %v231_v8, %v359_v17  ;;  %v163_v23 = vmul.f32 %v960_v14, %v1306_v1 }
  0x18   :  { %1252 = vst [vmem:[%s1634_s3 + $0x20] sm:$0xff] %v1081_v16   ;;  %v964_v24 = vunpack.c.l.bf16 %v1225_v15  ;;  %v965_v25 = vunpack.c.h.bf16 %v1225_v15  ;;  %v1086_v28 = vpack.c.bf16 %v423_v22, %v422_v18  ;;  %vm297_vm13 = vcmp.ge.f32.partialorder %v233_v19, 0.0 }
  0x19   :  { %v361_v29 = vmul.f32 0.1, %v233_v19  ;;  %v424_v30 = vsel %vm296_vm12, %v232_v13, %v360_v20  ;;  %v164_v31 = vmul.f32 %v961_v21, %v1306_v1  ;;  %v234_v32 = vadd.f32 %v1320_v7, %v163_v23 }
  0x1a   :  { %v165_v33 = vmul.f32 %v964_v24, %v1306_v1  ;;  %v166_v34 = vmul.f32 %v965_v25, %v1306_v1  ;;  %1253 = vst [vmem:[%s1634_s3 + $0x28] sm:$0xff] %v1086_v28   ;;  %v968_v36 = vunpack.c.l.bf16 %v1226_v26  ;;  %v969_v37 = vunpack.c.h.bf16 %v1226_v26  ;;  %v1231_v28 = vld [vmem:[%s1631_s0 + $0x70] sm:$0xff]  }
  0x1b   :  { %v425_v35 = vsel %vm297_vm13, %v233_v19, %v361_v29  ;;  %v972_v38 = vunpack.c.l.bf16 %v1227_v27  ;;  %v235_v40 = vadd.f32 %v1320_v7, %v164_v31  ;;  %vm298_vm14 = vcmp.ge.f32.partialorder %v234_v32, 0.0 }
  0x1c   :  { %v1091_v39 = vpack.c.bf16 %v425_v35, %v424_v30  ;;  %v362_v41 = vmul.f32 0.1, %v234_v32  ;;  %v236_v42 = vadd.f32 %v1320_v7, %v165_v33  ;;  %v237_v43 = vadd.f32 %v1320_v7, %v166_v34 }
  0x1d   :  { %v167_v44 = vmul.f32 %v968_v36, %v1306_v1  ;;  %v168_v45 = vmul.f32 %v969_v37, %v1306_v1  ;;  %vm299_vm15 = vcmp.ge.f32.partialorder %v235_v40, 0.0  ;;  %v363_v46 = vmul.f32 0.1, %v235_v40  ;;  %v1232_v37 = vld [vmem:[%s1631_s0 + $0x78] sm:$0xff]  }
  0x1e   :  { %1254 = vst [vmem:[%s1634_s3 + $0x30] sm:$0xff] %v1091_v39   ;;  %v426_v47 = vsel %vm298_vm14, %v234_v32, %v362_v41  ;;  %v973_v48 = vunpack.c.h.bf16 %v1227_v27  ;;  %vm300_vm0 = vcmp.ge.f32.partialorder %v236_v42, 0.0  ;;  %vm301_vm1 = vcmp.ge.f32.partialorder %v237_v43, 0.0 }
  0x1f   :  { %v364_v49 = vmul.f32 0.1, %v236_v42  ;;  %v365_v50 = vmul.f32 0.1, %v237_v43  ;;  %v427_v51 = vsel %vm299_vm15, %v235_v40, %v363_v46  ;;  %v238_v52 = vadd.f32 %v1320_v7, %v167_v44 }
  0x20   :  { %v239_v53 = vadd.f32 %v1320_v7, %v168_v45  ;;  %v169_v54 = vmul.f32 %v972_v38, %v1306_v1  ;;  %v1096_v56 = vpack.c.bf16 %v427_v51, %v426_v47  ;;  %v170_v59 = vmul.f32 %v973_v48, %v1306_v1 }
  0x21   :  { %v428_v57 = vsel %vm300_vm0, %v236_v42, %v364_v49  ;;  %v429_v58 = vsel %vm301_vm1, %v237_v43, %v365_v50  ;;  %vm302_vm2 = vcmp.ge.f32.partialorder %v238_v52, 0.0  ;;  %v366_v62 = vmul.f32 0.1, %v238_v52  ;;  %v1233_v42 = vld [vmem:[%s1631_s0 + $0x80] sm:$0xff]   ;;  %v1234_v50 = vld [vmem:[%s1631_s0 + $0x88] sm:$0xff]  }
  0x22   :  { %v1101_v61 = vpack.c.bf16 %v429_v58, %v428_v57  ;;  %vm303_vm3 = vcmp.ge.f32.partialorder %v239_v53, 0.0  ;;  %1255 = vst [vmem:[%s1634_s3 + $0x38] sm:$0xff] %v1096_v56   ;;  %v367_v63 = vmul.f32 0.1, %v239_v53  ;;  %v240_v0 = vadd.f32 %v1320_v7, %v169_v54 }
  0x23   :  { %v241_v2 = vadd.f32 %v1320_v7, %v170_v59  ;;  %v976_v3 = vunpack.c.l.bf16 %v1228_v55  ;;  %v430_v4 = vsel %vm302_vm2, %v238_v52, %v366_v62  ;;  %v977_v5 = vunpack.c.h.bf16 %v1228_v55 }
  0x24   :  { %1256 = vst [vmem:[%s1634_s3 + $0x40] sm:$0xff] %v1101_v61   ;;  %v980_v6 = vunpack.c.l.bf16 %v1229_v60  ;;  %v981_v8 = vunpack.c.h.bf16 %v1229_v60  ;;  %v431_v10 = vsel %vm303_vm3, %v239_v53, %v367_v63  ;;  %vm304_vm4 = vcmp.ge.f32.partialorder %v240_v0, 0.0 }
  0x25   :  { %vm305_vm5 = vcmp.ge.f32.partialorder %v241_v2, 0.0  ;;  %v368_v11 = vmul.f32 0.1, %v240_v0  ;;  %v1106_v12 = vpack.c.bf16 %v431_v10, %v430_v4  ;;  %v369_v13 = vmul.f32 0.1, %v241_v2 }
  0x26   :  { %v171_v14 = vmul.f32 %v976_v3, %v1306_v1  ;;  %v172_v15 = vmul.f32 %v977_v5, %v1306_v1  ;;  %v173_v17 = vmul.f32 %v980_v6, %v1306_v1  ;;  %v174_v18 = vmul.f32 %v981_v8, %v1306_v1 }
  0x27   :  { %v432_v16 = vsel %vm304_vm4, %v240_v0, %v368_v11  ;;  %v984_v19 = vunpack.c.l.bf16 %v1230_v9  ;;  %1257 = vst [vmem:[%s1634_s3 + $0x48] sm:$0xff] %v1106_v12   ;;  %v433_v20 = vsel %vm305_vm5, %v241_v2, %v369_v13  ;;  %v985_v23 = vunpack.c.h.bf16 %v1230_v9 }
  0x28   :  { %v242_v21 = vadd.f32 %v1320_v7, %v171_v14  ;;  %v243_v22 = vadd.f32 %v1320_v7, %v172_v15  ;;  %v1111_v24 = vpack.c.bf16 %v433_v20, %v432_v16  ;;  %v244_v25 = vadd.f32 %v1320_v7, %v173_v17  ;;  %v1235_v15 = vld [vmem:[%s1631_s0 + $0x90] sm:$0xff]   ;;  %v1236_v20 = vld [vmem:[%s1631_s0 + $0x98] sm:$0xff]  }
  0x29   :  { %v245_v26 = vadd.f32 %v1320_v7, %v174_v18  ;;  %v175_v27 = vmul.f32 %v984_v19, %v1306_v1  ;;  %v176_v35 = vmul.f32 %v985_v23, %v1306_v1  ;;  %v988_v41 = vunpack.c.l.bf16 %v1231_v28 }
  0x2a   :  { %vm306_vm6 = vcmp.ge.f32.partialorder %v242_v21, 0.0  ;;  %vm307_vm7 = vcmp.ge.f32.partialorder %v243_v22, 0.0  ;;  %v370_v29 = vmul.f32 0.1, %v242_v21  ;;  %v371_v30 = vmul.f32 0.1, %v243_v22 }
  0x2b   :  { %1258 = vst [vmem:[%s1634_s3 + $0x50] sm:$0xff] %v1111_v24   ;;  %vm308_vm8 = vcmp.ge.f32.partialorder %v244_v25, 0.0  ;;  %vm309_vm9 = vcmp.ge.f32.partialorder %v245_v26, 0.0  ;;  %v372_v31 = vmul.f32 0.1, %v244_v25  ;;  %v246_v36 = vadd.f32 %v1320_v7, %v175_v27 }
  0x2c   :  { %v373_v32 = vmul.f32 0.1, %v245_v26  ;;  %v434_v33 = vsel %vm306_vm6, %v242_v21, %v370_v29  ;;  %v435_v34 = vsel %vm307_vm7, %v243_v22, %v371_v30  ;;  %v247_v44 = vadd.f32 %v1320_v7, %v176_v35  ;;  %v1237_v21 = vld [vmem:[%s1631_s0 + $0xa0] sm:$0xff]  }
  0x2d   :  { %v1116_v38 = vpack.c.bf16 %v435_v34, %v434_v33  ;;  %v436_v39 = vsel %vm308_vm8, %v244_v25, %v372_v31  ;;  %vm310_vm10 = vcmp.ge.f32.partialorder %v246_v36, 0.0  ;;  %v374_v45 = vmul.f32 0.1, %v246_v36 }
  0x2e   :  { %v437_v40 = vsel %vm309_vm9, %v245_v26, %v373_v32  ;;  %v989_v46 = vunpack.c.h.bf16 %v1231_v28  ;;  %v177_v47 = vmul.f32 %v988_v41, %v1306_v1  ;;  %v992_v48 = vunpack.c.l.bf16 %v1232_v37 }
  0x2f   :  { %v1121_v43 = vpack.c.bf16 %v437_v40, %v436_v39  ;;  %1259 = vst [vmem:[%s1634_s3 + $0x58] sm:$0xff] %v1116_v38   ;;  %v993_v49 = vunpack.c.h.bf16 %v1232_v37  ;;  %vm311_vm11 = vcmp.ge.f32.partialorder %v247_v44, 0.0  ;;  %v375_v51 = vmul.f32 0.1, %v247_v44  ;;  %v1238_v40 = vld [vmem:[%s1631_s0 + $0xa8] sm:$0xff]  }
  0x30   :  { %v438_v52 = vsel %vm310_vm10, %v246_v36, %v374_v45  ;;  %v996_v53 = vunpack.c.l.bf16 %v1233_v42  ;;  %v178_v54 = vmul.f32 %v989_v46, %v1306_v1  ;;  %v248_v55 = vadd.f32 %v1320_v7, %v177_v47 }
  0x31   :  { %1260 = vst [vmem:[%s1634_s3 + $0x60] sm:$0xff] %v1121_v43   ;;  %v179_v56 = vmul.f32 %v992_v48, %v1306_v1  ;;  %v180_v57 = vmul.f32 %v993_v49, %v1306_v1  ;;  %v439_v58 = vsel %vm311_vm11, %v247_v44, %v375_v51  ;;  %v997_v59 = vunpack.c.h.bf16 %v1233_v42 }
  0x32   :  { %v181_v60 = vmul.f32 %v996_v53, %v1306_v1  ;;  %v1000_v61 = vunpack.c.l.bf16 %v1234_v50  ;;  %v1126_v62 = vpack.c.bf16 %v439_v58, %v438_v52  ;;  %v249_v63 = vadd.f32 %v1320_v7, %v178_v54 }
  0x33   :  { %vm312_vm12 = vcmp.ge.f32.partialorder %v248_v55, 0.0  ;;  %v376_v0 = vmul.f32 0.1, %v248_v55  ;;  %v250_v2 = vadd.f32 %v1320_v7, %v179_v56  ;;  %v251_v3 = vadd.f32 %v1320_v7, %v180_v57 }
  0x34   :  { %v182_v4 = vmul.f32 %v997_v59, %v1306_v1  ;;  %v252_v5 = vadd.f32 %v1320_v7, %v181_v60  ;;  %1261 = vst [vmem:[%s1634_s3 + $0x68] sm:$0xff] %v1126_v62   ;;  %vm313_vm13 = vcmp.ge.f32.partialorder %v249_v63, 0.0  ;;  %v377_v6 = vmul.f32 0.1, %v249_v63 }
  0x35   :  { %v440_v8 = vsel %vm312_vm12, %v248_v55, %v376_v0  ;;  %v1001_v9 = vunpack.c.h.bf16 %v1234_v50  ;;  %vm314_vm14 = vcmp.ge.f32.partialorder %v250_v2, 0.0  ;;  %vm315_vm15 = vcmp.ge.f32.partialorder %v251_v3, 0.0  ;;  %v1239_v0 = vld [vmem:[%s1631_s0 + $0xb0] sm:$0xff]  }
  0x36   :  { %v378_v10 = vmul.f32 0.1, %v250_v2  ;;  %v379_v11 = vmul.f32 0.1, %v251_v3  ;;  %v441_v12 = vsel %vm313_vm13, %v249_v63, %v377_v6  ;;  %v253_v13 = vadd.f32 %v1320_v7, %v182_v4 }
  0x37   :  { %vm316_vm0 = vcmp.ge.f32.partialorder %v252_v5, 0.0  ;;  %v380_v14 = vmul.f32 0.1, %v252_v5  ;;  %v1131_v16 = vpack.c.bf16 %v441_v12, %v440_v8  ;;  %v183_v19 = vmul.f32 %v1000_v61, %v1306_v1 }
  0x38   :  { %v442_v17 = vsel %vm314_vm14, %v250_v2, %v378_v10  ;;  %v443_v18 = vsel %vm315_vm15, %v251_v3, %v379_v11  ;;  %vm317_vm1 = vcmp.ge.f32.partialorder %v253_v13, 0.0  ;;  %v381_v23 = vmul.f32 0.1, %v253_v13  ;;  %v1240_v2 = vld [vmem:[%s1631_s0 + $0xb8] sm:$0xff]  }
  0x39   :  { %v1136_v22 = vpack.c.bf16 %v443_v18, %v442_v17  ;;  %v444_v24 = vsel %vm316_vm0, %v252_v5, %v380_v14  ;;  %1262 = vst [vmem:[%s1634_s3 + $0x70] sm:$0xff] %v1131_v16   ;;  %v184_v25 = vmul.f32 %v1001_v9, %v1306_v1  ;;  %v254_v26 = vadd.f32 %v1320_v7, %v183_v19  ;;  %v1241_v18 = vld [vmem:[%s1631_s0 + $0xc0] sm:$0xff]  }
  0x3a   :  { %v1004_v27 = vunpack.c.l.bf16 %v1235_v15  ;;  %v1005_v28 = vunpack.c.h.bf16 %v1235_v15  ;;  %v445_v29 = vsel %vm317_vm1, %v253_v13, %v381_v23  ;;  %v1008_v30 = vunpack.c.l.bf16 %v1236_v20 }
  0x3b   :  { %1263 = vst [vmem:[%s1634_s3 + $0x78] sm:$0xff] %v1136_v22   ;;  %v1009_v31 = vunpack.c.h.bf16 %v1236_v20  ;;  %v1012_v32 = vunpack.c.l.bf16 %v1237_v21  ;;  %v1141_v33 = vpack.c.bf16 %v445_v29, %v444_v24  ;;  %v255_v34 = vadd.f32 %v1320_v7, %v184_v25 }
  0x3c   :  { %vm318_vm2 = vcmp.ge.f32.partialorder %v254_v26, 0.0  ;;  %v382_v35 = vmul.f32 0.1, %v254_v26  ;;  %v185_v36 = vmul.f32 %v1004_v27, %v1306_v1  ;;  %v186_v37 = vmul.f32 %v1005_v28, %v1306_v1 }
  0x3d   :  { %v187_v38 = vmul.f32 %v1008_v30, %v1306_v1  ;;  %v188_v39 = vmul.f32 %v1009_v31, %v1306_v1  ;;  %1264 = vst [vmem:[%s1634_s3 + $0x80] sm:$0xff] %v1141_v33   ;;  %vm319_vm3 = vcmp.ge.f32.partialorder %v255_v34, 0.0  ;;  %v383_v41 = vmul.f32 0.1, %v255_v34 }
  0x3e   :  { %v446_v42 = vsel %vm318_vm2, %v254_v26, %v382_v35  ;;  %v1013_v43 = vunpack.c.h.bf16 %v1237_v21  ;;  %v256_v44 = vadd.f32 %v1320_v7, %v185_v36  ;;  %v257_v45 = vadd.f32 %v1320_v7, %v186_v37  ;;  %v1242_v36 = vld [vmem:[%s1631_s0 + $0xc8] sm:$0xff]  }
  0x3f   :  { %v258_v46 = vadd.f32 %v1320_v7, %v187_v38  ;;  %v259_v47 = vadd.f32 %v1320_v7, %v188_v39  ;;  %v447_v48 = vsel %vm319_vm3, %v255_v34, %v383_v41  ;;  %v189_v49 = vmul.f32 %v1012_v32, %v1306_v1 }
  0x40   :  { %v190_v50 = vmul.f32 %v1013_v43, %v1306_v1  ;;  %v1016_v51 = vunpack.c.l.bf16 %v1238_v40  ;;  %v1146_v52 = vpack.c.bf16 %v447_v48, %v446_v42  ;;  %vm320_vm4 = vcmp.ge.f32.partialorder %v256_v44, 0.0  ;;  %v1243_v42 = vld [vmem:[%s1631_s0 + $0xd0] sm:$0xff]  }
  0x41   :  { %vm321_vm5 = vcmp.ge.f32.partialorder %v257_v45, 0.0  ;;  %v384_v53 = vmul.f32 0.1, %v256_v44  ;;  %v385_v54 = vmul.f32 0.1, %v257_v45  ;;  %vm322_vm6 = vcmp.ge.f32.partialorder %v258_v46, 0.0 }
  0x42   :  { %vm323_vm7 = vcmp.ge.f32.partialorder %v259_v47, 0.0  ;;  %v386_v55 = vmul.f32 0.1, %v258_v46  ;;  %1265 = vst [vmem:[%s1634_s3 + $0x88] sm:$0xff] %v1146_v52   ;;  %v387_v57 = vmul.f32 0.1, %v259_v47  ;;  %v260_v58 = vadd.f32 %v1320_v7, %v189_v49 }
  0x43   :  { %v448_v56 = vsel %vm320_vm4, %v256_v44, %v384_v53  ;;  %v261_v59 = vadd.f32 %v1320_v7, %v190_v50  ;;  %v449_v60 = vsel %vm321_vm5, %v257_v45, %v385_v54  ;;  %v1017_v62 = vunpack.c.h.bf16 %v1238_v40 }
  0x44   :  { %v450_v61 = vsel %vm322_vm6, %v258_v46, %v386_v55  ;;  %v191_v63 = vmul.f32 %v1016_v51, %v1306_v1  ;;  %v1151_v3 = vpack.c.bf16 %v449_v60, %v448_v56  ;;  %v451_v4 = vsel %vm323_vm7, %v259_v47, %v387_v57  ;;  %v1244_v55 = vld [vmem:[%s1631_s0 + $0xd8] sm:$0xff]  }
  0x45   :  { %vm324_vm8 = vcmp.ge.f32.partialorder %v260_v58, 0.0  ;;  %vm325_vm9 = vcmp.ge.f32.partialorder %v261_v59, 0.0  ;;  %v1156_v5 = vpack.c.bf16 %v451_v4, %v450_v61  ;;  %v388_v6 = vmul.f32 0.1, %v260_v58 }
  0x46   :  { %v389_v8 = vmul.f32 0.1, %v261_v59  ;;  %v192_v9 = vmul.f32 %v1017_v62, %v1306_v1  ;;  %1266 = vst [vmem:[%s1634_s3 + $0x90] sm:$0xff] %v1151_v3   ;;  %v262_v10 = vadd.f32 %v1320_v7, %v191_v63  ;;  %v1020_v11 = vunpack.c.l.bf16 %v1239_v0 }
  0x47   :  { %v1021_v12 = vunpack.c.h.bf16 %v1239_v0  ;;  %v1024_v13 = vunpack.c.l.bf16 %v1240_v2  ;;  %1267 = vst [vmem:[%s1634_s3 + $0x98] sm:$0xff] %v1156_v5   ;;  %v452_v14 = vsel %vm324_vm8, %v260_v58, %v388_v6  ;;  %v1025_v17 = vunpack.c.h.bf16 %v1240_v2 }
  0x48   :  { %v453_v15 = vsel %vm325_vm9, %v261_v59, %v389_v8  ;;  %v263_v16 = vadd.f32 %v1320_v7, %v192_v9  ;;  %vm326_vm10 = vcmp.ge.f32.partialorder %v262_v10, 0.0  ;;  %v390_v20 = vmul.f32 0.1, %v262_v10 }
  0x49   :  { %v1161_v19 = vpack.c.bf16 %v453_v15, %v452_v14  ;;  %v193_v21 = vmul.f32 %v1020_v11, %v1306_v1  ;;  %v194_v23 = vmul.f32 %v1021_v12, %v1306_v1  ;;  %v195_v24 = vmul.f32 %v1024_v13, %v1306_v1  ;;  %v1246_v14 = vld [vmem:[%s1631_s0 + $0xe8] sm:$0xff]  }
  0x4a   :  { %vm327_vm11 = vcmp.ge.f32.partialorder %v263_v16, 0.0  ;;  %v391_v22 = vmul.f32 0.1, %v263_v16  ;;  %v454_v25 = vsel %vm326_vm10, %v262_v10, %v390_v20  ;;  %v196_v27 = vmul.f32 %v1025_v17, %v1306_v1  ;;  %v1245_v10 = vld [vmem:[%s1631_s0 + $0xe0] sm:$0xff]  }
  0x4b   :  { %1268 = vst [vmem:[%s1634_s3 + $0xa0] sm:$0xff] %v1161_v19   ;;  %v264_v26 = vadd.f32 %v1320_v7, %v193_v21  ;;  %v1028_v28 = vunpack.c.l.bf16 %v1241_v18  ;;  %v265_v30 = vadd.f32 %v1320_v7, %v194_v23  ;;  %v266_v31 = vadd.f32 %v1320_v7, %v195_v24 }
  0x4c   :  { %v455_v29 = vsel %vm327_vm11, %v263_v16, %v391_v22  ;;  %v1029_v32 = vunpack.c.h.bf16 %v1241_v18  ;;  %v267_v35 = vadd.f32 %v1320_v7, %v196_v27  ;;  %v1032_v46 = vunpack.c.l.bf16 %v1242_v36 }
  0x4d   :  { %v1166_v33 = vpack.c.bf16 %v455_v29, %v454_v25  ;;  %vm328_vm12 = vcmp.ge.f32.partialorder %v264_v26, 0.0  ;;  %v392_v34 = vmul.f32 0.1, %v264_v26  ;;  %vm329_vm13 = vcmp.ge.f32.partialorder %v265_v30, 0.0 }
  0x4e   :  { %v393_v37 = vmul.f32 0.1, %v265_v30  ;;  %vm330_vm14 = vcmp.ge.f32.partialorder %v266_v31, 0.0  ;;  %v394_v38 = vmul.f32 0.1, %v266_v31  ;;  %vm331_vm15 = vcmp.ge.f32.partialorder %v267_v35, 0.0 }
  0x4f   :  { %1269 = vst [vmem:[%s1634_s3 + $0xa8] sm:$0xff] %v1166_v33   ;;  %v456_v39 = vsel %vm328_vm12, %v264_v26, %v392_v34  ;;  %v395_v40 = vmul.f32 0.1, %v267_v35  ;;  %v197_v41 = vmul.f32 %v1028_v28, %v1306_v1  ;;  %v198_v45 = vmul.f32 %v1029_v32, %v1306_v1 }
  0x50   :  { %v457_v43 = vsel %vm329_vm13, %v265_v30, %v393_v37  ;;  %v458_v44 = vsel %vm330_vm14, %v266_v31, %v394_v38  ;;  %v1033_v50 = vunpack.c.h.bf16 %v1242_v36  ;;  %v199_v53 = vmul.f32 %v1032_v46, %v1306_v1  ;;  %v1247_v30 = vld [vmem:[%s1631_s0 + $0xf0] sm:$0xff]  }
  0x51   :  { %v1171_v47 = vpack.c.bf16 %v457_v43, %v456_v39  ;;  %v459_v48 = vsel %vm331_vm15, %v267_v35, %v395_v40  ;;  %v268_v49 = vadd.f32 %v1320_v7, %v197_v41  ;;  %v269_v52 = vadd.f32 %v1320_v7, %v198_v45 }
  0x52   :  { %v1176_v51 = vpack.c.bf16 %v459_v48, %v458_v44  ;;  %v1036_v54 = vunpack.c.l.bf16 %v1243_v42  ;;  %v200_v57 = vmul.f32 %v1033_v50, %v1306_v1  ;;  %v1037_v58 = vunpack.c.h.bf16 %v1243_v42  ;;  %v1248_v44 = vld [vmem:[%s1631_s0 + $0xf8] sm:$0xff]  }
  0x53   :  { %1270 = vst [vmem:[%s1634_s3 + $0xb0] sm:$0xff] %v1171_v47   ;;  %vm332_vm0 = vcmp.ge.f32.partialorder %v268_v49, 0.0  ;;  %v396_v56 = vmul.f32 0.1, %v268_v49  ;;  %vm333_vm1 = vcmp.ge.f32.partialorder %v269_v52, 0.0  ;;  %v270_v60 = vadd.f32 %v1320_v7, %v199_v53 }
  0x54   :  { %1271 = vst [vmem:[%s1634_s3 + $0xb8] sm:$0xff] %v1176_v51   ;;  %v397_v59 = vmul.f32 0.1, %v269_v52  ;;  %v201_v61 = vmul.f32 %v1036_v54, %v1306_v1  ;;  %v271_v63 = vadd.f32 %v1320_v7, %v200_v57  ;;  %v202_v0 = vmul.f32 %v1037_v58, %v1306_v1 }
  0x55   :  { %v460_v62 = vsel %vm332_vm0, %v268_v49, %v396_v56  ;;  %v1040_v2 = vunpack.c.l.bf16 %v1244_v55  ;;  %vm334_vm2 = vcmp.ge.f32.partialorder %v270_v60, 0.0  ;;  %v398_v4 = vmul.f32 0.1, %v270_v60 }
  0x56   :  { %v461_v3 = vsel %vm333_vm1, %v269_v52, %v397_v59  ;;  %v272_v5 = vadd.f32 %v1320_v7, %v201_v61  ;;  %vm335_vm3 = vcmp.ge.f32.partialorder %v271_v63, 0.0  ;;  %v399_v8 = vmul.f32 0.1, %v271_v63 }
  0x57   :  { %v1181_v6 = vpack.c.bf16 %v461_v3, %v460_v62  ;;  %v273_v9 = vadd.f32 %v1320_v7, %v202_v0  ;;  %v462_v11 = vsel %vm334_vm2, %v270_v60, %v398_v4  ;;  %v1041_v13 = vunpack.c.h.bf16 %v1244_v55 }
  0x58   :  { %vm336_vm4 = vcmp.ge.f32.partialorder %v272_v5, 0.0  ;;  %v400_v12 = vmul.f32 0.1, %v272_v5  ;;  %v463_v15 = vsel %vm335_vm3, %v271_v63, %v399_v8  ;;  %v203_v17 = vmul.f32 %v1040_v2, %v1306_v1 }
  0x59   :  { %1272 = vst [vmem:[%s1634_s3 + $0xc0] sm:$0xff] %v1181_v6   ;;  %vm337_vm5 = vcmp.ge.f32.partialorder %v273_v9, 0.0  ;;  %v401_v16 = vmul.f32 0.1, %v273_v9  ;;  %v1186_v18 = vpack.c.bf16 %v463_v15, %v462_v11  ;;  %v204_v20 = vmul.f32 %v1041_v13, %v1306_v1 }
  0x5a   :  { %v464_v19 = vsel %vm336_vm4, %v272_v5, %v400_v12  ;;  %v1044_v21 = vunpack.c.l.bf16 %v1245_v10  ;;  %v274_v23 = vadd.f32 %v1320_v7, %v203_v17  ;;  %v1045_v24 = vunpack.c.h.bf16 %v1245_v10 }
  0x5b   :  { %v465_v22 = vsel %vm337_vm5, %v273_v9, %v401_v16  ;;  %v1048_v25 = vunpack.c.l.bf16 %v1246_v14  ;;  %1273 = vst [vmem:[%s1634_s3 + $0xc8] sm:$0xff] %v1186_v18   ;;  %v275_v27 = vadd.f32 %v1320_v7, %v204_v20  ;;  %v1049_v29 = vunpack.c.h.bf16 %v1246_v14 }
  0x5c   :  { %v1191_v26 = vpack.c.bf16 %v465_v22, %v464_v19  ;;  %v205_v28 = vmul.f32 %v1044_v21, %v1306_v1  ;;  %vm338_vm6 = vcmp.ge.f32.partialorder %v274_v23, 0.0  ;;  %v402_v31 = vmul.f32 0.1, %v274_v23 }
  0x5d   :  { %v206_v32 = vmul.f32 %v1045_v24, %v1306_v1  ;;  %v207_v33 = vmul.f32 %v1048_v25, %v1306_v1  ;;  %vm339_vm7 = vcmp.ge.f32.partialorder %v275_v27, 0.0  ;;  %v403_v34 = vmul.f32 0.1, %v275_v27 }
  0x5e   :  { %1274 = vst [vmem:[%s1634_s3 + $0xd0] sm:$0xff] %v1191_v26   ;;  %v276_v35 = vadd.f32 %v1320_v7, %v205_v28  ;;  %v208_v36 = vmul.f32 %v1049_v29, %v1306_v1  ;;  %v466_v37 = vsel %vm338_vm6, %v274_v23, %v402_v31  ;;  %v1052_v40 = vunpack.c.l.bf16 %v1247_v30 }
  0x5f   :  { %v277_v38 = vadd.f32 %v1320_v7, %v206_v32  ;;  %v278_v39 = vadd.f32 %v1320_v7, %v207_v33  ;;  %v467_v41 = vsel %vm339_vm7, %v275_v27, %v403_v34  ;;  %v1053_v51 = vunpack.c.h.bf16 %v1247_v30 }
  0x60   :  { %vm340_vm8 = vcmp.ge.f32.partialorder %v276_v35, 0.0  ;;  %v404_v42 = vmul.f32 0.1, %v276_v35  ;;  %v279_v43 = vadd.f32 %v1320_v7, %v208_v36  ;;  %v1196_v45 = vpack.c.bf16 %v467_v41, %v466_v37 }
  0x61   :  { %vm341_vm9 = vcmp.ge.f32.partialorder %v277_v38, 0.0  ;;  %v405_v46 = vmul.f32 0.1, %v277_v38  ;;  %vm342_vm10 = vcmp.ge.f32.partialorder %v278_v39, 0.0  ;;  %v406_v48 = vmul.f32 0.1, %v278_v39 }
  0x62   :  { %v468_v47 = vsel %vm340_vm8, %v276_v35, %v404_v42  ;;  %vm343_vm11 = vcmp.ge.f32.partialorder %v279_v43, 0.0  ;;  %v407_v49 = vmul.f32 0.1, %v279_v43  ;;  %1275 = vst [vmem:[%s1634_s3 + $0xd8] sm:$0xff] %v1196_v45   ;;  %v209_v52 = vmul.f32 %v1052_v40, %v1306_v1 }
  0x63   :  { %v469_v50 = vsel %vm341_vm9, %v277_v38, %v405_v46  ;;  %v1056_v53 = vunpack.c.l.bf16 %v1248_v44  ;;  %v470_v55 = vsel %vm342_vm10, %v278_v39, %v406_v48  ;;  %v1057_v57 = vunpack.c.h.bf16 %v1248_v44 }
  0x64   :  { %v1201_v54 = vpack.c.bf16 %v469_v50, %v468_v47  ;;  %v471_v56 = vsel %vm343_vm11, %v279_v43, %v407_v49  ;;  %v210_v59 = vmul.f32 %v1053_v51, %v1306_v1  ;;  %v280_v60 = vadd.f32 %v1320_v7, %v209_v52 }
  0x65   :  { %v1206_v58 = vpack.c.bf16 %v471_v56, %v470_v55  ;;  %v211_v61 = vmul.f32 %v1056_v53, %v1306_v1  ;;  %v212_v62 = vmul.f32 %v1057_v57, %v1306_v1 }
  0x66   :  { %1276 = vst [vmem:[%s1634_s3 + $0xe0] sm:$0xff] %v1201_v54   ;;  %v281_v63 = vadd.f32 %v1320_v7, %v210_v59  ;;  %vm344_vm12 = vcmp.ge.f32.partialorder %v280_v60, 0.0  ;;  %v408_v0 = vmul.f32 0.1, %v280_v60 }
  0x67   :  { %1277 = vst [vmem:[%s1634_s3 + $0xe8] sm:$0xff] %v1206_v58   ;;  %v282_v2 = vadd.f32 %v1320_v7, %v211_v61  ;;  %v283_v3 = vadd.f32 %v1320_v7, %v212_v62 }
  0x68   :  { %vm345_vm13 = vcmp.ge.f32.partialorder %v281_v63, 0.0  ;;  %v409_v4 = vmul.f32 0.1, %v281_v63  ;;  %v472_v5 = vsel %vm344_vm12, %v280_v60, %v408_v0 }
  0x69   :  { %vm346_vm14 = vcmp.ge.f32.partialorder %v282_v2, 0.0  ;;  %vm347_vm15 = vcmp.ge.f32.partialorder %v283_v3, 0.0  ;;  %v410_v6 = vmul.f32 0.1, %v282_v2  ;;  %v411_v8 = vmul.f32 0.1, %v283_v3 }
  0x6a   :  { %v473_v1 = vsel %vm345_vm13, %v281_v63, %v409_v4 }
  0x6b   :  { %v1211_v9 = vpack.c.bf16 %v473_v1, %v472_v5  ;;  %v474_v10 = vsel %vm346_vm14, %v282_v2, %v410_v6  ;;  %v475_v11 = vsel %vm347_vm15, %v283_v3, %v411_v8 }
  0x6c   :  { %v1216_v12 = vpack.c.bf16 %v475_v11, %v474_v10 }
  0x6d   :  { %1278 = vst [vmem:[%s1634_s3 + $0xf0] sm:$0xff] %v1211_v9  }
  0x6e   :  { %1279 = vst [vmem:[%s1634_s3 + $0xf8] sm:$0xff] %v1216_v12  }

// kernel: forward.13
= control target key start
LH: loop header
LB: loop body
LE: loop exit
PB: predicated region body
PF: predicated region fallthrough
CT: control target
= control target key end

     0   :  { %s2666_s0 = inlined_call_operand.vmem [shape: bf16[128,3456], index: 0, kind: input, shape index: {}]   ;;  %s2667_s1 = inlined_call_operand.vmem [shape: bf16[3456,256], index: 1, kind: input, shape index: {}]   ;;  %s2668_s2 = inlined_call_operand.vmem [shape: bf16[128,256], index: 2, kind: output, shape index: {0}]   ;;  %s2669_s3 = inlined_call_operand.vmem [shape: f32[8,256], index: 3, kind: output, shape index: {1}]   ;;  %s2670_s4 = inlined_call_operand.vmem [shape: f32[8,256], index: 4, kind: output, shape index: {2}]  }
   0x1   :  { %2675 = sst [smem:[#allocation10_spill]] %s2666_s0 }
   0x2   :  { %2676 = sst [smem:[#allocation11_spill]] %s2667_s1 }
   0x3   :  { %s2246_s15 = smov 0   ;;  %s2248_s16 = smov 0  }
   0x4   :  { %s2250_s17 = smov 0   ;;  %s2252_s18 = smov 0  }
   0x5   :  { %s2254_s19 = smov 0   ;;  %s2256_s20 = smov 0  }
   0x6   :  { %s2258_s21 = smov 0   ;;  %s2260_s22 = smov 0  }
   0x7   :  { %s2262_s23 = smov 0   ;;  %s2264_s24 = smov 0  }
   0x8   :  { %s2266_s25 = smov 0  }
   0x9 LB: > { %2677 = sst [smem:[#allocation6_spill]] %s2210_s23  ;;  %s1693_s26 = sadd.s32 4294967295, %s2218_s25   ;;  %s2218_s25 = sphi %s2266_s25, %s15_s25   ;;  %s2214_s24 = sphi %s2264_s24, %s2689_s24   ;;  %s2210_s23 = sphi %s2262_s23, %s2688_s23   ;;  %s2206_s22 = sphi %s2260_s22, %s2687_s22   ;;  %s2202_s21 = sphi %s2258_s21, %s2686_s21   ;;  %s2198_s20 = sphi %s2256_s20, %s2695_s20   ;;  %s2194_s19 = sphi %s2254_s19, %s2694_s19   ;;  %s2190_s18 = sphi %s2252_s18, %s2693_s18   ;;  %s2186_s17 = sphi %s2250_s17, %s2692_s17   ;;  %s2182_s16 = sphi %s2248_s16, %s2691_s16   ;;  %s2178_s15 = sphi %s2246_s15, %s2690_s15  }
   0xa   : > { %2678 = sst [smem:[#allocation7_spill]] %s2214_s24  ;;  %s27_s27 = sadd.s32 1, %s2210_s23 }
   0xb   : > { %p28_p0 = scmp.ge.s32.totalorder %s27_s27, 9  ;;  %s30_s28 = sadd.s32 1, %s2214_s24 }
   0xc   : > { %s43_s29 = sadd.s32 1, %s2198_s20  ;;  %p50_p1 = scmp.ne.s32.totalorder %s2198_s20, %s2194_s19 }
   0xd   : > { %s2697_s27 = smov (%p28_p0, %s27_s27), 0  ;;  %s2699_s28 = smov (!%p28_p0, %s30_s28), %s2214_s24 }
   0xe   : > { %2679 = sst [smem:[#allocation8_spill]] %s2697_s27  ;;  %s39_s30 = ssub.s32 %s2210_s23, %s2697_s27 }
   0xf   : > { %p51_p2 = scmp.eq.s32.totalorder %s2218_s25, 0  ;;  %p32_p3 = scmp.ge.s32.totalorder %s2699_s28, 2 }
  0x10   : > { %p41_p4 = scmp.eq.s32.totalorder %s39_s30, 0  ;;  %s71_s6 = sadd.s32 1, %s2190_s18 }
  0x11   : > { %p2313_p5 = por %p51_p2, %p50_p1  ;;  %s2701_s28 = smov (%p32_p3, %s2699_s28), 0 }
  0x12   : > { %2681 = sst [smem:[#allocation9_spill]] %s2701_s28  ;;  %s67_s8 = ssub.s32 %s2214_s24, %s2701_s28 }
  0x13   : > { %s2321_s7 = scalar_select %p41_p4, %s2198_s20, %s43_s29  }
  0x14   : > { %p78_p6 = scmp.ne.s32.totalorder %s2190_s18, %s2186_s17  ;;  %s68_s9 = sor.u32 %s67_s8, %s39_s30 }
  0x15   : > { %p97_p7 = scmp.eq.s32.totalorder %s67_s8, 0  ;;  %p69_p8 = scmp.eq.s32.totalorder %s68_s9, 0 }
  0x16   : > { %p2327_p9 = por %p78_p6, %p51_p2  ;;  %s99_s11 = sadd.s32 1, %s2182_s16 }
  0x17   : > { %p109_p10 = scmp.ne.s32.totalorder %s2182_s16, %s2178_s15  ;;  %p110_p11 = scmp.eq.s32.totalorder %s1693_s26, 17 }
  0x18   : > { %s2335_s12 = scalar_select %p69_p8, %s2190_s18, %s71_s6  }
  0x19   : > { %s2338_s13 = scalar_select %p97_p7, %s2182_s16, %s99_s11  }
  0x1a   : > { %p2340_p12 = por %p110_p11, %p109_p10  ;;  %p1696_p13 = scmp.ge.s32.totalorder %s2218_s25, 18 }
  0x1c   : > { %188 = sbr.rel (%p1696_p13) target bundleno = 101 (0x65), region = 16 }
  0x21   : > { %191 = sbr.rel (!%p2313_p5) target bundleno = 60 (0x3c), region = 20  ;;  %s193_s29 = sand.u32 (%p2313_p5), 1, %s2198_s20  }
  0x22   : > { %s1806_s30 = smul.u32 (%p2313_p5), 12, %s2210_s23  ;;  %s2684_s0 = sld [smem:[#allocation10_spill]] (%p2313_p5) }
  0x23   : > { %s1983_s8 = smul.u32 (%p2313_p5), 192, %s193_s29 }
  0x25   : > { %s2357_s26 = scalar_lea.vmem (%p2313_p5), [#allocation3], %s1983_s8 }
  0x28   : > { %s2352_s11 = scalar_lea.vmem %s2684_s0, %s1806_s30 }
  0x29   : > { %v216_v0 = vld [vmem:[%s2352_s11] sm:$0xff]  ;;  %v218_v1 = vld [vmem:[%s2352_s11 + $0x6c] sm:$0xff]  ;;  %v220_v2 = vld [vmem:[%s2352_s11 + $0xd8] sm:$0xff] }
  0x2a   : > { %217 = vst [vmem:[%s2357_s26] sm:$0xff] %v216_v0  ;;  %219 = vst [vmem:[%s2357_s26 + $0xc] sm:$0xff] %v218_v1  ;;  %v222_v3 = vld [vmem:[%s2352_s11 + $0x144] sm:$0xff]  ;;  %v224_v4 = vld [vmem:[%s2352_s11 + $0x1b0] sm:$0xff] }
  0x2b   : > { %221 = vst [vmem:[%s2357_s26 + $0x18] sm:$0xff] %v220_v2  ;;  %v226_v5 = vld [vmem:[%s2352_s11 + $0x21c] sm:$0xff]  ;;  %223 = vst [vmem:[%s2357_s26 + $0x24] sm:$0xff] %v222_v3  ;;  %v228_v6 = vld [vmem:[%s2352_s11 + $0x288] sm:$0xff] }
  0x2c   : > { %225 = vst [vmem:[%s2357_s26 + $0x30] sm:$0xff] %v224_v4  ;;  %227 = vst [vmem:[%s2357_s26 + $0x3c] sm:$0xff] %v226_v5  ;;  %v230_v7 = vld [vmem:[%s2352_s11 + $0x2f4] sm:$0xff]  ;;  %v232_v8 = vld [vmem:[%s2352_s11 + $0x360] sm:$0xff] }
  0x2d   : > { %229 = vst [vmem:[%s2357_s26 + $0x48] sm:$0xff] %v228_v6  ;;  %231 = vst [vmem:[%s2357_s26 + $0x54] sm:$0xff] %v230_v7  ;;  %v234_v9 = vld [vmem:[%s2352_s11 + $0x3cc] sm:$0xff]  ;;  %v236_v10 = vld [vmem:[%s2352_s11 + $0x438] sm:$0xff] }
  0x2e   : > { %233 = vst [vmem:[%s2357_s26 + $0x60] sm:$0xff] %v232_v8  ;;  %v238_v11 = vld [vmem:[%s2352_s11 + $0x4a4] sm:$0xff]  ;;  %235 = vst [vmem:[%s2357_s26 + $0x6c] sm:$0xff] %v234_v9  ;;  %v240_v12 = vld [vmem:[%s2352_s11 + $0x510] sm:$0xff] }
  0x2f   : > { %237 = vst [vmem:[%s2357_s26 + $0x78] sm:$0xff] %v236_v10  ;;  %239 = vst [vmem:[%s2357_s26 + $0x84] sm:$0xff] %v238_v11  ;;  %v242_v13 = vld [vmem:[%s2352_s11 + $0x57c] sm:$0xff]  ;;  %v244_v14 = vld [vmem:[%s2352_s11 + $0x5e8] sm:$0xff] }
  0x30   : > { %241 = vst [vmem:[%s2357_s26 + $0x90] sm:$0xff] %v240_v12  ;;  %243 = vst [vmem:[%s2357_s26 + $0x9c] sm:$0xff] %v242_v13  ;;  %v246_v15 = vld [vmem:[%s2352_s11 + $0x654] sm:$0xff]  ;;  %v1698_v16 = vld [vmem:[%s2352_s11 + $0x8] sm:$0xf] }
  0x31   : > { %245 = vst [vmem:[%s2357_s26 + $0xa8] sm:$0xff] %v244_v14  ;;  %v1700_v17 = vld [vmem:[%s2352_s11 + $0x74] sm:$0xf]  ;;  %247 = vst [vmem:[%s2357_s26 + $0xb4] sm:$0xff] %v246_v15  ;;  %v1702_v18 = vld [vmem:[%s2352_s11 + $0xe0] sm:$0xf] }
  0x32   : > { %1699 = vst [vmem:[%s2357_s26 + $0x8] sm:$0xf] %v1698_v16  ;;  %1701 = vst [vmem:[%s2357_s26 + $0x14] sm:$0xf] %v1700_v17  ;;  %v1704_v19 = vld [vmem:[%s2352_s11 + $0x14c] sm:$0xf] }
  0x33   : > { %v1706_v20 = vld [vmem:[%s2352_s11 + $0x1b8] sm:$0xf]  ;;  %1703 = vst [vmem:[%s2357_s26 + $0x20] sm:$0xf] %v1702_v18  ;;  %1705 = vst [vmem:[%s2357_s26 + $0x2c] sm:$0xf] %v1704_v19 }
  0x34   : > { %1707 = vst [vmem:[%s2357_s26 + $0x38] sm:$0xf] %v1706_v20  ;;  %v1708_v21 = vld [vmem:[%s2352_s11 + $0x224] sm:$0xf]  ;;  %v1710_v22 = vld [vmem:[%s2352_s11 + $0x290] sm:$0xf] }
  0x35   : > { %v1712_v23 = vld [vmem:[%s2352_s11 + $0x2fc] sm:$0xf]  ;;  %1709 = vst [vmem:[%s2357_s26 + $0x44] sm:$0xf] %v1708_v21  ;;  %1711 = vst [vmem:[%s2357_s26 + $0x50] sm:$0xf] %v1710_v22 }
  0x36   : > { %1713 = vst [vmem:[%s2357_s26 + $0x5c] sm:$0xf] %v1712_v23  ;;  %v1714_v24 = vld [vmem:[%s2352_s11 + $0x368] sm:$0xf]  ;;  %v1716_v25 = vld [vmem:[%s2352_s11 + $0x3d4] sm:$0xf] }
  0x37   : > { %v1718_v26 = vld [vmem:[%s2352_s11 + $0x440] sm:$0xf]  ;;  %1715 = vst [vmem:[%s2357_s26 + $0x68] sm:$0xf] %v1714_v24  ;;  %1717 = vst [vmem:[%s2357_s26 + $0x74] sm:$0xf] %v1716_v25 }
  0x38   : > { %1719 = vst [vmem:[%s2357_s26 + $0x80] sm:$0xf] %v1718_v26  ;;  %v1720_v27 = vld [vmem:[%s2352_s11 + $0x4ac] sm:$0xf]  ;;  %v1722_v28 = vld [vmem:[%s2352_s11 + $0x518] sm:$0xf] }
  0x39   : > { %v1724_v29 = vld [vmem:[%s2352_s11 + $0x584] sm:$0xf]  ;;  %1721 = vst [vmem:[%s2357_s26 + $0x8c] sm:$0xf] %v1720_v27  ;;  %1723 = vst [vmem:[%s2357_s26 + $0x98] sm:$0xf] %v1722_v28 }
  0x3a   : > { %1725 = vst [vmem:[%s2357_s26 + $0xa4] sm:$0xf] %v1724_v29  ;;  %v1726_v30 = vld [vmem:[%s2352_s11 + $0x5f0] sm:$0xf]  ;;  %v1728_v31 = vld [vmem:[%s2352_s11 + $0x65c] sm:$0xf] }
  0x3b   : > { %1727 = vst [vmem:[%s2357_s26 + $0xb0] sm:$0xf] %v1726_v30  ;;  %1729 = vst [vmem:[%s2357_s26 + $0xbc] sm:$0xf] %v1728_v31 }
  0x3c PF: > { %293 = sbr.rel (!%p2327_p9) target bundleno = 101 (0x65), region = 46  ;;  %s295_s5 = sand.u32 (%p2327_p9), 1, %s2190_s18  }
  0x3d   : > { %s1807_s29 = smul.u32 (%p2327_p9), 96, %s2210_s23  ;;  %s2685_s1 = sld [smem:[#allocation11_spill]] (%p2327_p9) }
  0x3e   : > { %s1984_s30 = smul.u32 (%p2327_p9), 192, %s295_s5 }
  0x3f   : > { %s300_s8 = sadd.s32 (%p2327_p9), %s2214_s24, %s1807_s29 }
  0x40   : > { %s1731_s6 = sshll.u32 (%p2327_p9), %s300_s8, 2  ;;  %s2433_s10 = scalar_lea.vmem (%p2327_p9), [#allocation4], %s1984_s30 }
  0x43   : > { %s2428_s28 = scalar_lea.vmem %s2685_s1, %s1731_s6 }
  0x44   : > { %v319_v32 = vld [vmem:[%s2428_s28] sm:$0xf]  ;;  %v321_v33 = vld [vmem:[%s2428_s28 + $0x8] sm:$0xf]  ;;  %v323_v34 = vld [vmem:[%s2428_s28 + $0x10] sm:$0xf] }
  0x45   : > { %320 = vst [vmem:[%s2433_s10] sm:$0xf] %v319_v32  ;;  %322 = vst [vmem:[%s2433_s10 + $0x4] sm:$0xf] %v321_v33  ;;  %v325_v35 = vld [vmem:[%s2428_s28 + $0x18] sm:$0xf] }
  0x46   : > { %324 = vst [vmem:[%s2433_s10 + $0x8] sm:$0xf] %v323_v34  ;;  %v327_v36 = vld [vmem:[%s2428_s28 + $0x20] sm:$0xf]  ;;  %v329_v37 = vld [vmem:[%s2428_s28 + $0x28] sm:$0xf] }
  0x47   : > { %326 = vst [vmem:[%s2433_s10 + $0xc] sm:$0xf] %v325_v35  ;;  %328 = vst [vmem:[%s2433_s10 + $0x10] sm:$0xf] %v327_v36  ;;  %v331_v38 = vld [vmem:[%s2428_s28 + $0x30] sm:$0xf] }
  0x48   : > { %330 = vst [vmem:[%s2433_s10 + $0x14] sm:$0xf] %v329_v37  ;;  %v333_v39 = vld [vmem:[%s2428_s28 + $0x38] sm:$0xf]  ;;  %v335_v40 = vld [vmem:[%s2428_s28 + $0x40] sm:$0xf] }
  0x49   : > { %332 = vst [vmem:[%s2433_s10 + $0x18] sm:$0xf] %v331_v38  ;;  %334 = vst [vmem:[%s2433_s10 + $0x1c] sm:$0xf] %v333_v39  ;;  %v337_v41 = vld [vmem:[%s2428_s28 + $0x48] sm:$0xf] }
  0x4a   : > { %336 = vst [vmem:[%s2433_s10 + $0x20] sm:$0xf] %v335_v40  ;;  %v339_v42 = vld [vmem:[%s2428_s28 + $0x50] sm:$0xf]  ;;  %v341_v43 = vld [vmem:[%s2428_s28 + $0x58] sm:$0xf] }
  0x4b   : > { %338 = vst [vmem:[%s2433_s10 + $0x24] sm:$0xf] %v337_v41  ;;  %340 = vst [vmem:[%s2433_s10 + $0x28] sm:$0xf] %v339_v42  ;;  %v343_v44 = vld [vmem:[%s2428_s28 + $0x60] sm:$0xf] }
  0x4c   : > { %342 = vst [vmem:[%s2433_s10 + $0x2c] sm:$0xf] %v341_v43  ;;  %v345_v45 = vld [vmem:[%s2428_s28 + $0x68] sm:$0xf]  ;;  %v347_v46 = vld [vmem:[%s2428_s28 + $0x70] sm:$0xf] }
  0x4d   : > { %344 = vst [vmem:[%s2433_s10 + $0x30] sm:$0xf] %v343_v44  ;;  %346 = vst [vmem:[%s2433_s10 + $0x34] sm:$0xf] %v345_v45  ;;  %v349_v47 = vld [vmem:[%s2428_s28 + $0x78] sm:$0xf] }
  0x4e   : > { %348 = vst [vmem:[%s2433_s10 + $0x38] sm:$0xf] %v347_v46  ;;  %v351_v48 = vld [vmem:[%s2428_s28 + $0x80] sm:$0xf]  ;;  %v353_v49 = vld [vmem:[%s2428_s28 + $0x88] sm:$0xf] }
  0x4f   : > { %350 = vst [vmem:[%s2433_s10 + $0x3c] sm:$0xf] %v349_v47  ;;  %352 = vst [vmem:[%s2433_s10 + $0x40] sm:$0xf] %v351_v48  ;;  %v355_v50 = vld [vmem:[%s2428_s28 + $0x90] sm:$0xf] }
  0x50   : > { %354 = vst [vmem:[%s2433_s10 + $0x44] sm:$0xf] %v353_v49  ;;  %v357_v51 = vld [vmem:[%s2428_s28 + $0x98] sm:$0xf]  ;;  %v359_v52 = vld [vmem:[%s2428_s28 + $0xa0] sm:$0xf] }
  0x51   : > { %356 = vst [vmem:[%s2433_s10 + $0x48] sm:$0xf] %v355_v50  ;;  %358 = vst [vmem:[%s2433_s10 + $0x4c] sm:$0xf] %v357_v51  ;;  %v361_v53 = vld [vmem:[%s2428_s28 + $0xa8] sm:$0xf] }
  0x52   : > { %360 = vst [vmem:[%s2433_s10 + $0x50] sm:$0xf] %v359_v52  ;;  %v363_v54 = vld [vmem:[%s2428_s28 + $0xb0] sm:$0xf]  ;;  %v365_v55 = vld [vmem:[%s2428_s28 + $0xb8] sm:$0xf] }
  0x53   : > { %362 = vst [vmem:[%s2433_s10 + $0x54] sm:$0xf] %v361_v53  ;;  %364 = vst [vmem:[%s2433_s10 + $0x58] sm:$0xf] %v363_v54  ;;  %v367_v56 = vld [vmem:[%s2428_s28 + $0xc0] sm:$0xf] }
  0x54   : > { %366 = vst [vmem:[%s2433_s10 + $0x5c] sm:$0xf] %v365_v55  ;;  %v369_v57 = vld [vmem:[%s2428_s28 + $0xc8] sm:$0xf]  ;;  %v371_v58 = vld [vmem:[%s2428_s28 + $0xd0] sm:$0xf] }
  0x55   : > { %368 = vst [vmem:[%s2433_s10 + $0x60] sm:$0xf] %v367_v56  ;;  %370 = vst [vmem:[%s2433_s10 + $0x64] sm:$0xf] %v369_v57  ;;  %v373_v59 = vld [vmem:[%s2428_s28 + $0xd8] sm:$0xf] }
  0x56   : > { %372 = vst [vmem:[%s2433_s10 + $0x68] sm:$0xf] %v371_v58  ;;  %v375_v60 = vld [vmem:[%s2428_s28 + $0xe0] sm:$0xf]  ;;  %v377_v61 = vld [vmem:[%s2428_s28 + $0xe8] sm:$0xf] }
  0x57   : > { %374 = vst [vmem:[%s2433_s10 + $0x6c] sm:$0xf] %v373_v59  ;;  %376 = vst [vmem:[%s2433_s10 + $0x70] sm:$0xf] %v375_v60  ;;  %v379_v62 = vld [vmem:[%s2428_s28 + $0xf0] sm:$0xf] }
  0x58   : > { %378 = vst [vmem:[%s2433_s10 + $0x74] sm:$0xf] %v377_v61  ;;  %v381_v63 = vld [vmem:[%s2428_s28 + $0xf8] sm:$0xf]  ;;  %v383_v0 = vld [vmem:[%s2428_s28 + $0x100] sm:$0xf] }
  0x59   : > { %380 = vst [vmem:[%s2433_s10 + $0x78] sm:$0xf] %v379_v62  ;;  %382 = vst [vmem:[%s2433_s10 + $0x7c] sm:$0xf] %v381_v63  ;;  %v385_v1 = vld [vmem:[%s2428_s28 + $0x108] sm:$0xf] }
  0x5a   : > { %384 = vst [vmem:[%s2433_s10 + $0x80] sm:$0xf] %v383_v0  ;;  %v387_v2 = vld [vmem:[%s2428_s28 + $0x110] sm:$0xf]  ;;  %v389_v3 = vld [vmem:[%s2428_s28 + $0x118] sm:$0xf] }
  0x5b   : > { %386 = vst [vmem:[%s2433_s10 + $0x84] sm:$0xf] %v385_v1  ;;  %388 = vst [vmem:[%s2433_s10 + $0x88] sm:$0xf] %v387_v2  ;;  %v391_v4 = vld [vmem:[%s2428_s28 + $0x120] sm:$0xf] }
  0x5c   : > { %390 = vst [vmem:[%s2433_s10 + $0x8c] sm:$0xf] %v389_v3  ;;  %v393_v5 = vld [vmem:[%s2428_s28 + $0x128] sm:$0xf]  ;;  %v395_v6 = vld [vmem:[%s2428_s28 + $0x130] sm:$0xf] }
  0x5d   : > { %392 = vst [vmem:[%s2433_s10 + $0x90] sm:$0xf] %v391_v4  ;;  %394 = vst [vmem:[%s2433_s10 + $0x94] sm:$0xf] %v393_v5  ;;  %v397_v7 = vld [vmem:[%s2428_s28 + $0x138] sm:$0xf] }
  0x5e   : > { %396 = vst [vmem:[%s2433_s10 + $0x98] sm:$0xf] %v395_v6  ;;  %v399_v8 = vld [vmem:[%s2428_s28 + $0x140] sm:$0xf]  ;;  %v401_v9 = vld [vmem:[%s2428_s28 + $0x148] sm:$0xf] }
  0x5f   : > { %398 = vst [vmem:[%s2433_s10 + $0x9c] sm:$0xf] %v397_v7  ;;  %400 = vst [vmem:[%s2433_s10 + $0xa0] sm:$0xf] %v399_v8  ;;  %v403_v10 = vld [vmem:[%s2428_s28 + $0x150] sm:$0xf] }
  0x60   : > { %402 = vst [vmem:[%s2433_s10 + $0xa4] sm:$0xf] %v401_v9  ;;  %v405_v11 = vld [vmem:[%s2428_s28 + $0x158] sm:$0xf]  ;;  %v407_v12 = vld [vmem:[%s2428_s28 + $0x160] sm:$0xf] }
  0x61   : > { %404 = vst [vmem:[%s2433_s10 + $0xa8] sm:$0xf] %v403_v10  ;;  %406 = vst [vmem:[%s2433_s10 + $0xac] sm:$0xf] %v405_v11  ;;  %v409_v13 = vld [vmem:[%s2428_s28 + $0x168] sm:$0xf] }
  0x62   : > { %408 = vst [vmem:[%s2433_s10 + $0xb0] sm:$0xf] %v407_v12  ;;  %v411_v14 = vld [vmem:[%s2428_s28 + $0x170] sm:$0xf]  ;;  %v413_v15 = vld [vmem:[%s2428_s28 + $0x178] sm:$0xf] }
  0x63   : > { %410 = vst [vmem:[%s2433_s10 + $0xb4] sm:$0xf] %v409_v13  ;;  %412 = vst [vmem:[%s2433_s10 + $0xb8] sm:$0xf] %v411_v14 }
  0x64   : > { %414 = vst [vmem:[%s2433_s10 + $0xbc] sm:$0xf] %v413_v15 }
  0x65 PF: > { %p1732_p0 = scmp.ge.s32.totalorder %s2218_s25, 1  ;;  %p533_p1 = scmp.lt.s32.totalorder %s2218_s25, 19 }
  0x67   : > { %p534_p2 = pnand %p1732_p0, %p533_p1 }
  0x68   : > { %s540_s0 = sand.u32 (!%p534_p2), 1, %s2194_s19   ;;  %s547_s11 = sand.u32 (!%p534_p2), 1, %s2186_s17  }
  0x69   : > { %537 = sbr.rel (%p534_p2) target bundleno = 478 (0x1de), region = 87  ;;  %s568_s28 = sand.u32 (!%p534_p2), 1, %s2178_s15  }
  0x6a   : > { %s1985_s26 = smul.u32 (!%p534_p2), 192, %s540_s0  ;;  %s1733_s29 = sshll.u32 (!%p534_p2), %s568_s28, 6 }
  0x6b   : > { %s1986_s5 = smul.u32 (!%p534_p2), 192, %s547_s11  ;;  %p597_p3 = scmp.lt.s32.totalorder (!%p534_p2), %s2206_s22, 1 }
  0x6c   : > { %s2545_s23 = scalar_lea.vmem (!%p534_p2), [#allocation3], %s1985_s26  ;;  %s2549_s15 = scalar_lea.vmem (!%p534_p2), [#allocation5], %s1733_s29 }
  0x6d   : > { %s2547_s17 = scalar_lea.vmem (!%p534_p2), [#allocation4], %s1986_s5  ;;  %p1736_p4 = scmp.ne.s32.totalorder (!%p534_p2), %s2202_s21, 0 }
  0x6e   : > { %s598_s30 = scalar_select %p597_p3, %s2206_s22, 1 }
  0x6f   : > { %615 = sbr.rel (%p1736_p4) target bundleno = 125 (0x7d), region = 99 }
  0x70   : > { %s1734_s8 = sshll.u32 %s598_s30, 3 }
  0x71   : > { %s2538_s10 = scalar_lea.vmem %s2669_s3, %s1734_s8  ;;  %s2543_s24 = scalar_lea.vmem %s2670_s4, %s1734_s8 }
  0x74   : > { %v2220_v16 = vmov 0.0  }
  0x75   : > { %616 = vst [vmem:[#allocation2 + $0x30] sm:$0xff] %v2220_v16  ;;  %617 = vst [vmem:[#allocation2] sm:$0xff] %v2220_v16 }
  0x76   : > { %618 = vst [vmem:[#allocation2 + $0x58] sm:$0xff] %v2220_v16  ;;  %619 = vst [vmem:[#allocation2 + $0x18] sm:$0xff] %v2220_v16 }
  0x77   : > { %620 = vst [vmem:[#allocation2 + $0x50] sm:$0xff] %v2220_v16  ;;  %621 = vst [vmem:[#allocation2 + $0x68] sm:$0xff] %v2220_v16 }
  0x78   : > { %622 = vst [vmem:[#allocation2 + $0x8] sm:$0xff] %v2220_v16  ;;  %623 = vst [vmem:[#allocation2 + $0x48] sm:$0xff] %v2220_v16 }
  0x79   : > { %624 = vst [vmem:[#allocation2 + $0x40] sm:$0xff] %v2220_v16  ;;  %625 = vst [vmem:[#allocation2 + $0x20] sm:$0xff] %v2220_v16 }
  0x7a   : > { %626 = vst [vmem:[#allocation2 + $0x10] sm:$0xff] %v2220_v16  ;;  %627 = vst [vmem:[#allocation2 + $0x38] sm:$0xff] %v2220_v16 }
  0x7b   : > { %628 = vst [vmem:[#allocation2 + $0x60] sm:$0xff] %v2220_v16  ;;  %629 = vst [vmem:[#allocation2 + $0x70] sm:$0xff] %v2220_v16 }
  0x7c   : > { %630 = vst [vmem:[#allocation2 + $0x78] sm:$0xff] %v2220_v16  ;;  %631 = vst [vmem:[#allocation2 + $0x28] sm:$0xff] %v2220_v16 }
  0x7d PF: > { %v2076_v17 = vld [vmem:[%s2547_s17 + $0x78] sm:$0xff]   ;;  %v2079_v20 = vld [vmem:[%s2547_s17 + $0x70] sm:$0xff]   ;;  %v2082_v23 = vld [vmem:[%s2547_s17 + $0x68] sm:$0xff]   ;;  %p1785_p5 = scmp.ne.s32.totalorder %s2202_s21, 8 }
  0x7e   : > { %v2077_v18 = vld [vmem:[%s2547_s17 + $0x38] sm:$0xff]   ;;  %1871 = vmatprep.subr.bf16.mxu0 %v2076_v17  ;;  %v2080_v21 = vld [vmem:[%s2547_s17 + $0x30] sm:$0xff]   ;;  %v2083_v24 = vld [vmem:[%s2547_s17 + $0x28] sm:$0xff]  }
  0x7f   : > { %v2078_v19 = vld [vmem:[%s2547_s17 + $0xb8] sm:$0xff]   ;;  %1872 = vmatpush3.bf16.msra.mxu0 %v2077_v18  ;;  %v2081_v22 = vld [vmem:[%s2547_s17 + $0xb0] sm:$0xff]   ;;  %v2084_v25 = vld [vmem:[%s2547_s17 + $0xa8] sm:$0xff]  }
  0x80   : > { %1951 = vmatprep.subr.bf16.mxu1 %v2078_v19  ;;  %1873 = vmatprep.subr.bf16.mxu0 %v2079_v20  ;;  %v2085_v26 = vld [vmem:[%s2547_s17 + $0x60] sm:$0xff]   ;;  %v2088_v29 = vld [vmem:[%s2547_s17 + $0x58] sm:$0xff]   ;;  %v2091_v32 = vld [vmem:[%s2547_s17 + $0x50] sm:$0xff]  }
  0x81   : > { %1952 = vmatpush3.bf16.msra.mxu1 %v2078_v19  ;;  %v2086_v27 = vld [vmem:[%s2547_s17 + $0x20] sm:$0xff]   ;;  %v2090_v30 = vld [vmem:[%s2547_s17 + $0x98] sm:$0xff]   ;;  %v2093_v33 = vld [vmem:[%s2547_s17 + $0x90] sm:$0xff]  }
  0x82   : > { %1953 = vmatprep.subr.bf16.mxu1 %v2081_v22  ;;  %v2087_v28 = vld [vmem:[%s2547_s17 + $0xa0] sm:$0xff]   ;;  %v2089_v31 = vld [vmem:[%s2547_s17 + $0x18] sm:$0xff]   ;;  %v2092_v34 = vld [vmem:[%s2547_s17 + $0x10] sm:$0xff]  }
  0x83   : > { %1874 = vmatpush3.bf16.msra.mxu0 %v2080_v21  ;;  %v2094_v35 = vld [vmem:[%s2547_s17 + $0x48] sm:$0xff]   ;;  %v2097_v38 = vld [vmem:[%s2547_s17 + $0x40] sm:$0xff]   ;;  %v2112_v49 = vld [vmem:[%s2545_s23 + $0x50] ss:$12 sps:$4 sm:$0xff]  }
  0x84   : > { %1875 = vmatprep.subr.bf16.mxu0 %v2082_v23  ;;  %v2095_v36 = vld [vmem:[%s2547_s17 + $0x8] sm:$0xff]   ;;  %v2099_v39 = vld [vmem:[%s2547_s17 + $0x80] sm:$0xff]   ;;  %v2110_v51 = vld [vmem:[%s2545_s23 + $0x30] ss:$12 sps:$4 sm:$0xff]  }
  0x85   : > { %1954 = vmatpush3.bf16.msra.mxu1 %v2081_v22  ;;  %v2096_v37 = vld [vmem:[%s2547_s17 + $0x88] sm:$0xff]   ;;  %v2102_v40 = vld [vmem:[%s2545_s23 + $0x4] ss:$12 sps:$4 sm:$0xff]   ;;  %v2108_v48 = vld [vmem:[%s2545_s23 + $0x34] ss:$12 sps:$4 sm:$0xff]  }
  0x86   : > { %1955 = vmatprep.subr.bf16.mxu1 %v2084_v25  ;;  %v2103_v41 = vld [vmem:[%s2545_s23 + $0x8] ss:$12 sps:$4 sm:$0xff]   ;;  %v2098_v42 = vld [vmem:[%s2547_s17] sm:$0xff]   ;;  %1032 = vmatprep.mubr.bf16.mxu0 %v2102_v40  ;;  %v2113_v52 = vld [vmem:[%s2545_s23 + $0x4c] ss:$12 sps:$4 sm:$0xff]  }
  0x87   : > { %1876 = vmatpush3.bf16.msra.mxu0 %v2083_v24  ;;  %1967 = vmatprep.mubr.bf16.mxu1 %v2103_v41  ;;  %v2100_v43 = vld [vmem:[%s2545_s23] ss:$12 sps:$4 sm:$0xff]   ;;  %v2105_v44 = vld [vmem:[%s2545_s23 + $0x1c] ss:$12 sps:$4 sm:$0xff]   ;;  %v2111_v46 = vld [vmem:[%s2545_s23 + $0x38] ss:$12 sps:$4 sm:$0xff]  }
  0x88   : > { %1877 = vmatprep.subr.bf16.mxu0 %v2085_v26  ;;  %v2104_v45 = vld [vmem:[%s2545_s23 + $0x20] ss:$12 sps:$4 sm:$0xff]   ;;  %v2107_v47 = vld [vmem:[%s2545_s23 + $0x18] ss:$12 sps:$4 sm:$0xff]   ;;  %v2119_v50 = vld [vmem:[%s2545_s23 + $0x68] ss:$12 sps:$4 sm:$0xff]  }
  0x89   : > { %1956 = vmatpush3.bf16.msra.mxu1 %v2084_v25  ;;  %v2120_v53 = vld [vmem:[%s2545_s23 + $0x80] ss:$12 sps:$4 sm:$0xff]   ;;  %v2127_v54 = vld [vmem:[%s2545_s23 + $0x98] ss:$12 sps:$4 sm:$0xff]   ;;  %v2115_v55 = vld [vmem:[%s2545_s23 + $0x48] ss:$12 sps:$4 sm:$0xff]  }
  0x8a   : > { %1957 = vmatprep.subr.bf16.mxu1 %v2087_v28  ;;  %v2116_v56 = vld [vmem:[%s2545_s23 + $0x64] ss:$12 sps:$4 sm:$0xff]   ;;  %v2118_v58 = vld [vmem:[%s2545_s23 + $0x60] ss:$12 sps:$4 sm:$0xff]   ;;  %v2121_v59 = vld [vmem:[%s2545_s23 + $0x7c] ss:$12 sps:$4 sm:$0xff]  }
  0x8b   : > { %1878 = vmatpush3.bf16.msra.mxu0 %v2086_v27  ;;  %v2128_v57 = vld [vmem:[%s2545_s23 + $0xb0] ss:$12 sps:$4 sm:$0xff]   ;;  %v2123_v60 = vld [vmem:[%s2545_s23 + $0x78] ss:$12 sps:$4 sm:$0xff]   ;;  %v2124_v61 = vld [vmem:[%s2545_s23 + $0x94] ss:$12 sps:$4 sm:$0xff]  }
  0x8c   : > { %1879 = vmatprep.subr.bf16.mxu0 %v2088_v29  ;;  %v2126_v62 = vld [vmem:[%s2545_s23 + $0x90] ss:$12 sps:$4 sm:$0xff]   ;;  %v2129_v63 = vld [vmem:[%s2545_s23 + $0xac] ss:$12 sps:$4 sm:$0xff]   ;;  %v2131_v0 = vld [vmem:[%s2545_s23 + $0xa8] ss:$12 sps:$4 sm:$0xff]  }
  0x8d   : > { %1958 = vmatpush3.bf16.msra.mxu1 %v2087_v28  ;;  %v632_v6 = vld [vmem:[#allocation2 + $0x30] sm:$0xff]  ;;  %v633_v14 = vld [vmem:[#allocation2] sm:$0xff]  ;;  %v634_v21 = vld [vmem:[#allocation2 + $0x58] sm:$0xff] }
  0x8e   : > { %1959 = vmatprep.subr.bf16.mxu1 %v2090_v30  ;;  %v635_v28 = vld [vmem:[#allocation2 + $0x18] sm:$0xff] }
  0x8f   : > { %1880 = vmatpush3.bf16.msra.mxu0 %v2089_v31 }
  0x90   : > { %1881 = vmatprep.subr.bf16.mxu0 %v2091_v32 }
  0x91   : > { %1960 = vmatpush3.bf16.msra.mxu1 %v2090_v30 }
  0x92   : > { %1961 = vmatprep.subr.bf16.mxu1 %v2093_v33 }
  0x93   : > { %1882 = vmatpush3.bf16.msra.mxu0 %v2092_v34 }
  0x94   : > { %1883 = vmatprep.subr.bf16.mxu0 %v2094_v35 }
  0x95   : > { %1962 = vmatpush3.bf16.msra.mxu1 %v2093_v33 }
  0x96   : > { %1963 = vmatprep.subr.bf16.mxu1 %v2096_v37 }
  0x97   : > { %1884 = vmatpush3.bf16.msra.mxu0 %v2095_v36  ;;  %v636_v36 = vld [vmem:[#allocation2 + $0x50] sm:$0xff] }
  0x98   : > { %1885 = vmatprep.subr.bf16.mxu0 %v2097_v38 }
  0x99   : > { %1964 = vmatpush3.bf16.msra.mxu1 %v2096_v37 }
  0x9a   : > { %1965 = vmatprep.subr.bf16.mxu1 %v2099_v39 }
  0x9b   : > { %1886 = vmatpush3.bf16.msra.mxu0 %v2098_v42 }
  0x9d   : > { %1966 = vmatpush3.bf16.msra.mxu1 %v2099_v39 }
  0x9e   : > { %1033 = vmatmul.mubr.bf16.vlgmr.msra.gmra.mxu0 %v2100_v43  ;;  %v637_v43 = vld [vmem:[#allocation2 + $0x68] sm:$0xff] }
  0x9f   : > { %1040 = vmatprep.mubr.bf16.mxu0 %v2105_v44 }
  0xa0   : > { %1968 = vmatmul.mubr.bf16.vlgmr.msra.gmra.mxu1 %v2104_v45 }
  0xa1   : > { %1971 = vmatprep.mubr.bf16.mxu1 %v2111_v46 }
  0xa6   : > { %1041 = vmatmul.mubr.bf16.gmra.mxu0 %v2107_v47 }
  0xa7   : > { %1048 = vmatprep.mubr.bf16.mxu0 %v2108_v48 }
  0xa8   : > { %1972 = vmatmul.mubr.bf16.gmra.mxu1 %v2112_v49  ;;  %v638_v49 = vld [vmem:[#allocation2 + $0x8] sm:$0xff] }
  0xa9   : > { %1975 = vmatprep.mubr.bf16.mxu1 %v2119_v50 }
  0xae   : > { %1049 = vmatmul.mubr.bf16.gmra.mxu0 %v2110_v51 }
  0xaf   : > { %1056 = vmatprep.mubr.bf16.mxu0 %v2113_v52 }
  0xb0   : > { %1976 = vmatmul.mubr.bf16.gmra.mxu1 %v2120_v53 }
  0xb1   : > { %1979 = vmatprep.mubr.bf16.mxu1 %v2127_v54 }
  0xb6   : > { %1057 = vmatmul.mubr.bf16.gmra.mxu0 %v2115_v55 }
  0xb7   : > { %1064 = vmatprep.mubr.bf16.mxu0 %v2116_v56  ;;  %v639_v56 = vld [vmem:[#allocation2 + $0x48] sm:$0xff] }
  0xb8   : > { %1980 = vmatmul.mubr.bf16.gmra.mxu1 %v2128_v57 }
  0xbe   : > { %1065 = vmatmul.mubr.bf16.gmra.mxu0 %v2118_v58 }
  0xbf   : > { %1072 = vmatprep.mubr.bf16.mxu0 %v2121_v59 }
  0xc6   : > { %1073 = vmatmul.mubr.bf16.gmra.mxu0 %v2123_v60 }
  0xc7   : > { %1080 = vmatprep.mubr.bf16.mxu0 %v2124_v61 }
  0xce   : > { %1081 = vmatmul.mubr.bf16.gmra.mxu0 %v2126_v62 }
  0xcf   : > { %1088 = vmatprep.mubr.bf16.mxu0 %v2129_v63 }
  0xd6   : > { %1089 = vmatmul.mubr.bf16.gmra.mxu0 %v2131_v0  ;;  %v640_v0 = vld [vmem:[#allocation2 + $0x40] sm:$0xff] }
 0x15e   : > { %v1887_v1 = vpop.f32.mrf.mxu0 }
 0x160   : > { %v1888_v2 = vpop.f32.mrf.mxu0  ;;  %v1969_v3 = vpop.f32.mrf.mxu1 }
 0x161   : > { %v1889_v4 = vadd.f32 %v1888_v2, %v1887_v1 }
 0x162   : > { %v1890_v5 = vpop.f32.mrf.mxu0  ;;  %v1131_v7 = vpop.f32.mrf.mxu1 }
 0x163   : > { %v1132_v8 = vadd.f32 %v1889_v4, %v1131_v7  ;;  %v641_v7 = vld [vmem:[#allocation2 + $0x20] sm:$0xff] }
 0x164   : > { %v1891_v9 = vpop.f32.mrf.mxu0  ;;  %v1970_v10 = vpop.f32.mrf.mxu1 }
 0x165   : > { %v1194_v11 = vadd.f32 %v1132_v8, %v632_v6  ;;  %v1892_v12 = vadd.f32 %v1891_v9, %v1890_v5 }
 0x166   : > { %v1893_v13 = vpop.f32.mrf.mxu0  ;;  %v1134_v15 = vpop.f32.mrf.mxu1 }
 0x167   : > { %1210 = vst [vmem:[#allocation2 + $0x30] sm:$0xff] %v1194_v11  ;;  %v1135_v16 = vadd.f32 %v1892_v12, %v1134_v15 }
 0x168   : > { %v1894_v17 = vpop.f32.mrf.mxu0  ;;  %v1973_v18 = vpop.f32.mrf.mxu1 }
 0x169   : > { %v1195_v19 = vadd.f32 %v1135_v16, %v633_v14  ;;  %v1895_v20 = vadd.f32 %v1894_v17, %v1893_v13  ;;  %v642_v13 = vld [vmem:[#allocation2 + $0x10] sm:$0xff] }
 0x16a   : > { %v1896_v22 = vpop.f32.mrf.mxu0  ;;  %v1147_v25 = vpop.f32.mrf.mxu1 }
 0x16b   : > { %1211 = vst [vmem:[#allocation2] sm:$0xff] %v1195_v19  ;;  %v1140_v23 = vadd.f32 %v1969_v3, %v1895_v20  ;;  %v643_v20 = vld [vmem:[#allocation2 + $0x38] sm:$0xff] }
 0x16c   : > { %v1897_v24 = vpop.f32.mrf.mxu0  ;;  %v1974_v32 = vpop.f32.mrf.mxu1 }
 0x16d   : > { %v1196_v26 = vadd.f32 %v1140_v23, %v634_v21  ;;  %v1898_v27 = vadd.f32 %v1897_v24, %v1896_v22 }
 0x16e   : > { %v1899_v29 = vpop.f32.mrf.mxu0  ;;  %v1150_v39 = vpop.f32.mrf.mxu1 }
 0x16f   : > { %1212 = vst [vmem:[#allocation2 + $0x58] sm:$0xff] %v1196_v26  ;;  %v1143_v30 = vadd.f32 %v1970_v10, %v1898_v27 }
 0x170   : > { %v1900_v31 = vpop.f32.mrf.mxu0  ;;  %v1977_v46 = vpop.f32.mrf.mxu1 }
 0x171   : > { %v1197_v33 = vadd.f32 %v1143_v30, %v635_v28  ;;  %v1901_v34 = vadd.f32 %v1900_v31, %v1899_v29  ;;  %v644_v28 = vld [vmem:[#allocation2 + $0x60] sm:$0xff] }
 0x172   : > { %v1902_v35 = vpop.f32.mrf.mxu0  ;;  %v1163_v53 = vpop.f32.mrf.mxu1 }
 0x173   : > { %1213 = vst [vmem:[#allocation2 + $0x18] sm:$0xff] %v1197_v33  ;;  %v1148_v37 = vadd.f32 %v1901_v34, %v1147_v25 }
 0x174   : > { %v1903_v38 = vpop.f32.mrf.mxu0  ;;  %v1978_v60 = vpop.f32.mrf.mxu1 }
 0x175   : > { %v1198_v40 = vadd.f32 %v1148_v37, %v636_v36  ;;  %v1904_v41 = vadd.f32 %v1903_v38, %v1902_v35  ;;  %v645_v35 = vld [vmem:[#allocation2 + $0x70] sm:$0xff] }
 0x176   : > { %v1905_v42 = vpop.f32.mrf.mxu0  ;;  %v1166_v3 = vpop.f32.mrf.mxu1 }
 0x177   : > { %1214 = vst [vmem:[#allocation2 + $0x50] sm:$0xff] %v1198_v40  ;;  %v1151_v44 = vadd.f32 %v1904_v41, %v1150_v39  ;;  %v646_v40 = vld [vmem:[#allocation2 + $0x78] sm:$0xff] }
 0x178   : > { %v1906_v45 = vpop.f32.mrf.mxu0  ;;  %v1981_v10 = vpop.f32.mrf.mxu1 }
 0x179   : > { %v1199_v47 = vadd.f32 %v1151_v44, %v637_v43  ;;  %v1907_v48 = vadd.f32 %v1906_v45, %v1905_v42 }
 0x17a   : > { %v1908_v50 = vpop.f32.mrf.mxu0  ;;  %v1179_v17 = vpop.f32.mrf.mxu1 }
 0x17b   : > { %1215 = vst [vmem:[#allocation2 + $0x68] sm:$0xff] %v1199_v47  ;;  %v1156_v51 = vadd.f32 %v1973_v18, %v1907_v48 }
 0x17c   : > { %v1909_v52 = vpop.f32.mrf.mxu0  ;;  %v1982_v24 = vpop.f32.mrf.mxu1 }
 0x17d   : > { %v1200_v54 = vadd.f32 %v1156_v51, %v638_v49  ;;  %v1910_v55 = vadd.f32 %v1909_v52, %v1908_v50 }
 0x17e   : > { %v1911_v57 = vpop.f32.mrf.mxu0  ;;  %v1182_v31 = vpop.f32.mrf.mxu1 }
 0x17f   : > { %1216 = vst [vmem:[#allocation2 + $0x8] sm:$0xff] %v1200_v54  ;;  %v1159_v58 = vadd.f32 %v1974_v32, %v1910_v55 }
 0x180   : > { %v1912_v59 = vpop.f32.mrf.mxu0 }
 0x181   : > { %v1201_v61 = vadd.f32 %v1159_v58, %v639_v56  ;;  %v1913_v62 = vadd.f32 %v1912_v59, %v1911_v57 }
 0x182   : > { %v1914_v63 = vpop.f32.mrf.mxu0 }
 0x183   : > { %1217 = vst [vmem:[#allocation2 + $0x48] sm:$0xff] %v1201_v61  ;;  %v1164_v1 = vadd.f32 %v1913_v62, %v1163_v53 }
 0x184   : > { %v1915_v2 = vpop.f32.mrf.mxu0 }
 0x185   : > { %v1202_v4 = vadd.f32 %v1164_v1, %v640_v0  ;;  %v1916_v5 = vadd.f32 %v1915_v2, %v1914_v63 }
 0x186   : > { %v1917_v6 = vpop.f32.mrf.mxu0 }
 0x187   : > { %1218 = vst [vmem:[#allocation2 + $0x40] sm:$0xff] %v1202_v4  ;;  %v1167_v8 = vadd.f32 %v1916_v5, %v1166_v3 }
 0x188   : > { %v1918_v9 = vpop.f32.mrf.mxu0 }
 0x189   : > { %v1203_v11 = vadd.f32 %v1167_v8, %v641_v7  ;;  %v1919_v12 = vadd.f32 %v1918_v9, %v1917_v6 }
 0x18a   : > { %v1920_v14 = vpop.f32.mrf.mxu0 }
 0x18b   : > { %1219 = vst [vmem:[#allocation2 + $0x20] sm:$0xff] %v1203_v11  ;;  %v1172_v15 = vadd.f32 %v1977_v46, %v1919_v12  ;;  %v647_v46 = vld [vmem:[#allocation2 + $0x28] sm:$0xff] }
 0x18c   : > { %v1921_v16 = vpop.f32.mrf.mxu0 }
 0x18d   : > { %v1204_v18 = vadd.f32 %v1172_v15, %v642_v13  ;;  %v1922_v19 = vadd.f32 %v1921_v16, %v1920_v14 }
 0x18e   : > { %v1923_v21 = vpop.f32.mrf.mxu0 }
 0x18f   : > { %1220 = vst [vmem:[#allocation2 + $0x10] sm:$0xff] %v1204_v18  ;;  %v1175_v22 = vadd.f32 %v1978_v60, %v1922_v19 }
 0x190   : > { %v1924_v23 = vpop.f32.mrf.mxu0 }
 0x191   : > { %v1205_v25 = vadd.f32 %v1175_v22, %v643_v20  ;;  %v1925_v26 = vadd.f32 %v1924_v23, %v1923_v21 }
 0x192   : > { %v1926_v27 = vpop.f32.mrf.mxu0 }
 0x193   : > { %1221 = vst [vmem:[#allocation2 + $0x38] sm:$0xff] %v1205_v25  ;;  %v1180_v29 = vadd.f32 %v1925_v26, %v1179_v17 }
 0x194   : > { %v1927_v30 = vpop.f32.mrf.mxu0 }
 0x195   : > { %v1206_v32 = vadd.f32 %v1180_v29, %v644_v28  ;;  %v1928_v33 = vadd.f32 %v1927_v30, %v1926_v27 }
 0x196   : > { %v1929_v34 = vpop.f32.mrf.mxu0 }
 0x197   : > { %1222 = vst [vmem:[#allocation2 + $0x60] sm:$0xff] %v1206_v32  ;;  %v1183_v36 = vadd.f32 %v1928_v33, %v1182_v31 }
 0x198   : > { %v1930_v37 = vpop.f32.mrf.mxu0 }
 0x199   : > { %v1207_v38 = vadd.f32 %v1183_v36, %v645_v35  ;;  %v1931_v39 = vadd.f32 %v1930_v37, %v1929_v34 }
 0x19a   : > { %v1932_v41 = vpop.f32.mrf.mxu0 }
 0x19b   : > { %1223 = vst [vmem:[#allocation2 + $0x70] sm:$0xff] %v1207_v38  ;;  %v1188_v42 = vadd.f32 %v1981_v10, %v1931_v39 }
 0x19c   : > { %v1933_v43 = vpop.f32.mrf.mxu0 }
 0x19d   : > { %v1208_v44 = vadd.f32 %v1188_v42, %v646_v40  ;;  %v1934_v45 = vadd.f32 %v1933_v43, %v1932_v41 }
 0x19f   : > { %1224 = vst [vmem:[#allocation2 + $0x78] sm:$0xff] %v1208_v44  ;;  %v1191_v47 = vadd.f32 %v1982_v24, %v1934_v45  ;;  %1229 = sbr.rel (%p1785_p5) target bundleno = 466 (0x1d2), region = 103 }
 0x1a1   : > { %v1209_v48 = vadd.f32 %v1191_v47, %v647_v46 }
 0x1a3   : > { %1225 = vst [vmem:[#allocation2 + $0x28] sm:$0xff] %v1209_v48 }
 0x1a4   : > { %v1230_v49 = vld [vmem:[#allocation2 + $0x30] sm:$0xff]  ;;  %v1231_v50 = vld [vmem:[#allocation2] sm:$0xff]  ;;  %v1232_v51 = vld [vmem:[#allocation2 + $0x58] sm:$0xff] }
 0x1a5   : > { %v1827_v52 = vpack.c.bf16 %v1231_v50, %v1230_v49  ;;  %v1326_v53 = vadd.f32 %v1231_v50, %v1230_v49  ;;  %v1347_v54 = vmul.f32 %v1230_v49, %v1230_v49  ;;  %v1348_v55 = vmul.f32 %v1231_v50, %v1231_v50  ;;  %v1233_v56 = vld [vmem:[#allocation2 + $0x18] sm:$0xff]  ;;  %v1234_v57 = vld [vmem:[#allocation2 + $0x50] sm:$0xff]  ;;  %v1235_v58 = vld [vmem:[#allocation2 + $0x68] sm:$0xff] }
 0x1a6   : > { %v1832_v59 = vpack.c.bf16 %v1233_v56, %v1232_v51  ;;  %v1349_v60 = vmul.f32 %v1232_v51, %v1232_v51  ;;  %v1837_v61 = vpack.c.bf16 %v1235_v58, %v1234_v57  ;;  %v1236_v62 = vld [vmem:[#allocation2 + $0x8] sm:$0xff]  ;;  %v1350_v1 = vmul.f32 %v1233_v56, %v1233_v56  ;;  %v1238_v3 = vld [vmem:[#allocation2 + $0x40] sm:$0xff]  ;;  %v1240_v7 = vld [vmem:[#allocation2 + $0x10] sm:$0xff] }
 0x1a7   : > { %1828 = vst [vmem:[%s2549_s15] sm:$0xff] %v1827_v52   ;;  %v1363_v63 = vadd.f32 %v1348_v55, %v1347_v54  ;;  %v1327_v0 = vadd.f32 %v1326_v53, %v1232_v51  ;;  %v1237_v2 = vld [vmem:[#allocation2 + $0x48] sm:$0xff]  ;;  %v1239_v4 = vld [vmem:[#allocation2 + $0x20] sm:$0xff]  ;;  %v1351_v10 = vmul.f32 %v1234_v57, %v1234_v57  ;;  %v1241_v11 = vld [vmem:[#allocation2 + $0x38] sm:$0xff]  ;;  %v1352_v18 = vmul.f32 %v1235_v58, %v1235_v58 }
 0x1a8   : > { %1864 = vst [vmem:[%s2549_s15 + $0x8] sm:$0xff] %v1832_v59   ;;  %1865 = vst [vmem:[%s2549_s15 + $0x10] sm:$0xff] %v1837_v61   ;;  %v1842_v5 = vpack.c.bf16 %v1237_v2, %v1236_v62  ;;  %v1847_v6 = vpack.c.bf16 %v1239_v4, %v1238_v3  ;;  %v1242_v12 = vld [vmem:[#allocation2 + $0x60] sm:$0xff]  ;;  %v1243_v13 = vld [vmem:[#allocation2 + $0x70] sm:$0xff]  ;;  %v1852_v14 = vpack.c.bf16 %v1241_v11, %v1240_v7 }
 0x1a9   : > { %v1328_v8 = vadd.f32 %v1327_v0, %v1233_v56  ;;  %v1364_v9 = vadd.f32 %v1363_v63, %v1349_v60  ;;  %v1857_v15 = vpack.c.bf16 %v1243_v13, %v1242_v12  ;;  %v1244_v19 = vld [vmem:[#allocation2 + $0x78] sm:$0xff]  ;;  %v1353_v24 = vmul.f32 %v1236_v62, %v1236_v62 }
 0x1aa   : > { %1866 = vst [vmem:[%s2549_s15 + $0x18] sm:$0xff] %v1842_v5   ;;  %1867 = vst [vmem:[%s2549_s15 + $0x20] sm:$0xff] %v1847_v6   ;;  %v1245_v20 = vld [vmem:[#allocation2 + $0x28] sm:$0xff]  ;;  %v1354_v27 = vmul.f32 %v1237_v2, %v1237_v2  ;;  %v1355_v30 = vmul.f32 %v1238_v3, %v1238_v3  ;;  %v1356_v33 = vmul.f32 %v1239_v4, %v1239_v4 }
 0x1ab   : > { %v1365_v16 = vadd.f32 %v1364_v9, %v1350_v1  ;;  %v1329_v17 = vadd.f32 %v1328_v8, %v1234_v57  ;;  %1868 = vst [vmem:[%s2549_s15 + $0x28] sm:$0xff] %v1852_v14   ;;  %1869 = vst [vmem:[%s2549_s15 + $0x30] sm:$0xff] %v1857_v15   ;;  %v1862_v21 = vpack.c.bf16 %v1245_v20, %v1244_v19 }
 0x1ac   : > { %v1357_v36 = vmul.f32 %v1240_v7, %v1240_v7  ;;  %v1358_v39 = vmul.f32 %v1241_v11, %v1241_v11  ;;  %v1359_v42 = vmul.f32 %v1242_v12, %v1242_v12  ;;  %v1360_v45 = vmul.f32 %v1243_v13, %v1243_v13 }
 0x1ad   : > { %v1330_v22 = vadd.f32 %v1329_v17, %v1235_v58  ;;  %v1366_v23 = vadd.f32 %v1365_v16, %v1351_v10  ;;  %1870 = vst [vmem:[%s2549_s15 + $0x38] sm:$0xff] %v1862_v21   ;;  %v1361_v48 = vmul.f32 %v1244_v19, %v1244_v19  ;;  %v1362_v51 = vmul.f32 %v1245_v20, %v1245_v20 }
 0x1af   : > { %v1367_v25 = vadd.f32 %v1366_v23, %v1352_v18  ;;  %v1331_v26 = vadd.f32 %v1330_v22, %v1236_v62 }
 0x1b1   : > { %v1332_v28 = vadd.f32 %v1331_v26, %v1237_v2  ;;  %v1368_v29 = vadd.f32 %v1367_v25, %v1353_v24 }
 0x1b3   : > { %v1369_v31 = vadd.f32 %v1368_v29, %v1354_v27  ;;  %v1333_v32 = vadd.f32 %v1332_v28, %v1238_v3 }
 0x1b5   : > { %v1334_v34 = vadd.f32 %v1333_v32, %v1239_v4  ;;  %v1370_v35 = vadd.f32 %v1369_v31, %v1355_v30 }
 0x1b7   : > { %v1371_v37 = vadd.f32 %v1370_v35, %v1356_v33  ;;  %v1335_v38 = vadd.f32 %v1334_v34, %v1240_v7 }
 0x1b9   : > { %v1336_v40 = vadd.f32 %v1335_v38, %v1241_v11  ;;  %v1372_v41 = vadd.f32 %v1371_v37, %v1357_v36 }
 0x1bb   : > { %v1373_v43 = vadd.f32 %v1372_v41, %v1358_v39  ;;  %v1337_v44 = vadd.f32 %v1336_v40, %v1242_v12 }
 0x1bd   : > { %v1338_v46 = vadd.f32 %v1337_v44, %v1243_v13  ;;  %v1374_v47 = vadd.f32 %v1373_v43, %v1359_v42 }
 0x1bf   : > { %v1375_v49 = vadd.f32 %v1374_v47, %v1360_v45  ;;  %v1339_v50 = vadd.f32 %v1338_v46, %v1244_v19 }
 0x1c1   : > { %v1340_v52 = vadd.f32 %v1339_v50, %v1245_v20  ;;  %v1376_v53 = vadd.f32 %v1375_v49, %v1361_v48 }
 0x1c3   : > { %v1341_v54 = vrot.slane %v1340_v52, 4  ;;  %v1377_v55 = vadd.f32 %v1376_v53, %v1362_v51 }
 0x1c5   : > { %v1342_v56 = vadd.f32 %v1341_v54, %v1340_v52  ;;  %v1378_v57 = vrot.slane %v1377_v55, 4 }
 0x1c7   : > { %v1343_v58 = vrot.slane %v1342_v56, 2  ;;  %v1379_v59 = vadd.f32 %v1378_v57, %v1377_v55 }
 0x1c9   : > { %v1344_v60 = vadd.f32 %v1343_v58, %v1342_v56  ;;  %v1380_v61 = vrot.slane %v1379_v59, 2 }
 0x1cb   : > { %v1345_v62 = vrot.slane %v1344_v60, 1  ;;  %v1381_v63 = vadd.f32 %v1380_v61, %v1379_v59 }
 0x1cd   : > { %v1346_v0 = vadd.f32 %v1345_v62, %v1344_v60  ;;  %v1382_v1 = vrot.slane %v1381_v63, 1 }
 0x1cf   : > { %1384 = vst [vmem:[%s2538_s10] sm:$0xff] %v1346_v0  ;;  %v1383_v2 = vadd.f32 %v1382_v1, %v1381_v63 }
 0x1d1   : > { %1385 = vst [vmem:[%s2543_s24] sm:$0xff] %v1383_v2 }
 0x1d2 PF: > { %1408 = sbr.rel (!%p2340_p12) target bundleno = 478 (0x1de), region = 107  ;;  %s1803_s1 = sshll.u32 (%p2340_p12), %s2206_s22, 2  ;;  %v1430_v3 = vld [vmem:[%s2549_s15] sm:$0xf] (%p2340_p12)  ;;  %v1432_v4 = vld [vmem:[%s2549_s15 + $0x4] sm:$0xf] (%p2340_p12) }
 0x1d3   : > { %s1413_s23 = scalar_lea.vmem (%p2340_p12), %s2668_s2, %s1803_s1  ;;  %v1434_v5 = vld [vmem:[%s2549_s15 + $0x8] sm:$0xf] (%p2340_p12)  ;;  %v1436_v6 = vld [vmem:[%s2549_s15 + $0xc] sm:$0xf] (%p2340_p12)  ;;  %v1438_v7 = vld [vmem:[%s2549_s15 + $0x10] sm:$0xf] (%p2340_p12) }
 0x1d4   : > { %1431 = vst [vmem:[%s1413_s23] sm:$0xf] (%p2340_p12), %v1430_v3  ;;  %1433 = vst [vmem:[%s1413_s23 + $0x8] sm:$0xf] (%p2340_p12), %v1432_v4  ;;  %v1440_v8 = vld [vmem:[%s2549_s15 + $0x14] sm:$0xf] (%p2340_p12) }
 0x1d5   : > { %1435 = vst [vmem:[%s1413_s23 + $0x10] sm:$0xf] (%p2340_p12), %v1434_v5  ;;  %1437 = vst [vmem:[%s1413_s23 + $0x18] sm:$0xf] (%p2340_p12), %v1436_v6  ;;  %v1442_v9 = vld [vmem:[%s2549_s15 + $0x18] sm:$0xf] (%p2340_p12) }
 0x1d6   : > { %1439 = vst [vmem:[%s1413_s23 + $0x20] sm:$0xf] (%p2340_p12), %v1438_v7  ;;  %v1444_v10 = vld [vmem:[%s2549_s15 + $0x1c] sm:$0xf] (%p2340_p12)  ;;  %1441 = vst [vmem:[%s1413_s23 + $0x28] sm:$0xf] (%p2340_p12), %v1440_v8 }
 0x1d7   : > { %1443 = vst [vmem:[%s1413_s23 + $0x30] sm:$0xf] %v1442_v9  ;;  %1445 = vst [vmem:[%s1413_s23 + $0x38] sm:$0xf] %v1444_v10  ;;  %v1446_v11 = vld [vmem:[%s2549_s15 + $0x20] sm:$0xf] }
 0x1d8   : > { %v1448_v12 = vld [vmem:[%s2549_s15 + $0x24] sm:$0xf]  ;;  %v1450_v13 = vld [vmem:[%s2549_s15 + $0x28] sm:$0xf]  ;;  %1447 = vst [vmem:[%s1413_s23 + $0x40] sm:$0xf] %v1446_v11 }
 0x1d9   : > { %1449 = vst [vmem:[%s1413_s23 + $0x48] sm:$0xf] %v1448_v12  ;;  %1451 = vst [vmem:[%s1413_s23 + $0x50] sm:$0xf] %v1450_v13  ;;  %v1452_v14 = vld [vmem:[%s2549_s15 + $0x2c] sm:$0xf] }
 0x1da   : > { %v1454_v15 = vld [vmem:[%s2549_s15 + $0x30] sm:$0xf]  ;;  %v1456_v16 = vld [vmem:[%s2549_s15 + $0x34] sm:$0xf]  ;;  %1453 = vst [vmem:[%s1413_s23 + $0x58] sm:$0xf] %v1452_v14 }
 0x1db   : > { %1455 = vst [vmem:[%s1413_s23 + $0x60] sm:$0xf] %v1454_v15  ;;  %1457 = vst [vmem:[%s1413_s23 + $0x68] sm:$0xf] %v1456_v16  ;;  %v1458_v17 = vld [vmem:[%s2549_s15 + $0x38] sm:$0xf] }
 0x1dc   : > { %v1460_v18 = vld [vmem:[%s2549_s15 + $0x3c] sm:$0xf]  ;;  %1459 = vst [vmem:[%s1413_s23 + $0x70] sm:$0xf] %v1458_v17 }
 0x1dd   : > { %1461 = vst [vmem:[%s1413_s23 + $0x78] sm:$0xf] %v1460_v18 }
 0x1de PF: > { %s15_s25 = sadd.s32 1, %s2218_s25   ;;  %s2686_s21 = sld [smem:[#allocation6_spill]] }
 0x1df   : > { %p12_p6 = scmp.ge.s32.totalorder %s15_s25, 20   ;;  %s2687_s22 = sld [smem:[#allocation7_spill]] }
 0x1e0   : > { %s2688_s23 = sld [smem:[#allocation8_spill]]  ;;  %s2690_s15 = smov %s2182_s16 }
 0x1e1   : > { %s2689_s24 = sld [smem:[#allocation9_spill]]  ;;  %s2691_s16 = smov %s2338_s13 }
 0x1e2   : > { %s2692_s17 = smov %s2190_s18  ;;  %s2693_s18 = smov %s2335_s12 }
 0x1e3   : > { %s2694_s19 = smov %s2198_s20  ;;  %s2695_s20 = smov %s2321_s7 }
 0x1e4   :  { %14 = sbr.rel (!%p12_p6) target bundleno = 9 (0x9), region = 217 }

// kernel: forward.14
= control target key start
LH: loop header
LB: loop body
LE: loop exit
PB: predicated region body
PF: predicated region fallthrough
CT: control target
= control target key end

     0   :  { %v64_v0 = vlaneseq  ;;  %s608_s0 = inlined_call_operand.vmem [shape: bf16[128,256], index: 0, kind: input, shape index: {}]   ;;  %s609_s1 = inlined_call_operand.vmem [shape: f32[1,256], index: 1, kind: input, shape index: {}]   ;;  %s610_s2 = inlined_call_operand.vmem [shape: f32[1,256], index: 2, kind: input, shape index: {}]   ;;  %s611_s3 = inlined_call_operand.vmem [shape: bf16[128,256], index: 3, kind: output, shape index: {}]  }
   0x1   :  { %v14_v1 = vld [vmem:[%s608_s0] sm:$0xff]  ;;  %v15_v6 = vld [vmem:[%s608_s0 + $0x8] sm:$0xff]  ;;  %v16_v7 = vld [vmem:[%s608_s0 + $0x10] sm:$0xff] }
   0x2   :  { %v62_v2 = vld [vmem:[%s609_s1] sm:$0x3]  ;;  %v30_v3 = vunpack.c.l.bf16 %v14_v1  ;;  %v31_v4 = vunpack.c.h.bf16 %v14_v1  ;;  %v65_v5 = vshrl.u32 %v64_v0, 7  ;;  %v17_v8 = vld [vmem:[%s608_s0 + $0x18] sm:$0xff]  ;;  %v32_v10 = vunpack.c.l.bf16 %v15_v6  ;;  %v440_v15 = vld [vmem:[%s608_s0 + $0x28] sm:$0xff] }
   0x3   :  { %v106_v9 = vld [vmem:[%s610_s2] sm:$0x3]  ;;  %v33_v11 = vunpack.c.h.bf16 %v15_v6  ;;  %v34_v12 = vunpack.c.l.bf16 %v16_v7  ;;  %v35_v13 = vunpack.c.h.bf16 %v16_v7  ;;  %v36_v18 = vunpack.c.l.bf16 %v17_v8  ;;  %v445_v20 = vld [vmem:[%s608_s0 + $0x30] sm:$0xff]  ;;  %v450_v21 = vld [vmem:[%s608_s0 + $0x38] sm:$0xff] }
   0x4   :  { %v435_v14 = vld [vmem:[%s608_s0 + $0x20] sm:$0xff]  ;;  %v66_v16 = vsub.s32 0, %v65_v5  ;;  %v70_v17 = vsub.s32 1, %v65_v5  ;;  %v37_v19 = vunpack.c.h.bf16 %v17_v8  ;;  %v40_v24 = vunpack.c.l.bf16 %v440_v15 }
   0x5   :  { %v38_v22 = vunpack.c.l.bf16 %v435_v14  ;;  %v39_v23 = vunpack.c.h.bf16 %v435_v14  ;;  %v41_v25 = vunpack.c.h.bf16 %v440_v15  ;;  %v42_v30 = vunpack.c.l.bf16 %v445_v20 }
   0x6   :  { %v456_v26 = vrot.slane %v62_v2, %v66_v16  ;;  %v458_v27 = vrot.slane %v62_v2, %v70_v17  ;;  %v460_v28 = vrot.slane %v106_v9, %v66_v16  ;;  %v462_v29 = vrot.slane %v106_v9, %v70_v17 }
   0x7   :  { %v43_v31 = vunpack.c.h.bf16 %v445_v20  ;;  %v44_v32 = vunpack.c.l.bf16 %v450_v21  ;;  %v45_v33 = vunpack.c.h.bf16 %v450_v21 }
   0x8   :  { %v74_v34 = vmul.f32 %v456_v26, %v30_v3  ;;  %v75_v35 = vmul.f32 %v458_v27, %v31_v4  ;;  %v76_v36 = vmul.f32 %v456_v26, %v32_v10  ;;  %v77_v37 = vmul.f32 %v458_v27, %v33_v11 }
   0x9   :  { %v78_v38 = vmul.f32 %v456_v26, %v34_v12  ;;  %v79_v39 = vmul.f32 %v458_v27, %v35_v13  ;;  %v80_v40 = vmul.f32 %v456_v26, %v36_v18  ;;  %v81_v41 = vmul.f32 %v458_v27, %v37_v19 }
   0xa   :  { %v118_v42 = vadd.f32 %v460_v28, %v74_v34  ;;  %v119_v43 = vadd.f32 %v462_v29, %v75_v35  ;;  %v120_v44 = vadd.f32 %v460_v28, %v76_v36  ;;  %v121_v45 = vadd.f32 %v462_v29, %v77_v37  ;;  %v23_v37 = vld [vmem:[%s608_s0 + $0x48] sm:$0xff] }
   0xb   :  { %v122_v46 = vadd.f32 %v460_v28, %v78_v38  ;;  %v123_v47 = vadd.f32 %v462_v29, %v79_v39  ;;  %v124_v48 = vadd.f32 %v460_v28, %v80_v40  ;;  %v125_v49 = vadd.f32 %v462_v29, %v81_v41 }
   0xc   :  { %vm150_vm0 = vcmp.ge.f32.partialorder %v118_v42, 0.0  ;;  %vm151_vm1 = vcmp.ge.f32.partialorder %v119_v43, 0.0  ;;  %v182_v50 = vmul.f32 0.1, %v118_v42  ;;  %v183_v51 = vmul.f32 0.1, %v119_v43 }
   0xd   :  { %vm152_vm2 = vcmp.ge.f32.partialorder %v120_v44, 0.0  ;;  %vm153_vm3 = vcmp.ge.f32.partialorder %v121_v45, 0.0  ;;  %v184_v52 = vmul.f32 0.1, %v120_v44  ;;  %v185_v53 = vmul.f32 0.1, %v121_v45 }
   0xe   :  { %v214_v54 = vsel %vm150_vm0, %v118_v42, %v182_v50  ;;  %v215_v55 = vsel %vm151_vm1, %v119_v43, %v183_v51  ;;  %vm154_vm4 = vcmp.ge.f32.partialorder %v122_v46, 0.0  ;;  %vm155_vm5 = vcmp.ge.f32.partialorder %v123_v47, 0.0 }
   0xf   :  { %v378_v56 = vpack.c.bf16 %v215_v55, %v214_v54  ;;  %v216_v57 = vsel %vm152_vm2, %v120_v44, %v184_v52  ;;  %v217_v58 = vsel %vm153_vm3, %v121_v45, %v185_v53  ;;  %v186_v59 = vmul.f32 0.1, %v122_v46 }
  0x10   :  { %v379_v60 = vpack.c.bf16 %v217_v58, %v216_v57  ;;  %v187_v61 = vmul.f32 0.1, %v123_v47  ;;  %vm156_vm6 = vcmp.ge.f32.partialorder %v124_v48, 0.0  ;;  %vm157_vm7 = vcmp.ge.f32.partialorder %v125_v49, 0.0 }
  0x11   :  { %342 = vst [vmem:[%s611_s3] sm:$0xff] %v378_v56  ;;  %v218_v62 = vsel %vm154_vm4, %v122_v46, %v186_v59  ;;  %v188_v63 = vmul.f32 0.1, %v124_v48  ;;  %v189_v0 = vmul.f32 0.1, %v125_v49  ;;  %v82_v1 = vmul.f32 %v456_v26, %v38_v22  ;;  %v24_v46 = vld [vmem:[%s608_s0 + $0x50] sm:$0xff] }
  0x12   :  { %343 = vst [vmem:[%s611_s3 + $0x8] sm:$0xff] %v379_v60  ;;  %v219_v2 = vsel %vm155_vm5, %v123_v47, %v187_v61  ;;  %v83_v3 = vmul.f32 %v458_v27, %v39_v23  ;;  %v84_v4 = vmul.f32 %v456_v26, %v40_v24  ;;  %v85_v5 = vmul.f32 %v458_v27, %v41_v25 }
  0x13   :  { %v380_v6 = vpack.c.bf16 %v219_v2, %v218_v62  ;;  %v220_v7 = vsel %vm156_vm6, %v124_v48, %v188_v63  ;;  %v221_v8 = vsel %vm157_vm7, %v125_v49, %v189_v0  ;;  %v126_v9 = vadd.f32 %v460_v28, %v82_v1  ;;  %v25_v1 = vld [vmem:[%s608_s0 + $0x58] sm:$0xff] }
  0x14   :  { %v381_v10 = vpack.c.bf16 %v221_v8, %v220_v7  ;;  %v127_v11 = vadd.f32 %v462_v29, %v83_v3  ;;  %v128_v12 = vadd.f32 %v460_v28, %v84_v4  ;;  %v129_v13 = vadd.f32 %v462_v29, %v85_v5 }
  0x15   :  { %344 = vst [vmem:[%s611_s3 + $0x10] sm:$0xff] %v380_v6  ;;  %vm158_vm8 = vcmp.ge.f32.partialorder %v126_v9, 0.0  ;;  %v190_v14 = vmul.f32 0.1, %v126_v9  ;;  %v86_v15 = vmul.f32 %v456_v26, %v42_v30  ;;  %v87_v16 = vmul.f32 %v458_v27, %v43_v31  ;;  %v22_v31 = vld [vmem:[%s608_s0 + $0x40] sm:$0xff] }
  0x16   :  { %345 = vst [vmem:[%s611_s3 + $0x18] sm:$0xff] %v381_v10  ;;  %vm159_vm9 = vcmp.ge.f32.partialorder %v127_v11, 0.0  ;;  %v191_v17 = vmul.f32 0.1, %v127_v11  ;;  %vm160_vm10 = vcmp.ge.f32.partialorder %v128_v12, 0.0  ;;  %vm161_vm11 = vcmp.ge.f32.partialorder %v129_v13, 0.0 }
  0x17   :  { %v222_v18 = vsel %vm158_vm8, %v126_v9, %v190_v14  ;;  %v192_v19 = vmul.f32 0.1, %v128_v12  ;;  %v193_v20 = vmul.f32 0.1, %v129_v13  ;;  %v130_v22 = vadd.f32 %v460_v28, %v86_v15  ;;  %v26_v10 = vld [vmem:[%s608_s0 + $0x60] sm:$0xff]  ;;  %v27_v15 = vld [vmem:[%s608_s0 + $0x68] sm:$0xff] }
  0x18   :  { %v223_v23 = vsel %vm159_vm9, %v127_v11, %v191_v17  ;;  %v131_v24 = vadd.f32 %v462_v29, %v87_v16  ;;  %v88_v25 = vmul.f32 %v456_v26, %v44_v32  ;;  %v89_v30 = vmul.f32 %v458_v27, %v45_v33 }
  0x19   :  { %v382_v34 = vpack.c.bf16 %v223_v23, %v222_v18  ;;  %v224_v35 = vsel %vm160_vm10, %v128_v12, %v192_v19  ;;  %v225_v36 = vsel %vm161_vm11, %v129_v13, %v193_v20  ;;  %vm162_vm12 = vcmp.ge.f32.partialorder %v130_v22, 0.0 }
  0x1a   :  { %v383_v38 = vpack.c.bf16 %v225_v36, %v224_v35  ;;  %vm163_vm13 = vcmp.ge.f32.partialorder %v131_v24, 0.0  ;;  %v194_v39 = vmul.f32 0.1, %v130_v22  ;;  %v195_v32 = vmul.f32 0.1, %v131_v24 }
  0x1b   :  { %346 = vst [vmem:[%s611_s3 + $0x20] sm:$0xff] %v382_v34  ;;  %v132_v21 = vadd.f32 %v460_v28, %v88_v25  ;;  %v133_v33 = vadd.f32 %v462_v29, %v89_v30  ;;  %v46_v40 = vunpack.c.l.bf16 %v22_v31  ;;  %v47_v41 = vunpack.c.h.bf16 %v22_v31 }
  0x1c   :  { %347 = vst [vmem:[%s611_s3 + $0x28] sm:$0xff] %v383_v38  ;;  %v226_v42 = vsel %vm162_vm12, %v130_v22, %v194_v39  ;;  %v227_v43 = vsel %vm163_vm13, %v131_v24, %v195_v32  ;;  %v48_v44 = vunpack.c.l.bf16 %v23_v37  ;;  %v49_v45 = vunpack.c.h.bf16 %v23_v37  ;;  %v28_v37 = vld [vmem:[%s608_s0 + $0x70] sm:$0xff] }
  0x1d   :  { %v384_v47 = vpack.c.bf16 %v227_v43, %v226_v42  ;;  %vm164_vm14 = vcmp.ge.f32.partialorder %v132_v21, 0.0  ;;  %vm165_vm15 = vcmp.ge.f32.partialorder %v133_v33, 0.0  ;;  %v196_v48 = vmul.f32 0.1, %v132_v21 }
  0x1e   :  { %v197_v49 = vmul.f32 0.1, %v133_v33  ;;  %v90_v50 = vmul.f32 %v456_v26, %v46_v40  ;;  %v91_v51 = vmul.f32 %v458_v27, %v47_v41  ;;  %v92_v52 = vmul.f32 %v456_v26, %v48_v44 }
  0x1f   :  { %348 = vst [vmem:[%s611_s3 + $0x30] sm:$0xff] %v384_v47  ;;  %v228_v53 = vsel %vm164_vm14, %v132_v21, %v196_v48  ;;  %v93_v54 = vmul.f32 %v458_v27, %v49_v45  ;;  %v50_v55 = vunpack.c.l.bf16 %v24_v46  ;;  %v51_v56 = vunpack.c.h.bf16 %v24_v46 }
  0x20   :  { %v229_v57 = vsel %vm165_vm15, %v133_v33, %v197_v49  ;;  %v134_v58 = vadd.f32 %v460_v28, %v90_v50  ;;  %v135_v59 = vadd.f32 %v462_v29, %v91_v51  ;;  %v136_v60 = vadd.f32 %v460_v28, %v92_v52 }
  0x21   :  { %v385_v61 = vpack.c.bf16 %v229_v57, %v228_v53  ;;  %v137_v62 = vadd.f32 %v462_v29, %v93_v54  ;;  %v94_v63 = vmul.f32 %v456_v26, %v50_v55  ;;  %v95_v0 = vmul.f32 %v458_v27, %v51_v56  ;;  %v29_v53 = vld [vmem:[%s608_s0 + $0x78] sm:$0xff] }
  0x22   :  { %vm166_vm0 = vcmp.ge.f32.partialorder %v134_v58, 0.0  ;;  %vm167_vm1 = vcmp.ge.f32.partialorder %v135_v59, 0.0  ;;  %v198_v2 = vmul.f32 0.1, %v134_v58  ;;  %v199_v3 = vmul.f32 0.1, %v135_v59 }
  0x23   :  { %349 = vst [vmem:[%s611_s3 + $0x38] sm:$0xff] %v385_v61  ;;  %vm168_vm2 = vcmp.ge.f32.partialorder %v136_v60, 0.0  ;;  %vm169_vm3 = vcmp.ge.f32.partialorder %v137_v62, 0.0  ;;  %v200_v4 = vmul.f32 0.1, %v136_v60  ;;  %v138_v8 = vadd.f32 %v460_v28, %v94_v63 }
  0x24   :  { %v201_v5 = vmul.f32 0.1, %v137_v62  ;;  %v230_v6 = vsel %vm166_vm0, %v134_v58, %v198_v2  ;;  %v231_v7 = vsel %vm167_vm1, %v135_v59, %v199_v3  ;;  %v139_v9 = vadd.f32 %v462_v29, %v95_v0 }
  0x25   :  { %v386_v11 = vpack.c.bf16 %v231_v7, %v230_v6  ;;  %v232_v12 = vsel %vm168_vm2, %v136_v60, %v200_v4  ;;  %v52_v14 = vunpack.c.l.bf16 %v25_v1  ;;  %vm170_vm4 = vcmp.ge.f32.partialorder %v138_v8, 0.0 }
  0x26   :  { %v233_v13 = vsel %vm169_vm3, %v137_v62, %v201_v5  ;;  %vm171_vm5 = vcmp.ge.f32.partialorder %v139_v9, 0.0  ;;  %v202_v17 = vmul.f32 0.1, %v138_v8  ;;  %v203_v18 = vmul.f32 0.1, %v139_v9 }
  0x27   :  { %v387_v16 = vpack.c.bf16 %v233_v13, %v232_v12  ;;  %350 = vst [vmem:[%s611_s3 + $0x40] sm:$0xff] %v386_v11  ;;  %v53_v19 = vunpack.c.h.bf16 %v25_v1  ;;  %v96_v20 = vmul.f32 %v456_v26, %v52_v14  ;;  %v54_v22 = vunpack.c.l.bf16 %v26_v10 }
  0x28   :  { %v234_v23 = vsel %vm170_vm4, %v138_v8, %v202_v17  ;;  %v55_v24 = vunpack.c.h.bf16 %v26_v10  ;;  %v56_v25 = vunpack.c.l.bf16 %v27_v15  ;;  %v57_v30 = vunpack.c.h.bf16 %v27_v15 }
  0x29   :  { %351 = vst [vmem:[%s611_s3 + $0x48] sm:$0xff] %v387_v16  ;;  %v235_v31 = vsel %vm171_vm5, %v139_v9, %v203_v18  ;;  %v97_v34 = vmul.f32 %v458_v27, %v53_v19  ;;  %v140_v35 = vadd.f32 %v460_v28, %v96_v20  ;;  %v98_v36 = vmul.f32 %v456_v26, %v54_v22 }
  0x2a   :  { %v388_v38 = vpack.c.bf16 %v235_v31, %v234_v23  ;;  %v99_v39 = vmul.f32 %v458_v27, %v55_v24  ;;  %v100_v32 = vmul.f32 %v456_v26, %v56_v25  ;;  %v101_v21 = vmul.f32 %v458_v27, %v57_v30 }
  0x2b   :  { %v141_v33 = vadd.f32 %v462_v29, %v97_v34  ;;  %vm172_vm6 = vcmp.ge.f32.partialorder %v140_v35, 0.0  ;;  %v204_v40 = vmul.f32 0.1, %v140_v35  ;;  %v142_v41 = vadd.f32 %v460_v28, %v98_v36 }
  0x2c   :  { %352 = vst [vmem:[%s611_s3 + $0x50] sm:$0xff] %v388_v38  ;;  %v143_v42 = vadd.f32 %v462_v29, %v99_v39  ;;  %v144_v43 = vadd.f32 %v460_v28, %v100_v32  ;;  %v145_v44 = vadd.f32 %v462_v29, %v101_v21  ;;  %v58_v45 = vunpack.c.l.bf16 %v28_v37 }
  0x2d   :  { %vm173_vm7 = vcmp.ge.f32.partialorder %v141_v33, 0.0  ;;  %v205_v46 = vmul.f32 0.1, %v141_v33  ;;  %v236_v47 = vsel %vm172_vm6, %v140_v35, %v204_v40  ;;  %vm174_vm8 = vcmp.ge.f32.partialorder %v142_v41, 0.0 }
  0x2e   :  { %vm175_vm9 = vcmp.ge.f32.partialorder %v143_v42, 0.0  ;;  %v206_v48 = vmul.f32 0.1, %v142_v41  ;;  %v207_v49 = vmul.f32 0.1, %v143_v42  ;;  %vm176_vm10 = vcmp.ge.f32.partialorder %v144_v43, 0.0 }
  0x2f   :  { %v237_v50 = vsel %vm173_vm7, %v141_v33, %v205_v46  ;;  %vm177_vm11 = vcmp.ge.f32.partialorder %v145_v44, 0.0  ;;  %v208_v51 = vmul.f32 0.1, %v144_v43  ;;  %v209_v52 = vmul.f32 0.1, %v145_v44 }
  0x30   :  { %v389_v54 = vpack.c.bf16 %v237_v50, %v236_v47  ;;  %v238_v55 = vsel %vm174_vm8, %v142_v41, %v206_v48  ;;  %v239_v56 = vsel %vm175_vm9, %v143_v42, %v207_v49  ;;  %v59_v57 = vunpack.c.h.bf16 %v28_v37 }
  0x31   :  { %v390_v58 = vpack.c.bf16 %v239_v56, %v238_v55  ;;  %v240_v59 = vsel %vm176_vm10, %v144_v43, %v208_v51  ;;  %v241_v60 = vsel %vm177_vm11, %v145_v44, %v209_v52  ;;  %v102_v61 = vmul.f32 %v456_v26, %v58_v45 }
  0x32   :  { %353 = vst [vmem:[%s611_s3 + $0x58] sm:$0xff] %v389_v54  ;;  %v391_v62 = vpack.c.bf16 %v241_v60, %v240_v59  ;;  %v103_v63 = vmul.f32 %v458_v27, %v59_v57  ;;  %v60_v0 = vunpack.c.l.bf16 %v29_v53  ;;  %v61_v1 = vunpack.c.h.bf16 %v29_v53 }
  0x33   :  { %354 = vst [vmem:[%s611_s3 + $0x60] sm:$0xff] %v390_v58  ;;  %v146_v2 = vadd.f32 %v460_v28, %v102_v61 }
  0x34   :  { %355 = vst [vmem:[%s611_s3 + $0x68] sm:$0xff] %v391_v62  ;;  %v147_v3 = vadd.f32 %v462_v29, %v103_v63  ;;  %v104_v4 = vmul.f32 %v456_v26, %v60_v0  ;;  %v105_v5 = vmul.f32 %v458_v27, %v61_v1 }
  0x35   :  { %vm178_vm12 = vcmp.ge.f32.partialorder %v146_v2, 0.0  ;;  %v210_v6 = vmul.f32 0.1, %v146_v2 }
  0x36   :  { %vm179_vm13 = vcmp.ge.f32.partialorder %v147_v3, 0.0  ;;  %v211_v7 = vmul.f32 0.1, %v147_v3  ;;  %v148_v8 = vadd.f32 %v460_v28, %v104_v4  ;;  %v149_v9 = vadd.f32 %v462_v29, %v105_v5 }
  0x37   :  { %v242_v10 = vsel %vm178_vm12, %v146_v2, %v210_v6 }
  0x38   :  { %v243_v11 = vsel %vm179_vm13, %v147_v3, %v211_v7  ;;  %vm180_vm14 = vcmp.ge.f32.partialorder %v148_v8, 0.0  ;;  %vm181_vm15 = vcmp.ge.f32.partialorder %v149_v9, 0.0  ;;  %v212_v12 = vmul.f32 0.1, %v148_v8 }
  0x39   :  { %v392_v13 = vpack.c.bf16 %v243_v11, %v242_v10  ;;  %v213_v14 = vmul.f32 0.1, %v149_v9 }
  0x3a   :  { %v244_v15 = vsel %vm180_vm14, %v148_v8, %v212_v12 }
  0x3b   :  { %356 = vst [vmem:[%s611_s3 + $0x70] sm:$0xff] %v392_v13  ;;  %v245_v26 = vsel %vm181_vm15, %v149_v9, %v213_v14 }
  0x3c   :  { %v393_v27 = vpack.c.bf16 %v245_v26, %v244_v15 }
  0x3e   :  { %357 = vst [vmem:[%s611_s3 + $0x78] sm:$0xff] %v393_v27 }

// kernel: forward.15
= control target key start
LH: loop header
LB: loop body
LE: loop exit
PB: predicated region body
PF: predicated region fallthrough
CT: control target
= control target key end

     0   :  { %s3693_s0 = inlined_call_operand.vmem [shape: bf16[128,2304], index: 0, kind: input, shape index: {}]   ;;  %s3694_s1 = inlined_call_operand.vmem [shape: bf16[2304,256], index: 1, kind: input, shape index: {}]   ;;  %s3695_s2 = inlined_call_operand.vmem [shape: bf16[128,256], index: 2, kind: output, shape index: {0}]   ;;  %s3696_s3 = inlined_call_operand.vmem [shape: f32[8,256], index: 3, kind: output, shape index: {1}]   ;;  %s3697_s4 = inlined_call_operand.vmem [shape: f32[8,256], index: 4, kind: output, shape index: {2}]  }
   0x1   :  { %3702 = sst [smem:[#allocation10_spill]] %s3693_s0 }
   0x2   :  { %3703 = sst [smem:[#allocation11_spill]] %s3694_s1 }
   0x3   :  { %s3049_s15 = smov 0   ;;  %s3051_s16 = smov 0  }
   0x4   :  { %s3053_s17 = smov 0   ;;  %s3055_s18 = smov 0  }
   0x5   :  { %s3057_s19 = smov 0   ;;  %s3059_s20 = smov 0  }
   0x6   :  { %s3061_s21 = smov 0   ;;  %s3063_s22 = smov 0  }
   0x7   :  { %s3065_s23 = smov 0   ;;  %s3067_s24 = smov 0  }
   0x8   :  { %s3069_s25 = smov 0  }
   0x9 LB: > { %3704 = sst [smem:[#allocation6_spill]] %s3013_s23  ;;  %s2320_s26 = sadd.s32 4294967295, %s3021_s25   ;;  %s3021_s25 = sphi %s3069_s25, %s15_s25   ;;  %s3017_s24 = sphi %s3067_s24, %s3716_s24   ;;  %s3013_s23 = sphi %s3065_s23, %s3715_s23   ;;  %s3009_s22 = sphi %s3063_s22, %s3714_s22   ;;  %s3005_s21 = sphi %s3061_s21, %s3713_s21   ;;  %s3001_s20 = sphi %s3059_s20, %s3722_s20   ;;  %s2997_s19 = sphi %s3057_s19, %s3721_s19   ;;  %s2993_s18 = sphi %s3055_s18, %s3720_s18   ;;  %s2989_s17 = sphi %s3053_s17, %s3719_s17   ;;  %s2985_s16 = sphi %s3051_s16, %s3718_s16   ;;  %s2981_s15 = sphi %s3049_s15, %s3717_s15  }
   0xa   : > { %3705 = sst [smem:[#allocation7_spill]] %s3017_s24  ;;  %s27_s27 = sadd.s32 1, %s3013_s23 }
   0xb   : > { %p28_p0 = scmp.ge.s32.totalorder %s27_s27, 3  ;;  %s30_s28 = sadd.s32 1, %s3017_s24 }
   0xc   : > { %s43_s29 = sadd.s32 1, %s3001_s20  ;;  %p50_p1 = scmp.ne.s32.totalorder %s3001_s20, %s2997_s19 }
   0xd   : > { %s3724_s27 = smov (%p28_p0, %s27_s27), 0  ;;  %s3726_s28 = smov (!%p28_p0, %s30_s28), %s3017_s24 }
   0xe   : > { %3706 = sst [smem:[#allocation8_spill]] %s3724_s27  ;;  %s39_s30 = ssub.s32 %s3013_s23, %s3724_s27 }
   0xf   : > { %p51_p2 = scmp.eq.s32.totalorder %s3021_s25, 0  ;;  %p32_p3 = scmp.ge.s32.totalorder %s3726_s28, 2 }
  0x10   : > { %p41_p4 = scmp.eq.s32.totalorder %s39_s30, 0  ;;  %s71_s6 = sadd.s32 1, %s2993_s18 }
  0x11   : > { %p3116_p5 = por %p51_p2, %p50_p1  ;;  %s3728_s28 = smov (%p32_p3, %s3726_s28), 0 }
  0x12   : > { %3708 = sst [smem:[#allocation9_spill]] %s3728_s28  ;;  %s67_s8 = ssub.s32 %s3017_s24, %s3728_s28 }
  0x13   : > { %s3124_s7 = scalar_select %p41_p4, %s3001_s20, %s43_s29  }
  0x14   : > { %p78_p6 = scmp.ne.s32.totalorder %s2993_s18, %s2989_s17  ;;  %s68_s9 = sor.u32 %s67_s8, %s39_s30 }
  0x15   : > { %p97_p7 = scmp.eq.s32.totalorder %s67_s8, 0  ;;  %p69_p8 = scmp.eq.s32.totalorder %s68_s9, 0 }
  0x16   : > { %p3130_p9 = por %p78_p6, %p51_p2  ;;  %s99_s11 = sadd.s32 1, %s2985_s16 }
  0x17   : > { %p109_p10 = scmp.ne.s32.totalorder %s2985_s16, %s2981_s15  ;;  %p110_p11 = scmp.eq.s32.totalorder %s2320_s26, 5 }
  0x18   : > { %s3138_s12 = scalar_select %p69_p8, %s2993_s18, %s71_s6  }
  0x19   : > { %s3141_s13 = scalar_select %p97_p7, %s2985_s16, %s99_s11  }
  0x1a   : > { %p3143_p12 = por %p110_p11, %p109_p10  ;;  %p2323_p13 = scmp.ge.s32.totalorder %s3021_s25, 6 }
  0x1c   : > { %188 = sbr.rel (%p2323_p13) target bundleno = 139 (0x8b), region = 16 }
  0x21   : > { %191 = sbr.rel (!%p3116_p5) target bundleno = 66 (0x42), region = 20  ;;  %s193_s29 = sand.u32 (%p3116_p5), 1, %s3001_s20  }
  0x22   : > { %s2449_s30 = smul.u32 (%p3116_p5), 24, %s3013_s23  ;;  %s3711_s0 = sld [smem:[#allocation10_spill]] (%p3116_p5) }
  0x23   : > { %s2722_s8 = smul.u32 (%p3116_p5), 384, %s193_s29 }
  0x25   : > { %s3160_s26 = scalar_lea.vmem (%p3116_p5), [#allocation3], %s2722_s8 }
  0x28   : > { %s3155_s11 = scalar_lea.vmem %s3711_s0, %s2449_s30 }
  0x29   : > { %v214_v0 = vld [vmem:[%s3155_s11] sm:$0xff]  ;;  %v216_v1 = vld [vmem:[%s3155_s11 + $0x8] sm:$0xff]  ;;  %v218_v2 = vld [vmem:[%s3155_s11 + $0x10] sm:$0xff] }
  0x2a   : > { %215 = vst [vmem:[%s3160_s26] sm:$0xff] %v214_v0  ;;  %217 = vst [vmem:[%s3160_s26 + $0x8] sm:$0xff] %v216_v1  ;;  %v220_v3 = vld [vmem:[%s3155_s11 + $0x48] sm:$0xff]  ;;  %v222_v4 = vld [vmem:[%s3155_s11 + $0x50] sm:$0xff] }
  0x2b   : > { %219 = vst [vmem:[%s3160_s26 + $0x10] sm:$0xff] %v218_v2  ;;  %v224_v5 = vld [vmem:[%s3155_s11 + $0x58] sm:$0xff]  ;;  %221 = vst [vmem:[%s3160_s26 + $0x18] sm:$0xff] %v220_v3  ;;  %v226_v6 = vld [vmem:[%s3155_s11 + $0x90] sm:$0xff] }
  0x2c   : > { %223 = vst [vmem:[%s3160_s26 + $0x20] sm:$0xff] %v222_v4  ;;  %225 = vst [vmem:[%s3160_s26 + $0x28] sm:$0xff] %v224_v5  ;;  %v228_v7 = vld [vmem:[%s3155_s11 + $0x98] sm:$0xff]  ;;  %v230_v8 = vld [vmem:[%s3155_s11 + $0xa0] sm:$0xff] }
  0x2d   : > { %227 = vst [vmem:[%s3160_s26 + $0x30] sm:$0xff] %v226_v6  ;;  %229 = vst [vmem:[%s3160_s26 + $0x38] sm:$0xff] %v228_v7  ;;  %v232_v9 = vld [vmem:[%s3155_s11 + $0xd8] sm:$0xff]  ;;  %v234_v10 = vld [vmem:[%s3155_s11 + $0xe0] sm:$0xff] }
  0x2e   : > { %231 = vst [vmem:[%s3160_s26 + $0x40] sm:$0xff] %v230_v8  ;;  %v236_v11 = vld [vmem:[%s3155_s11 + $0xe8] sm:$0xff]  ;;  %233 = vst [vmem:[%s3160_s26 + $0x48] sm:$0xff] %v232_v9  ;;  %v238_v12 = vld [vmem:[%s3155_s11 + $0x120] sm:$0xff] }
  0x2f   : > { %235 = vst [vmem:[%s3160_s26 + $0x50] sm:$0xff] %v234_v10  ;;  %237 = vst [vmem:[%s3160_s26 + $0x58] sm:$0xff] %v236_v11  ;;  %v240_v13 = vld [vmem:[%s3155_s11 + $0x128] sm:$0xff]  ;;  %v242_v14 = vld [vmem:[%s3155_s11 + $0x130] sm:$0xff] }
  0x30   : > { %239 = vst [vmem:[%s3160_s26 + $0x60] sm:$0xff] %v238_v12  ;;  %241 = vst [vmem:[%s3160_s26 + $0x68] sm:$0xff] %v240_v13  ;;  %v244_v15 = vld [vmem:[%s3155_s11 + $0x168] sm:$0xff]  ;;  %v246_v16 = vld [vmem:[%s3155_s11 + $0x170] sm:$0xff] }
  0x31   : > { %243 = vst [vmem:[%s3160_s26 + $0x70] sm:$0xff] %v242_v14  ;;  %v248_v17 = vld [vmem:[%s3155_s11 + $0x178] sm:$0xff]  ;;  %245 = vst [vmem:[%s3160_s26 + $0x78] sm:$0xff] %v244_v15  ;;  %v250_v18 = vld [vmem:[%s3155_s11 + $0x1b0] sm:$0xff] }
  0x32   : > { %247 = vst [vmem:[%s3160_s26 + $0x80] sm:$0xff] %v246_v16  ;;  %249 = vst [vmem:[%s3160_s26 + $0x88] sm:$0xff] %v248_v17  ;;  %v252_v19 = vld [vmem:[%s3155_s11 + $0x1b8] sm:$0xff]  ;;  %v254_v20 = vld [vmem:[%s3155_s11 + $0x1c0] sm:$0xff] }
  0x33   : > { %251 = vst [vmem:[%s3160_s26 + $0x90] sm:$0xff] %v250_v18  ;;  %253 = vst [vmem:[%s3160_s26 + $0x98] sm:$0xff] %v252_v19  ;;  %v256_v21 = vld [vmem:[%s3155_s11 + $0x1f8] sm:$0xff]  ;;  %v258_v22 = vld [vmem:[%s3155_s11 + $0x200] sm:$0xff] }
  0x34   : > { %255 = vst [vmem:[%s3160_s26 + $0xa0] sm:$0xff] %v254_v20  ;;  %v260_v23 = vld [vmem:[%s3155_s11 + $0x208] sm:$0xff]  ;;  %257 = vst [vmem:[%s3160_s26 + $0xa8] sm:$0xff] %v256_v21  ;;  %v262_v24 = vld [vmem:[%s3155_s11 + $0x240] sm:$0xff] }
  0x35   : > { %259 = vst [vmem:[%s3160_s26 + $0xb0] sm:$0xff] %v258_v22  ;;  %261 = vst [vmem:[%s3160_s26 + $0xb8] sm:$0xff] %v260_v23  ;;  %v264_v25 = vld [vmem:[%s3155_s11 + $0x248] sm:$0xff]  ;;  %v266_v26 = vld [vmem:[%s3155_s11 + $0x250] sm:$0xff] }
  0x36   : > { %263 = vst [vmem:[%s3160_s26 + $0xc0] sm:$0xff] %v262_v24  ;;  %265 = vst [vmem:[%s3160_s26 + $0xc8] sm:$0xff] %v264_v25  ;;  %v268_v27 = vld [vmem:[%s3155_s11 + $0x288] sm:$0xff]  ;;  %v270_v28 = vld [vmem:[%s3155_s11 + $0x290] sm:$0xff] }
  0x37   : > { %267 = vst [vmem:[%s3160_s26 + $0xd0] sm:$0xff] %v266_v26  ;;  %v272_v29 = vld [vmem:[%s3155_s11 + $0x298] sm:$0xff]  ;;  %269 = vst [vmem:[%s3160_s26 + $0xd8] sm:$0xff] %v268_v27  ;;  %v274_v30 = vld [vmem:[%s3155_s11 + $0x2d0] sm:$0xff] }
  0x38   : > { %271 = vst [vmem:[%s3160_s26 + $0xe0] sm:$0xff] %v270_v28  ;;  %273 = vst [vmem:[%s3160_s26 + $0xe8] sm:$0xff] %v272_v29  ;;  %v276_v31 = vld [vmem:[%s3155_s11 + $0x2d8] sm:$0xff]  ;;  %v278_v32 = vld [vmem:[%s3155_s11 + $0x2e0] sm:$0xff] }
  0x39   : > { %275 = vst [vmem:[%s3160_s26 + $0xf0] sm:$0xff] %v274_v30  ;;  %277 = vst [vmem:[%s3160_s26 + $0xf8] sm:$0xff] %v276_v31  ;;  %v280_v33 = vld [vmem:[%s3155_s11 + $0x318] sm:$0xff]  ;;  %v282_v34 = vld [vmem:[%s3155_s11 + $0x320] sm:$0xff] }
  0x3a   : > { %279 = vst [vmem:[%s3160_s26 + $0x100] sm:$0xff] %v278_v32  ;;  %v284_v35 = vld [vmem:[%s3155_s11 + $0x328] sm:$0xff]  ;;  %281 = vst [vmem:[%s3160_s26 + $0x108] sm:$0xff] %v280_v33  ;;  %v286_v36 = vld [vmem:[%s3155_s11 + $0x360] sm:$0xff] }
  0x3b   : > { %283 = vst [vmem:[%s3160_s26 + $0x110] sm:$0xff] %v282_v34  ;;  %285 = vst [vmem:[%s3160_s26 + $0x118] sm:$0xff] %v284_v35  ;;  %v288_v37 = vld [vmem:[%s3155_s11 + $0x368] sm:$0xff]  ;;  %v290_v38 = vld [vmem:[%s3155_s11 + $0x370] sm:$0xff] }
  0x3c   : > { %287 = vst [vmem:[%s3160_s26 + $0x120] sm:$0xff] %v286_v36  ;;  %289 = vst [vmem:[%s3160_s26 + $0x128] sm:$0xff] %v288_v37  ;;  %v292_v39 = vld [vmem:[%s3155_s11 + $0x3a8] sm:$0xff]  ;;  %v294_v40 = vld [vmem:[%s3155_s11 + $0x3b0] sm:$0xff] }
  0x3d   : > { %291 = vst [vmem:[%s3160_s26 + $0x130] sm:$0xff] %v290_v38  ;;  %v296_v41 = vld [vmem:[%s3155_s11 + $0x3b8] sm:$0xff]  ;;  %293 = vst [vmem:[%s3160_s26 + $0x138] sm:$0xff] %v292_v39  ;;  %v298_v42 = vld [vmem:[%s3155_s11 + $0x3f0] sm:$0xff] }
  0x3e   : > { %295 = vst [vmem:[%s3160_s26 + $0x140] sm:$0xff] %v294_v40  ;;  %297 = vst [vmem:[%s3160_s26 + $0x148] sm:$0xff] %v296_v41  ;;  %v300_v43 = vld [vmem:[%s3155_s11 + $0x3f8] sm:$0xff]  ;;  %v302_v44 = vld [vmem:[%s3155_s11 + $0x400] sm:$0xff] }
  0x3f   : > { %299 = vst [vmem:[%s3160_s26 + $0x150] sm:$0xff] %v298_v42  ;;  %301 = vst [vmem:[%s3160_s26 + $0x158] sm:$0xff] %v300_v43  ;;  %v304_v45 = vld [vmem:[%s3155_s11 + $0x438] sm:$0xff]  ;;  %v306_v46 = vld [vmem:[%s3155_s11 + $0x440] sm:$0xff] }
  0x40   : > { %303 = vst [vmem:[%s3160_s26 + $0x160] sm:$0xff] %v302_v44  ;;  %v308_v47 = vld [vmem:[%s3155_s11 + $0x448] sm:$0xff]  ;;  %305 = vst [vmem:[%s3160_s26 + $0x168] sm:$0xff] %v304_v45 }
  0x41   : > { %307 = vst [vmem:[%s3160_s26 + $0x170] sm:$0xff] %v306_v46  ;;  %309 = vst [vmem:[%s3160_s26 + $0x178] sm:$0xff] %v308_v47 }
  0x42 PF: > { %315 = sbr.rel (!%p3130_p9) target bundleno = 139 (0x8b), region = 43  ;;  %s317_s5 = sand.u32 (%p3130_p9), 1, %s2993_s18  }
  0x43   : > { %s2450_s29 = smul.u32 (%p3130_p9), 192, %s3013_s23  ;;  %s3712_s1 = sld [smem:[#allocation11_spill]] (%p3130_p9) }
  0x44   : > { %s2723_s30 = smul.u32 (%p3130_p9), 384, %s317_s5 }
  0x45   : > { %s322_s8 = sadd.s32 (%p3130_p9), %s3017_s24, %s2450_s29 }
  0x46   : > { %s2326_s6 = sshll.u32 (%p3130_p9), %s322_s8, 2  ;;  %s3268_s10 = scalar_lea.vmem (%p3130_p9), [#allocation4], %s2723_s30 }
  0x49   : > { %s3263_s28 = scalar_lea.vmem %s3712_s1, %s2326_s6 }
  0x4a   : > { %v341_v48 = vld [vmem:[%s3263_s28] sm:$0xf]  ;;  %v343_v49 = vld [vmem:[%s3263_s28 + $0x8] sm:$0xf]  ;;  %v345_v50 = vld [vmem:[%s3263_s28 + $0x10] sm:$0xf] }
  0x4b   : > { %342 = vst [vmem:[%s3268_s10] sm:$0xf] %v341_v48  ;;  %344 = vst [vmem:[%s3268_s10 + $0x4] sm:$0xf] %v343_v49  ;;  %v347_v51 = vld [vmem:[%s3263_s28 + $0x18] sm:$0xf] }
  0x4c   : > { %346 = vst [vmem:[%s3268_s10 + $0x8] sm:$0xf] %v345_v50  ;;  %v349_v52 = vld [vmem:[%s3263_s28 + $0x20] sm:$0xf]  ;;  %v351_v53 = vld [vmem:[%s3263_s28 + $0x28] sm:$0xf] }
  0x4d   : > { %348 = vst [vmem:[%s3268_s10 + $0xc] sm:$0xf] %v347_v51  ;;  %350 = vst [vmem:[%s3268_s10 + $0x10] sm:$0xf] %v349_v52  ;;  %v353_v54 = vld [vmem:[%s3263_s28 + $0x30] sm:$0xf] }
  0x4e   : > { %352 = vst [vmem:[%s3268_s10 + $0x14] sm:$0xf] %v351_v53  ;;  %v355_v55 = vld [vmem:[%s3263_s28 + $0x38] sm:$0xf]  ;;  %v357_v56 = vld [vmem:[%s3263_s28 + $0x40] sm:$0xf] }
  0x4f   : > { %354 = vst [vmem:[%s3268_s10 + $0x18] sm:$0xf] %v353_v54  ;;  %356 = vst [vmem:[%s3268_s10 + $0x1c] sm:$0xf] %v355_v55  ;;  %v359_v57 = vld [vmem:[%s3263_s28 + $0x48] sm:$0xf] }
  0x50   : > { %358 = vst [vmem:[%s3268_s10 + $0x20] sm:$0xf] %v357_v56  ;;  %v361_v58 = vld [vmem:[%s3263_s28 + $0x50] sm:$0xf]  ;;  %v363_v59 = vld [vmem:[%s3263_s28 + $0x58] sm:$0xf] }
  0x51   : > { %360 = vst [vmem:[%s3268_s10 + $0x24] sm:$0xf] %v359_v57  ;;  %362 = vst [vmem:[%s3268_s10 + $0x28] sm:$0xf] %v361_v58  ;;  %v365_v60 = vld [vmem:[%s3263_s28 + $0x60] sm:$0xf] }
  0x52   : > { %364 = vst [vmem:[%s3268_s10 + $0x2c] sm:$0xf] %v363_v59  ;;  %v367_v61 = vld [vmem:[%s3263_s28 + $0x68] sm:$0xf]  ;;  %v369_v62 = vld [vmem:[%s3263_s28 + $0x70] sm:$0xf] }
  0x53   : > { %366 = vst [vmem:[%s3268_s10 + $0x30] sm:$0xf] %v365_v60  ;;  %368 = vst [vmem:[%s3268_s10 + $0x34] sm:$0xf] %v367_v61  ;;  %v371_v63 = vld [vmem:[%s3263_s28 + $0x78] sm:$0xf] }
  0x54   : > { %370 = vst [vmem:[%s3268_s10 + $0x38] sm:$0xf] %v369_v62  ;;  %v373_v0 = vld [vmem:[%s3263_s28 + $0x80] sm:$0xf]  ;;  %v375_v1 = vld [vmem:[%s3263_s28 + $0x88] sm:$0xf] }
  0x55   : > { %372 = vst [vmem:[%s3268_s10 + $0x3c] sm:$0xf] %v371_v63  ;;  %374 = vst [vmem:[%s3268_s10 + $0x40] sm:$0xf] %v373_v0  ;;  %v377_v2 = vld [vmem:[%s3263_s28 + $0x90] sm:$0xf] }
  0x56   : > { %376 = vst [vmem:[%s3268_s10 + $0x44] sm:$0xf] %v375_v1  ;;  %v379_v3 = vld [vmem:[%s3263_s28 + $0x98] sm:$0xf]  ;;  %v381_v4 = vld [vmem:[%s3263_s28 + $0xa0] sm:$0xf] }
  0x57   : > { %378 = vst [vmem:[%s3268_s10 + $0x48] sm:$0xf] %v377_v2  ;;  %380 = vst [vmem:[%s3268_s10 + $0x4c] sm:$0xf] %v379_v3  ;;  %v383_v5 = vld [vmem:[%s3263_s28 + $0xa8] sm:$0xf] }
  0x58   : > { %382 = vst [vmem:[%s3268_s10 + $0x50] sm:$0xf] %v381_v4  ;;  %v385_v6 = vld [vmem:[%s3263_s28 + $0xb0] sm:$0xf]  ;;  %v387_v7 = vld [vmem:[%s3263_s28 + $0xb8] sm:$0xf] }
  0x59   : > { %384 = vst [vmem:[%s3268_s10 + $0x54] sm:$0xf] %v383_v5  ;;  %386 = vst [vmem:[%s3268_s10 + $0x58] sm:$0xf] %v385_v6  ;;  %v389_v8 = vld [vmem:[%s3263_s28 + $0xc0] sm:$0xf] }
  0x5a   : > { %388 = vst [vmem:[%s3268_s10 + $0x5c] sm:$0xf] %v387_v7  ;;  %v391_v9 = vld [vmem:[%s3263_s28 + $0xc8] sm:$0xf]  ;;  %v393_v10 = vld [vmem:[%s3263_s28 + $0xd0] sm:$0xf] }
  0x5b   : > { %390 = vst [vmem:[%s3268_s10 + $0x60] sm:$0xf] %v389_v8  ;;  %392 = vst [vmem:[%s3268_s10 + $0x64] sm:$0xf] %v391_v9  ;;  %v395_v11 = vld [vmem:[%s3263_s28 + $0xd8] sm:$0xf] }
  0x5c   : > { %394 = vst [vmem:[%s3268_s10 + $0x68] sm:$0xf] %v393_v10  ;;  %v397_v12 = vld [vmem:[%s3263_s28 + $0xe0] sm:$0xf]  ;;  %v399_v13 = vld [vmem:[%s3263_s28 + $0xe8] sm:$0xf] }
  0x5d   : > { %396 = vst [vmem:[%s3268_s10 + $0x6c] sm:$0xf] %v395_v11  ;;  %398 = vst [vmem:[%s3268_s10 + $0x70] sm:$0xf] %v397_v12  ;;  %v401_v14 = vld [vmem:[%s3263_s28 + $0xf0] sm:$0xf] }
  0x5e   : > { %400 = vst [vmem:[%s3268_s10 + $0x74] sm:$0xf] %v399_v13  ;;  %v403_v15 = vld [vmem:[%s3263_s28 + $0xf8] sm:$0xf]  ;;  %v405_v16 = vld [vmem:[%s3263_s28 + $0x100] sm:$0xf] }
  0x5f   : > { %402 = vst [vmem:[%s3268_s10 + $0x78] sm:$0xf] %v401_v14  ;;  %404 = vst [vmem:[%s3268_s10 + $0x7c] sm:$0xf] %v403_v15  ;;  %v407_v17 = vld [vmem:[%s3263_s28 + $0x108] sm:$0xf] }
  0x60   : > { %406 = vst [vmem:[%s3268_s10 + $0x80] sm:$0xf] %v405_v16  ;;  %v409_v18 = vld [vmem:[%s3263_s28 + $0x110] sm:$0xf]  ;;  %v411_v19 = vld [vmem:[%s3263_s28 + $0x118] sm:$0xf] }
  0x61   : > { %408 = vst [vmem:[%s3268_s10 + $0x84] sm:$0xf] %v407_v17  ;;  %410 = vst [vmem:[%s3268_s10 + $0x88] sm:$0xf] %v409_v18  ;;  %v413_v20 = vld [vmem:[%s3263_s28 + $0x120] sm:$0xf] }
  0x62   : > { %412 = vst [vmem:[%s3268_s10 + $0x8c] sm:$0xf] %v411_v19  ;;  %v415_v21 = vld [vmem:[%s3263_s28 + $0x128] sm:$0xf]  ;;  %v417_v22 = vld [vmem:[%s3263_s28 + $0x130] sm:$0xf] }
  0x63   : > { %414 = vst [vmem:[%s3268_s10 + $0x90] sm:$0xf] %v413_v20  ;;  %416 = vst [vmem:[%s3268_s10 + $0x94] sm:$0xf] %v415_v21  ;;  %v419_v23 = vld [vmem:[%s3263_s28 + $0x138] sm:$0xf] }
  0x64   : > { %418 = vst [vmem:[%s3268_s10 + $0x98] sm:$0xf] %v417_v22  ;;  %v421_v24 = vld [vmem:[%s3263_s28 + $0x140] sm:$0xf]  ;;  %v423_v25 = vld [vmem:[%s3263_s28 + $0x148] sm:$0xf] }
  0x65   : > { %420 = vst [vmem:[%s3268_s10 + $0x9c] sm:$0xf] %v419_v23  ;;  %422 = vst [vmem:[%s3268_s10 + $0xa0] sm:$0xf] %v421_v24  ;;  %v425_v26 = vld [vmem:[%s3263_s28 + $0x150] sm:$0xf] }
  0x66   : > { %424 = vst [vmem:[%s3268_s10 + $0xa4] sm:$0xf] %v423_v25  ;;  %v427_v27 = vld [vmem:[%s3263_s28 + $0x158] sm:$0xf]  ;;  %v429_v28 = vld [vmem:[%s3263_s28 + $0x160] sm:$0xf] }
  0x67   : > { %426 = vst [vmem:[%s3268_s10 + $0xa8] sm:$0xf] %v425_v26  ;;  %428 = vst [vmem:[%s3268_s10 + $0xac] sm:$0xf] %v427_v27  ;;  %v431_v29 = vld [vmem:[%s3263_s28 + $0x168] sm:$0xf] }
  0x68   : > { %430 = vst [vmem:[%s3268_s10 + $0xb0] sm:$0xf] %v429_v28  ;;  %v433_v30 = vld [vmem:[%s3263_s28 + $0x170] sm:$0xf]  ;;  %v435_v31 = vld [vmem:[%s3263_s28 + $0x178] sm:$0xf] }
  0x69   : > { %432 = vst [vmem:[%s3268_s10 + $0xb4] sm:$0xf] %v431_v29  ;;  %434 = vst [vmem:[%s3268_s10 + $0xb8] sm:$0xf] %v433_v30  ;;  %v437_v32 = vld [vmem:[%s3263_s28 + $0x180] sm:$0xf] }
  0x6a   : > { %436 = vst [vmem:[%s3268_s10 + $0xbc] sm:$0xf] %v435_v31  ;;  %v439_v33 = vld [vmem:[%s3263_s28 + $0x188] sm:$0xf]  ;;  %v441_v34 = vld [vmem:[%s3263_s28 + $0x190] sm:$0xf] }
  0x6b   : > { %438 = vst [vmem:[%s3268_s10 + $0xc0] sm:$0xf] %v437_v32  ;;  %440 = vst [vmem:[%s3268_s10 + $0xc4] sm:$0xf] %v439_v33  ;;  %v443_v35 = vld [vmem:[%s3263_s28 + $0x198] sm:$0xf] }
  0x6c   : > { %442 = vst [vmem:[%s3268_s10 + $0xc8] sm:$0xf] %v441_v34  ;;  %v445_v36 = vld [vmem:[%s3263_s28 + $0x1a0] sm:$0xf]  ;;  %v447_v37 = vld [vmem:[%s3263_s28 + $0x1a8] sm:$0xf] }
  0x6d   : > { %444 = vst [vmem:[%s3268_s10 + $0xcc] sm:$0xf] %v443_v35  ;;  %446 = vst [vmem:[%s3268_s10 + $0xd0] sm:$0xf] %v445_v36  ;;  %v449_v38 = vld [vmem:[%s3263_s28 + $0x1b0] sm:$0xf] }
  0x6e   : > { %448 = vst [vmem:[%s3268_s10 + $0xd4] sm:$0xf] %v447_v37  ;;  %v451_v39 = vld [vmem:[%s3263_s28 + $0x1b8] sm:$0xf]  ;;  %v453_v40 = vld [vmem:[%s3263_s28 + $0x1c0] sm:$0xf] }
  0x6f   : > { %450 = vst [vmem:[%s3268_s10 + $0xd8] sm:$0xf] %v449_v38  ;;  %452 = vst [vmem:[%s3268_s10 + $0xdc] sm:$0xf] %v451_v39  ;;  %v455_v41 = vld [vmem:[%s3263_s28 + $0x1c8] sm:$0xf] }
  0x70   : > { %454 = vst [vmem:[%s3268_s10 + $0xe0] sm:$0xf] %v453_v40  ;;  %v457_v42 = vld [vmem:[%s3263_s28 + $0x1d0] sm:$0xf]  ;;  %v459_v43 = vld [vmem:[%s3263_s28 + $0x1d8] sm:$0xf] }
  0x71   : > { %456 = vst [vmem:[%s3268_s10 + $0xe4] sm:$0xf] %v455_v41  ;;  %458 = vst [vmem:[%s3268_s10 + $0xe8] sm:$0xf] %v457_v42  ;;  %v461_v44 = vld [vmem:[%s3263_s28 + $0x1e0] sm:$0xf] }
  0x72   : > { %460 = vst [vmem:[%s3268_s10 + $0xec] sm:$0xf] %v459_v43  ;;  %v463_v45 = vld [vmem:[%s3263_s28 + $0x1e8] sm:$0xf]  ;;  %v465_v46 = vld [vmem:[%s3263_s28 + $0x1f0] sm:$0xf] }
  0x73   : > { %462 = vst [vmem:[%s3268_s10 + $0xf0] sm:$0xf] %v461_v44  ;;  %464 = vst [vmem:[%s3268_s10 + $0xf4] sm:$0xf] %v463_v45  ;;  %v467_v47 = vld [vmem:[%s3263_s28 + $0x1f8] sm:$0xf] }
  0x74   : > { %466 = vst [vmem:[%s3268_s10 + $0xf8] sm:$0xf] %v465_v46  ;;  %v469_v48 = vld [vmem:[%s3263_s28 + $0x200] sm:$0xf]  ;;  %v471_v49 = vld [vmem:[%s3263_s28 + $0x208] sm:$0xf] }
  0x75   : > { %468 = vst [vmem:[%s3268_s10 + $0xfc] sm:$0xf] %v467_v47  ;;  %470 = vst [vmem:[%s3268_s10 + $0x100] sm:$0xf] %v469_v48  ;;  %v473_v50 = vld [vmem:[%s3263_s28 + $0x210] sm:$0xf] }
  0x76   : > { %472 = vst [vmem:[%s3268_s10 + $0x104] sm:$0xf] %v471_v49  ;;  %v475_v51 = vld [vmem:[%s3263_s28 + $0x218] sm:$0xf]  ;;  %v477_v52 = vld [vmem:[%s3263_s28 + $0x220] sm:$0xf] }
  0x77   : > { %474 = vst [vmem:[%s3268_s10 + $0x108] sm:$0xf] %v473_v50  ;;  %476 = vst [vmem:[%s3268_s10 + $0x10c] sm:$0xf] %v475_v51  ;;  %v479_v53 = vld [vmem:[%s3263_s28 + $0x228] sm:$0xf] }
  0x78   : > { %478 = vst [vmem:[%s3268_s10 + $0x110] sm:$0xf] %v477_v52  ;;  %v481_v54 = vld [vmem:[%s3263_s28 + $0x230] sm:$0xf]  ;;  %v483_v55 = vld [vmem:[%s3263_s28 + $0x238] sm:$0xf] }
  0x79   : > { %480 = vst [vmem:[%s3268_s10 + $0x114] sm:$0xf] %v479_v53  ;;  %482 = vst [vmem:[%s3268_s10 + $0x118] sm:$0xf] %v481_v54  ;;  %v485_v56 = vld [vmem:[%s3263_s28 + $0x240] sm:$0xf] }
  0x7a   : > { %484 = vst [vmem:[%s3268_s10 + $0x11c] sm:$0xf] %v483_v55  ;;  %v487_v57 = vld [vmem:[%s3263_s28 + $0x248] sm:$0xf]  ;;  %v489_v58 = vld [vmem:[%s3263_s28 + $0x250] sm:$0xf] }
  0x7b   : > { %486 = vst [vmem:[%s3268_s10 + $0x120] sm:$0xf] %v485_v56  ;;  %488 = vst [vmem:[%s3268_s10 + $0x124] sm:$0xf] %v487_v57  ;;  %v491_v59 = vld [vmem:[%s3263_s28 + $0x258] sm:$0xf] }
  0x7c   : > { %490 = vst [vmem:[%s3268_s10 + $0x128] sm:$0xf] %v489_v58  ;;  %v493_v60 = vld [vmem:[%s3263_s28 + $0x260] sm:$0xf]  ;;  %v495_v61 = vld [vmem:[%s3263_s28 + $0x268] sm:$0xf] }
  0x7d   : > { %492 = vst [vmem:[%s3268_s10 + $0x12c] sm:$0xf] %v491_v59  ;;  %494 = vst [vmem:[%s3268_s10 + $0x130] sm:$0xf] %v493_v60  ;;  %v497_v62 = vld [vmem:[%s3263_s28 + $0x270] sm:$0xf] }
  0x7e   : > { %496 = vst [vmem:[%s3268_s10 + $0x134] sm:$0xf] %v495_v61  ;;  %v499_v63 = vld [vmem:[%s3263_s28 + $0x278] sm:$0xf]  ;;  %v501_v0 = vld [vmem:[%s3263_s28 + $0x280] sm:$0xf] }
  0x7f   : > { %498 = vst [vmem:[%s3268_s10 + $0x138] sm:$0xf] %v497_v62  ;;  %500 = vst [vmem:[%s3268_s10 + $0x13c] sm:$0xf] %v499_v63  ;;  %v503_v1 = vld [vmem:[%s3263_s28 + $0x288] sm:$0xf] }
  0x80   : > { %502 = vst [vmem:[%s3268_s10 + $0x140] sm:$0xf] %v501_v0  ;;  %v505_v2 = vld [vmem:[%s3263_s28 + $0x290] sm:$0xf]  ;;  %v507_v3 = vld [vmem:[%s3263_s28 + $0x298] sm:$0xf] }
  0x81   : > { %504 = vst [vmem:[%s3268_s10 + $0x144] sm:$0xf] %v503_v1  ;;  %506 = vst [vmem:[%s3268_s10 + $0x148] sm:$0xf] %v505_v2  ;;  %v509_v4 = vld [vmem:[%s3263_s28 + $0x2a0] sm:$0xf] }
  0x82   : > { %508 = vst [vmem:[%s3268_s10 + $0x14c] sm:$0xf] %v507_v3  ;;  %v511_v5 = vld [vmem:[%s3263_s28 + $0x2a8] sm:$0xf]  ;;  %v513_v6 = vld [vmem:[%s3263_s28 + $0x2b0] sm:$0xf] }
  0x83   : > { %510 = vst [vmem:[%s3268_s10 + $0x150] sm:$0xf] %v509_v4  ;;  %512 = vst [vmem:[%s3268_s10 + $0x154] sm:$0xf] %v511_v5  ;;  %v515_v7 = vld [vmem:[%s3263_s28 + $0x2b8] sm:$0xf] }
  0x84   : > { %514 = vst [vmem:[%s3268_s10 + $0x158] sm:$0xf] %v513_v6  ;;  %v517_v8 = vld [vmem:[%s3263_s28 + $0x2c0] sm:$0xf]  ;;  %v519_v9 = vld [vmem:[%s3263_s28 + $0x2c8] sm:$0xf] }
  0x85   : > { %516 = vst [vmem:[%s3268_s10 + $0x15c] sm:$0xf] %v515_v7  ;;  %518 = vst [vmem:[%s3268_s10 + $0x160] sm:$0xf] %v517_v8  ;;  %v521_v10 = vld [vmem:[%s3263_s28 + $0x2d0] sm:$0xf] }
  0x86   : > { %520 = vst [vmem:[%s3268_s10 + $0x164] sm:$0xf] %v519_v9  ;;  %v523_v11 = vld [vmem:[%s3263_s28 + $0x2d8] sm:$0xf]  ;;  %v525_v12 = vld [vmem:[%s3263_s28 + $0x2e0] sm:$0xf] }
  0x87   : > { %522 = vst [vmem:[%s3268_s10 + $0x168] sm:$0xf] %v521_v10  ;;  %524 = vst [vmem:[%s3268_s10 + $0x16c] sm:$0xf] %v523_v11  ;;  %v527_v13 = vld [vmem:[%s3263_s28 + $0x2e8] sm:$0xf] }
  0x88   : > { %526 = vst [vmem:[%s3268_s10 + $0x170] sm:$0xf] %v525_v12  ;;  %v529_v14 = vld [vmem:[%s3263_s28 + $0x2f0] sm:$0xf]  ;;  %v531_v15 = vld [vmem:[%s3263_s28 + $0x2f8] sm:$0xf] }
  0x89   : > { %528 = vst [vmem:[%s3268_s10 + $0x174] sm:$0xf] %v527_v13  ;;  %530 = vst [vmem:[%s3268_s10 + $0x178] sm:$0xf] %v529_v14 }
  0x8a   : > { %532 = vst [vmem:[%s3268_s10 + $0x17c] sm:$0xf] %v531_v15 }
  0x8b PF: > { %p2327_p0 = scmp.ge.s32.totalorder %s3021_s25, 1  ;;  %p747_p1 = scmp.lt.s32.totalorder %s3021_s25, 7 }
  0x8d   : > { %p748_p2 = pnand %p2327_p0, %p747_p1 }
  0x8e   : > { %s754_s0 = sand.u32 (!%p748_p2), 1, %s2997_s19   ;;  %s761_s11 = sand.u32 (!%p748_p2), 1, %s2989_s17  }
  0x8f   : > { %751 = sbr.rel (%p748_p2) target bundleno = 550 (0x226), region = 84  ;;  %s782_s28 = sand.u32 (!%p748_p2), 1, %s2981_s15  }
  0x90   : > { %s2724_s26 = smul.u32 (!%p748_p2), 384, %s754_s0  ;;  %s2328_s29 = sshll.u32 (!%p748_p2), %s782_s28, 6 }
  0x91   : > { %s2725_s5 = smul.u32 (!%p748_p2), 384, %s761_s11  ;;  %p811_p3 = scmp.lt.s32.totalorder (!%p748_p2), %s3009_s22, 1 }
  0x92   : > { %s3476_s23 = scalar_lea.vmem (!%p748_p2), [#allocation3], %s2724_s26  ;;  %s3480_s15 = scalar_lea.vmem (!%p748_p2), [#allocation5], %s2328_s29 }
  0x93   : > { %s3478_s17 = scalar_lea.vmem (!%p748_p2), [#allocation4], %s2725_s5  ;;  %p2331_p4 = scmp.ne.s32.totalorder (!%p748_p2), %s3005_s21, 0 }
  0x94   : > { %s812_s30 = scalar_select %p811_p3, %s3009_s22, 1 }
  0x95   : > { %829 = sbr.rel (%p2331_p4) target bundleno = 163 (0xa3), region = 96 }
  0x96   : > { %s2329_s8 = sshll.u32 %s812_s30, 3 }
  0x97   : > { %s3469_s10 = scalar_lea.vmem %s3696_s3, %s2329_s8  ;;  %s3474_s24 = scalar_lea.vmem %s3697_s4, %s2329_s8 }
  0x9a   : > { %v3023_v16 = vmov 0.0  }
  0x9b   : > { %830 = vst [vmem:[#allocation2 + $0x30] sm:$0xff] %v3023_v16  ;;  %831 = vst [vmem:[#allocation2] sm:$0xff] %v3023_v16 }
  0x9c   : > { %832 = vst [vmem:[#allocation2 + $0x58] sm:$0xff] %v3023_v16  ;;  %833 = vst [vmem:[#allocation2 + $0x18] sm:$0xff] %v3023_v16 }
  0x9d   : > { %834 = vst [vmem:[#allocation2 + $0x50] sm:$0xff] %v3023_v16  ;;  %835 = vst [vmem:[#allocation2 + $0x68] sm:$0xff] %v3023_v16 }
  0x9e   : > { %836 = vst [vmem:[#allocation2 + $0x8] sm:$0xff] %v3023_v16  ;;  %837 = vst [vmem:[#allocation2 + $0x48] sm:$0xff] %v3023_v16 }
  0x9f   : > { %838 = vst [vmem:[#allocation2 + $0x40] sm:$0xff] %v3023_v16  ;;  %839 = vst [vmem:[#allocation2 + $0x20] sm:$0xff] %v3023_v16 }
  0xa0   : > { %840 = vst [vmem:[#allocation2 + $0x10] sm:$0xff] %v3023_v16  ;;  %841 = vst [vmem:[#allocation2 + $0x38] sm:$0xff] %v3023_v16 }
  0xa1   : > { %842 = vst [vmem:[#allocation2 + $0x60] sm:$0xff] %v3023_v16  ;;  %843 = vst [vmem:[#allocation2 + $0x70] sm:$0xff] %v3023_v16 }
  0xa2   : > { %844 = vst [vmem:[#allocation2 + $0x78] sm:$0xff] %v3023_v16  ;;  %845 = vst [vmem:[#allocation2 + $0x28] sm:$0xff] %v3023_v16 }
  0xa3 PF: > { %v2815_v17 = vld [vmem:[%s3478_s17 + $0x78] sm:$0xff]   ;;  %v2817_v19 = vld [vmem:[%s3478_s17 + $0x70] sm:$0xff]   ;;  %v2819_v21 = vld [vmem:[%s3478_s17 + $0x68] sm:$0xff]   ;;  %p2428_p5 = scmp.ne.s32.totalorder %s3005_s21, 2 }
  0xa4   : > { %v2816_v18 = vld [vmem:[%s3478_s17 + $0x38] sm:$0xff]   ;;  %2514 = vmatprep.subr.bf16.mxu0 %v2815_v17  ;;  %2706 = vmatprep.subr.bf16.mxu1 %v2815_v17  ;;  %v2818_v20 = vld [vmem:[%s3478_s17 + $0x30] sm:$0xff]   ;;  %v2820_v22 = vld [vmem:[%s3478_s17 + $0x28] sm:$0xff]  }
  0xa5   : > { %2515 = vmatpush3.bf16.msra.mxu0 %v2816_v18  ;;  %2714 = vmatpush3.bf16.msra.mxu1 %v2816_v18  ;;  %v2821_v23 = vld [vmem:[%s3478_s17 + $0x60] sm:$0xff]   ;;  %v2823_v25 = vld [vmem:[%s3478_s17 + $0x58] sm:$0xff]   ;;  %v2825_v27 = vld [vmem:[%s3478_s17 + $0x50] sm:$0xff]  }
  0xa6   : > { %2516 = vmatprep.subr.bf16.mxu0 %v2817_v19  ;;  %2707 = vmatprep.subr.bf16.mxu1 %v2817_v19  ;;  %v2822_v24 = vld [vmem:[%s3478_s17 + $0x20] sm:$0xff]   ;;  %v2824_v26 = vld [vmem:[%s3478_s17 + $0x18] sm:$0xff]   ;;  %v2826_v30 = vld [vmem:[%s3478_s17 + $0x10] sm:$0xff]  }
  0xa7   : > { %v2833_v28 = vld [vmem:[%s3476_s23 + $0x4] ss:$24 sps:$4 sm:$0xff]   ;;  %v2827_v31 = vld [vmem:[%s3478_s17 + $0x48] sm:$0xff]   ;;  %v2831_v35 = vld [vmem:[%s3476_s23] ss:$24 sps:$4 sm:$0xff]  }
  0xa8   : > { %v2836_v29 = vld [vmem:[%s3476_s23 + $0xc4] ss:$24 sps:$4 sm:$0xff]   ;;  %1566 = vmatprep.mubr.bf16.mxu0 %v2833_v28  ;;  %v2828_v32 = vld [vmem:[%s3478_s17 + $0x8] sm:$0xff]   ;;  %v2834_v36 = vld [vmem:[%s3476_s23 + $0xc0] ss:$24 sps:$4 sm:$0xff]  }
  0xa9   : > { %2517 = vmatpush3.bf16.msra.mxu0 %v2818_v20  ;;  %2715 = vmatpush3.bf16.msra.mxu1 %v2818_v20  ;;  %v2829_v33 = vld [vmem:[%s3478_s17 + $0x40] sm:$0xff]   ;;  %v2837_v37 = vld [vmem:[%s3478_s17 + $0xf8] sm:$0xff]   ;;  %v2841_v41 = vld [vmem:[%s3478_s17 + $0xf0] sm:$0xff]  }
  0xaa   : > { %2518 = vmatprep.subr.bf16.mxu0 %v2819_v21  ;;  %2708 = vmatprep.subr.bf16.mxu1 %v2819_v21  ;;  %v2830_v34 = vld [vmem:[%s3478_s17] sm:$0xff]   ;;  %v2838_v38 = vld [vmem:[%s3478_s17 + $0x178] sm:$0xff]   ;;  %v2842_v42 = vld [vmem:[%s3478_s17 + $0x170] sm:$0xff]  }
  0xab   : > { %1598 = vmatprep.mubr.bf16.mxu1 %v2836_v29  ;;  %v2839_v39 = vld [vmem:[%s3478_s17 + $0xb8] sm:$0xff]   ;;  %v2845_v43 = vld [vmem:[%s3476_s23 + $0x34] ss:$24 sps:$4 sm:$0xff]   ;;  %v2849_v48 = vld [vmem:[%s3476_s23 + $0x30] ss:$24 sps:$4 sm:$0xff]  }
  0xac   : > { %v2840_v40 = vld [vmem:[%s3478_s17 + $0x138] sm:$0xff]   ;;  %v2843_v44 = vld [vmem:[%s3478_s17 + $0xb0] sm:$0xff]   ;;  %v2851_v47 = vld [vmem:[%s3478_s17 + $0xe8] sm:$0xff]  }
  0xad   : > { %2519 = vmatpush3.bf16.msra.mxu0 %v2820_v22  ;;  %2716 = vmatpush3.bf16.msra.mxu1 %v2820_v22  ;;  %v2847_v45 = vld [vmem:[%s3476_s23 + $0xf4] ss:$24 sps:$4 sm:$0xff]   ;;  %v2850_v50 = vld [vmem:[%s3476_s23 + $0xf0] ss:$24 sps:$4 sm:$0xff]   ;;  %v2855_v53 = vld [vmem:[%s3478_s17 + $0xe0] sm:$0xff]  }
  0xae   : > { %2520 = vmatprep.subr.bf16.mxu0 %v2821_v23  ;;  %2709 = vmatprep.subr.bf16.mxu1 %v2821_v23  ;;  %v2844_v46 = vld [vmem:[%s3478_s17 + $0x130] sm:$0xff]   ;;  %v2852_v49 = vld [vmem:[%s3478_s17 + $0x168] sm:$0xff]   ;;  %v2856_v54 = vld [vmem:[%s3478_s17 + $0x160] sm:$0xff]  }
  0xaf   : > { %v2853_v51 = vld [vmem:[%s3478_s17 + $0xa8] sm:$0xff]   ;;  %v2859_v55 = vld [vmem:[%s3476_s23 + $0x64] ss:$24 sps:$4 sm:$0xff]   ;;  %v2863_v60 = vld [vmem:[%s3476_s23 + $0x60] ss:$24 sps:$4 sm:$0xff]  }
  0xb0   : > { %v2854_v52 = vld [vmem:[%s3478_s17 + $0x128] sm:$0xff]   ;;  %v2857_v56 = vld [vmem:[%s3478_s17 + $0xa0] sm:$0xff]   ;;  %v2865_v59 = vld [vmem:[%s3478_s17 + $0xd8] sm:$0xff]  }
  0xb1   : > { %2521 = vmatpush3.bf16.msra.mxu0 %v2822_v24  ;;  %2717 = vmatpush3.bf16.msra.mxu1 %v2822_v24  ;;  %v2861_v57 = vld [vmem:[%s3476_s23 + $0x124] ss:$24 sps:$4 sm:$0xff]   ;;  %v2864_v61 = vld [vmem:[%s3476_s23 + $0x120] ss:$24 sps:$4 sm:$0xff]   ;;  %v2869_v1 = vld [vmem:[%s3478_s17 + $0xd0] sm:$0xff]  }
  0xb2   : > { %2522 = vmatprep.subr.bf16.mxu0 %v2823_v25  ;;  %2710 = vmatprep.subr.bf16.mxu1 %v2823_v25  ;;  %v2858_v58 = vld [vmem:[%s3478_s17 + $0x120] sm:$0xff]   ;;  %v2866_v62 = vld [vmem:[%s3478_s17 + $0x158] sm:$0xff]   ;;  %v2870_v2 = vld [vmem:[%s3478_s17 + $0x150] sm:$0xff]  }
  0xb3   : > { %v2867_v63 = vld [vmem:[%s3478_s17 + $0x98] sm:$0xff]   ;;  %v2873_v3 = vld [vmem:[%s3476_s23 + $0x94] ss:$24 sps:$4 sm:$0xff]   ;;  %v2877_v8 = vld [vmem:[%s3476_s23 + $0x90] ss:$24 sps:$4 sm:$0xff]  }
  0xb4   : > { %v2868_v0 = vld [vmem:[%s3478_s17 + $0x118] sm:$0xff]   ;;  %v2875_v4 = vld [vmem:[%s3476_s23 + $0x154] ss:$24 sps:$4 sm:$0xff]   ;;  %v2878_v9 = vld [vmem:[%s3476_s23 + $0x150] ss:$24 sps:$4 sm:$0xff]  }
  0xb5   : > { %2523 = vmatpush3.bf16.msra.mxu0 %v2824_v26  ;;  %2718 = vmatpush3.bf16.msra.mxu1 %v2824_v26  ;;  %v2871_v5 = vld [vmem:[%s3478_s17 + $0x90] sm:$0xff]   ;;  %v2879_v7 = vld [vmem:[%s3478_s17 + $0xc8] sm:$0xff]   ;;  %v2883_v13 = vld [vmem:[%s3478_s17 + $0xc0] sm:$0xff]  }
  0xb6   : > { %2524 = vmatprep.subr.bf16.mxu0 %v2825_v27  ;;  %2711 = vmatprep.subr.bf16.mxu1 %v2825_v27  ;;  %v2872_v6 = vld [vmem:[%s3478_s17 + $0x110] sm:$0xff]   ;;  %v2880_v10 = vld [vmem:[%s3478_s17 + $0x148] sm:$0xff]   ;;  %v2884_v14 = vld [vmem:[%s3478_s17 + $0x140] sm:$0xff]  }
  0xb7   : > { %v2881_v11 = vld [vmem:[%s3478_s17 + $0x88] sm:$0xff]   ;;  %v2885_v15 = vld [vmem:[%s3478_s17 + $0x80] sm:$0xff]   ;;  %v2893_v21 = vld [vmem:[%s3476_s23 + $0x3c] ss:$24 sps:$4 sm:$0xff]  }
  0xb8   : > { %v2882_v12 = vld [vmem:[%s3478_s17 + $0x108] sm:$0xff]   ;;  %v2886_v16 = vld [vmem:[%s3478_s17 + $0x100] sm:$0xff]   ;;  %v2897_v23 = vld [vmem:[%s3476_s23 + $0x38] ss:$24 sps:$4 sm:$0xff]  }
  0xb9   : > { %2525 = vmatpush3.bf16.msra.mxu0 %v2826_v30  ;;  %2719 = vmatpush3.bf16.msra.mxu1 %v2826_v30  ;;  %v2889_v17 = vld [vmem:[%s3476_s23 + $0xc] ss:$24 sps:$4 sm:$0xff]   ;;  %v2887_v18 = vld [vmem:[%s3476_s23 + $0x8] ss:$24 sps:$4 sm:$0xff]   ;;  %v2905_v29 = vld [vmem:[%s3476_s23 + $0x9c] ss:$24 sps:$4 sm:$0xff]  }
  0xba   : > { %2526 = vmatprep.subr.bf16.mxu0 %v2827_v31  ;;  %2712 = vmatprep.subr.bf16.mxu1 %v2827_v31  ;;  %v2892_v19 = vld [vmem:[%s3476_s23 + $0x14] ss:$24 sps:$4 sm:$0xff]   ;;  %v2890_v20 = vld [vmem:[%s3476_s23 + $0x10] ss:$24 sps:$4 sm:$0xff]   ;;  %v2895_v22 = vld [vmem:[%s3476_s23 + $0x44] ss:$24 sps:$4 sm:$0xff]  }
  0xbb   : > { %v2898_v24 = vld [vmem:[%s3476_s23 + $0x40] ss:$24 sps:$4 sm:$0xff]   ;;  %v2899_v25 = vld [vmem:[%s3476_s23 + $0x6c] ss:$24 sps:$4 sm:$0xff]   ;;  %v2904_v28 = vld [vmem:[%s3476_s23 + $0x70] ss:$24 sps:$4 sm:$0xff]  }
  0xbc   : > { %v2901_v26 = vld [vmem:[%s3476_s23 + $0x74] ss:$24 sps:$4 sm:$0xff]   ;;  %v2903_v27 = vld [vmem:[%s3476_s23 + $0x68] ss:$24 sps:$4 sm:$0xff]   ;;  %v2907_v30 = vld [vmem:[%s3476_s23 + $0xa4] ss:$24 sps:$4 sm:$0xff]  }
  0xbd   : > { %2527 = vmatpush3.bf16.msra.mxu0 %v2828_v32  ;;  %2720 = vmatpush3.bf16.msra.mxu1 %v2828_v32  ;;  %v2909_v31 = vld [vmem:[%s3476_s23 + $0x98] ss:$24 sps:$4 sm:$0xff]  }
  0xbe   : > { %2528 = vmatprep.subr.bf16.mxu0 %v2829_v33  ;;  %2713 = vmatprep.subr.bf16.mxu1 %v2829_v33  ;;  %v2910_v32 = vld [vmem:[%s3476_s23 + $0xa0] ss:$24 sps:$4 sm:$0xff]   ;;  %v2911_v33 = vld [vmem:[%s3476_s23 + $0xcc] ss:$24 sps:$4 sm:$0xff]  }
  0xc1   : > { %2529 = vmatpush3.bf16.msra.mxu0 %v2830_v34  ;;  %2721 = vmatpush3.bf16.msra.mxu1 %v2830_v34  ;;  %v2913_v34 = vld [vmem:[%s3476_s23 + $0xd4] ss:$24 sps:$4 sm:$0xff]  }
  0xc2   : > { %2578 = vmatprep.subr.bf16.mxu1 %v2837_v37  ;;  %2642 = vmatprep.subr.bf16.mxu0 %v2838_v38  ;;  %v2917_v37 = vld [vmem:[%s3476_s23 + $0xfc] ss:$24 sps:$4 sm:$0xff]  }
  0xc3   : > { %v2919_v38 = vld [vmem:[%s3476_s23 + $0x104] ss:$24 sps:$4 sm:$0xff]  }
  0xc4   : > { %1567 = vmatmul.mubr.bf16.vlgmr.msra.gmra.mxu0 %v2831_v35  ;;  %1599 = vmatmul.mubr.bf16.vlgmr.msra.gmra.mxu1 %v2834_v36  ;;  %v2915_v35 = vld [vmem:[%s3476_s23 + $0xc8] ss:$24 sps:$4 sm:$0xff]  }
  0xc5   : > { %2579 = vmatpush3.bf16.msra.mxu1 %v2839_v39  ;;  %2643 = vmatpush3.bf16.msra.mxu0 %v2840_v40  ;;  %v2916_v36 = vld [vmem:[%s3476_s23 + $0xd0] ss:$24 sps:$4 sm:$0xff]   ;;  %v2922_v40 = vld [vmem:[%s3476_s23 + $0x100] ss:$24 sps:$4 sm:$0xff]  }
  0xc6   : > { %2580 = vmatprep.subr.bf16.mxu1 %v2841_v41  ;;  %2644 = vmatprep.subr.bf16.mxu0 %v2842_v42  ;;  %v2921_v39 = vld [vmem:[%s3476_s23 + $0xf8] ss:$24 sps:$4 sm:$0xff]   ;;  %v2923_v41 = vld [vmem:[%s3476_s23 + $0x12c] ss:$24 sps:$4 sm:$0xff]  }
  0xc7   : > { %1574 = vmatprep.mubr.bf16.mxu0 %v2845_v43  ;;  %1606 = vmatprep.mubr.bf16.mxu1 %v2847_v45  ;;  %v2925_v42 = vld [vmem:[%s3476_s23 + $0x134] ss:$24 sps:$4 sm:$0xff]   ;;  %v2927_v43 = vld [vmem:[%s3476_s23 + $0x128] ss:$24 sps:$4 sm:$0xff]  }
  0xc8   : > { %v2929_v45 = vld [vmem:[%s3476_s23 + $0x15c] ss:$24 sps:$4 sm:$0xff]  }
  0xc9   : > { %2581 = vmatpush3.bf16.msra.mxu1 %v2843_v44  ;;  %2645 = vmatpush3.bf16.msra.mxu0 %v2844_v46  ;;  %v2928_v44 = vld [vmem:[%s3476_s23 + $0x130] ss:$24 sps:$4 sm:$0xff]   ;;  %v2931_v46 = vld [vmem:[%s3476_s23 + $0x164] ss:$24 sps:$4 sm:$0xff]  }
  0xca   : > { %2582 = vmatprep.subr.bf16.mxu1 %v2851_v47  ;;  %2646 = vmatprep.subr.bf16.mxu0 %v2852_v49  ;;  %v2933_v47 = vld [vmem:[%s3476_s23 + $0x158] ss:$24 sps:$4 sm:$0xff]  }
  0xcc   : > { %1575 = vmatmul.mubr.bf16.gmra.mxu0 %v2849_v48  ;;  %1607 = vmatmul.mubr.bf16.gmra.mxu1 %v2850_v50  ;;  %v2934_v48 = vld [vmem:[%s3476_s23 + $0x160] ss:$24 sps:$4 sm:$0xff]  }
  0xcd   : > { %2583 = vmatpush3.bf16.msra.mxu1 %v2853_v51  ;;  %2647 = vmatpush3.bf16.msra.mxu0 %v2854_v52 }
  0xce   : > { %2584 = vmatprep.subr.bf16.mxu1 %v2855_v53  ;;  %2648 = vmatprep.subr.bf16.mxu0 %v2856_v54 }
  0xcf   : > { %1582 = vmatprep.mubr.bf16.mxu0 %v2859_v55  ;;  %1614 = vmatprep.mubr.bf16.mxu1 %v2861_v57 }
  0xd1   : > { %2585 = vmatpush3.bf16.msra.mxu1 %v2857_v56  ;;  %2649 = vmatpush3.bf16.msra.mxu0 %v2858_v58 }
  0xd2   : > { %2586 = vmatprep.subr.bf16.mxu1 %v2865_v59  ;;  %2650 = vmatprep.subr.bf16.mxu0 %v2866_v62 }
  0xd4   : > { %1583 = vmatmul.mubr.bf16.gmra.mxu0 %v2863_v60  ;;  %1615 = vmatmul.mubr.bf16.gmra.mxu1 %v2864_v61 }
  0xd5   : > { %2587 = vmatpush3.bf16.msra.mxu1 %v2867_v63  ;;  %2651 = vmatpush3.bf16.msra.mxu0 %v2868_v0 }
  0xd6   : > { %2588 = vmatprep.subr.bf16.mxu1 %v2869_v1  ;;  %2652 = vmatprep.subr.bf16.mxu0 %v2870_v2 }
  0xd7   : > { %1590 = vmatprep.mubr.bf16.mxu0 %v2873_v3  ;;  %1622 = vmatprep.mubr.bf16.mxu1 %v2875_v4 }
  0xd9   : > { %2589 = vmatpush3.bf16.msra.mxu1 %v2871_v5  ;;  %2653 = vmatpush3.bf16.msra.mxu0 %v2872_v6 }
  0xda   : > { %2590 = vmatprep.subr.bf16.mxu1 %v2879_v7  ;;  %2654 = vmatprep.subr.bf16.mxu0 %v2880_v10 }
  0xdc   : > { %1591 = vmatmul.mubr.bf16.gmra.mxu0 %v2877_v8  ;;  %1623 = vmatmul.mubr.bf16.gmra.mxu1 %v2878_v9 }
  0xdd   : > { %2591 = vmatpush3.bf16.msra.mxu1 %v2881_v11  ;;  %2655 = vmatpush3.bf16.msra.mxu0 %v2882_v12 }
  0xde   : > { %2592 = vmatprep.subr.bf16.mxu1 %v2883_v13  ;;  %2656 = vmatprep.subr.bf16.mxu0 %v2884_v14 }
  0xdf   : > { %1663 = vmatprep.mubr.bf16.mxu1 %v2889_v17  ;;  %1760 = vmatprep.mubr.bf16.mxu0 %v2892_v19 }
  0xe1   : > { %2593 = vmatpush3.bf16.msra.mxu1 %v2885_v15  ;;  %2657 = vmatpush3.bf16.msra.mxu0 %v2886_v16 }
  0xe4   : > { %1664 = vmatmul.mubr.bf16.vlgmr.msra.gmra.mxu1 %v2887_v18  ;;  %1761 = vmatmul.mubr.bf16.vlgmr.msra.gmra.mxu0 %v2890_v20 }
  0xe5   : > { %1671 = vmatprep.mubr.bf16.mxu1 %v2893_v21  ;;  %1768 = vmatprep.mubr.bf16.mxu0 %v2895_v22 }
  0xec   : > { %1672 = vmatmul.mubr.bf16.gmra.mxu1 %v2897_v23  ;;  %1769 = vmatmul.mubr.bf16.gmra.mxu0 %v2898_v24 }
  0xed   : > { %1679 = vmatprep.mubr.bf16.mxu1 %v2899_v25  ;;  %1776 = vmatprep.mubr.bf16.mxu0 %v2901_v26 }
  0xf4   : > { %1680 = vmatmul.mubr.bf16.gmra.mxu1 %v2903_v27  ;;  %1777 = vmatmul.mubr.bf16.gmra.mxu0 %v2904_v28 }
  0xf5   : > { %1687 = vmatprep.mubr.bf16.mxu1 %v2905_v29  ;;  %1784 = vmatprep.mubr.bf16.mxu0 %v2907_v30 }
  0xfc   : > { %1688 = vmatmul.mubr.bf16.gmra.mxu1 %v2909_v31  ;;  %1785 = vmatmul.mubr.bf16.gmra.mxu0 %v2910_v32 }
  0xfd   : > { %1695 = vmatprep.mubr.bf16.mxu1 %v2911_v33  ;;  %1792 = vmatprep.mubr.bf16.mxu0 %v2913_v34 }
 0x104   : > { %1696 = vmatmul.mubr.bf16.gmra.mxu1 %v2915_v35  ;;  %1793 = vmatmul.mubr.bf16.gmra.mxu0 %v2916_v36  ;;  %v846_v35 = vld [vmem:[#allocation2 + $0x30] sm:$0xff] }
 0x105   : > { %1703 = vmatprep.mubr.bf16.mxu1 %v2917_v37  ;;  %1800 = vmatprep.mubr.bf16.mxu0 %v2919_v38 }
 0x10c   : > { %1704 = vmatmul.mubr.bf16.gmra.mxu1 %v2921_v39  ;;  %1801 = vmatmul.mubr.bf16.gmra.mxu0 %v2922_v40 }
 0x10d   : > { %1711 = vmatprep.mubr.bf16.mxu1 %v2923_v41  ;;  %1808 = vmatprep.mubr.bf16.mxu0 %v2925_v42 }
 0x114   : > { %1712 = vmatmul.mubr.bf16.gmra.mxu1 %v2927_v43  ;;  %1809 = vmatmul.mubr.bf16.gmra.mxu0 %v2928_v44 }
 0x115   : > { %1719 = vmatprep.mubr.bf16.mxu1 %v2929_v45  ;;  %1816 = vmatprep.mubr.bf16.mxu0 %v2931_v46  ;;  %v847_v46 = vld [vmem:[#allocation2] sm:$0xff] }
 0x11c   : > { %1720 = vmatmul.mubr.bf16.gmra.mxu1 %v2933_v47  ;;  %1817 = vmatmul.mubr.bf16.gmra.mxu0 %v2934_v48 }
 0x184   : > { %v2530_v49 = vpop.f32.mrf.mxu0  ;;  %v2554_v50 = vpop.f32.mrf.mxu1 }
 0x186   : > { %v2531_v51 = vpop.f32.mrf.mxu0  ;;  %v2555_v52 = vpop.f32.mrf.mxu1 }
 0x187   : > { %v3579_v53 = vadd.f32 %v2555_v52, %v2554_v50  ;;  %v2532_v29 = vadd.f32 %v2531_v51, %v2530_v49 }
 0x188   : > { %v2533_v54 = vpop.f32.mrf.mxu0  ;;  %v2557_v55 = vpop.f32.mrf.mxu1 }
 0x18a   : > { %v2534_v56 = vpop.f32.mrf.mxu0  ;;  %v2558_v57 = vpop.f32.mrf.mxu1 }
 0x18b   : > { %v3581_v58 = vadd.f32 %v2558_v57, %v2557_v55  ;;  %v2535_v38 = vadd.f32 %v2534_v56, %v2533_v54  ;;  %v848_v54 = vld [vmem:[#allocation2 + $0x58] sm:$0xff] }
 0x18c   : > { %v2536_v59 = vpop.f32.mrf.mxu0  ;;  %v2560_v60 = vpop.f32.mrf.mxu1 }
 0x18e   : > { %v2537_v61 = vpop.f32.mrf.mxu0  ;;  %v2561_v62 = vpop.f32.mrf.mxu1 }
 0x18f   : > { %v3583_v63 = vadd.f32 %v2561_v62, %v2560_v60  ;;  %v2538_v49 = vadd.f32 %v2537_v61, %v2536_v59  ;;  %v849_v61 = vld [vmem:[#allocation2 + $0x18] sm:$0xff] }
 0x190   : > { %v2539_v0 = vpop.f32.mrf.mxu0  ;;  %v2563_v1 = vpop.f32.mrf.mxu1 }
 0x192   : > { %v2540_v2 = vpop.f32.mrf.mxu0  ;;  %v2564_v3 = vpop.f32.mrf.mxu1 }
 0x193   : > { %v3585_v4 = vadd.f32 %v2564_v3, %v2563_v1  ;;  %v2541_v3 = vadd.f32 %v2540_v2, %v2539_v0 }
 0x194   : > { %v3587_v5 = vpop.f32.mrf.mxu0  ;;  %v2566_v6 = vpop.f32.mrf.mxu1 }
 0x196   : > { %v3589_v7 = vpop.f32.mrf.mxu0  ;;  %v2567_v8 = vpop.f32.mrf.mxu1 }
 0x197   : > { %v3591_v9 = vadd.f32 %v2567_v8, %v2566_v6 }
 0x198   : > { %v3593_v10 = vpop.f32.mrf.mxu0  ;;  %v2569_v11 = vpop.f32.mrf.mxu1 }
 0x19a   : > { %v3595_v12 = vpop.f32.mrf.mxu0  ;;  %v2570_v13 = vpop.f32.mrf.mxu1 }
 0x19b   : > { %v3597_v14 = vadd.f32 %v2570_v13, %v2569_v11 }
 0x19c   : > { %v3599_v15 = vpop.f32.mrf.mxu0  ;;  %v2572_v16 = vpop.f32.mrf.mxu1 }
 0x19e   : > { %v3601_v17 = vpop.f32.mrf.mxu0  ;;  %v2573_v18 = vpop.f32.mrf.mxu1 }
 0x19f   : > { %v3603_v19 = vadd.f32 %v2573_v18, %v2572_v16 }
 0x1a0   : > { %v3605_v20 = vpop.f32.mrf.mxu0  ;;  %v2575_v21 = vpop.f32.mrf.mxu1 }
 0x1a2   : > { %v3607_v22 = vpop.f32.mrf.mxu0  ;;  %v2576_v23 = vpop.f32.mrf.mxu1 }
 0x1a3   : > { %v3609_v24 = vadd.f32 %v2576_v23, %v2575_v21 }
 0x1a4   : > { %v2594_v25 = vpop.f32.mrf.mxu1  ;;  %v2658_v26 = vpop.f32.mrf.mxu0 }
 0x1a6   : > { %v2595_v27 = vpop.f32.mrf.mxu1  ;;  %v2659_v28 = vpop.f32.mrf.mxu0 }
 0x1a7   : > { %v2596_v30 = vadd.f32 %v2595_v27, %v2594_v25  ;;  %v2660_v34 = vadd.f32 %v2659_v28, %v2658_v26  ;;  %v2544_v25 = vadd.f32 %v3589_v7, %v3587_v5 }
 0x1a8   : > { %v2597_v31 = vpop.f32.mrf.mxu1  ;;  %v2661_v32 = vpop.f32.mrf.mxu0 }
 0x1a9   : > { %v1666_v33 = vadd.f32 %v2596_v30, %v2532_v29 }
 0x1aa   : > { %v2598_v36 = vpop.f32.mrf.mxu1  ;;  %v2662_v37 = vpop.f32.mrf.mxu0 }
 0x1ab   : > { %v1763_v39 = vadd.f32 %v2660_v34, %v1666_v33  ;;  %v2599_v40 = vadd.f32 %v2598_v36, %v2597_v31  ;;  %v2663_v45 = vadd.f32 %v2662_v37, %v2661_v32  ;;  %v850_v31 = vld [vmem:[#allocation2 + $0x50] sm:$0xff]  ;;  %v2547_v34 = vadd.f32 %v3595_v12, %v3593_v10 }
 0x1ac   : > { %v2600_v41 = vpop.f32.mrf.mxu1  ;;  %v2664_v42 = vpop.f32.mrf.mxu0 }
 0x1ad   : > { %v1825_v43 = vadd.f32 %v1763_v39, %v846_v35  ;;  %v1669_v44 = vadd.f32 %v2599_v40, %v2535_v38  ;;  %v851_v40 = vld [vmem:[#allocation2 + $0x68] sm:$0xff] }
 0x1ae   : > { %v2601_v47 = vpop.f32.mrf.mxu1  ;;  %v2665_v48 = vpop.f32.mrf.mxu0 }
 0x1af   : > { %1841 = vst [vmem:[#allocation2 + $0x30] sm:$0xff] %v1825_v43  ;;  %v1766_v50 = vadd.f32 %v2663_v45, %v1669_v44  ;;  %v2602_v51 = vadd.f32 %v2601_v47, %v2600_v41  ;;  %v2666_v62 = vadd.f32 %v2665_v48, %v2664_v42  ;;  %v2550_v43 = vadd.f32 %v3601_v17, %v3599_v15 }
 0x1b0   : > { %v2603_v52 = vpop.f32.mrf.mxu1  ;;  %v2667_v55 = vpop.f32.mrf.mxu0 }
 0x1b1   : > { %v1826_v57 = vadd.f32 %v1766_v50, %v847_v46  ;;  %v1674_v60 = vadd.f32 %v2602_v51, %v2538_v49  ;;  %v852_v49 = vld [vmem:[#allocation2 + $0x8] sm:$0xff] }
 0x1b2   : > { %v2604_v56 = vpop.f32.mrf.mxu1  ;;  %v2668_v1 = vpop.f32.mrf.mxu0 }
 0x1b3   : > { %1842 = vst [vmem:[#allocation2] sm:$0xff] %v1826_v57  ;;  %v1771_v6 = vadd.f32 %v2666_v62, %v1674_v60  ;;  %v2605_v8 = vadd.f32 %v2604_v56, %v2603_v52  ;;  %v2669_v59 = vadd.f32 %v2668_v1, %v2667_v55  ;;  %v2553_v52 = vadd.f32 %v3607_v22, %v3605_v20  ;;  %v853_v56 = vld [vmem:[#allocation2 + $0x48] sm:$0xff]  ;;  %v854_v22 = vld [vmem:[#allocation2 + $0x40] sm:$0xff] }
 0x1b4   : > { %v2606_v11 = vpop.f32.mrf.mxu1  ;;  %v2670_v13 = vpop.f32.mrf.mxu0 }
 0x1b5   : > { %v1827_v16 = vadd.f32 %v1771_v6, %v848_v54  ;;  %v1677_v18 = vadd.f32 %v2605_v8, %v2541_v3 }
 0x1b6   : > { %v2607_v21 = vpop.f32.mrf.mxu1  ;;  %v2671_v23 = vpop.f32.mrf.mxu0 }
 0x1b7   : > { %1843 = vst [vmem:[#allocation2 + $0x58] sm:$0xff] %v1827_v16  ;;  %v1774_v26 = vadd.f32 %v2669_v59, %v1677_v18  ;;  %v2608_v27 = vadd.f32 %v2607_v21, %v2606_v11  ;;  %v2672_v30 = vadd.f32 %v2671_v23, %v2670_v13 }
 0x1b8   : > { %v2609_v28 = vpop.f32.mrf.mxu1  ;;  %v2673_v29 = vpop.f32.mrf.mxu0 }
 0x1b9   : > { %v1828_v0 = vadd.f32 %v1774_v26, %v849_v61  ;;  %v1682_v2 = vadd.f32 %v2608_v27, %v2544_v25 }
 0x1ba   : > { %v2610_v32 = vpop.f32.mrf.mxu1  ;;  %v2674_v33 = vpop.f32.mrf.mxu0 }
 0x1bb   : > { %1844 = vst [vmem:[#allocation2 + $0x18] sm:$0xff] %v1828_v0  ;;  %v1779_v35 = vadd.f32 %v2672_v30, %v1682_v2  ;;  %v2611_v36 = vadd.f32 %v2610_v32, %v2609_v28  ;;  %v2675_v39 = vadd.f32 %v2674_v33, %v2673_v29  ;;  %v855_v0 = vld [vmem:[#allocation2 + $0x20] sm:$0xff] }
 0x1bc   : > { %v2612_v37 = vpop.f32.mrf.mxu1  ;;  %v2676_v38 = vpop.f32.mrf.mxu0 }
 0x1bd   : > { %v1829_v5 = vadd.f32 %v1779_v35, %v850_v31  ;;  %v1685_v7 = vadd.f32 %v2611_v36, %v2547_v34 }
 0x1be   : > { %v2613_v41 = vpop.f32.mrf.mxu1  ;;  %v2677_v42 = vpop.f32.mrf.mxu0 }
 0x1bf   : > { %1845 = vst [vmem:[#allocation2 + $0x50] sm:$0xff] %v1829_v5  ;;  %v1782_v44 = vadd.f32 %v2675_v39, %v1685_v7  ;;  %v2614_v45 = vadd.f32 %v2613_v41, %v2612_v37  ;;  %v2678_v48 = vadd.f32 %v2677_v42, %v2676_v38  ;;  %v856_v37 = vld [vmem:[#allocation2 + $0x10] sm:$0xff] }
 0x1c0   : > { %v2615_v46 = vpop.f32.mrf.mxu1  ;;  %v2679_v47 = vpop.f32.mrf.mxu0 }
 0x1c1   : > { %v1830_v10 = vadd.f32 %v1782_v44, %v851_v40  ;;  %v1690_v12 = vadd.f32 %v2614_v45, %v2550_v43  ;;  %v857_v44 = vld [vmem:[#allocation2 + $0x38] sm:$0xff] }
 0x1c2   : > { %v2616_v50 = vpop.f32.mrf.mxu1  ;;  %v2680_v51 = vpop.f32.mrf.mxu0 }
 0x1c3   : > { %1846 = vst [vmem:[#allocation2 + $0x68] sm:$0xff] %v1830_v10  ;;  %v1787_v55 = vadd.f32 %v2678_v48, %v1690_v12  ;;  %v2617_v57 = vadd.f32 %v2616_v50, %v2615_v46  ;;  %v2681_v54 = vadd.f32 %v2680_v51, %v2679_v47  ;;  %v858_v51 = vld [vmem:[#allocation2 + $0x60] sm:$0xff] }
 0x1c4   : > { %v2618_v60 = vpop.f32.mrf.mxu1  ;;  %v2682_v62 = vpop.f32.mrf.mxu0 }
 0x1c5   : > { %v1831_v15 = vadd.f32 %v1787_v55, %v852_v49  ;;  %v1693_v17 = vadd.f32 %v2617_v57, %v2553_v52 }
 0x1c6   : > { %v2619_v1 = vpop.f32.mrf.mxu1  ;;  %v2683_v3 = vpop.f32.mrf.mxu0 }
 0x1c7   : > { %1847 = vst [vmem:[#allocation2 + $0x8] sm:$0xff] %v1831_v15  ;;  %v1790_v6 = vadd.f32 %v2681_v54, %v1693_v17  ;;  %v2620_v8 = vadd.f32 %v2619_v1, %v2618_v60  ;;  %v2684_v20 = vadd.f32 %v2683_v3, %v2682_v62 }
 0x1c8   : > { %v2621_v11 = vpop.f32.mrf.mxu1  ;;  %v2685_v13 = vpop.f32.mrf.mxu0 }
 0x1c9   : > { %v1832_v16 = vadd.f32 %v1790_v6, %v853_v56  ;;  %v1698_v18 = vadd.f32 %v2620_v8, %v3579_v53  ;;  %v859_v56 = vld [vmem:[#allocation2 + $0x70] sm:$0xff] }
 0x1ca   : > { %v2622_v59 = vpop.f32.mrf.mxu1  ;;  %v2686_v61 = vpop.f32.mrf.mxu0 }
 0x1cb   : > { %1848 = vst [vmem:[#allocation2 + $0x48] sm:$0xff] %v1832_v16  ;;  %v1795_v21 = vadd.f32 %v2684_v20, %v1698_v18  ;;  %v2623_v23 = vadd.f32 %v2622_v59, %v2621_v11  ;;  %v2687_v29 = vadd.f32 %v2686_v61, %v2685_v13  ;;  %v860_v20 = vld [vmem:[#allocation2 + $0x78] sm:$0xff] }
 0x1cc   : > { %v2624_v25 = vpop.f32.mrf.mxu1  ;;  %v2688_v26 = vpop.f32.mrf.mxu0 }
 0x1cd   : > { %v1833_v27 = vadd.f32 %v1795_v21, %v854_v22  ;;  %v1701_v28 = vadd.f32 %v2623_v23, %v3581_v58 }
 0x1ce   : > { %v2625_v2 = vpop.f32.mrf.mxu1  ;;  %v2689_v30 = vpop.f32.mrf.mxu0 }
 0x1cf   : > { %1849 = vst [vmem:[#allocation2 + $0x40] sm:$0xff] %v1833_v27  ;;  %v1798_v31 = vadd.f32 %v2687_v29, %v1701_v28  ;;  %v2626_v32 = vadd.f32 %v2625_v2, %v2624_v25  ;;  %v2690_v36 = vadd.f32 %v2689_v30, %v2688_v26  ;;  %v861_v26 = vld [vmem:[#allocation2 + $0x28] sm:$0xff] }
 0x1d0   : > { %v2627_v53 = vpop.f32.mrf.mxu1  ;;  %v2691_v33 = vpop.f32.mrf.mxu0 }
 0x1d1   : > { %v1834_v34 = vadd.f32 %v1798_v31, %v855_v0  ;;  %v1706_v35 = vadd.f32 %v2626_v32, %v3583_v63 }
 0x1d2   : > { %v2628_v38 = vpop.f32.mrf.mxu1  ;;  %v2692_v5 = vpop.f32.mrf.mxu0 }
 0x1d3   : > { %1850 = vst [vmem:[#allocation2 + $0x20] sm:$0xff] %v1834_v34  ;;  %v1803_v7 = vadd.f32 %v2690_v36, %v1706_v35  ;;  %v2629_v39 = vadd.f32 %v2628_v38, %v2627_v53  ;;  %v2693_v43 = vadd.f32 %v2692_v5, %v2691_v33 }
 0x1d4   : > { %v2630_v58 = vpop.f32.mrf.mxu1  ;;  %v2694_v40 = vpop.f32.mrf.mxu0 }
 0x1d5   : > { %v1835_v41 = vadd.f32 %v1803_v7, %v856_v37  ;;  %v1709_v42 = vadd.f32 %v2629_v39, %v3585_v4 }
 0x1d6   : > { %v2631_v45 = vpop.f32.mrf.mxu1  ;;  %v2695_v46 = vpop.f32.mrf.mxu0 }
 0x1d7   : > { %1851 = vst [vmem:[#allocation2 + $0x10] sm:$0xff] %v1835_v41  ;;  %v1806_v47 = vadd.f32 %v2693_v43, %v1709_v42  ;;  %v2632_v10 = vadd.f32 %v2631_v45, %v2630_v58  ;;  %v2696_v50 = vadd.f32 %v2695_v46, %v2694_v40 }
 0x1d8   : > { %v2633_v63 = vpop.f32.mrf.mxu1  ;;  %v2697_v12 = vpop.f32.mrf.mxu0 }
 0x1d9   : > { %v1836_v48 = vadd.f32 %v1806_v47, %v857_v44  ;;  %v1714_v49 = vadd.f32 %v2632_v10, %v3591_v9 }
 0x1da   : > { %v2634_v52 = vpop.f32.mrf.mxu1  ;;  %v2698_v55 = vpop.f32.mrf.mxu0 }
 0x1db   : > { %1852 = vst [vmem:[#allocation2 + $0x38] sm:$0xff] %v1836_v48  ;;  %v1811_v57 = vadd.f32 %v2696_v50, %v1714_v49  ;;  %v2635_v60 = vadd.f32 %v2634_v52, %v2633_v63  ;;  %v2699_v54 = vadd.f32 %v2698_v55, %v2697_v12 }
 0x1dc   : > { %v2636_v4 = vpop.f32.mrf.mxu1  ;;  %v2700_v62 = vpop.f32.mrf.mxu0 }
 0x1dd   : > { %v1837_v15 = vadd.f32 %v1811_v57, %v858_v51  ;;  %v1717_v17 = vadd.f32 %v2635_v60, %v3597_v14 }
 0x1de   : > { %v2637_v1 = vpop.f32.mrf.mxu1  ;;  %v2701_v3 = vpop.f32.mrf.mxu0 }
 0x1df   : > { %1853 = vst [vmem:[#allocation2 + $0x60] sm:$0xff] %v1837_v15  ;;  %v1814_v6 = vadd.f32 %v2699_v54, %v1717_v17  ;;  %v2638_v8 = vadd.f32 %v2637_v1, %v2636_v4  ;;  %v2702_v18 = vadd.f32 %v2701_v3, %v2700_v62 }
 0x1e0   : > { %v2639_v9 = vpop.f32.mrf.mxu1  ;;  %v2703_v11 = vpop.f32.mrf.mxu0 }
 0x1e1   : > { %v1838_v13 = vadd.f32 %v1814_v6, %v859_v56  ;;  %v1722_v16 = vadd.f32 %v2638_v8, %v3603_v19 }
 0x1e2   : > { %v2640_v22 = vpop.f32.mrf.mxu1  ;;  %v2704_v59 = vpop.f32.mrf.mxu0 }
 0x1e3   : > { %1854 = vst [vmem:[#allocation2 + $0x70] sm:$0xff] %v1838_v13  ;;  %v1819_v61 = vadd.f32 %v2702_v18, %v1722_v16  ;;  %v2641_v21 = vadd.f32 %v2640_v22, %v2639_v9  ;;  %v2705_v25 = vadd.f32 %v2704_v59, %v2703_v11 }
 0x1e5   : > { %v1839_v14 = vadd.f32 %v1819_v61, %v860_v20  ;;  %v1725_v23 = vadd.f32 %v2641_v21, %v3609_v24 }
 0x1e7   : > { %1855 = vst [vmem:[#allocation2 + $0x78] sm:$0xff] %v1839_v14  ;;  %v1822_v27 = vadd.f32 %v2705_v25, %v1725_v23  ;;  %1860 = sbr.rel (%p2428_p5) target bundleno = 538 (0x21a), region = 100 }
 0x1e9   : > { %v1840_v28 = vadd.f32 %v1822_v27, %v861_v26 }
 0x1eb   : > { %1856 = vst [vmem:[#allocation2 + $0x28] sm:$0xff] %v1840_v28 }
 0x1ec   : > { %v1861_v19 = vld [vmem:[#allocation2 + $0x30] sm:$0xff]  ;;  %v1862_v29 = vld [vmem:[#allocation2] sm:$0xff]  ;;  %v1863_v0 = vld [vmem:[#allocation2 + $0x58] sm:$0xff] }
 0x1ed   : > { %v2470_v2 = vpack.c.bf16 %v1862_v29, %v1861_v19  ;;  %v1957_v30 = vadd.f32 %v1862_v29, %v1861_v19  ;;  %v1978_v31 = vmul.f32 %v1861_v19, %v1861_v19  ;;  %v1979_v32 = vmul.f32 %v1862_v29, %v1862_v29  ;;  %v1864_v24 = vld [vmem:[#allocation2 + $0x18] sm:$0xff]  ;;  %v1865_v53 = vld [vmem:[#allocation2 + $0x50] sm:$0xff]  ;;  %v1866_v33 = vld [vmem:[#allocation2 + $0x68] sm:$0xff] }
 0x1ee   : > { %v2475_v34 = vpack.c.bf16 %v1864_v24, %v1863_v0  ;;  %v1980_v35 = vmul.f32 %v1863_v0, %v1863_v0  ;;  %v2480_v36 = vpack.c.bf16 %v1866_v33, %v1865_v53  ;;  %v1867_v37 = vld [vmem:[#allocation2 + $0x8] sm:$0xff]  ;;  %v1981_v7 = vmul.f32 %v1864_v24, %v1864_v24  ;;  %v1869_v58 = vld [vmem:[#allocation2 + $0x40] sm:$0xff]  ;;  %v1871_v43 = vld [vmem:[#allocation2 + $0x10] sm:$0xff] }
 0x1ef   : > { %2471 = vst [vmem:[%s3480_s15] sm:$0xff] %v2470_v2   ;;  %v1994_v38 = vadd.f32 %v1979_v32, %v1978_v31  ;;  %v1958_v5 = vadd.f32 %v1957_v30, %v1863_v0  ;;  %v1868_v39 = vld [vmem:[#allocation2 + $0x48] sm:$0xff]  ;;  %v1870_v40 = vld [vmem:[#allocation2 + $0x20] sm:$0xff]  ;;  %v1982_v46 = vmul.f32 %v1865_v53, %v1865_v53  ;;  %v1872_v47 = vld [vmem:[#allocation2 + $0x38] sm:$0xff]  ;;  %v1983_v51 = vmul.f32 %v1866_v33, %v1866_v33 }
 0x1f0   : > { %2507 = vst [vmem:[%s3480_s15 + $0x8] sm:$0xff] %v2475_v34   ;;  %2508 = vst [vmem:[%s3480_s15 + $0x10] sm:$0xff] %v2480_v36   ;;  %v2485_v41 = vpack.c.bf16 %v1868_v39, %v1867_v37  ;;  %v2490_v42 = vpack.c.bf16 %v1870_v40, %v1869_v58  ;;  %v1873_v10 = vld [vmem:[#allocation2 + $0x60] sm:$0xff]  ;;  %v1874_v63 = vld [vmem:[#allocation2 + $0x70] sm:$0xff]  ;;  %v2495_v12 = vpack.c.bf16 %v1872_v47, %v1871_v43 }
 0x1f1   : > { %v1959_v44 = vadd.f32 %v1958_v5, %v1864_v24  ;;  %v1995_v45 = vadd.f32 %v1994_v38, %v1980_v35  ;;  %v2500_v48 = vpack.c.bf16 %v1874_v63, %v1873_v10  ;;  %v1875_v52 = vld [vmem:[#allocation2 + $0x78] sm:$0xff]  ;;  %v1984_v62 = vmul.f32 %v1867_v37, %v1867_v37 }
 0x1f2   : > { %2509 = vst [vmem:[%s3480_s15 + $0x18] sm:$0xff] %v2485_v41   ;;  %2510 = vst [vmem:[%s3480_s15 + $0x20] sm:$0xff] %v2490_v42   ;;  %v1876_v55 = vld [vmem:[#allocation2 + $0x28] sm:$0xff]  ;;  %v1985_v54 = vmul.f32 %v1868_v39, %v1868_v39  ;;  %v1986_v3 = vmul.f32 %v1869_v58, %v1869_v58  ;;  %v1987_v9 = vmul.f32 %v1870_v40, %v1870_v40 }
 0x1f3   : > { %v1996_v49 = vadd.f32 %v1995_v45, %v1981_v7  ;;  %v1960_v50 = vadd.f32 %v1959_v44, %v1865_v53  ;;  %2511 = vst [vmem:[%s3480_s15 + $0x28] sm:$0xff] %v2495_v12   ;;  %2512 = vst [vmem:[%s3480_s15 + $0x30] sm:$0xff] %v2500_v48   ;;  %v2505_v57 = vpack.c.bf16 %v1876_v55, %v1875_v52 }
 0x1f4   : > { %v1988_v16 = vmul.f32 %v1871_v43, %v1871_v43  ;;  %v1989_v22 = vmul.f32 %v1872_v47, %v1872_v47  ;;  %v1990_v21 = vmul.f32 %v1873_v10, %v1873_v10  ;;  %v1991_v25 = vmul.f32 %v1874_v63, %v1874_v63 }
 0x1f5   : > { %v1961_v60 = vadd.f32 %v1960_v50, %v1866_v33  ;;  %v1997_v4 = vadd.f32 %v1996_v49, %v1982_v46  ;;  %2513 = vst [vmem:[%s3480_s15 + $0x38] sm:$0xff] %v2505_v57   ;;  %v1992_v28 = vmul.f32 %v1875_v52, %v1875_v52  ;;  %v1993_v0 = vmul.f32 %v1876_v55, %v1876_v55 }
 0x1f7   : > { %v1998_v15 = vadd.f32 %v1997_v4, %v1983_v51  ;;  %v1962_v17 = vadd.f32 %v1961_v60, %v1867_v37 }
 0x1f9   : > { %v1963_v56 = vadd.f32 %v1962_v17, %v1868_v39  ;;  %v1999_v1 = vadd.f32 %v1998_v15, %v1984_v62 }
 0x1fb   : > { %v2000_v6 = vadd.f32 %v1999_v1, %v1985_v54  ;;  %v1964_v8 = vadd.f32 %v1963_v56, %v1869_v58 }
 0x1fd   : > { %v1965_v11 = vadd.f32 %v1964_v8, %v1870_v40  ;;  %v2001_v13 = vadd.f32 %v2000_v6, %v1986_v3 }
 0x1ff   : > { %v2002_v18 = vadd.f32 %v2001_v13, %v1987_v9  ;;  %v1966_v20 = vadd.f32 %v1965_v11, %v1871_v43 }
 0x201   : > { %v1967_v59 = vadd.f32 %v1966_v20, %v1872_v47  ;;  %v2003_v61 = vadd.f32 %v2002_v18, %v1988_v16 }
 0x203   : > { %v2004_v14 = vadd.f32 %v2003_v61, %v1989_v22  ;;  %v1968_v23 = vadd.f32 %v1967_v59, %v1873_v10 }
 0x205   : > { %v1969_v26 = vadd.f32 %v1968_v23, %v1874_v63  ;;  %v2005_v27 = vadd.f32 %v2004_v14, %v1990_v21 }
 0x207   : > { %v2006_v19 = vadd.f32 %v2005_v27, %v1991_v25  ;;  %v1970_v29 = vadd.f32 %v1969_v26, %v1875_v52 }
 0x209   : > { %v1971_v2 = vadd.f32 %v1970_v29, %v1876_v55  ;;  %v2007_v30 = vadd.f32 %v2006_v19, %v1992_v28 }
 0x20b   : > { %v1972_v31 = vrot.slane %v1971_v2, 4  ;;  %v2008_v32 = vadd.f32 %v2007_v30, %v1993_v0 }
 0x20d   : > { %v1973_v24 = vadd.f32 %v1972_v31, %v1971_v2  ;;  %v2009_v53 = vrot.slane %v2008_v32, 4 }
 0x20f   : > { %v1974_v33 = vrot.slane %v1973_v24, 2  ;;  %v2010_v34 = vadd.f32 %v2009_v53, %v2008_v32 }
 0x211   : > { %v1975_v35 = vadd.f32 %v1974_v33, %v1973_v24  ;;  %v2011_v36 = vrot.slane %v2010_v34, 2 }
 0x213   : > { %v1976_v37 = vrot.slane %v1975_v35, 1  ;;  %v2012_v38 = vadd.f32 %v2011_v36, %v2010_v34 }
 0x215   : > { %v1977_v5 = vadd.f32 %v1976_v37, %v1975_v35  ;;  %v2013_v7 = vrot.slane %v2012_v38, 1 }
 0x217   : > { %2015 = vst [vmem:[%s3469_s10] sm:$0xff] %v1977_v5  ;;  %v2014_v39 = vadd.f32 %v2013_v7, %v2012_v38 }
 0x219   : > { %2016 = vst [vmem:[%s3474_s24] sm:$0xff] %v2014_v39 }
 0x21a PF: > { %2039 = sbr.rel (!%p3143_p12) target bundleno = 550 (0x226), region = 104  ;;  %s2446_s1 = sshll.u32 (%p3143_p12), %s3009_s22, 2  ;;  %v2061_v58 = vld [vmem:[%s3480_s15] sm:$0xf] (%p3143_p12)  ;;  %v2063_v40 = vld [vmem:[%s3480_s15 + $0x4] sm:$0xf] (%p3143_p12) }
 0x21b   : > { %s2044_s23 = scalar_lea.vmem (%p3143_p12), %s3695_s2, %s2446_s1  ;;  %v2065_v41 = vld [vmem:[%s3480_s15 + $0x8] sm:$0xf] (%p3143_p12)  ;;  %v2067_v42 = vld [vmem:[%s3480_s15 + $0xc] sm:$0xf] (%p3143_p12)  ;;  %v2069_v43 = vld [vmem:[%s3480_s15 + $0x10] sm:$0xf] (%p3143_p12) }
 0x21c   : > { %2062 = vst [vmem:[%s2044_s23] sm:$0xf] (%p3143_p12), %v2061_v58  ;;  %2064 = vst [vmem:[%s2044_s23 + $0x8] sm:$0xf] (%p3143_p12), %v2063_v40  ;;  %v2071_v44 = vld [vmem:[%s3480_s15 + $0x14] sm:$0xf] (%p3143_p12) }
 0x21d   : > { %2066 = vst [vmem:[%s2044_s23 + $0x10] sm:$0xf] (%p3143_p12), %v2065_v41  ;;  %2068 = vst [vmem:[%s2044_s23 + $0x18] sm:$0xf] (%p3143_p12), %v2067_v42  ;;  %v2073_v45 = vld [vmem:[%s3480_s15 + $0x18] sm:$0xf] (%p3143_p12) }
 0x21e   : > { %2070 = vst [vmem:[%s2044_s23 + $0x20] sm:$0xf] (%p3143_p12), %v2069_v43  ;;  %v2075_v46 = vld [vmem:[%s3480_s15 + $0x1c] sm:$0xf] (%p3143_p12)  ;;  %2072 = vst [vmem:[%s2044_s23 + $0x28] sm:$0xf] (%p3143_p12), %v2071_v44 }
 0x21f   : > { %2074 = vst [vmem:[%s2044_s23 + $0x30] sm:$0xf] %v2073_v45  ;;  %2076 = vst [vmem:[%s2044_s23 + $0x38] sm:$0xf] %v2075_v46  ;;  %v2077_v47 = vld [vmem:[%s3480_s15 + $0x20] sm:$0xf] }
 0x220   : > { %v2079_v10 = vld [vmem:[%s3480_s15 + $0x24] sm:$0xf]  ;;  %v2081_v63 = vld [vmem:[%s3480_s15 + $0x28] sm:$0xf]  ;;  %2078 = vst [vmem:[%s2044_s23 + $0x40] sm:$0xf] %v2077_v47 }
 0x221   : > { %2080 = vst [vmem:[%s2044_s23 + $0x48] sm:$0xf] %v2079_v10  ;;  %2082 = vst [vmem:[%s2044_s23 + $0x50] sm:$0xf] %v2081_v63  ;;  %v2083_v12 = vld [vmem:[%s3480_s15 + $0x2c] sm:$0xf] }
 0x222   : > { %v2085_v48 = vld [vmem:[%s3480_s15 + $0x30] sm:$0xf]  ;;  %v2087_v49 = vld [vmem:[%s3480_s15 + $0x34] sm:$0xf]  ;;  %2084 = vst [vmem:[%s2044_s23 + $0x58] sm:$0xf] %v2083_v12 }
 0x223   : > { %2086 = vst [vmem:[%s2044_s23 + $0x60] sm:$0xf] %v2085_v48  ;;  %2088 = vst [vmem:[%s2044_s23 + $0x68] sm:$0xf] %v2087_v49  ;;  %v2089_v50 = vld [vmem:[%s3480_s15 + $0x38] sm:$0xf] }
 0x224   : > { %v2091_v51 = vld [vmem:[%s3480_s15 + $0x3c] sm:$0xf]  ;;  %2090 = vst [vmem:[%s2044_s23 + $0x70] sm:$0xf] %v2089_v50 }
 0x225   : > { %2092 = vst [vmem:[%s2044_s23 + $0x78] sm:$0xf] %v2091_v51 }
 0x226 PF: > { %s15_s25 = sadd.s32 1, %s3021_s25   ;;  %s3713_s21 = sld [smem:[#allocation6_spill]] }
 0x227   : > { %p12_p6 = scmp.ge.s32.totalorder %s15_s25, 8   ;;  %s3714_s22 = sld [smem:[#allocation7_spill]] }
 0x228   : > { %s3715_s23 = sld [smem:[#allocation8_spill]]  ;;  %s3717_s15 = smov %s2985_s16 }
 0x229   : > { %s3716_s24 = sld [smem:[#allocation9_spill]]  ;;  %s3718_s16 = smov %s3141_s13 }
 0x22a   : > { %s3719_s17 = smov %s2993_s18  ;;  %s3720_s18 = smov %s3138_s12 }
 0x22b   : > { %s3721_s19 = smov %s3001_s20  ;;  %s3722_s20 = smov %s3124_s7 }
 0x22c   :  { %14 = sbr.rel (!%p12_p6) target bundleno = 9 (0x9), region = 208 }

// kernel: forward.17
= control target key start
LH: loop header
LB: loop body
LE: loop exit
PB: predicated region body
PF: predicated region fallthrough
CT: control target
= control target key end

     0   :  { %s2164_s9 = smov 0   ;;  %s2166_s10 = smov 0   ;;  %s2568_s0 = inlined_call_operand.vmem [shape: bf16[128,512], index: 0, kind: input, shape index: {}]   ;;  %s2569_s1 = inlined_call_operand.vmem [shape: bf16[512,1024], index: 1, kind: input, shape index: {}]   ;;  %s2570_s2 = inlined_call_operand.vmem [shape: bf16[128,1024], index: 2, kind: output, shape index: {}]  }
   0x1   :  { %s2168_s11 = smov 0   ;;  %s2170_s12 = smov 0  }
   0x2   :  { %s2172_s13 = smov 0  }
   0x3 LB: > { %s27_s14 = sadd.s32 1, %s2143_s12  ;;  %s1779_s15 = sadd.s32 4294967295, %s2147_s13   ;;  %s2147_s13 = sphi %s2172_s13, %s12_s13   ;;  %s2143_s12 = sphi %s2170_s12, %s2575_s12   ;;  %s2139_s11 = sphi %s2168_s11, %s2574_s11   ;;  %s2135_s10 = sphi %s2166_s10, %s2573_s10   ;;  %s2131_s9 = sphi %s2164_s9, %s2572_s9  }
   0x4   : > { %p29_p0 = scmp.ge.s32.totalorder %s27_s14, 4  ;;  %p75_p1 = scmp.ne.s32.totalorder %s2135_s10, %s2131_s9 }
   0x5   : > { %p76_p2 = scmp.eq.s32.totalorder %s2147_s13, 0  ;;  %p107_p4 = scmp.eq.s32.totalorder %s1779_s15, 3 }
   0x6   : > { %s2577_s14 = smov (%p29_p0, %s27_s14), 0  ;;  %s68_s17 = sadd.s32 1, %s2135_s10 }
   0x7   : > { %p77_p3 = por %p76_p2, %p75_p1  ;;  %s64_s16 = ssub.s32 %s2143_s12, %s2577_s14 }
   0x8   : > { %p66_p5 = scmp.eq.s32.totalorder %s64_s16, 0  ;;  %p2199_p6 = por %p107_p4, %p75_p1 }
   0x9   : > { %p1783_p7 = scmp.ge.s32.totalorder %s2147_s13, 4 }
   0xa   : > { %s2204_s19 = scalar_select %p66_p5, %s2135_s10, %s68_s17  }
   0xb   : > { %144 = sbr.rel (%p1783_p7) target bundleno = 84 (0x54), region = 20 }
  0x10   : > { %147 = sbr.rel (!%p77_p3) target bundleno = 84 (0x54), region = 24  ;;  %s149_s20 = sand.u32 (%p77_p3), 1, %s2135_s10  }
  0x11   : > { %s1907_s21 = sshll.u32 (%p77_p3), %s2143_s12, 3  ;;  %s1784_s22 = sshll.u32 (%p77_p3), %s149_s20, 9 }
  0x12   : > { %s2212_s25 = scalar_lea.vmem (%p77_p3), %s2569_s1, %s1907_s21  ;;  %s2217_s26 = scalar_lea.vmem (%p77_p3), [#allocation3], %s1784_s22 }
  0x13   : > { %v312_v0 = vld [vmem:[%s2212_s25] sm:$0xff] (%p77_p3) }
  0x14   : > { %v314_v1 = vld [vmem:[%s2212_s25 + $0x20] sm:$0xff] (%p77_p3)  ;;  %313 = vst [vmem:[%s2217_s26] sm:$0xff] (%p77_p3), %v312_v0 }
  0x15   : > { %v316_v2 = vld [vmem:[%s2212_s25 + $0x40] sm:$0xff]  ;;  %315 = vst [vmem:[%s2217_s26 + $0x8] sm:$0xff] %v314_v1 }
  0x16   : > { %317 = vst [vmem:[%s2217_s26 + $0x10] sm:$0xff] %v316_v2  ;;  %v318_v3 = vld [vmem:[%s2212_s25 + $0x60] sm:$0xff] }
  0x17   : > { %v320_v4 = vld [vmem:[%s2212_s25 + $0x80] sm:$0xff]  ;;  %319 = vst [vmem:[%s2217_s26 + $0x18] sm:$0xff] %v318_v3 }
  0x18   : > { %v322_v5 = vld [vmem:[%s2212_s25 + $0xa0] sm:$0xff]  ;;  %321 = vst [vmem:[%s2217_s26 + $0x20] sm:$0xff] %v320_v4 }
  0x19   : > { %323 = vst [vmem:[%s2217_s26 + $0x28] sm:$0xff] %v322_v5  ;;  %v324_v6 = vld [vmem:[%s2212_s25 + $0xc0] sm:$0xff] }
  0x1a   : > { %v326_v7 = vld [vmem:[%s2212_s25 + $0xe0] sm:$0xff]  ;;  %325 = vst [vmem:[%s2217_s26 + $0x30] sm:$0xff] %v324_v6 }
  0x1b   : > { %v328_v8 = vld [vmem:[%s2212_s25 + $0x100] sm:$0xff]  ;;  %327 = vst [vmem:[%s2217_s26 + $0x38] sm:$0xff] %v326_v7 }
  0x1c   : > { %329 = vst [vmem:[%s2217_s26 + $0x40] sm:$0xff] %v328_v8  ;;  %v330_v9 = vld [vmem:[%s2212_s25 + $0x120] sm:$0xff] }
  0x1d   : > { %v332_v10 = vld [vmem:[%s2212_s25 + $0x140] sm:$0xff]  ;;  %331 = vst [vmem:[%s2217_s26 + $0x48] sm:$0xff] %v330_v9 }
  0x1e   : > { %v334_v11 = vld [vmem:[%s2212_s25 + $0x160] sm:$0xff]  ;;  %333 = vst [vmem:[%s2217_s26 + $0x50] sm:$0xff] %v332_v10 }
  0x1f   : > { %335 = vst [vmem:[%s2217_s26 + $0x58] sm:$0xff] %v334_v11  ;;  %v336_v12 = vld [vmem:[%s2212_s25 + $0x180] sm:$0xff] }
  0x20   : > { %v338_v13 = vld [vmem:[%s2212_s25 + $0x1a0] sm:$0xff]  ;;  %337 = vst [vmem:[%s2217_s26 + $0x60] sm:$0xff] %v336_v12 }
  0x21   : > { %v340_v14 = vld [vmem:[%s2212_s25 + $0x1c0] sm:$0xff]  ;;  %339 = vst [vmem:[%s2217_s26 + $0x68] sm:$0xff] %v338_v13 }
  0x22   : > { %341 = vst [vmem:[%s2217_s26 + $0x70] sm:$0xff] %v340_v14  ;;  %v342_v15 = vld [vmem:[%s2212_s25 + $0x1e0] sm:$0xff] }
  0x23   : > { %v344_v16 = vld [vmem:[%s2212_s25 + $0x200] sm:$0xff]  ;;  %343 = vst [vmem:[%s2217_s26 + $0x78] sm:$0xff] %v342_v15 }
  0x24   : > { %v346_v17 = vld [vmem:[%s2212_s25 + $0x220] sm:$0xff]  ;;  %345 = vst [vmem:[%s2217_s26 + $0x80] sm:$0xff] %v344_v16 }
  0x25   : > { %347 = vst [vmem:[%s2217_s26 + $0x88] sm:$0xff] %v346_v17  ;;  %v348_v18 = vld [vmem:[%s2212_s25 + $0x240] sm:$0xff] }
  0x26   : > { %v350_v19 = vld [vmem:[%s2212_s25 + $0x260] sm:$0xff]  ;;  %349 = vst [vmem:[%s2217_s26 + $0x90] sm:$0xff] %v348_v18 }
  0x27   : > { %v352_v20 = vld [vmem:[%s2212_s25 + $0x280] sm:$0xff]  ;;  %351 = vst [vmem:[%s2217_s26 + $0x98] sm:$0xff] %v350_v19 }
  0x28   : > { %353 = vst [vmem:[%s2217_s26 + $0xa0] sm:$0xff] %v352_v20  ;;  %v354_v21 = vld [vmem:[%s2212_s25 + $0x2a0] sm:$0xff] }
  0x29   : > { %v356_v22 = vld [vmem:[%s2212_s25 + $0x2c0] sm:$0xff]  ;;  %355 = vst [vmem:[%s2217_s26 + $0xa8] sm:$0xff] %v354_v21 }
  0x2a   : > { %v358_v23 = vld [vmem:[%s2212_s25 + $0x2e0] sm:$0xff]  ;;  %357 = vst [vmem:[%s2217_s26 + $0xb0] sm:$0xff] %v356_v22 }
  0x2b   : > { %359 = vst [vmem:[%s2217_s26 + $0xb8] sm:$0xff] %v358_v23  ;;  %v360_v24 = vld [vmem:[%s2212_s25 + $0x300] sm:$0xff] }
  0x2c   : > { %v362_v25 = vld [vmem:[%s2212_s25 + $0x320] sm:$0xff]  ;;  %361 = vst [vmem:[%s2217_s26 + $0xc0] sm:$0xff] %v360_v24 }
  0x2d   : > { %v364_v26 = vld [vmem:[%s2212_s25 + $0x340] sm:$0xff]  ;;  %363 = vst [vmem:[%s2217_s26 + $0xc8] sm:$0xff] %v362_v25 }
  0x2e   : > { %365 = vst [vmem:[%s2217_s26 + $0xd0] sm:$0xff] %v364_v26  ;;  %v366_v27 = vld [vmem:[%s2212_s25 + $0x360] sm:$0xff] }
  0x2f   : > { %v368_v28 = vld [vmem:[%s2212_s25 + $0x380] sm:$0xff]  ;;  %367 = vst [vmem:[%s2217_s26 + $0xd8] sm:$0xff] %v366_v27 }
  0x30   : > { %v370_v29 = vld [vmem:[%s2212_s25 + $0x3a0] sm:$0xff]  ;;  %369 = vst [vmem:[%s2217_s26 + $0xe0] sm:$0xff] %v368_v28 }
  0x31   : > { %371 = vst [vmem:[%s2217_s26 + $0xe8] sm:$0xff] %v370_v29  ;;  %v372_v30 = vld [vmem:[%s2212_s25 + $0x3c0] sm:$0xff] }
  0x32   : > { %v374_v31 = vld [vmem:[%s2212_s25 + $0x3e0] sm:$0xff]  ;;  %373 = vst [vmem:[%s2217_s26 + $0xf0] sm:$0xff] %v372_v30 }
  0x33   : > { %v376_v32 = vld [vmem:[%s2212_s25 + $0x400] sm:$0xff]  ;;  %375 = vst [vmem:[%s2217_s26 + $0xf8] sm:$0xff] %v374_v31 }
  0x34   : > { %377 = vst [vmem:[%s2217_s26 + $0x100] sm:$0xff] %v376_v32  ;;  %v378_v33 = vld [vmem:[%s2212_s25 + $0x420] sm:$0xff] }
  0x35   : > { %v380_v34 = vld [vmem:[%s2212_s25 + $0x440] sm:$0xff]  ;;  %379 = vst [vmem:[%s2217_s26 + $0x108] sm:$0xff] %v378_v33 }
  0x36   : > { %v382_v35 = vld [vmem:[%s2212_s25 + $0x460] sm:$0xff]  ;;  %381 = vst [vmem:[%s2217_s26 + $0x110] sm:$0xff] %v380_v34 }
  0x37   : > { %383 = vst [vmem:[%s2217_s26 + $0x118] sm:$0xff] %v382_v35  ;;  %v384_v36 = vld [vmem:[%s2212_s25 + $0x480] sm:$0xff] }
  0x38   : > { %v386_v37 = vld [vmem:[%s2212_s25 + $0x4a0] sm:$0xff]  ;;  %385 = vst [vmem:[%s2217_s26 + $0x120] sm:$0xff] %v384_v36 }
  0x39   : > { %v388_v38 = vld [vmem:[%s2212_s25 + $0x4c0] sm:$0xff]  ;;  %387 = vst [vmem:[%s2217_s26 + $0x128] sm:$0xff] %v386_v37 }
  0x3a   : > { %389 = vst [vmem:[%s2217_s26 + $0x130] sm:$0xff] %v388_v38  ;;  %v390_v39 = vld [vmem:[%s2212_s25 + $0x4e0] sm:$0xff] }
  0x3b   : > { %v392_v40 = vld [vmem:[%s2212_s25 + $0x500] sm:$0xff]  ;;  %391 = vst [vmem:[%s2217_s26 + $0x138] sm:$0xff] %v390_v39 }
  0x3c   : > { %v394_v41 = vld [vmem:[%s2212_s25 + $0x520] sm:$0xff]  ;;  %393 = vst [vmem:[%s2217_s26 + $0x140] sm:$0xff] %v392_v40 }
  0x3d   : > { %395 = vst [vmem:[%s2217_s26 + $0x148] sm:$0xff] %v394_v41  ;;  %v396_v42 = vld [vmem:[%s2212_s25 + $0x540] sm:$0xff] }
  0x3e   : > { %v398_v43 = vld [vmem:[%s2212_s25 + $0x560] sm:$0xff]  ;;  %397 = vst [vmem:[%s2217_s26 + $0x150] sm:$0xff] %v396_v42 }
  0x3f   : > { %v400_v44 = vld [vmem:[%s2212_s25 + $0x580] sm:$0xff]  ;;  %399 = vst [vmem:[%s2217_s26 + $0x158] sm:$0xff] %v398_v43 }
  0x40   : > { %401 = vst [vmem:[%s2217_s26 + $0x160] sm:$0xff] %v400_v44  ;;  %v402_v45 = vld [vmem:[%s2212_s25 + $0x5a0] sm:$0xff] }
  0x41   : > { %v404_v46 = vld [vmem:[%s2212_s25 + $0x5c0] sm:$0xff]  ;;  %403 = vst [vmem:[%s2217_s26 + $0x168] sm:$0xff] %v402_v45 }
  0x42   : > { %v406_v47 = vld [vmem:[%s2212_s25 + $0x5e0] sm:$0xff]  ;;  %405 = vst [vmem:[%s2217_s26 + $0x170] sm:$0xff] %v404_v46 }
  0x43   : > { %407 = vst [vmem:[%s2217_s26 + $0x178] sm:$0xff] %v406_v47  ;;  %v408_v48 = vld [vmem:[%s2212_s25 + $0x600] sm:$0xff] }
  0x44   : > { %v410_v49 = vld [vmem:[%s2212_s25 + $0x620] sm:$0xff]  ;;  %409 = vst [vmem:[%s2217_s26 + $0x180] sm:$0xff] %v408_v48 }
  0x45   : > { %v412_v50 = vld [vmem:[%s2212_s25 + $0x640] sm:$0xff]  ;;  %411 = vst [vmem:[%s2217_s26 + $0x188] sm:$0xff] %v410_v49 }
  0x46   : > { %413 = vst [vmem:[%s2217_s26 + $0x190] sm:$0xff] %v412_v50  ;;  %v414_v51 = vld [vmem:[%s2212_s25 + $0x660] sm:$0xff] }
  0x47   : > { %v416_v52 = vld [vmem:[%s2212_s25 + $0x680] sm:$0xff]  ;;  %415 = vst [vmem:[%s2217_s26 + $0x198] sm:$0xff] %v414_v51 }
  0x48   : > { %v418_v53 = vld [vmem:[%s2212_s25 + $0x6a0] sm:$0xff]  ;;  %417 = vst [vmem:[%s2217_s26 + $0x1a0] sm:$0xff] %v416_v52 }
  0x49   : > { %419 = vst [vmem:[%s2217_s26 + $0x1a8] sm:$0xff] %v418_v53  ;;  %v420_v54 = vld [vmem:[%s2212_s25 + $0x6c0] sm:$0xff] }
  0x4a   : > { %v422_v55 = vld [vmem:[%s2212_s25 + $0x6e0] sm:$0xff]  ;;  %421 = vst [vmem:[%s2217_s26 + $0x1b0] sm:$0xff] %v420_v54 }
  0x4b   : > { %v424_v56 = vld [vmem:[%s2212_s25 + $0x700] sm:$0xff]  ;;  %423 = vst [vmem:[%s2217_s26 + $0x1b8] sm:$0xff] %v422_v55 }
  0x4c   : > { %425 = vst [vmem:[%s2217_s26 + $0x1c0] sm:$0xff] %v424_v56  ;;  %v426_v57 = vld [vmem:[%s2212_s25 + $0x720] sm:$0xff] }
  0x4d   : > { %v428_v58 = vld [vmem:[%s2212_s25 + $0x740] sm:$0xff]  ;;  %427 = vst [vmem:[%s2217_s26 + $0x1c8] sm:$0xff] %v426_v57 }
  0x4e   : > { %v430_v59 = vld [vmem:[%s2212_s25 + $0x760] sm:$0xff]  ;;  %429 = vst [vmem:[%s2217_s26 + $0x1d0] sm:$0xff] %v428_v58 }
  0x4f   : > { %431 = vst [vmem:[%s2217_s26 + $0x1d8] sm:$0xff] %v430_v59  ;;  %v432_v60 = vld [vmem:[%s2212_s25 + $0x780] sm:$0xff] }
  0x50   : > { %v434_v61 = vld [vmem:[%s2212_s25 + $0x7a0] sm:$0xff]  ;;  %433 = vst [vmem:[%s2217_s26 + $0x1e0] sm:$0xff] %v432_v60 }
  0x51   : > { %v436_v62 = vld [vmem:[%s2212_s25 + $0x7c0] sm:$0xff]  ;;  %435 = vst [vmem:[%s2217_s26 + $0x1e8] sm:$0xff] %v434_v61 }
  0x52   : > { %437 = vst [vmem:[%s2217_s26 + $0x1f0] sm:$0xff] %v436_v62  ;;  %v438_v63 = vld [vmem:[%s2212_s25 + $0x7e0] sm:$0xff] }
  0x53   : > { %439 = vst [vmem:[%s2217_s26 + $0x1f8] sm:$0xff] %v438_v63 }
  0x54 PF: > { %p1787_p8 = scmp.ge.s32.totalorder %s2147_s13, 1  ;;  %p444_p9 = scmp.lt.s32.totalorder %s2147_s13, 5 }
  0x56   : > { %p445_p10 = pnand %p1787_p8, %p444_p9 }
  0x57   : > { %s451_s27 = sand.u32 (!%p445_p10), 1, %s2131_s9  }
  0x58   : > { %448 = sbr.rel (%p445_p10) target bundleno = 428 (0x1ac), region = 62  ;;  %s1788_s28 = sshll.u32 (!%p445_p10), %s451_s27, 9 }
  0x59   : > { %s2355_s5 = scalar_lea.vmem (!%p445_p10), [#allocation3], %s1788_s28  ;;  %s1789_s15 = sshll.u32 (!%p445_p10), %s451_s27, 7 }
  0x5a   : > { %s2513_s16 = scalar_lea.vmem (!%p445_p10), [#allocation4], %s1789_s15 }
  0x5d   : > { %v2063_v0 = vld [vmem:[%s2568_s0 + $0x4] ss:$16 sps:$4 sm:$0xff]   ;;  %v2066_v1 = vld [vmem:[%s2568_s0 + $0xc] ss:$16 sps:$4 sm:$0xff]   ;;  %v1969_v4 = vld [vmem:[%s2355_s5 + $0x70] ss:$8 sps:$4 sm:$0xff]  }
  0x5e   : > { %v1965_v2 = vld [vmem:[%s2355_s5 + $0x74] ss:$8 sps:$4 sm:$0xff]   ;;  %1173 = vmatprep.mubr.bf16.mxu0 %v2063_v0  ;;  %1286 = vmatprep.mubr.bf16.mxu1 %v2066_v1  ;;  %v1970_v5 = vld [vmem:[%s2355_s5 + $0x170] ss:$8 sps:$4 sm:$0xff]   ;;  %v1971_v6 = vld [vmem:[%s2355_s5 + $0x64] ss:$8 sps:$4 sm:$0xff]  }
  0x5f   : > { %v1967_v3 = vld [vmem:[%s2355_s5 + $0x174] ss:$8 sps:$4 sm:$0xff]   ;;  %1141 = vmatprep.subr.bf16.mxu0 %v1965_v2  ;;  %v1973_v7 = vld [vmem:[%s2355_s5 + $0x164] ss:$8 sps:$4 sm:$0xff]   ;;  %v1975_v8 = vld [vmem:[%s2355_s5 + $0x60] ss:$8 sps:$4 sm:$0xff]  }
  0x60   : > { %1254 = vmatprep.subr.bf16.mxu1 %v1967_v3  ;;  %1142 = vmatpush1.bf16.msra.mxu0 %v1969_v4  ;;  %v1976_v9 = vld [vmem:[%s2355_s5 + $0x160] ss:$8 sps:$4 sm:$0xff]   ;;  %v1977_v10 = vld [vmem:[%s2355_s5 + $0x54] ss:$8 sps:$4 sm:$0xff]   ;;  %v1981_v12 = vld [vmem:[%s2355_s5 + $0x50] ss:$8 sps:$4 sm:$0xff]  }
  0x61   : > { %1255 = vmatpush1.bf16.msra.mxu1 %v1970_v5  ;;  %1143 = vmatprep.subr.bf16.mxu0 %v1971_v6  ;;  %v1979_v11 = vld [vmem:[%s2355_s5 + $0x154] ss:$8 sps:$4 sm:$0xff]   ;;  %v1982_v13 = vld [vmem:[%s2355_s5 + $0x150] ss:$8 sps:$4 sm:$0xff]   ;;  %v1983_v14 = vld [vmem:[%s2355_s5 + $0x44] ss:$8 sps:$4 sm:$0xff]  }
  0x62   : > { %1256 = vmatprep.subr.bf16.mxu1 %v1973_v7  ;;  %v1985_v15 = vld [vmem:[%s2355_s5 + $0x144] ss:$8 sps:$4 sm:$0xff]   ;;  %v1987_v16 = vld [vmem:[%s2355_s5 + $0x40] ss:$8 sps:$4 sm:$0xff]   ;;  %v1989_v18 = vld [vmem:[%s2355_s5 + $0x34] ss:$8 sps:$4 sm:$0xff]  }
  0x63   : > { %v1988_v17 = vld [vmem:[%s2355_s5 + $0x140] ss:$8 sps:$4 sm:$0xff]   ;;  %v1991_v19 = vld [vmem:[%s2355_s5 + $0x134] ss:$8 sps:$4 sm:$0xff]   ;;  %v1993_v20 = vld [vmem:[%s2355_s5 + $0x30] ss:$8 sps:$4 sm:$0xff]  }
  0x64   : > { %1144 = vmatpush1.bf16.msra.mxu0 %v1975_v8  ;;  %v1994_v21 = vld [vmem:[%s2355_s5 + $0x130] ss:$8 sps:$4 sm:$0xff]   ;;  %v1995_v22 = vld [vmem:[%s2355_s5 + $0x24] ss:$8 sps:$4 sm:$0xff]   ;;  %v1999_v24 = vld [vmem:[%s2355_s5 + $0x20] ss:$8 sps:$4 sm:$0xff]  }
  0x65   : > { %1257 = vmatpush1.bf16.msra.mxu1 %v1976_v9  ;;  %1145 = vmatprep.subr.bf16.mxu0 %v1977_v10  ;;  %v1997_v23 = vld [vmem:[%s2355_s5 + $0x124] ss:$8 sps:$4 sm:$0xff]   ;;  %v2000_v25 = vld [vmem:[%s2355_s5 + $0x120] ss:$8 sps:$4 sm:$0xff]   ;;  %v2001_v26 = vld [vmem:[%s2355_s5 + $0x14] ss:$8 sps:$4 sm:$0xff]  }
  0x66   : > { %1258 = vmatprep.subr.bf16.mxu1 %v1979_v11  ;;  %v2003_v27 = vld [vmem:[%s2355_s5 + $0x114] ss:$8 sps:$4 sm:$0xff]   ;;  %v2005_v28 = vld [vmem:[%s2355_s5 + $0x10] ss:$8 sps:$4 sm:$0xff]   ;;  %v2007_v30 = vld [vmem:[%s2355_s5 + $0x4] ss:$8 sps:$4 sm:$0xff]  }
  0x67   : > { %v2006_v29 = vld [vmem:[%s2355_s5 + $0x110] ss:$8 sps:$4 sm:$0xff]   ;;  %v2009_v31 = vld [vmem:[%s2355_s5 + $0x104] ss:$8 sps:$4 sm:$0xff]   ;;  %v2011_v32 = vld [vmem:[%s2355_s5] ss:$8 sps:$4 sm:$0xff]  }
  0x68   : > { %1146 = vmatpush1.bf16.msra.mxu0 %v1981_v12  ;;  %v2012_v33 = vld [vmem:[%s2355_s5 + $0x100] ss:$8 sps:$4 sm:$0xff]   ;;  %v2013_v34 = vld [vmem:[%s2355_s5 + $0xf4] ss:$8 sps:$4 sm:$0xff]   ;;  %v2017_v36 = vld [vmem:[%s2355_s5 + $0xf0] ss:$8 sps:$4 sm:$0xff]  }
  0x69   : > { %1259 = vmatpush1.bf16.msra.mxu1 %v1982_v13  ;;  %1147 = vmatprep.subr.bf16.mxu0 %v1983_v14  ;;  %v2015_v35 = vld [vmem:[%s2355_s5 + $0x1f4] ss:$8 sps:$4 sm:$0xff]   ;;  %v2018_v37 = vld [vmem:[%s2355_s5 + $0x1f0] ss:$8 sps:$4 sm:$0xff]   ;;  %v2019_v38 = vld [vmem:[%s2355_s5 + $0xe4] ss:$8 sps:$4 sm:$0xff]  }
  0x6a   : > { %1260 = vmatprep.subr.bf16.mxu1 %v1985_v15  ;;  %v2021_v39 = vld [vmem:[%s2355_s5 + $0x1e4] ss:$8 sps:$4 sm:$0xff]   ;;  %v2023_v40 = vld [vmem:[%s2355_s5 + $0xe0] ss:$8 sps:$4 sm:$0xff]   ;;  %v2025_v42 = vld [vmem:[%s2355_s5 + $0xd4] ss:$8 sps:$4 sm:$0xff]  }
  0x6b   : > { %v2024_v41 = vld [vmem:[%s2355_s5 + $0x1e0] ss:$8 sps:$4 sm:$0xff]   ;;  %v2027_v43 = vld [vmem:[%s2355_s5 + $0x1d4] ss:$8 sps:$4 sm:$0xff]   ;;  %v2029_v44 = vld [vmem:[%s2355_s5 + $0xd0] ss:$8 sps:$4 sm:$0xff]  }
  0x6c   : > { %1148 = vmatpush1.bf16.msra.mxu0 %v1987_v16  ;;  %v2030_v45 = vld [vmem:[%s2355_s5 + $0x1d0] ss:$8 sps:$4 sm:$0xff]   ;;  %v2031_v46 = vld [vmem:[%s2355_s5 + $0xc4] ss:$8 sps:$4 sm:$0xff]   ;;  %v2035_v48 = vld [vmem:[%s2355_s5 + $0xc0] ss:$8 sps:$4 sm:$0xff]  }
  0x6d   : > { %1261 = vmatpush1.bf16.msra.mxu1 %v1988_v17  ;;  %1149 = vmatprep.subr.bf16.mxu0 %v1989_v18  ;;  %v2033_v47 = vld [vmem:[%s2355_s5 + $0x1c4] ss:$8 sps:$4 sm:$0xff]   ;;  %v2036_v49 = vld [vmem:[%s2355_s5 + $0x1c0] ss:$8 sps:$4 sm:$0xff]   ;;  %v2037_v50 = vld [vmem:[%s2355_s5 + $0xb4] ss:$8 sps:$4 sm:$0xff]  }
  0x6e   : > { %1262 = vmatprep.subr.bf16.mxu1 %v1991_v19  ;;  %v2039_v51 = vld [vmem:[%s2355_s5 + $0x1b4] ss:$8 sps:$4 sm:$0xff]   ;;  %v2041_v52 = vld [vmem:[%s2355_s5 + $0xb0] ss:$8 sps:$4 sm:$0xff]   ;;  %v2043_v54 = vld [vmem:[%s2355_s5 + $0xa4] ss:$8 sps:$4 sm:$0xff]  }
  0x6f   : > { %v2042_v53 = vld [vmem:[%s2355_s5 + $0x1b0] ss:$8 sps:$4 sm:$0xff]   ;;  %v2045_v55 = vld [vmem:[%s2355_s5 + $0x1a4] ss:$8 sps:$4 sm:$0xff]   ;;  %v2047_v56 = vld [vmem:[%s2355_s5 + $0xa0] ss:$8 sps:$4 sm:$0xff]  }
  0x70   : > { %1150 = vmatpush1.bf16.msra.mxu0 %v1993_v20  ;;  %v2048_v57 = vld [vmem:[%s2355_s5 + $0x1a0] ss:$8 sps:$4 sm:$0xff]   ;;  %v2049_v58 = vld [vmem:[%s2355_s5 + $0x94] ss:$8 sps:$4 sm:$0xff]   ;;  %v2053_v60 = vld [vmem:[%s2355_s5 + $0x90] ss:$8 sps:$4 sm:$0xff]  }
  0x71   : > { %1263 = vmatpush1.bf16.msra.mxu1 %v1994_v21  ;;  %1151 = vmatprep.subr.bf16.mxu0 %v1995_v22  ;;  %v2051_v59 = vld [vmem:[%s2355_s5 + $0x194] ss:$8 sps:$4 sm:$0xff]   ;;  %v2054_v61 = vld [vmem:[%s2355_s5 + $0x190] ss:$8 sps:$4 sm:$0xff]   ;;  %v2055_v62 = vld [vmem:[%s2355_s5 + $0x84] ss:$8 sps:$4 sm:$0xff]  }
  0x72   : > { %1264 = vmatprep.subr.bf16.mxu1 %v1997_v23  ;;  %v2057_v63 = vld [vmem:[%s2355_s5 + $0x184] ss:$8 sps:$4 sm:$0xff]   ;;  %v2059_v0 = vld [vmem:[%s2355_s5 + $0x80] ss:$8 sps:$4 sm:$0xff]   ;;  %s1924_s9 = sshll.u32 (%p2199_p6), %s2139_s11, 3 }
  0x73   : > { %v2060_v1 = vld [vmem:[%s2355_s5 + $0x180] ss:$8 sps:$4 sm:$0xff]   ;;  %v2067_v4 = vld [vmem:[%s2568_s0 + $0x24] ss:$16 sps:$4 sm:$0xff]   ;;  %v2069_v5 = vld [vmem:[%s2568_s0 + $0x2c] ss:$16 sps:$4 sm:$0xff]   ;;  %s1590_s20 = scalar_lea.vmem (%p2199_p6), %s2570_s2, %s1924_s9 }
  0x74   : > { %1152 = vmatpush1.bf16.msra.mxu0 %v1999_v24  ;;  %v2061_v2 = vld [vmem:[%s2568_s0] ss:$16 sps:$4 sm:$0xff]   ;;  %v2064_v3 = vld [vmem:[%s2568_s0 + $0x8] ss:$16 sps:$4 sm:$0xff]   ;;  %v2073_v8 = vld [vmem:[%s2568_s0 + $0x44] ss:$16 sps:$4 sm:$0xff]  }
  0x75   : > { %1265 = vmatpush1.bf16.msra.mxu1 %v2000_v25  ;;  %1153 = vmatprep.subr.bf16.mxu0 %v2001_v26  ;;  %v2071_v6 = vld [vmem:[%s2568_s0 + $0x20] ss:$16 sps:$4 sm:$0xff]   ;;  %v2072_v7 = vld [vmem:[%s2568_s0 + $0x28] ss:$16 sps:$4 sm:$0xff]   ;;  %v2075_v9 = vld [vmem:[%s2568_s0 + $0x4c] ss:$16 sps:$4 sm:$0xff]  }
  0x76   : > { %1266 = vmatprep.subr.bf16.mxu1 %v2003_v27  ;;  %v2077_v10 = vld [vmem:[%s2568_s0 + $0x40] ss:$16 sps:$4 sm:$0xff]   ;;  %v2078_v11 = vld [vmem:[%s2568_s0 + $0x48] ss:$16 sps:$4 sm:$0xff]   ;;  %v2079_v12 = vld [vmem:[%s2568_s0 + $0x64] ss:$16 sps:$4 sm:$0xff]  }
  0x77   : > { %v2081_v13 = vld [vmem:[%s2568_s0 + $0x6c] ss:$16 sps:$4 sm:$0xff]   ;;  %v2083_v14 = vld [vmem:[%s2568_s0 + $0x60] ss:$16 sps:$4 sm:$0xff]   ;;  %v2084_v15 = vld [vmem:[%s2568_s0 + $0x68] ss:$16 sps:$4 sm:$0xff]  }
  0x78   : > { %1154 = vmatpush1.bf16.msra.mxu0 %v2005_v28  ;;  %v2085_v16 = vld [vmem:[%s2568_s0 + $0x84] ss:$16 sps:$4 sm:$0xff]   ;;  %v2087_v17 = vld [vmem:[%s2568_s0 + $0x8c] ss:$16 sps:$4 sm:$0xff]   ;;  %v2089_v18 = vld [vmem:[%s2568_s0 + $0x80] ss:$16 sps:$4 sm:$0xff]  }
  0x79   : > { %1267 = vmatpush1.bf16.msra.mxu1 %v2006_v29  ;;  %1155 = vmatprep.subr.bf16.mxu0 %v2007_v30  ;;  %v2090_v19 = vld [vmem:[%s2568_s0 + $0x88] ss:$16 sps:$4 sm:$0xff]   ;;  %v2091_v20 = vld [vmem:[%s2568_s0 + $0xa4] ss:$16 sps:$4 sm:$0xff]   ;;  %v2093_v21 = vld [vmem:[%s2568_s0 + $0xac] ss:$16 sps:$4 sm:$0xff]  }
  0x7a   : > { %1268 = vmatprep.subr.bf16.mxu1 %v2009_v31  ;;  %v2095_v22 = vld [vmem:[%s2568_s0 + $0xa0] ss:$16 sps:$4 sm:$0xff]   ;;  %v2096_v23 = vld [vmem:[%s2568_s0 + $0xa8] ss:$16 sps:$4 sm:$0xff]   ;;  %v2097_v24 = vld [vmem:[%s2568_s0 + $0xc4] ss:$16 sps:$4 sm:$0xff]  }
  0x7b   : > { %v2099_v25 = vld [vmem:[%s2568_s0 + $0xcc] ss:$16 sps:$4 sm:$0xff]   ;;  %v2101_v26 = vld [vmem:[%s2568_s0 + $0xc0] ss:$16 sps:$4 sm:$0xff]   ;;  %v2102_v27 = vld [vmem:[%s2568_s0 + $0xc8] ss:$16 sps:$4 sm:$0xff]  }
  0x7c   : > { %1156 = vmatpush1.bf16.msra.mxu0 %v2011_v32  ;;  %v2103_v28 = vld [vmem:[%s2568_s0 + $0xe4] ss:$16 sps:$4 sm:$0xff]   ;;  %v2105_v29 = vld [vmem:[%s2568_s0 + $0xec] ss:$16 sps:$4 sm:$0xff]   ;;  %v2107_v30 = vld [vmem:[%s2568_s0 + $0xe0] ss:$16 sps:$4 sm:$0xff]  }
  0x7d   : > { %1269 = vmatpush1.bf16.msra.mxu1 %v2012_v33  ;;  %1157 = vmatprep.subr.bf16.mxu0 %v2013_v34  ;;  %v2108_v31 = vld [vmem:[%s2568_s0 + $0xe8] ss:$16 sps:$4 sm:$0xff]  }
  0x7e   : > { %1270 = vmatprep.subr.bf16.mxu1 %v2015_v35 }
  0x80   : > { %1158 = vmatpush2.bf16.msra.mxu0 %v2017_v36 }
  0x81   : > { %1271 = vmatpush2.bf16.msra.mxu1 %v2018_v37  ;;  %1159 = vmatprep.subr.bf16.mxu0 %v2019_v38 }
  0x82   : > { %1272 = vmatprep.subr.bf16.mxu1 %v2021_v39 }
  0x84   : > { %1160 = vmatpush2.bf16.msra.mxu0 %v2023_v40 }
  0x85   : > { %1273 = vmatpush2.bf16.msra.mxu1 %v2024_v41  ;;  %1161 = vmatprep.subr.bf16.mxu0 %v2025_v42 }
  0x86   : > { %1274 = vmatprep.subr.bf16.mxu1 %v2027_v43 }
  0x88   : > { %1162 = vmatpush2.bf16.msra.mxu0 %v2029_v44 }
  0x89   : > { %1275 = vmatpush2.bf16.msra.mxu1 %v2030_v45  ;;  %1163 = vmatprep.subr.bf16.mxu0 %v2031_v46 }
  0x8a   : > { %1276 = vmatprep.subr.bf16.mxu1 %v2033_v47 }
  0x8c   : > { %1164 = vmatpush2.bf16.msra.mxu0 %v2035_v48 }
  0x8d   : > { %1277 = vmatpush2.bf16.msra.mxu1 %v2036_v49  ;;  %1165 = vmatprep.subr.bf16.mxu0 %v2037_v50 }
  0x8e   : > { %1278 = vmatprep.subr.bf16.mxu1 %v2039_v51 }
  0x90   : > { %1166 = vmatpush2.bf16.msra.mxu0 %v2041_v52 }
  0x91   : > { %1279 = vmatpush2.bf16.msra.mxu1 %v2042_v53  ;;  %1167 = vmatprep.subr.bf16.mxu0 %v2043_v54 }
  0x92   : > { %1280 = vmatprep.subr.bf16.mxu1 %v2045_v55 }
  0x94   : > { %1168 = vmatpush2.bf16.msra.mxu0 %v2047_v56 }
  0x95   : > { %1281 = vmatpush2.bf16.msra.mxu1 %v2048_v57  ;;  %1169 = vmatprep.subr.bf16.mxu0 %v2049_v58 }
  0x96   : > { %1282 = vmatprep.subr.bf16.mxu1 %v2051_v59 }
  0x98   : > { %1170 = vmatpush2.bf16.msra.mxu0 %v2053_v60 }
  0x99   : > { %1283 = vmatpush2.bf16.msra.mxu1 %v2054_v61  ;;  %1171 = vmatprep.subr.bf16.mxu0 %v2055_v62 }
  0x9a   : > { %1284 = vmatprep.subr.bf16.mxu1 %v2057_v63 }
  0x9c   : > { %1172 = vmatpush2.bf16.msra.mxu0 %v2059_v0 }
  0x9d   : > { %1285 = vmatpush2.bf16.msra.mxu1 %v2060_v1 }
  0x9f   : > { %1174 = vmatmul.mubr.bf16.vlgmr.msra.gmra.mxu0 %v2061_v2 }
  0xa0   : > { %1287 = vmatmul.mubr.bf16.vlgmr.msra.gmra.mxu1 %v2064_v3  ;;  %1183 = vmatprep.mubr.bf16.mxu0 %v2067_v4 }
  0xa1   : > { %1296 = vmatprep.mubr.bf16.mxu1 %v2069_v5 }
  0xa7   : > { %1184 = vmatmul.mubr.bf16.gmra.mxu0 %v2071_v6 }
  0xa8   : > { %1297 = vmatmul.mubr.bf16.gmra.mxu1 %v2072_v7  ;;  %1193 = vmatprep.mubr.bf16.mxu0 %v2073_v8 }
  0xa9   : > { %1306 = vmatprep.mubr.bf16.mxu1 %v2075_v9 }
  0xaf   : > { %1194 = vmatmul.mubr.bf16.gmra.mxu0 %v2077_v10 }
  0xb0   : > { %1307 = vmatmul.mubr.bf16.gmra.mxu1 %v2078_v11  ;;  %1203 = vmatprep.mubr.bf16.mxu0 %v2079_v12 }
  0xb1   : > { %1316 = vmatprep.mubr.bf16.mxu1 %v2081_v13 }
  0xb7   : > { %1204 = vmatmul.mubr.bf16.gmra.mxu0 %v2083_v14 }
  0xb8   : > { %1317 = vmatmul.mubr.bf16.gmra.mxu1 %v2084_v15  ;;  %1213 = vmatprep.mubr.bf16.mxu0 %v2085_v16 }
  0xb9   : > { %1326 = vmatprep.mubr.bf16.mxu1 %v2087_v17 }
  0xbf   : > { %1214 = vmatmul.mubr.bf16.gmra.mxu0 %v2089_v18 }
  0xc0   : > { %1327 = vmatmul.mubr.bf16.gmra.mxu1 %v2090_v19  ;;  %1223 = vmatprep.mubr.bf16.mxu0 %v2091_v20 }
  0xc1   : > { %1336 = vmatprep.mubr.bf16.mxu1 %v2093_v21 }
  0xc7   : > { %1224 = vmatmul.mubr.bf16.gmra.mxu0 %v2095_v22 }
  0xc8   : > { %1337 = vmatmul.mubr.bf16.gmra.mxu1 %v2096_v23  ;;  %1233 = vmatprep.mubr.bf16.mxu0 %v2097_v24 }
  0xc9   : > { %1346 = vmatprep.mubr.bf16.mxu1 %v2099_v25 }
  0xcf   : > { %1234 = vmatmul.mubr.bf16.gmra.mxu0 %v2101_v26 }
  0xd0   : > { %1347 = vmatmul.mubr.bf16.gmra.mxu1 %v2102_v27  ;;  %1243 = vmatprep.mubr.bf16.mxu0 %v2103_v28 }
  0xd1   : > { %1356 = vmatprep.mubr.bf16.mxu1 %v2105_v29 }
  0xd7   : > { %1244 = vmatmul.mubr.bf16.gmra.mxu0 %v2107_v30 }
  0xd8   : > { %1357 = vmatmul.mubr.bf16.gmra.mxu1 %v2108_v31 }
 0x15f   : > { %v1175_v32 = vpop.f32.mrf.mxu0 }
 0x160   : > { %v1288_v33 = vpop.f32.mrf.mxu1 }
 0x161   : > { %v1177_v34 = vpop.f32.mrf.mxu0  ;;  %v1289_v36 = vadd.f32 %v1288_v33, %v1175_v32 }
 0x162   : > { %v1290_v35 = vpop.f32.mrf.mxu1 }
 0x163   : > { %v1291_v37 = vadd.f32 %v1290_v35, %v1177_v34  ;;  %v1179_v38 = vpop.f32.mrf.mxu0 }
 0x164   : > { %v1292_v39 = vpop.f32.mrf.mxu1 }
 0x165   : > { %v1908_v40 = vpack.c.bf16 %v1291_v37, %v1289_v36  ;;  %v1181_v41 = vpop.f32.mrf.mxu0  ;;  %v1293_v43 = vadd.f32 %v1292_v39, %v1179_v38 }
 0x166   : > { %v1294_v42 = vpop.f32.mrf.mxu1 }
 0x167   : > { %1562 = vst [vmem:[%s2513_s16] sm:$0xff] %v1908_v40  ;;  %v1295_v44 = vadd.f32 %v1294_v42, %v1181_v41  ;;  %v1185_v45 = vpop.f32.mrf.mxu0 }
 0x168   : > { %v1298_v46 = vpop.f32.mrf.mxu1 }
 0x169   : > { %v1909_v47 = vpack.c.bf16 %v1295_v44, %v1293_v43  ;;  %v1187_v48 = vpop.f32.mrf.mxu0  ;;  %v1299_v50 = vadd.f32 %v1298_v46, %v1185_v45 }
 0x16a   : > { %v1300_v49 = vpop.f32.mrf.mxu1 }
 0x16b   : > { %1563 = vst [vmem:[%s2513_s16 + $0x8] sm:$0xff] %v1909_v47  ;;  %v1301_v51 = vadd.f32 %v1300_v49, %v1187_v48  ;;  %v1189_v52 = vpop.f32.mrf.mxu0 }
 0x16c   : > { %v1302_v53 = vpop.f32.mrf.mxu1 }
 0x16d   : > { %v1910_v54 = vpack.c.bf16 %v1301_v51, %v1299_v50  ;;  %v1191_v55 = vpop.f32.mrf.mxu0  ;;  %v1303_v57 = vadd.f32 %v1302_v53, %v1189_v52 }
 0x16e   : > { %v1304_v56 = vpop.f32.mrf.mxu1 }
 0x16f   : > { %1564 = vst [vmem:[%s2513_s16 + $0x10] sm:$0xff] %v1910_v54  ;;  %v1305_v58 = vadd.f32 %v1304_v56, %v1191_v55  ;;  %v1195_v59 = vpop.f32.mrf.mxu0 }
 0x170   : > { %v1308_v60 = vpop.f32.mrf.mxu1 }
 0x171   : > { %v1911_v61 = vpack.c.bf16 %v1305_v58, %v1303_v57  ;;  %v1197_v62 = vpop.f32.mrf.mxu0  ;;  %v1309_v0 = vadd.f32 %v1308_v60, %v1195_v59 }
 0x172   : > { %v1310_v63 = vpop.f32.mrf.mxu1 }
 0x173   : > { %1565 = vst [vmem:[%s2513_s16 + $0x18] sm:$0xff] %v1911_v61  ;;  %v1311_v1 = vadd.f32 %v1310_v63, %v1197_v62  ;;  %v1199_v2 = vpop.f32.mrf.mxu0 }
 0x174   : > { %v1312_v3 = vpop.f32.mrf.mxu1 }
 0x175   : > { %v1912_v4 = vpack.c.bf16 %v1311_v1, %v1309_v0  ;;  %v1201_v5 = vpop.f32.mrf.mxu0  ;;  %v1313_v7 = vadd.f32 %v1312_v3, %v1199_v2 }
 0x176   : > { %v1314_v6 = vpop.f32.mrf.mxu1 }
 0x177   : > { %1566 = vst [vmem:[%s2513_s16 + $0x20] sm:$0xff] %v1912_v4  ;;  %v1315_v8 = vadd.f32 %v1314_v6, %v1201_v5  ;;  %v1205_v9 = vpop.f32.mrf.mxu0 }
 0x178   : > { %v1318_v10 = vpop.f32.mrf.mxu1 }
 0x179   : > { %v1913_v11 = vpack.c.bf16 %v1315_v8, %v1313_v7  ;;  %v1207_v12 = vpop.f32.mrf.mxu0  ;;  %v1319_v14 = vadd.f32 %v1318_v10, %v1205_v9 }
 0x17a   : > { %v1320_v13 = vpop.f32.mrf.mxu1 }
 0x17b   : > { %1567 = vst [vmem:[%s2513_s16 + $0x28] sm:$0xff] %v1913_v11  ;;  %v1321_v15 = vadd.f32 %v1320_v13, %v1207_v12  ;;  %v1209_v16 = vpop.f32.mrf.mxu0 }
 0x17c   : > { %v1322_v17 = vpop.f32.mrf.mxu1 }
 0x17d   : > { %v1914_v18 = vpack.c.bf16 %v1321_v15, %v1319_v14  ;;  %v1211_v19 = vpop.f32.mrf.mxu0  ;;  %v1323_v21 = vadd.f32 %v1322_v17, %v1209_v16  ;;  %v1649_v16 = vld [vmem:[%s2513_s16] sm:$0xff] (%p2199_p6)  ;;  %v1651_v17 = vld [vmem:[%s2513_s16 + $0x8] sm:$0xff] (%p2199_p6) }
 0x17e   : > { %v1324_v20 = vpop.f32.mrf.mxu1  ;;  %1650 = vst [vmem:[%s1590_s20] sm:$0xff] (%p2199_p6), %v1649_v16  ;;  %1652 = vst [vmem:[%s1590_s20 + $0x20] sm:$0xff] (%p2199_p6), %v1651_v17 }
 0x17f   : > { %1568 = vst [vmem:[%s2513_s16 + $0x30] sm:$0xff] %v1914_v18  ;;  %v1325_v22 = vadd.f32 %v1324_v20, %v1211_v19  ;;  %v1215_v23 = vpop.f32.mrf.mxu0  ;;  %v1653_v18 = vld [vmem:[%s2513_s16 + $0x10] sm:$0xff] (%p2199_p6)  ;;  %v1655_v19 = vld [vmem:[%s2513_s16 + $0x18] sm:$0xff] (%p2199_p6)  ;;  %v1657_v20 = vld [vmem:[%s2513_s16 + $0x20] sm:$0xff] (%p2199_p6) }
 0x180   : > { %v1328_v24 = vpop.f32.mrf.mxu1  ;;  %1654 = vst [vmem:[%s1590_s20 + $0x40] sm:$0xff] (%p2199_p6), %v1653_v18  ;;  %1656 = vst [vmem:[%s1590_s20 + $0x60] sm:$0xff] (%p2199_p6), %v1655_v19 }
 0x181   : > { %v1915_v25 = vpack.c.bf16 %v1325_v22, %v1323_v21  ;;  %v1217_v26 = vpop.f32.mrf.mxu0  ;;  %v1329_v28 = vadd.f32 %v1328_v24, %v1215_v23  ;;  %1658 = vst [vmem:[%s1590_s20 + $0x80] sm:$0xff] (%p2199_p6), %v1657_v20 }
 0x182   : > { %v1330_v27 = vpop.f32.mrf.mxu1  ;;  %v1659_v21 = vld [vmem:[%s2513_s16 + $0x28] sm:$0xff] (%p2199_p6) }
 0x183   : > { %1569 = vst [vmem:[%s2513_s16 + $0x38] sm:$0xff] %v1915_v25  ;;  %v1331_v29 = vadd.f32 %v1330_v27, %v1217_v26  ;;  %v1219_v30 = vpop.f32.mrf.mxu0  ;;  %1660 = vst [vmem:[%s1590_s20 + $0xa0] sm:$0xff] (%p2199_p6), %v1659_v21 }
 0x184   : > { %v1332_v31 = vpop.f32.mrf.mxu1 }
 0x185   : > { %v1916_v32 = vpack.c.bf16 %v1331_v29, %v1329_v28  ;;  %v1221_v33 = vpop.f32.mrf.mxu0  ;;  %v1333_v35 = vadd.f32 %v1332_v31, %v1219_v30 }
 0x186   : > { %v1334_v34 = vpop.f32.mrf.mxu1  ;;  %v1661_v22 = vld [vmem:[%s2513_s16 + $0x30] sm:$0xff] (%p2199_p6) }
 0x187   : > { %1570 = vst [vmem:[%s2513_s16 + $0x40] sm:$0xff] %v1916_v32  ;;  %v1335_v36 = vadd.f32 %v1334_v34, %v1221_v33  ;;  %v1225_v37 = vpop.f32.mrf.mxu0  ;;  %1662 = vst [vmem:[%s1590_s20 + $0xc0] sm:$0xff] (%p2199_p6), %v1661_v22 }
 0x188   : > { %v1338_v38 = vpop.f32.mrf.mxu1 }
 0x189   : > { %v1917_v39 = vpack.c.bf16 %v1335_v36, %v1333_v35  ;;  %v1227_v40 = vpop.f32.mrf.mxu0  ;;  %v1339_v42 = vadd.f32 %v1338_v38, %v1225_v37 }
 0x18a   : > { %v1340_v41 = vpop.f32.mrf.mxu1  ;;  %v1663_v23 = vld [vmem:[%s2513_s16 + $0x38] sm:$0xff] (%p2199_p6) }
 0x18b   : > { %1571 = vst [vmem:[%s2513_s16 + $0x48] sm:$0xff] %v1917_v39  ;;  %v1341_v43 = vadd.f32 %v1340_v41, %v1227_v40  ;;  %v1229_v44 = vpop.f32.mrf.mxu0  ;;  %1664 = vst [vmem:[%s1590_s20 + $0xe0] sm:$0xff] (%p2199_p6), %v1663_v23 }
 0x18c   : > { %v1342_v45 = vpop.f32.mrf.mxu1 }
 0x18d   : > { %v1918_v46 = vpack.c.bf16 %v1341_v43, %v1339_v42  ;;  %v1231_v47 = vpop.f32.mrf.mxu0  ;;  %v1343_v49 = vadd.f32 %v1342_v45, %v1229_v44 }
 0x18e   : > { %v1344_v48 = vpop.f32.mrf.mxu1  ;;  %v1665_v24 = vld [vmem:[%s2513_s16 + $0x40] sm:$0xff] (%p2199_p6) }
 0x18f   : > { %1572 = vst [vmem:[%s2513_s16 + $0x50] sm:$0xff] %v1918_v46  ;;  %v1345_v50 = vadd.f32 %v1344_v48, %v1231_v47  ;;  %v1235_v51 = vpop.f32.mrf.mxu0  ;;  %1666 = vst [vmem:[%s1590_s20 + $0x100] sm:$0xff] (%p2199_p6), %v1665_v24 }
 0x190   : > { %v1348_v52 = vpop.f32.mrf.mxu1 }
 0x191   : > { %v1919_v53 = vpack.c.bf16 %v1345_v50, %v1343_v49  ;;  %v1237_v54 = vpop.f32.mrf.mxu0  ;;  %v1349_v56 = vadd.f32 %v1348_v52, %v1235_v51 }
 0x192   : > { %v1350_v55 = vpop.f32.mrf.mxu1  ;;  %v1667_v25 = vld [vmem:[%s2513_s16 + $0x48] sm:$0xff] (%p2199_p6) }
 0x193   : > { %1573 = vst [vmem:[%s2513_s16 + $0x58] sm:$0xff] %v1919_v53  ;;  %v1351_v57 = vadd.f32 %v1350_v55, %v1237_v54  ;;  %v1239_v58 = vpop.f32.mrf.mxu0  ;;  %1668 = vst [vmem:[%s1590_s20 + $0x120] sm:$0xff] (%p2199_p6), %v1667_v25 }
 0x194   : > { %v1352_v59 = vpop.f32.mrf.mxu1 }
 0x195   : > { %v1920_v60 = vpack.c.bf16 %v1351_v57, %v1349_v56  ;;  %v1241_v61 = vpop.f32.mrf.mxu0  ;;  %v1353_v63 = vadd.f32 %v1352_v59, %v1239_v58 }
 0x196   : > { %v1354_v62 = vpop.f32.mrf.mxu1  ;;  %v1669_v26 = vld [vmem:[%s2513_s16 + $0x50] sm:$0xff] (%p2199_p6) }
 0x197   : > { %1574 = vst [vmem:[%s2513_s16 + $0x60] sm:$0xff] %v1920_v60  ;;  %v1355_v0 = vadd.f32 %v1354_v62, %v1241_v61  ;;  %v1245_v1 = vpop.f32.mrf.mxu0  ;;  %1670 = vst [vmem:[%s1590_s20 + $0x140] sm:$0xff] (%p2199_p6), %v1669_v26 }
 0x198   : > { %v1358_v2 = vpop.f32.mrf.mxu1 }
 0x199   : > { %v1921_v3 = vpack.c.bf16 %v1355_v0, %v1353_v63  ;;  %v1247_v4 = vpop.f32.mrf.mxu0  ;;  %v1359_v6 = vadd.f32 %v1358_v2, %v1245_v1 }
 0x19a   : > { %v1360_v5 = vpop.f32.mrf.mxu1  ;;  %v1671_v27 = vld [vmem:[%s2513_s16 + $0x58] sm:$0xff] (%p2199_p6) }
 0x19b   : > { %1575 = vst [vmem:[%s2513_s16 + $0x68] sm:$0xff] %v1921_v3  ;;  %v1361_v7 = vadd.f32 %v1360_v5, %v1247_v4  ;;  %v1249_v8 = vpop.f32.mrf.mxu0  ;;  %1672 = vst [vmem:[%s1590_s20 + $0x160] sm:$0xff] (%p2199_p6), %v1671_v27 }
 0x19c   : > { %v1362_v9 = vpop.f32.mrf.mxu1 }
 0x19d   : > { %v1922_v10 = vpack.c.bf16 %v1361_v7, %v1359_v6  ;;  %v1251_v11 = vpop.f32.mrf.mxu0  ;;  %v1363_v13 = vadd.f32 %v1362_v9, %v1249_v8 }
 0x19e   : > { %v1364_v12 = vpop.f32.mrf.mxu1  ;;  %v1673_v28 = vld [vmem:[%s2513_s16 + $0x60] sm:$0xff] (%p2199_p6) }
 0x19f   : > { %1576 = vst [vmem:[%s2513_s16 + $0x70] sm:$0xff] %v1922_v10  ;;  %v1365_v14 = vadd.f32 %v1364_v12, %v1251_v11  ;;  %1584 = sbr.rel (!%p2199_p6) target bundleno = 428 (0x1ac), region = 78  ;;  %1674 = vst [vmem:[%s1590_s20 + $0x180] sm:$0xff] (%p2199_p6), %v1673_v28 }
 0x1a1   : > { %v1923_v15 = vpack.c.bf16 %v1365_v14, %v1363_v13 }
 0x1a2   : > { %v1675_v29 = vld [vmem:[%s2513_s16 + $0x68] sm:$0xff] (%p2199_p6) }
 0x1a3   : > { %1577 = vst [vmem:[%s2513_s16 + $0x78] sm:$0xff] %v1923_v15  ;;  %1676 = vst [vmem:[%s1590_s20 + $0x1a0] sm:$0xff] (%p2199_p6), %v1675_v29 }
 0x1a6   : > { %v1677_v30 = vld [vmem:[%s2513_s16 + $0x70] sm:$0xff] }
 0x1a7   : > { %1678 = vst [vmem:[%s1590_s20 + $0x1c0] sm:$0xff] %v1677_v30 }
 0x1aa   : > { %v1679_v31 = vld [vmem:[%s2513_s16 + $0x78] sm:$0xff] }
 0x1ab   : > { %1680 = vst [vmem:[%s1590_s20 + $0x1e0] sm:$0xff] %v1679_v31 }
 0x1ac PF: > { %s12_s13 = sadd.s32 1, %s2147_s13   ;;  %s2572_s9 = smov %s2135_s10 }
 0x1ad   : > { %p9_p11 = scmp.ge.s32.totalorder %s12_s13, 6   ;;  %s2573_s10 = smov %s2204_s19 }
 0x1ae   : > { %s2574_s11 = smov %s2143_s12  ;;  %s2575_s12 = smov %s2577_s14 }
 0x1af   :  { %11 = sbr.rel (!%p9_p11) target bundleno = 3 (0x3), region = 150 }

</bundles_post_ra>
